<compile_context>
chip_gen: v6e
topology: v6e:2x2x1
jax: 0.10.0
libtpu: 0.0.40
codegen_flags: <defaults>
</compile_context>

<pallas_src>
import functools
import math

import jax
import jax.numpy as jnp
from jax import lax
from jax.experimental import pallas as pl
from jax.experimental.pallas import tpu as pltpu


CFG = dict(
    patch_size=8,
    in_chans=3,
    img_size=16,             # H = W = 16 -> 2x2 patches + cls = 5 tokens
    backbone_dim=192,        # scaled down from 768 (dino_vitb8) for the demo
    backbone_heads=12,
    backbone_mlp_ratio=4.0,
    n_pretrained_blocks=2,   # module allows n_pretrained_blocks <= 11
    head_dim=128,
    head_heads=4,
    head_qk_scale=0.125,
    head_mlp_ratio=4.0,
    n_head_blocks=2,
    feature_dim=64,
)

_NEG_BIAS = -1e9
_BLOCK_KEYS = ("ln1_g", "ln1_b", "wq", "wk", "wv", "bq", "bk", "bv",
               "proj_w", "proj_b", "ln2_g", "ln2_b",
               "fc1_w", "fc1_b", "fc2_w", "fc2_b")


def _round_up(x, m):
    return ((x + m - 1) // m) * m


# ----------------------------------------------------------------------------
# In-kernel math helpers (operate on VMEM-resident values)
# ----------------------------------------------------------------------------
def _layernorm(x, g, b, eps):
    mean = jnp.mean(x, axis=-1, keepdims=True)
    xc = x - mean
    var = jnp.mean(xc * xc, axis=-1, keepdims=True)
    return xc * lax.rsqrt(var + eps) * g + b


def _gelu(x):
    # TODO(synk): PyTorch nn.GELU defaults to the exact erf formulation; the
    # tanh approximation is used here (deviation ~1e-3).
    c = math.sqrt(2.0 / math.pi)
    return 0.5 * x * (1.0 + jnp.tanh(c * (x + 0.044715 * x * x * x)))


def _matmul(x_f32, w_bf16):
    # bf16 operands on the MXU, f32 accumulation.
    return jnp.dot(x_f32.astype(jnp.bfloat16), w_bf16,
                   preferred_element_type=jnp.float32)


def _transformer_block(x, wts, key_bias, *, eps, scale):
    """Fused pre-LN ViT block on VMEM-resident values.

    x:        (M, dim) f32 activations (token rows of ONE image, padded to 8).
    wts:      dict of weights; wq/wk/wv/proj_w are head-major (H, dh, dim)
              bf16, biases bq/bk/bv are (H, 1, dh) f32, the rest are
              (1, n) rows / lane-dense 2D bf16 matrices.
    key_bias: (M, M) f32, 0 for real key tokens, -1e9 for padded key rows.
    """
    M, dim = x.shape
    H = wts["wq"].shape[0]

    # --- attention: LN1 -> batched per-head q/k/v -> softmax(qk)v -> proj.
    #     All head handling is batched einsums; no per-head lane slicing and
    #     no serial accumulation across heads.
    y = _layernorm(x, wts["ln1_g"], wts["ln1_b"], eps)
    yb = jnp.broadcast_to(y.astype(jnp.bfloat16)[None], (H, M, dim))

    qh = jnp.einsum("hmc,hdc->hmd", yb, wts["wq"],
                    preferred_element_type=jnp.float32) + wts["bq"]
    kh = jnp.einsum("hmc,hdc->hmd", yb, wts["wk"],
                    preferred_element_type=jnp.float32) + wts["bk"]
    vh = jnp.einsum("hmc,hdc->hmd", yb, wts["wv"],
                    preferred_element_type=jnp.float32) + wts["bv"]

    s = jnp.einsum("hmd,hnd->hmn",
                   qh.astype(jnp.bfloat16), kh.astype(jnp.bfloat16),
                   preferred_element_type=jnp.float32)
    s = s * scale + key_bias                       # mask padded key tokens
    s = s - jnp.max(s, axis=-1, keepdims=True)
    p = jnp.exp(s)                                 # f32 softmax numerator
    inv = pl.reciprocal(jnp.sum(p, axis=-1, keepdims=True), approx=True)

    o = jnp.einsum("hmn,hnd->hmd",
                   p.astype(jnp.bfloat16), vh.astype(jnp.bfloat16),
                   preferred_element_type=jnp.float32)
    o = o * inv                                    # normalise after p@v
    # per-head proj expressed as one batched einsum + head-sum
    # (== concat(heads) @ proj_w, without an in-kernel head-merge relayout)
    po = jnp.einsum("hmd,hdc->hmc", o.astype(jnp.bfloat16), wts["proj_w"],
                    preferred_element_type=jnp.float32)
    x = x + jnp.sum(po, axis=0) + wts["proj_b"]

    # --- MLP: LN2 -> fc1 -> GELU -> fc2 -> residual
    y = _layernorm(x, wts["ln2_g"], wts["ln2_b"], eps)
    hdn = _gelu(_matmul(y, wts["fc1_w"]) + wts["fc1_b"])
    x = x + _matmul(hdn, wts["fc2_w"]) + wts["fc2_b"]
    return x


# ----------------------------------------------------------------------------
# The fused forward kernel (one grid step == one image)
# ----------------------------------------------------------------------------
def _fused_forward_kernel(*refs, cfg):
    out_ref = refs[-1]
    it = iter(refs[:-1])

    def val():
        return next(it)[...]

    def block_weights():
        return {key: val() for key in _BLOCK_KEYS}

    n_tok = cfg["n_tok"]
    n_pad = cfg["n_pad"]

    patches = next(it)[0]      # (n_pad, C*p*p) f32; zero rows in cls/pad slots
    patch_w = val()            # (C*p*p, D) bf16
    tok_base = val()           # (n_pad, D) f32: cls+pos | pos+conv_bias | 0

    # key-validity bias built in-kernel (constant, no HBM operand needed)
    col = lax.broadcasted_iota(jnp.int32, (n_pad, n_pad), 1)
    key_bias = jnp.where(col < n_tok, 0.0, _NEG_BIAS).astype(jnp.float32)

    # patch embed (stride==kernel conv as a per-patch matmul) + cls + pos
    tok = jnp.dot(patches.astype(jnp.bfloat16), patch_w,
                  preferred_element_type=jnp.float32) + tok_base

    # frozen / pretrained backbone blocks (forward identical either way)
    bb_scale = float(cfg["backbone_dim"] // cfg["backbone_heads"]) ** -0.5
    for _ in range(cfg["n_pretrained_blocks"]):
        tok = _transformer_block(tok, block_weights(), key_bias,
                                 eps=1e-6, scale=bb_scale)

    # trainable head: Linear(D,128) -> 2 x Block(128, heads=4, qk_scale=.125)
    #                 -> Linear(128, feature_dim padded to 128 lanes)
    head_in_w, head_in_b = val(), val()
    t = _matmul(tok, head_in_w) + head_in_b
    for _ in range(cfg["n_head_blocks"]):
        t = _transformer_block(t, block_weights(), key_bias,
                               eps=1e-5, scale=cfg["head_qk_scale"])
    head_out_w, head_out_b = val(), val()
    out = _matmul(t, head_out_w) + head_out_b      # (n_pad, 128) lane-dense
    out_ref[0] = out.astype(out_ref.dtype)


# ----------------------------------------------------------------------------
# Weight packing (one-time cast / head-major re-layout / constant precompute)
# ----------------------------------------------------------------------------
def _as_row(v):
    return v.reshape(1, -1).astype(jnp.float32)


def _pack_block(bp, num_heads):
    dim = bp["proj_w"].shape[0]
    dh = dim // num_heads

    def heads_T(w2d):
        # (dim_in, dim_out) -> (H, dh, dim_in): head-major, lane-dense (dim last)
        return jnp.transpose(w2d).reshape(num_heads, dh, dim).astype(jnp.bfloat16)

    def heads_b(b1d):
        return b1d.reshape(num_heads, 1, dh).astype(jnp.float32)

    qkv_w, qkv_b = bp["qkv_w"], bp["qkv_b"]
    d = dict(
        ln1_g=_as_row(bp["ln1_g"]), ln1_b=_as_row(bp["ln1_b"]),
        wq=heads_T(qkv_w[:, 0 * dim:1 * dim]),
        wk=heads_T(qkv_w[:, 1 * dim:2 * dim]),
        wv=heads_T(qkv_w[:, 2 * dim:3 * dim]),
        bq=heads_b(qkv_b[0 * dim:1 * dim]),
        bk=heads_b(qkv_b[1 * dim:2 * dim]),
        bv=heads_b(qkv_b[2 * dim:3 * dim]),
        proj_w=bp["proj_w"].reshape(num_heads, dh, dim).astype(jnp.bfloat16),
        proj_b=_as_row(bp["proj_b"]),
        ln2_g=_as_row(bp["ln2_g"]), ln2_b=_as_row(bp["ln2_b"]),
        fc1_w=bp["fc1_w"].astype(jnp.bfloat16), fc1_b=_as_row(bp["fc1_b"]),
        fc2_w=bp["fc2_w"].astype(jnp.bfloat16), fc2_b=_as_row(bp["fc2_b"]),
    )
    return [d[k] for k in _BLOCK_KEYS]


def pack_weights(params, cfg):
    D = cfg["backbone_dim"]
    p = cfg["patch_size"]
    hw = (cfg["img_size"] // p) ** 2
    n_tok = 1 + hw
    n_pad = _round_up(n_tok, 8)
    feat = cfg["feature_dim"]
    fpad = _round_up(feat, 128)

    # token-base rows: cls+pos | pos + conv-bias | 0 (precomputed once here,
    # not per forward call).
    # TODO(synk): interpolate_pos_encoding for other image sizes not implemented.
    pos = params["pos_embed"].reshape(n_tok, D).astype(jnp.float32)
    base = jnp.zeros((n_pad, D), jnp.float32)
    base = base.at[0].set(params["cls_token"].reshape(D) + pos[0])
    base = base.at[1:n_tok].set(pos[1:] + params["patch_b"][None, :])

    flat = [params["patch_w"].astype(jnp.bfloat16), base]
    for bp in params["backbone_blocks"]:
        flat += _pack_block(bp, cfg["backbone_heads"])
    flat += [params["head_in_w"].astype(jnp.bfloat16),
             _as_row(params["head_in_b"])]
    for bp in params["head_blocks"]:
        flat += _pack_block(bp, cfg["head_heads"])

    # lane-dense (128-wide) padded output projection; wrapper slices [:feat]
    how = jnp.zeros((cfg["head_dim"], fpad), jnp.float32)
    how = how.at[:, :feat].set(params["head_out_w"])
    hob = jnp.zeros((1, fpad), jnp.float32)
    hob = hob.at[:, :feat].set(params["head_out_b"][None, :])
    flat += [how.astype(jnp.bfloat16), hob]
    return flat


# ----------------------------------------------------------------------------
# Forward wrapper (only cheap glue: patch extraction, padding, final rearrange)
# ----------------------------------------------------------------------------
def _const_spec(arr):
    nd = arr.ndim
    return pl.BlockSpec(arr.shape, lambda b, _nd=nd: (0,) * _nd)


def dino_with_head_forward(x, packed_weights, cfg):
    B, C, H, W = x.shape
    p = cfg["patch_size"]
    h, w = H // p, W // p
    hw = h * w
    n_tok = 1 + hw
    n_pad = _round_up(n_tok, 8)            # pad tokens per image to sublane tile
    feat = cfg["feature_dim"]
    fpad = _round_up(feat, 128)
    cpp = C * p * p
    assert packed_weights[1].shape[0] == n_pad, "pos_embed / image size mismatch"

    # patch pixels laid out in padded token-row order:
    # row 0 = cls slot (zeros), rows 1..hw = patches, rest = pad (zeros).
    # TODO(synk): real torch conv weights (D,C,p,p) would need .reshape(D,-1).T
    # to match this (C,p,p) flatten order.
    patches = (x.reshape(B, C, h, p, w, p)
                .transpose(0, 2, 4, 1, 3, 5)
                .reshape(B, hw, cpp).astype(jnp.float32))
    patches_padded = jnp.pad(patches, ((0, 0), (1, n_pad - n_tok), (0, 0)))

    kcfg = dict(cfg, n_tok=n_tok, n_pad=n_pad)
    kernel = functools.partial(_fused_forward_kernel, cfg=kcfg)

    in_specs = [pl.BlockSpec((1, n_pad, cpp), lambda b: (b, 0, 0))]
    in_specs += [_const_spec(wt) for wt in packed_weights]
    out_spec = pl.BlockSpec((1, n_pad, fpad), lambda b: (b, 0, 0))

    out3d = pl.pallas_call(
        kernel,
        grid=(B,),                               # one image per grid step
        in_specs=in_specs,
        out_specs=out_spec,
        out_shape=jax.ShapeDtypeStruct((B, n_pad, fpad), jnp.float32),
        compiler_params=pltpu.CompilerParams(
            dimension_semantics=("parallel",),   # v7x: split batch across TCs
            # ~4 MB packed weights (+ double buffers + scratch); sized to the
            # footprint instead of a blanket 32 MB.
            vmem_limit_bytes=24 * 1024 * 1024),
    )(patches_padded, *packed_weights)

    # drop cls + padding rows and padded feature lanes; 'b (h w) c -> b c h w'
    out = out3d[:, 1:1 + hw, :feat]
    out = out.reshape(B, h, w, feat).transpose(0, 3, 1, 2)
    return out


# ----------------------------------------------------------------------------
# Deterministic synthetic parameters (no torch.hub / .pt loading)
# ----------------------------------------------------------------------------
def init_params(key, cfg):
    D, Hd = cfg["backbone_dim"], cfg["head_dim"]
    p, C = cfg["patch_size"], cfg["in_chans"]
    n_tok = 1 + (cfg["img_size"] // p) ** 2
    keys = iter(jax.random.split(key, 64))

    def w(shape, scale=0.02):
        return jax.random.normal(next(keys), shape, jnp.float32) * scale

    def zeros(n):
        return jnp.zeros((n,), jnp.float32)

    def block_params(dim, mlp_ratio):
        hidden = int(dim * mlp_ratio)
        return dict(
            ln1_g=jnp.ones((dim,), jnp.float32), ln1_b=zeros(dim),
            qkv_w=w((dim, 3 * dim)), qkv_b=zeros(3 * dim),
            proj_w=w((dim, dim)), proj_b=zeros(dim),
            ln2_g=jnp.ones((dim,), jnp.float32), ln2_b=zeros(dim),
            fc1_w=w((dim, hidden)), fc1_b=zeros(hidden),
            fc2_w=w((hidden, dim)), fc2_b=zeros(dim),
        )

    return dict(
        patch_w=w((C * p * p, D)), patch_b=zeros(D),   # conv(k=8,s=8) as matmul
        cls_token=w((1, 1, D)), pos_embed=w((1, n_tok, D)),
        backbone_blocks=[block_params(D, cfg["backbone_mlp_ratio"])
                         for _ in range(cfg["n_pretrained_blocks"])],
        head_in_w=w((D, Hd)), head_in_b=zeros(Hd),
        head_blocks=[block_params(Hd, cfg["head_mlp_ratio"])
                     for _ in range(cfg["n_head_blocks"])],
        head_out_w=w((Hd, cfg["feature_dim"])),
        head_out_b=zeros(cfg["feature_dim"]),
    )


if __name__ == "__main__":
    key = jax.random.PRNGKey(0)
    kx, kp = jax.random.split(key)
    x = jax.random.normal(
        kx, (2, CFG["in_chans"], CFG["img_size"], CFG["img_size"]), jnp.float32
    )
    params = init_params(kp, CFG)
    packed = pack_weights(params, CFG)     # one-time bf16 cast / re-layout

    fwd = jax.jit(functools.partial(dino_with_head_forward, cfg=CFG))
    out = jax.block_until_ready(fwd(x, packed))

    expected = (2, CFG["feature_dim"],
                CFG["img_size"] // CFG["patch_size"],
                CFG["img_size"] // CFG["patch_size"])
    assert out.shape == expected, (out.shape, expected)
    assert bool(jnp.all(jnp.isfinite(out)))
    print("KERNEL_OK")
</pallas_src>

<mosaic_0001>
module attributes {stable_mosaic.version = 11 : i64} {
  func.func @_fused_forward_kernel(%arg0: i32, %arg1: memref<1x8x192xf32, #tpu.memory_space<vmem>>, %arg2: memref<192x192xbf16, #tpu.memory_space<vmem>>, %arg3: memref<8x192xf32, #tpu.memory_space<vmem>>, %arg4: memref<1x192xf32, #tpu.memory_space<vmem>>, %arg5: memref<1x192xf32, #tpu.memory_space<vmem>>, %arg6: memref<12x16x192xbf16, #tpu.memory_space<vmem>>, %arg7: memref<12x16x192xbf16, #tpu.memory_space<vmem>>, %arg8: memref<12x16x192xbf16, #tpu.memory_space<vmem>>, %arg9: memref<12x1x16xf32, #tpu.memory_space<vmem>>, %arg10: memref<12x1x16xf32, #tpu.memory_space<vmem>>, %arg11: memref<12x1x16xf32, #tpu.memory_space<vmem>>, %arg12: memref<12x16x192xbf16, #tpu.memory_space<vmem>>, %arg13: memref<1x192xf32, #tpu.memory_space<vmem>>, %arg14: memref<1x192xf32, #tpu.memory_space<vmem>>, %arg15: memref<1x192xf32, #tpu.memory_space<vmem>>, %arg16: memref<192x768xbf16, #tpu.memory_space<vmem>>, %arg17: memref<1x768xf32, #tpu.memory_space<vmem>>, %arg18: memref<768x192xbf16, #tpu.memory_space<vmem>>, %arg19: memref<1x192xf32, #tpu.memory_space<vmem>>, %arg20: memref<1x192xf32, #tpu.memory_space<vmem>>, %arg21: memref<1x192xf32, #tpu.memory_space<vmem>>, %arg22: memref<12x16x192xbf16, #tpu.memory_space<vmem>>, %arg23: memref<12x16x192xbf16, #tpu.memory_space<vmem>>, %arg24: memref<12x16x192xbf16, #tpu.memory_space<vmem>>, %arg25: memref<12x1x16xf32, #tpu.memory_space<vmem>>, %arg26: memref<12x1x16xf32, #tpu.memory_space<vmem>>, %arg27: memref<12x1x16xf32, #tpu.memory_space<vmem>>, %arg28: memref<12x16x192xbf16, #tpu.memory_space<vmem>>, %arg29: memref<1x192xf32, #tpu.memory_space<vmem>>, %arg30: memref<1x192xf32, #tpu.memory_space<vmem>>, %arg31: memref<1x192xf32, #tpu.memory_space<vmem>>, %arg32: memref<192x768xbf16, #tpu.memory_space<vmem>>, %arg33: memref<1x768xf32, #tpu.memory_space<vmem>>, %arg34: memref<768x192xbf16, #tpu.memory_space<vmem>>, %arg35: memref<1x192xf32, #tpu.memory_space<vmem>>, %arg36: memref<192x128xbf16, #tpu.memory_space<vmem>>, %arg37: memref<1x128xf32, #tpu.memory_space<vmem>>, %arg38: memref<1x128xf32, #tpu.memory_space<vmem>>, %arg39: memref<1x128xf32, #tpu.memory_space<vmem>>, %arg40: memref<4x32x128xbf16, #tpu.memory_space<vmem>>, %arg41: memref<4x32x128xbf16, #tpu.memory_space<vmem>>, %arg42: memref<4x32x128xbf16, #tpu.memory_space<vmem>>, %arg43: memref<4x1x32xf32, #tpu.memory_space<vmem>>, %arg44: memref<4x1x32xf32, #tpu.memory_space<vmem>>, %arg45: memref<4x1x32xf32, #tpu.memory_space<vmem>>, %arg46: memref<4x32x128xbf16, #tpu.memory_space<vmem>>, %arg47: memref<1x128xf32, #tpu.memory_space<vmem>>, %arg48: memref<1x128xf32, #tpu.memory_space<vmem>>, %arg49: memref<1x128xf32, #tpu.memory_space<vmem>>, %arg50: memref<128x512xbf16, #tpu.memory_space<vmem>>, %arg51: memref<1x512xf32, #tpu.memory_space<vmem>>, %arg52: memref<512x128xbf16, #tpu.memory_space<vmem>>, %arg53: memref<1x128xf32, #tpu.memory_space<vmem>>, %arg54: memref<1x128xf32, #tpu.memory_space<vmem>>, %arg55: memref<1x128xf32, #tpu.memory_space<vmem>>, %arg56: memref<4x32x128xbf16, #tpu.memory_space<vmem>>, %arg57: memref<4x32x128xbf16, #tpu.memory_space<vmem>>, %arg58: memref<4x32x128xbf16, #tpu.memory_space<vmem>>, %arg59: memref<4x1x32xf32, #tpu.memory_space<vmem>>, %arg60: memref<4x1x32xf32, #tpu.memory_space<vmem>>, %arg61: memref<4x1x32xf32, #tpu.memory_space<vmem>>, %arg62: memref<4x32x128xbf16, #tpu.memory_space<vmem>>, %arg63: memref<1x128xf32, #tpu.memory_space<vmem>>, %arg64: memref<1x128xf32, #tpu.memory_space<vmem>>, %arg65: memref<1x128xf32, #tpu.memory_space<vmem>>, %arg66: memref<128x512xbf16, #tpu.memory_space<vmem>>, %arg67: memref<1x512xf32, #tpu.memory_space<vmem>>, %arg68: memref<512x128xbf16, #tpu.memory_space<vmem>>, %arg69: memref<1x128xf32, #tpu.memory_space<vmem>>, %arg70: memref<128x128xbf16, #tpu.memory_space<vmem>>, %arg71: memref<1x128xf32, #tpu.memory_space<vmem>>, %arg72: memref<1x8x128xf32, #tpu.memory_space<vmem>>) attributes {dimension_semantics = [#tpu.dimension_semantics<parallel>], iteration_bounds = array<i64: 2>, scalar_prefetch = 0 : i64, scratch_operands = 0 : i64, tpu.core_type = #tpu.core_type<tc>, window_params = [{transform_indices = @transform_0, window_bounds = array<i64: 1, 8, 192>}, {pipeline_mode = #tpu.pipeline_mode<synchronous>, transform_indices = @transform_1, window_bounds = array<i64: 192, 192>}, {pipeline_mode = #tpu.pipeline_mode<synchronous>, transform_indices = @transform_2, window_bounds = array<i64: 8, 192>}, {pipeline_mode = #tpu.pipeline_mode<synchronous>, transform_indices = @transform_3, window_bounds = array<i64: 1, 192>}, {pipeline_mode = #tpu.pipeline_mode<synchronous>, transform_indices = @transform_4, window_bounds = array<i64: 1, 192>}, {pipeline_mode = #tpu.pipeline_mode<synchronous>, transform_indices = @transform_5, window_bounds = array<i64: 12, 16, 192>}, {pipeline_mode = #tpu.pipeline_mode<synchronous>, transform_indices = @transform_6, window_bounds = array<i64: 12, 16, 192>}, {pipeline_mode = #tpu.pipeline_mode<synchronous>, transform_indices = @transform_7, window_bounds = array<i64: 12, 16, 192>}, {pipeline_mode = #tpu.pipeline_mode<synchronous>, transform_indices = @transform_8, window_bounds = array<i64: 12, 1, 16>}, {pipeline_mode = #tpu.pipeline_mode<synchronous>, transform_indices = @transform_9, window_bounds = array<i64: 12, 1, 16>}, {pipeline_mode = #tpu.pipeline_mode<synchronous>, transform_indices = @transform_10, window_bounds = array<i64: 12, 1, 16>}, {pipeline_mode = #tpu.pipeline_mode<synchronous>, transform_indices = @transform_11, window_bounds = array<i64: 12, 16, 192>}, {pipeline_mode = #tpu.pipeline_mode<synchronous>, transform_indices = @transform_12, window_bounds = array<i64: 1, 192>}, {pipeline_mode = #tpu.pipeline_mode<synchronous>, transform_indices = @transform_13, window_bounds = array<i64: 1, 192>}, {pipeline_mode = #tpu.pipeline_mode<synchronous>, transform_indices = @transform_14, window_bounds = array<i64: 1, 192>}, {pipeline_mode = #tpu.pipeline_mode<synchronous>, transform_indices = @transform_15, window_bounds = array<i64: 192, 768>}, {pipeline_mode = #tpu.pipeline_mode<synchronous>, transform_indices = @transform_16, window_bounds = array<i64: 1, 768>}, {pipeline_mode = #tpu.pipeline_mode<synchronous>, transform_indices = @transform_17, window_bounds = array<i64: 768, 192>}, {pipeline_mode = #tpu.pipeline_mode<synchronous>, transform_indices = @transform_18, window_bounds = array<i64: 1, 192>}, {pipeline_mode = #tpu.pipeline_mode<synchronous>, transform_indices = @transform_19, window_bounds = array<i64: 1, 192>}, {pipeline_mode = #tpu.pipeline_mode<synchronous>, transform_indices = @transform_20, window_bounds = array<i64: 1, 192>}, {pipeline_mode = #tpu.pipeline_mode<synchronous>, transform_indices = @transform_21, window_bounds = array<i64: 12, 16, 192>}, {pipeline_mode = #tpu.pipeline_mode<synchronous>, transform_indices = @transform_22, window_bounds = array<i64: 12, 16, 192>}, {pipeline_mode = #tpu.pipeline_mode<synchronous>, transform_indices = @transform_23, window_bounds = array<i64: 12, 16, 192>}, {pipeline_mode = #tpu.pipeline_mode<synchronous>, transform_indices = @transform_24, window_bounds = array<i64: 12, 1, 16>}, {pipeline_mode = #tpu.pipeline_mode<synchronous>, transform_indices = @transform_25, window_bounds = array<i64: 12, 1, 16>}, {pipeline_mode = #tpu.pipeline_mode<synchronous>, transform_indices = @transform_26, window_bounds = array<i64: 12, 1, 16>}, {pipeline_mode = #tpu.pipeline_mode<synchronous>, transform_indices = @transform_27, window_bounds = array<i64: 12, 16, 192>}, {pipeline_mode = #tpu.pipeline_mode<synchronous>, transform_indices = @transform_28, window_bounds = array<i64: 1, 192>}, {pipeline_mode = #tpu.pipeline_mode<synchronous>, transform_indices = @transform_29, window_bounds = array<i64: 1, 192>}, {pipeline_mode = #tpu.pipeline_mode<synchronous>, transform_indices = @transform_30, window_bounds = array<i64: 1, 192>}, {pipeline_mode = #tpu.pipeline_mode<synchronous>, transform_indices = @transform_31, window_bounds = array<i64: 192, 768>}, {pipeline_mode = #tpu.pipeline_mode<synchronous>, transform_indices = @transform_32, window_bounds = array<i64: 1, 768>}, {pipeline_mode = #tpu.pipeline_mode<synchronous>, transform_indices = @transform_33, window_bounds = array<i64: 768, 192>}, {pipeline_mode = #tpu.pipeline_mode<synchronous>, transform_indices = @transform_34, window_bounds = array<i64: 1, 192>}, {pipeline_mode = #tpu.pipeline_mode<synchronous>, transform_indices = @transform_35, window_bounds = array<i64: 192, 128>}, {pipeline_mode = #tpu.pipeline_mode<synchronous>, transform_indices = @transform_36, window_bounds = array<i64: 1, 128>}, {pipeline_mode = #tpu.pipeline_mode<synchronous>, transform_indices = @transform_37, window_bounds = array<i64: 1, 128>}, {pipeline_mode = #tpu.pipeline_mode<synchronous>, transform_indices = @transform_38, window_bounds = array<i64: 1, 128>}, {pipeline_mode = #tpu.pipeline_mode<synchronous>, transform_indices = @transform_39, window_bounds = array<i64: 4, 32, 128>}, {pipeline_mode = #tpu.pipeline_mode<synchronous>, transform_indices = @transform_40, window_bounds = array<i64: 4, 32, 128>}, {pipeline_mode = #tpu.pipeline_mode<synchronous>, transform_indices = @transform_41, window_bounds = array<i64: 4, 32, 128>}, {pipeline_mode = #tpu.pipeline_mode<synchronous>, transform_indices = @transform_42, window_bounds = array<i64: 4, 1, 32>}, {pipeline_mode = #tpu.pipeline_mode<synchronous>, transform_indices = @transform_43, window_bounds = array<i64: 4, 1, 32>}, {pipeline_mode = #tpu.pipeline_mode<synchronous>, transform_indices = @transform_44, window_bounds = array<i64: 4, 1, 32>}, {pipeline_mode = #tpu.pipeline_mode<synchronous>, transform_indices = @transform_45, window_bounds = array<i64: 4, 32, 128>}, {pipeline_mode = #tpu.pipeline_mode<synchronous>, transform_indices = @transform_46, window_bounds = array<i64: 1, 128>}, {pipeline_mode = #tpu.pipeline_mode<synchronous>, transform_indices = @transform_47, window_bounds = array<i64: 1, 128>}, {pipeline_mode = #tpu.pipeline_mode<synchronous>, transform_indices = @transform_48, window_bounds = array<i64: 1, 128>}, {pipeline_mode = #tpu.pipeline_mode<synchronous>, transform_indices = @transform_49, window_bounds = array<i64: 128, 512>}, {pipeline_mode = #tpu.pipeline_mode<synchronous>, transform_indices = @transform_50, window_bounds = array<i64: 1, 512>}, {pipeline_mode = #tpu.pipeline_mode<synchronous>, transform_indices = @transform_51, window_bounds = array<i64: 512, 128>}, {pipeline_mode = #tpu.pipeline_mode<synchronous>, transform_indices = @transform_52, window_bounds = array<i64: 1, 128>}, {pipeline_mode = #tpu.pipeline_mode<synchronous>, transform_indices = @transform_53, window_bounds = array<i64: 1, 128>}, {pipeline_mode = #tpu.pipeline_mode<synchronous>, transform_indices = @transform_54, window_bounds = array<i64: 1, 128>}, {pipeline_mode = #tpu.pipeline_mode<synchronous>, transform_indices = @transform_55, window_bounds = array<i64: 4, 32, 128>}, {pipeline_mode = #tpu.pipeline_mode<synchronous>, transform_indices = @transform_56, window_bounds = array<i64: 4, 32, 128>}, {pipeline_mode = #tpu.pipeline_mode<synchronous>, transform_indices = @transform_57, window_bounds = array<i64: 4, 32, 128>}, {pipeline_mode = #tpu.pipeline_mode<synchronous>, transform_indices = @transform_58, window_bounds = array<i64: 4, 1, 32>}, {pipeline_mode = #tpu.pipeline_mode<synchronous>, transform_indices = @transform_59, window_bounds = array<i64: 4, 1, 32>}, {pipeline_mode = #tpu.pipeline_mode<synchronous>, transform_indices = @transform_60, window_bounds = array<i64: 4, 1, 32>}, {pipeline_mode = #tpu.pipeline_mode<synchronous>, transform_indices = @transform_61, window_bounds = array<i64: 4, 32, 128>}, {pipeline_mode = #tpu.pipeline_mode<synchronous>, transform_indices = @transform_62, window_bounds = array<i64: 1, 128>}, {pipeline_mode = #tpu.pipeline_mode<synchronous>, transform_indices = @transform_63, window_bounds = array<i64: 1, 128>}, {pipeline_mode = #tpu.pipeline_mode<synchronous>, transform_indices = @transform_64, window_bounds = array<i64: 1, 128>}, {pipeline_mode = #tpu.pipeline_mode<synchronous>, transform_indices = @transform_65, window_bounds = array<i64: 128, 512>}, {pipeline_mode = #tpu.pipeline_mode<synchronous>, transform_indices = @transform_66, window_bounds = array<i64: 1, 512>}, {pipeline_mode = #tpu.pipeline_mode<synchronous>, transform_indices = @transform_67, window_bounds = array<i64: 512, 128>}, {pipeline_mode = #tpu.pipeline_mode<synchronous>, transform_indices = @transform_68, window_bounds = array<i64: 1, 128>}, {pipeline_mode = #tpu.pipeline_mode<synchronous>, transform_indices = @transform_69, window_bounds = array<i64: 128, 128>}, {pipeline_mode = #tpu.pipeline_mode<synchronous>, transform_indices = @transform_70, window_bounds = array<i64: 1, 128>}, {transform_indices = @transform_71, window_bounds = array<i64: 1, 8, 128>}]} {
    %c0 = arith.constant 0 : index
    %c0_0 = arith.constant 0 : index
    %c0_1 = arith.constant 0 : index
    %0 = vector.load %arg1[%c0, %c0_0, %c0_1] : memref<1x8x192xf32, #tpu.memory_space<vmem>>, vector<1x8x192xf32>
    %1 = vector.shape_cast %0 : vector<1x8x192xf32> to vector<8x192xf32>
    %c0_2 = arith.constant 0 : index
    %c0_3 = arith.constant 0 : index
    %2 = vector.load %arg2[%c0_2, %c0_3] : memref<192x192xbf16, #tpu.memory_space<vmem>>, vector<192x192xbf16>
    %c0_4 = arith.constant 0 : index
    %c0_5 = arith.constant 0 : index
    %3 = vector.load %arg3[%c0_4, %c0_5] : memref<8x192xf32, #tpu.memory_space<vmem>>, vector<8x192xf32>
    %4 = tpu.iota {dimensions = array<i32: 1>} : vector<8x8xi32>
    %c5_i32 = arith.constant 5 : i32
    %5 = vector.broadcast %c5_i32 : i32 to vector<8x8xi32>
    %6 = arith.cmpi slt, %4, %5 : vector<8x8xi32>
    %cst = arith.constant 0.000000e+00 : f32
    %cst_6 = arith.constant -1.000000e+09 : f32
    %7 = vector.broadcast %cst : f32 to vector<8x8xf32>
    %8 = vector.broadcast %cst_6 : f32 to vector<8x8xf32>
    %9 = arith.select %6, %7, %8 : vector<8x8xi1>, vector<8x8xf32>
    %10 = arith.truncf %1 : vector<8x192xf32> to vector<8x192xbf16>
    %cst_7 = arith.constant dense<0.000000e+00> : vector<8x192xf32>
    %11 = tpu.matmul %10, %2, %cst_7 {dimension_numbers = #tpu.dot_dimension_numbers<[1], [0], [0], [1], [0, 0, 1, 1], [], []>} : vector<8x192xbf16>, vector<192x192xbf16>, vector<8x192xf32> -> vector<8x192xf32>
    %12 = arith.addf %11, %3 : vector<8x192xf32>
    %c0_8 = arith.constant 0 : index
    %c0_9 = arith.constant 0 : index
    %13 = vector.load %arg4[%c0_8, %c0_9] : memref<1x192xf32, #tpu.memory_space<vmem>>, vector<1x192xf32>
    %c0_10 = arith.constant 0 : index
    %c0_11 = arith.constant 0 : index
    %14 = vector.load %arg5[%c0_10, %c0_11] : memref<1x192xf32, #tpu.memory_space<vmem>>, vector<1x192xf32>
    %c0_12 = arith.constant 0 : index
    %c0_13 = arith.constant 0 : index
    %c0_14 = arith.constant 0 : index
    %15 = vector.load %arg6[%c0_12, %c0_13, %c0_14] : memref<12x16x192xbf16, #tpu.memory_space<vmem>>, vector<12x16x192xbf16>
    %c0_15 = arith.constant 0 : index
    %c0_16 = arith.constant 0 : index
    %c0_17 = arith.constant 0 : index
    %16 = vector.load %arg7[%c0_15, %c0_16, %c0_17] : memref<12x16x192xbf16, #tpu.memory_space<vmem>>, vector<12x16x192xbf16>
    %c0_18 = arith.constant 0 : index
    %c0_19 = arith.constant 0 : index
    %c0_20 = arith.constant 0 : index
    %17 = vector.load %arg8[%c0_18, %c0_19, %c0_20] : memref<12x16x192xbf16, #tpu.memory_space<vmem>>, vector<12x16x192xbf16>
    %c0_21 = arith.constant 0 : index
    %c0_22 = arith.constant 0 : index
    %c0_23 = arith.constant 0 : index
    %18 = vector.load %arg9[%c0_21, %c0_22, %c0_23] : memref<12x1x16xf32, #tpu.memory_space<vmem>>, vector<12x1x16xf32>
    %c0_24 = arith.constant 0 : index
    %c0_25 = arith.constant 0 : index
    %c0_26 = arith.constant 0 : index
    %19 = vector.load %arg10[%c0_24, %c0_25, %c0_26] : memref<12x1x16xf32, #tpu.memory_space<vmem>>, vector<12x1x16xf32>
    %c0_27 = arith.constant 0 : index
    %c0_28 = arith.constant 0 : index
    %c0_29 = arith.constant 0 : index
    %20 = vector.load %arg11[%c0_27, %c0_28, %c0_29] : memref<12x1x16xf32, #tpu.memory_space<vmem>>, vector<12x1x16xf32>
    %c0_30 = arith.constant 0 : index
    %c0_31 = arith.constant 0 : index
    %c0_32 = arith.constant 0 : index
    %21 = vector.load %arg12[%c0_30, %c0_31, %c0_32] : memref<12x16x192xbf16, #tpu.memory_space<vmem>>, vector<12x16x192xbf16>
    %c0_33 = arith.constant 0 : index
    %c0_34 = arith.constant 0 : index
    %22 = vector.load %arg13[%c0_33, %c0_34] : memref<1x192xf32, #tpu.memory_space<vmem>>, vector<1x192xf32>
    %c0_35 = arith.constant 0 : index
    %c0_36 = arith.constant 0 : index
    %23 = vector.load %arg14[%c0_35, %c0_36] : memref<1x192xf32, #tpu.memory_space<vmem>>, vector<1x192xf32>
    %c0_37 = arith.constant 0 : index
    %c0_38 = arith.constant 0 : index
    %24 = vector.load %arg15[%c0_37, %c0_38] : memref<1x192xf32, #tpu.memory_space<vmem>>, vector<1x192xf32>
    %c0_39 = arith.constant 0 : index
    %c0_40 = arith.constant 0 : index
    %25 = vector.load %arg16[%c0_39, %c0_40] : memref<192x768xbf16, #tpu.memory_space<vmem>>, vector<192x768xbf16>
    %c0_41 = arith.constant 0 : index
    %c0_42 = arith.constant 0 : index
    %26 = vector.load %arg17[%c0_41, %c0_42] : memref<1x768xf32, #tpu.memory_space<vmem>>, vector<1x768xf32>
    %c0_43 = arith.constant 0 : index
    %c0_44 = arith.constant 0 : index
    %27 = vector.load %arg18[%c0_43, %c0_44] : memref<768x192xbf16, #tpu.memory_space<vmem>>, vector<768x192xbf16>
    %c0_45 = arith.constant 0 : index
    %c0_46 = arith.constant 0 : index
    %28 = vector.load %arg19[%c0_45, %c0_46] : memref<1x192xf32, #tpu.memory_space<vmem>>, vector<1x192xf32>
    %cst_47 = arith.constant dense<0.000000e+00> : vector<8xf32>
    %29 = vector.multi_reduction <add>, %12, %cst_47 [1] : vector<8x192xf32> to vector<8xf32>
    %30 = vector.shape_cast %29 : vector<8xf32> to vector<8x1xf32>
    %cst_48 = arith.constant 1.920000e+02 : f32
    %31 = vector.broadcast %cst_48 : f32 to vector<8x1xf32>
    %32 = arith.divf %30, %31 : vector<8x1xf32>
    %33 = vector.broadcast %32 : vector<8x1xf32> to vector<8x192xf32>
    %34 = arith.subf %12, %33 : vector<8x192xf32>
    %35 = arith.mulf %34, %34 : vector<8x192xf32>
    %cst_49 = arith.constant dense<0.000000e+00> : vector<8xf32>
    %36 = vector.multi_reduction <add>, %35, %cst_49 [1] : vector<8x192xf32> to vector<8xf32>
    %37 = vector.shape_cast %36 : vector<8xf32> to vector<8x1xf32>
    %cst_50 = arith.constant 1.920000e+02 : f32
    %38 = vector.broadcast %cst_50 : f32 to vector<8x1xf32>
    %39 = arith.divf %37, %38 : vector<8x1xf32>
    %cst_51 = arith.constant 9.99999997E-7 : f32
    %40 = vector.broadcast %cst_51 : f32 to vector<8x1xf32>
    %41 = arith.addf %39, %40 : vector<8x1xf32>
    %42 = math.rsqrt %41 : vector<8x1xf32>
    %43 = vector.broadcast %42 : vector<8x1xf32> to vector<8x192xf32>
    %44 = arith.mulf %34, %43 : vector<8x192xf32>
    %45 = vector.broadcast %13 : vector<1x192xf32> to vector<8x192xf32>
    %46 = arith.mulf %44, %45 : vector<8x192xf32>
    %47 = vector.broadcast %14 : vector<1x192xf32> to vector<8x192xf32>
    %48 = arith.addf %46, %47 : vector<8x192xf32>
    %49 = arith.truncf %48 : vector<8x192xf32> to vector<8x192xbf16>
    %50 = vector.shape_cast %49 : vector<8x192xbf16> to vector<1x8x192xbf16>
    %51 = vector.shape_cast %50 : vector<1x8x192xbf16> to vector<1x8x192xbf16>
    %52 = vector.broadcast %51 : vector<1x8x192xbf16> to vector<12x8x192xbf16>
    "tpu.trace_start"() <{level = 10 : i32, message = "hmc,hdc->hmd"}> : () -> ()
    %cst_52 = arith.constant dense<0.000000e+00> : vector<12x8x16xf32>
    %53 = tpu.matmul %52, %15, %cst_52 {dimension_numbers = #tpu.dot_dimension_numbers<[2], [2], [1], [1], [0, 0, 0, 1, 1, 1], [0], [0]>} : vector<12x8x192xbf16>, vector<12x16x192xbf16>, vector<12x8x16xf32> -> vector<12x8x16xf32>
    "tpu.trace_stop"() : () -> ()
    %54 = vector.broadcast %18 : vector<12x1x16xf32> to vector<12x8x16xf32>
    %55 = arith.addf %53, %54 : vector<12x8x16xf32>
    "tpu.trace_start"() <{level = 10 : i32, message = "hmc,hdc->hmd"}> : () -> ()
    %cst_53 = arith.constant dense<0.000000e+00> : vector<12x8x16xf32>
    %56 = tpu.matmul %52, %16, %cst_53 {dimension_numbers = #tpu.dot_dimension_numbers<[2], [2], [1], [1], [0, 0, 0, 1, 1, 1], [0], [0]>} : vector<12x8x192xbf16>, vector<12x16x192xbf16>, vector<12x8x16xf32> -> vector<12x8x16xf32>
    "tpu.trace_stop"() : () -> ()
    %57 = vector.broadcast %19 : vector<12x1x16xf32> to vector<12x8x16xf32>
    %58 = arith.addf %56, %57 : vector<12x8x16xf32>
    "tpu.trace_start"() <{level = 10 : i32, message = "hmc,hdc->hmd"}> : () -> ()
    %cst_54 = arith.constant dense<0.000000e+00> : vector<12x8x16xf32>
    %59 = tpu.matmul %52, %17, %cst_54 {dimension_numbers = #tpu.dot_dimension_numbers<[2], [2], [1], [1], [0, 0, 0, 1, 1, 1], [0], [0]>} : vector<12x8x192xbf16>, vector<12x16x192xbf16>, vector<12x8x16xf32> -> vector<12x8x16xf32>
    "tpu.trace_stop"() : () -> ()
    %60 = vector.broadcast %20 : vector<12x1x16xf32> to vector<12x8x16xf32>
    %61 = arith.addf %59, %60 : vector<12x8x16xf32>
    %62 = arith.truncf %55 : vector<12x8x16xf32> to vector<12x8x16xbf16>
    %63 = arith.truncf %58 : vector<12x8x16xf32> to vector<12x8x16xbf16>
    "tpu.trace_start"() <{level = 10 : i32, message = "hmd,hnd->hmn"}> : () -> ()
    %cst_55 = arith.constant dense<0.000000e+00> : vector<12x8x8xf32>
    %64 = tpu.matmul %62, %63, %cst_55 {dimension_numbers = #tpu.dot_dimension_numbers<[2], [2], [1], [1], [0, 0, 0, 1, 1, 1], [0], [0]>} : vector<12x8x16xbf16>, vector<12x8x16xbf16>, vector<12x8x8xf32> -> vector<12x8x8xf32>
    "tpu.trace_stop"() : () -> ()
    %cst_56 = arith.constant 2.500000e-01 : f32
    %65 = vector.broadcast %cst_56 : f32 to vector<12x8x8xf32>
    %66 = arith.mulf %64, %65 : vector<12x8x8xf32>
    %67 = vector.shape_cast %9 : vector<8x8xf32> to vector<1x8x8xf32>
    %68 = vector.broadcast %67 : vector<1x8x8xf32> to vector<12x8x8xf32>
    %69 = arith.addf %66, %68 : vector<12x8x8xf32>
    %cst_57 = arith.constant dense<0xFF800000> : vector<12x8xf32>
    %70 = vector.multi_reduction <maximumf>, %69, %cst_57 [2] : vector<12x8x8xf32> to vector<12x8xf32>
    %71 = vector.shape_cast %70 : vector<12x8xf32> to vector<12x8x1xf32>
    %72 = vector.broadcast %71 : vector<12x8x1xf32> to vector<12x8x8xf32>
    %73 = arith.subf %69, %72 : vector<12x8x8xf32>
    %74 = math.exp %73 : vector<12x8x8xf32>
    %cst_58 = arith.constant dense<0.000000e+00> : vector<12x8xf32>
    %75 = vector.multi_reduction <add>, %74, %cst_58 [2] : vector<12x8x8xf32> to vector<12x8xf32>
    %76 = vector.shape_cast %75 : vector<12x8xf32> to vector<12x8x1xf32>
    %77 = tpu.reciprocal %76 {approx = true} : vector<12x8x1xf32> -> vector<12x8x1xf32>
    %78 = arith.truncf %74 : vector<12x8x8xf32> to vector<12x8x8xbf16>
    %79 = arith.truncf %61 : vector<12x8x16xf32> to vector<12x8x16xbf16>
    "tpu.trace_start"() <{level = 10 : i32, message = "hmn,hnd->hmd"}> : () -> ()
    %cst_59 = arith.constant dense<0.000000e+00> : vector<12x8x16xf32>
    %80 = tpu.matmul %78, %79, %cst_59 {dimension_numbers = #tpu.dot_dimension_numbers<[2], [1], [1], [2], [0, 0, 0, 1, 1, 2], [0], [0]>} : vector<12x8x8xbf16>, vector<12x8x16xbf16>, vector<12x8x16xf32> -> vector<12x8x16xf32>
    "tpu.trace_stop"() : () -> ()
    %81 = vector.broadcast %77 : vector<12x8x1xf32> to vector<12x8x16xf32>
    %82 = arith.mulf %80, %81 : vector<12x8x16xf32>
    %83 = arith.truncf %82 : vector<12x8x16xf32> to vector<12x8x16xbf16>
    "tpu.trace_start"() <{level = 10 : i32, message = "hmd,hdc->hmc"}> : () -> ()
    %cst_60 = arith.constant dense<0.000000e+00> : vector<12x8x192xf32>
    %84 = tpu.matmul %83, %21, %cst_60 {dimension_numbers = #tpu.dot_dimension_numbers<[2], [1], [1], [2], [0, 0, 0, 1, 1, 2], [0], [0]>} : vector<12x8x16xbf16>, vector<12x16x192xbf16>, vector<12x8x192xf32> -> vector<12x8x192xf32>
    "tpu.trace_stop"() : () -> ()
    %cst_61 = arith.constant dense<0.000000e+00> : vector<8x192xf32>
    %85 = vector.multi_reduction <add>, %84, %cst_61 [0] : vector<12x8x192xf32> to vector<8x192xf32>
    %86 = arith.addf %12, %85 : vector<8x192xf32>
    %87 = vector.broadcast %22 : vector<1x192xf32> to vector<8x192xf32>
    %88 = arith.addf %86, %87 : vector<8x192xf32>
    %cst_62 = arith.constant dense<0.000000e+00> : vector<8xf32>
    %89 = vector.multi_reduction <add>, %88, %cst_62 [1] : vector<8x192xf32> to vector<8xf32>
    %90 = vector.shape_cast %89 : vector<8xf32> to vector<8x1xf32>
    %cst_63 = arith.constant 1.920000e+02 : f32
    %91 = vector.broadcast %cst_63 : f32 to vector<8x1xf32>
    %92 = arith.divf %90, %91 : vector<8x1xf32>
    %93 = vector.broadcast %92 : vector<8x1xf32> to vector<8x192xf32>
    %94 = arith.subf %88, %93 : vector<8x192xf32>
    %95 = arith.mulf %94, %94 : vector<8x192xf32>
    %cst_64 = arith.constant dense<0.000000e+00> : vector<8xf32>
    %96 = vector.multi_reduction <add>, %95, %cst_64 [1] : vector<8x192xf32> to vector<8xf32>
    %97 = vector.shape_cast %96 : vector<8xf32> to vector<8x1xf32>
    %cst_65 = arith.constant 1.920000e+02 : f32
    %98 = vector.broadcast %cst_65 : f32 to vector<8x1xf32>
    %99 = arith.divf %97, %98 : vector<8x1xf32>
    %cst_66 = arith.constant 9.99999997E-7 : f32
    %100 = vector.broadcast %cst_66 : f32 to vector<8x1xf32>
    %101 = arith.addf %99, %100 : vector<8x1xf32>
    %102 = math.rsqrt %101 : vector<8x1xf32>
    %103 = vector.broadcast %102 : vector<8x1xf32> to vector<8x192xf32>
    %104 = arith.mulf %94, %103 : vector<8x192xf32>
    %105 = vector.broadcast %23 : vector<1x192xf32> to vector<8x192xf32>
    %106 = arith.mulf %104, %105 : vector<8x192xf32>
    %107 = vector.broadcast %24 : vector<1x192xf32> to vector<8x192xf32>
    %108 = arith.addf %106, %107 : vector<8x192xf32>
    %109 = arith.truncf %108 : vector<8x192xf32> to vector<8x192xbf16>
    %cst_67 = arith.constant dense<0.000000e+00> : vector<8x768xf32>
    %110 = tpu.matmul %109, %25, %cst_67 {dimension_numbers = #tpu.dot_dimension_numbers<[1], [0], [0], [1], [0, 0, 1, 1], [], []>} : vector<8x192xbf16>, vector<192x768xbf16>, vector<8x768xf32> -> vector<8x768xf32>
    %111 = vector.broadcast %26 : vector<1x768xf32> to vector<8x768xf32>
    %112 = arith.addf %110, %111 : vector<8x768xf32>
    %cst_68 = arith.constant 5.000000e-01 : f32
    %113 = vector.broadcast %cst_68 : f32 to vector<8x768xf32>
    %114 = arith.mulf %113, %112 : vector<8x768xf32>
    %cst_69 = arith.constant 4.471500e-02 : f32
    %115 = vector.broadcast %cst_69 : f32 to vector<8x768xf32>
    %116 = arith.mulf %115, %112 : vector<8x768xf32>
    %117 = arith.mulf %116, %112 : vector<8x768xf32>
    %118 = arith.mulf %117, %112 : vector<8x768xf32>
    %119 = arith.addf %112, %118 : vector<8x768xf32>
    %cst_70 = arith.constant 0.797884583 : f32
    %120 = vector.broadcast %cst_70 : f32 to vector<8x768xf32>
    %121 = arith.mulf %120, %119 : vector<8x768xf32>
    %122 = math.tanh %121 : vector<8x768xf32>
    %cst_71 = arith.constant 1.000000e+00 : f32
    %123 = vector.broadcast %cst_71 : f32 to vector<8x768xf32>
    %124 = arith.addf %123, %122 : vector<8x768xf32>
    %125 = arith.mulf %114, %124 : vector<8x768xf32>
    %126 = arith.truncf %125 : vector<8x768xf32> to vector<8x768xbf16>
    %cst_72 = arith.constant dense<0.000000e+00> : vector<8x192xf32>
    %127 = tpu.matmul %126, %27, %cst_72 {dimension_numbers = #tpu.dot_dimension_numbers<[1], [0], [0], [1], [0, 0, 1, 1], [], []>} : vector<8x768xbf16>, vector<768x192xbf16>, vector<8x192xf32> -> vector<8x192xf32>
    %128 = arith.addf %88, %127 : vector<8x192xf32>
    %129 = vector.broadcast %28 : vector<1x192xf32> to vector<8x192xf32>
    %130 = arith.addf %128, %129 : vector<8x192xf32>
    %c0_73 = arith.constant 0 : index
    %c0_74 = arith.constant 0 : index
    %131 = vector.load %arg20[%c0_73, %c0_74] : memref<1x192xf32, #tpu.memory_space<vmem>>, vector<1x192xf32>
    %c0_75 = arith.constant 0 : index
    %c0_76 = arith.constant 0 : index
    %132 = vector.load %arg21[%c0_75, %c0_76] : memref<1x192xf32, #tpu.memory_space<vmem>>, vector<1x192xf32>
    %c0_77 = arith.constant 0 : index
    %c0_78 = arith.constant 0 : index
    %c0_79 = arith.constant 0 : index
    %133 = vector.load %arg22[%c0_77, %c0_78, %c0_79] : memref<12x16x192xbf16, #tpu.memory_space<vmem>>, vector<12x16x192xbf16>
    %c0_80 = arith.constant 0 : index
    %c0_81 = arith.constant 0 : index
    %c0_82 = arith.constant 0 : index
    %134 = vector.load %arg23[%c0_80, %c0_81, %c0_82] : memref<12x16x192xbf16, #tpu.memory_space<vmem>>, vector<12x16x192xbf16>
    %c0_83 = arith.constant 0 : index
    %c0_84 = arith.constant 0 : index
    %c0_85 = arith.constant 0 : index
    %135 = vector.load %arg24[%c0_83, %c0_84, %c0_85] : memref<12x16x192xbf16, #tpu.memory_space<vmem>>, vector<12x16x192xbf16>
    %c0_86 = arith.constant 0 : index
    %c0_87 = arith.constant 0 : index
    %c0_88 = arith.constant 0 : index
    %136 = vector.load %arg25[%c0_86, %c0_87, %c0_88] : memref<12x1x16xf32, #tpu.memory_space<vmem>>, vector<12x1x16xf32>
    %c0_89 = arith.constant 0 : index
    %c0_90 = arith.constant 0 : index
    %c0_91 = arith.constant 0 : index
    %137 = vector.load %arg26[%c0_89, %c0_90, %c0_91] : memref<12x1x16xf32, #tpu.memory_space<vmem>>, vector<12x1x16xf32>
    %c0_92 = arith.constant 0 : index
    %c0_93 = arith.constant 0 : index
    %c0_94 = arith.constant 0 : index
    %138 = vector.load %arg27[%c0_92, %c0_93, %c0_94] : memref<12x1x16xf32, #tpu.memory_space<vmem>>, vector<12x1x16xf32>
    %c0_95 = arith.constant 0 : index
    %c0_96 = arith.constant 0 : index
    %c0_97 = arith.constant 0 : index
    %139 = vector.load %arg28[%c0_95, %c0_96, %c0_97] : memref<12x16x192xbf16, #tpu.memory_space<vmem>>, vector<12x16x192xbf16>
    %c0_98 = arith.constant 0 : index
    %c0_99 = arith.constant 0 : index
    %140 = vector.load %arg29[%c0_98, %c0_99] : memref<1x192xf32, #tpu.memory_space<vmem>>, vector<1x192xf32>
    %c0_100 = arith.constant 0 : index
    %c0_101 = arith.constant 0 : index
    %141 = vector.load %arg30[%c0_100, %c0_101] : memref<1x192xf32, #tpu.memory_space<vmem>>, vector<1x192xf32>
    %c0_102 = arith.constant 0 : index
    %c0_103 = arith.constant 0 : index
    %142 = vector.load %arg31[%c0_102, %c0_103] : memref<1x192xf32, #tpu.memory_space<vmem>>, vector<1x192xf32>
    %c0_104 = arith.constant 0 : index
    %c0_105 = arith.constant 0 : index
    %143 = vector.load %arg32[%c0_104, %c0_105] : memref<192x768xbf16, #tpu.memory_space<vmem>>, vector<192x768xbf16>
    %c0_106 = arith.constant 0 : index
    %c0_107 = arith.constant 0 : index
    %144 = vector.load %arg33[%c0_106, %c0_107] : memref<1x768xf32, #tpu.memory_space<vmem>>, vector<1x768xf32>
    %c0_108 = arith.constant 0 : index
    %c0_109 = arith.constant 0 : index
    %145 = vector.load %arg34[%c0_108, %c0_109] : memref<768x192xbf16, #tpu.memory_space<vmem>>, vector<768x192xbf16>
    %c0_110 = arith.constant 0 : index
    %c0_111 = arith.constant 0 : index
    %146 = vector.load %arg35[%c0_110, %c0_111] : memref<1x192xf32, #tpu.memory_space<vmem>>, vector<1x192xf32>
    %cst_112 = arith.constant dense<0.000000e+00> : vector<8xf32>
    %147 = vector.multi_reduction <add>, %130, %cst_112 [1] : vector<8x192xf32> to vector<8xf32>
    %148 = vector.shape_cast %147 : vector<8xf32> to vector<8x1xf32>
    %cst_113 = arith.constant 1.920000e+02 : f32
    %149 = vector.broadcast %cst_113 : f32 to vector<8x1xf32>
    %150 = arith.divf %148, %149 : vector<8x1xf32>
    %151 = vector.broadcast %150 : vector<8x1xf32> to vector<8x192xf32>
    %152 = arith.subf %130, %151 : vector<8x192xf32>
    %153 = arith.mulf %152, %152 : vector<8x192xf32>
    %cst_114 = arith.constant dense<0.000000e+00> : vector<8xf32>
    %154 = vector.multi_reduction <add>, %153, %cst_114 [1] : vector<8x192xf32> to vector<8xf32>
    %155 = vector.shape_cast %154 : vector<8xf32> to vector<8x1xf32>
    %cst_115 = arith.constant 1.920000e+02 : f32
    %156 = vector.broadcast %cst_115 : f32 to vector<8x1xf32>
    %157 = arith.divf %155, %156 : vector<8x1xf32>
    %cst_116 = arith.constant 9.99999997E-7 : f32
    %158 = vector.broadcast %cst_116 : f32 to vector<8x1xf32>
    %159 = arith.addf %157, %158 : vector<8x1xf32>
    %160 = math.rsqrt %159 : vector<8x1xf32>
    %161 = vector.broadcast %160 : vector<8x1xf32> to vector<8x192xf32>
    %162 = arith.mulf %152, %161 : vector<8x192xf32>
    %163 = vector.broadcast %131 : vector<1x192xf32> to vector<8x192xf32>
    %164 = arith.mulf %162, %163 : vector<8x192xf32>
    %165 = vector.broadcast %132 : vector<1x192xf32> to vector<8x192xf32>
    %166 = arith.addf %164, %165 : vector<8x192xf32>
    %167 = arith.truncf %166 : vector<8x192xf32> to vector<8x192xbf16>
    %168 = vector.shape_cast %167 : vector<8x192xbf16> to vector<1x8x192xbf16>
    %169 = vector.shape_cast %168 : vector<1x8x192xbf16> to vector<1x8x192xbf16>
    %170 = vector.broadcast %169 : vector<1x8x192xbf16> to vector<12x8x192xbf16>
    "tpu.trace_start"() <{level = 10 : i32, message = "hmc,hdc->hmd"}> : () -> ()
    %cst_117 = arith.constant dense<0.000000e+00> : vector<12x8x16xf32>
    %171 = tpu.matmul %170, %133, %cst_117 {dimension_numbers = #tpu.dot_dimension_numbers<[2], [2], [1], [1], [0, 0, 0, 1, 1, 1], [0], [0]>} : vector<12x8x192xbf16>, vector<12x16x192xbf16>, vector<12x8x16xf32> -> vector<12x8x16xf32>
    "tpu.trace_stop"() : () -> ()
    %172 = vector.broadcast %136 : vector<12x1x16xf32> to vector<12x8x16xf32>
    %173 = arith.addf %171, %172 : vector<12x8x16xf32>
    "tpu.trace_start"() <{level = 10 : i32, message = "hmc,hdc->hmd"}> : () -> ()
    %cst_118 = arith.constant dense<0.000000e+00> : vector<12x8x16xf32>
    %174 = tpu.matmul %170, %134, %cst_118 {dimension_numbers = #tpu.dot_dimension_numbers<[2], [2], [1], [1], [0, 0, 0, 1, 1, 1], [0], [0]>} : vector<12x8x192xbf16>, vector<12x16x192xbf16>, vector<12x8x16xf32> -> vector<12x8x16xf32>
    "tpu.trace_stop"() : () -> ()
    %175 = vector.broadcast %137 : vector<12x1x16xf32> to vector<12x8x16xf32>
    %176 = arith.addf %174, %175 : vector<12x8x16xf32>
    "tpu.trace_start"() <{level = 10 : i32, message = "hmc,hdc->hmd"}> : () -> ()
    %cst_119 = arith.constant dense<0.000000e+00> : vector<12x8x16xf32>
    %177 = tpu.matmul %170, %135, %cst_119 {dimension_numbers = #tpu.dot_dimension_numbers<[2], [2], [1], [1], [0, 0, 0, 1, 1, 1], [0], [0]>} : vector<12x8x192xbf16>, vector<12x16x192xbf16>, vector<12x8x16xf32> -> vector<12x8x16xf32>
    "tpu.trace_stop"() : () -> ()
    %178 = vector.broadcast %138 : vector<12x1x16xf32> to vector<12x8x16xf32>
    %179 = arith.addf %177, %178 : vector<12x8x16xf32>
    %180 = arith.truncf %173 : vector<12x8x16xf32> to vector<12x8x16xbf16>
    %181 = arith.truncf %176 : vector<12x8x16xf32> to vector<12x8x16xbf16>
    "tpu.trace_start"() <{level = 10 : i32, message = "hmd,hnd->hmn"}> : () -> ()
    %cst_120 = arith.constant dense<0.000000e+00> : vector<12x8x8xf32>
    %182 = tpu.matmul %180, %181, %cst_120 {dimension_numbers = #tpu.dot_dimension_numbers<[2], [2], [1], [1], [0, 0, 0, 1, 1, 1], [0], [0]>} : vector<12x8x16xbf16>, vector<12x8x16xbf16>, vector<12x8x8xf32> -> vector<12x8x8xf32>
    "tpu.trace_stop"() : () -> ()
    %cst_121 = arith.constant 2.500000e-01 : f32
    %183 = vector.broadcast %cst_121 : f32 to vector<12x8x8xf32>
    %184 = arith.mulf %182, %183 : vector<12x8x8xf32>
    %185 = vector.shape_cast %9 : vector<8x8xf32> to vector<1x8x8xf32>
    %186 = vector.broadcast %185 : vector<1x8x8xf32> to vector<12x8x8xf32>
    %187 = arith.addf %184, %186 : vector<12x8x8xf32>
    %cst_122 = arith.constant dense<0xFF800000> : vector<12x8xf32>
    %188 = vector.multi_reduction <maximumf>, %187, %cst_122 [2] : vector<12x8x8xf32> to vector<12x8xf32>
    %189 = vector.shape_cast %188 : vector<12x8xf32> to vector<12x8x1xf32>
    %190 = vector.broadcast %189 : vector<12x8x1xf32> to vector<12x8x8xf32>
    %191 = arith.subf %187, %190 : vector<12x8x8xf32>
    %192 = math.exp %191 : vector<12x8x8xf32>
    %cst_123 = arith.constant dense<0.000000e+00> : vector<12x8xf32>
    %193 = vector.multi_reduction <add>, %192, %cst_123 [2] : vector<12x8x8xf32> to vector<12x8xf32>
    %194 = vector.shape_cast %193 : vector<12x8xf32> to vector<12x8x1xf32>
    %195 = tpu.reciprocal %194 {approx = true} : vector<12x8x1xf32> -> vector<12x8x1xf32>
    %196 = arith.truncf %192 : vector<12x8x8xf32> to vector<12x8x8xbf16>
    %197 = arith.truncf %179 : vector<12x8x16xf32> to vector<12x8x16xbf16>
    "tpu.trace_start"() <{level = 10 : i32, message = "hmn,hnd->hmd"}> : () -> ()
    %cst_124 = arith.constant dense<0.000000e+00> : vector<12x8x16xf32>
    %198 = tpu.matmul %196, %197, %cst_124 {dimension_numbers = #tpu.dot_dimension_numbers<[2], [1], [1], [2], [0, 0, 0, 1, 1, 2], [0], [0]>} : vector<12x8x8xbf16>, vector<12x8x16xbf16>, vector<12x8x16xf32> -> vector<12x8x16xf32>
    "tpu.trace_stop"() : () -> ()
    %199 = vector.broadcast %195 : vector<12x8x1xf32> to vector<12x8x16xf32>
    %200 = arith.mulf %198, %199 : vector<12x8x16xf32>
    %201 = arith.truncf %200 : vector<12x8x16xf32> to vector<12x8x16xbf16>
    "tpu.trace_start"() <{level = 10 : i32, message = "hmd,hdc->hmc"}> : () -> ()
    %cst_125 = arith.constant dense<0.000000e+00> : vector<12x8x192xf32>
    %202 = tpu.matmul %201, %139, %cst_125 {dimension_numbers = #tpu.dot_dimension_numbers<[2], [1], [1], [2], [0, 0, 0, 1, 1, 2], [0], [0]>} : vector<12x8x16xbf16>, vector<12x16x192xbf16>, vector<12x8x192xf32> -> vector<12x8x192xf32>
    "tpu.trace_stop"() : () -> ()
    %cst_126 = arith.constant dense<0.000000e+00> : vector<8x192xf32>
    %203 = vector.multi_reduction <add>, %202, %cst_126 [0] : vector<12x8x192xf32> to vector<8x192xf32>
    %204 = arith.addf %130, %203 : vector<8x192xf32>
    %205 = vector.broadcast %140 : vector<1x192xf32> to vector<8x192xf32>
    %206 = arith.addf %204, %205 : vector<8x192xf32>
    %cst_127 = arith.constant dense<0.000000e+00> : vector<8xf32>
    %207 = vector.multi_reduction <add>, %206, %cst_127 [1] : vector<8x192xf32> to vector<8xf32>
    %208 = vector.shape_cast %207 : vector<8xf32> to vector<8x1xf32>
    %cst_128 = arith.constant 1.920000e+02 : f32
    %209 = vector.broadcast %cst_128 : f32 to vector<8x1xf32>
    %210 = arith.divf %208, %209 : vector<8x1xf32>
    %211 = vector.broadcast %210 : vector<8x1xf32> to vector<8x192xf32>
    %212 = arith.subf %206, %211 : vector<8x192xf32>
    %213 = arith.mulf %212, %212 : vector<8x192xf32>
    %cst_129 = arith.constant dense<0.000000e+00> : vector<8xf32>
    %214 = vector.multi_reduction <add>, %213, %cst_129 [1] : vector<8x192xf32> to vector<8xf32>
    %215 = vector.shape_cast %214 : vector<8xf32> to vector<8x1xf32>
    %cst_130 = arith.constant 1.920000e+02 : f32
    %216 = vector.broadcast %cst_130 : f32 to vector<8x1xf32>
    %217 = arith.divf %215, %216 : vector<8x1xf32>
    %cst_131 = arith.constant 9.99999997E-7 : f32
    %218 = vector.broadcast %cst_131 : f32 to vector<8x1xf32>
    %219 = arith.addf %217, %218 : vector<8x1xf32>
    %220 = math.rsqrt %219 : vector<8x1xf32>
    %221 = vector.broadcast %220 : vector<8x1xf32> to vector<8x192xf32>
    %222 = arith.mulf %212, %221 : vector<8x192xf32>
    %223 = vector.broadcast %141 : vector<1x192xf32> to vector<8x192xf32>
    %224 = arith.mulf %222, %223 : vector<8x192xf32>
    %225 = vector.broadcast %142 : vector<1x192xf32> to vector<8x192xf32>
    %226 = arith.addf %224, %225 : vector<8x192xf32>
    %227 = arith.truncf %226 : vector<8x192xf32> to vector<8x192xbf16>
    %cst_132 = arith.constant dense<0.000000e+00> : vector<8x768xf32>
    %228 = tpu.matmul %227, %143, %cst_132 {dimension_numbers = #tpu.dot_dimension_numbers<[1], [0], [0], [1], [0, 0, 1, 1], [], []>} : vector<8x192xbf16>, vector<192x768xbf16>, vector<8x768xf32> -> vector<8x768xf32>
    %229 = vector.broadcast %144 : vector<1x768xf32> to vector<8x768xf32>
    %230 = arith.addf %228, %229 : vector<8x768xf32>
    %cst_133 = arith.constant 5.000000e-01 : f32
    %231 = vector.broadcast %cst_133 : f32 to vector<8x768xf32>
    %232 = arith.mulf %231, %230 : vector<8x768xf32>
    %cst_134 = arith.constant 4.471500e-02 : f32
    %233 = vector.broadcast %cst_134 : f32 to vector<8x768xf32>
    %234 = arith.mulf %233, %230 : vector<8x768xf32>
    %235 = arith.mulf %234, %230 : vector<8x768xf32>
    %236 = arith.mulf %235, %230 : vector<8x768xf32>
    %237 = arith.addf %230, %236 : vector<8x768xf32>
    %cst_135 = arith.constant 0.797884583 : f32
    %238 = vector.broadcast %cst_135 : f32 to vector<8x768xf32>
    %239 = arith.mulf %238, %237 : vector<8x768xf32>
    %240 = math.tanh %239 : vector<8x768xf32>
    %cst_136 = arith.constant 1.000000e+00 : f32
    %241 = vector.broadcast %cst_136 : f32 to vector<8x768xf32>
    %242 = arith.addf %241, %240 : vector<8x768xf32>
    %243 = arith.mulf %232, %242 : vector<8x768xf32>
    %244 = arith.truncf %243 : vector<8x768xf32> to vector<8x768xbf16>
    %cst_137 = arith.constant dense<0.000000e+00> : vector<8x192xf32>
    %245 = tpu.matmul %244, %145, %cst_137 {dimension_numbers = #tpu.dot_dimension_numbers<[1], [0], [0], [1], [0, 0, 1, 1], [], []>} : vector<8x768xbf16>, vector<768x192xbf16>, vector<8x192xf32> -> vector<8x192xf32>
    %246 = arith.addf %206, %245 : vector<8x192xf32>
    %247 = vector.broadcast %146 : vector<1x192xf32> to vector<8x192xf32>
    %248 = arith.addf %246, %247 : vector<8x192xf32>
    %c0_138 = arith.constant 0 : index
    %c0_139 = arith.constant 0 : index
    %249 = vector.load %arg36[%c0_138, %c0_139] : memref<192x128xbf16, #tpu.memory_space<vmem>>, vector<192x128xbf16>
    %c0_140 = arith.constant 0 : index
    %c0_141 = arith.constant 0 : index
    %250 = vector.load %arg37[%c0_140, %c0_141] : memref<1x128xf32, #tpu.memory_space<vmem>>, vector<1x128xf32>
    %251 = arith.truncf %248 : vector<8x192xf32> to vector<8x192xbf16>
    %cst_142 = arith.constant dense<0.000000e+00> : vector<8x128xf32>
    %252 = tpu.matmul %251, %249, %cst_142 {dimension_numbers = #tpu.dot_dimension_numbers<[1], [0], [0], [1], [0, 0, 1, 1], [], []>} : vector<8x192xbf16>, vector<192x128xbf16>, vector<8x128xf32> -> vector<8x128xf32>
    %253 = vector.broadcast %250 : vector<1x128xf32> to vector<8x128xf32>
    %254 = arith.addf %252, %253 : vector<8x128xf32>
    %c0_143 = arith.constant 0 : index
    %c0_144 = arith.constant 0 : index
    %255 = vector.load %arg38[%c0_143, %c0_144] : memref<1x128xf32, #tpu.memory_space<vmem>>, vector<1x128xf32>
    %c0_145 = arith.constant 0 : index
    %c0_146 = arith.constant 0 : index
    %256 = vector.load %arg39[%c0_145, %c0_146] : memref<1x128xf32, #tpu.memory_space<vmem>>, vector<1x128xf32>
    %c0_147 = arith.constant 0 : index
    %c0_148 = arith.constant 0 : index
    %c0_149 = arith.constant 0 : index
    %257 = vector.load %arg40[%c0_147, %c0_148, %c0_149] : memref<4x32x128xbf16, #tpu.memory_space<vmem>>, vector<4x32x128xbf16>
    %c0_150 = arith.constant 0 : index
    %c0_151 = arith.constant 0 : index
    %c0_152 = arith.constant 0 : index
    %258 = vector.load %arg41[%c0_150, %c0_151, %c0_152] : memref<4x32x128xbf16, #tpu.memory_space<vmem>>, vector<4x32x128xbf16>
    %c0_153 = arith.constant 0 : index
    %c0_154 = arith.constant 0 : index
    %c0_155 = arith.constant 0 : index
    %259 = vector.load %arg42[%c0_153, %c0_154, %c0_155] : memref<4x32x128xbf16, #tpu.memory_space<vmem>>, vector<4x32x128xbf16>
    %c0_156 = arith.constant 0 : index
    %c0_157 = arith.constant 0 : index
    %c0_158 = arith.constant 0 : index
    %260 = vector.load %arg43[%c0_156, %c0_157, %c0_158] : memref<4x1x32xf32, #tpu.memory_space<vmem>>, vector<4x1x32xf32>
    %c0_159 = arith.constant 0 : index
    %c0_160 = arith.constant 0 : index
    %c0_161 = arith.constant 0 : index
    %261 = vector.load %arg44[%c0_159, %c0_160, %c0_161] : memref<4x1x32xf32, #tpu.memory_space<vmem>>, vector<4x1x32xf32>
    %c0_162 = arith.constant 0 : index
    %c0_163 = arith.constant 0 : index
    %c0_164 = arith.constant 0 : index
    %262 = vector.load %arg45[%c0_162, %c0_163, %c0_164] : memref<4x1x32xf32, #tpu.memory_space<vmem>>, vector<4x1x32xf32>
    %c0_165 = arith.constant 0 : index
    %c0_166 = arith.constant 0 : index
    %c0_167 = arith.constant 0 : index
    %263 = vector.load %arg46[%c0_165, %c0_166, %c0_167] : memref<4x32x128xbf16, #tpu.memory_space<vmem>>, vector<4x32x128xbf16>
    %c0_168 = arith.constant 0 : index
    %c0_169 = arith.constant 0 : index
    %264 = vector.load %arg47[%c0_168, %c0_169] : memref<1x128xf32, #tpu.memory_space<vmem>>, vector<1x128xf32>
    %c0_170 = arith.constant 0 : index
    %c0_171 = arith.constant 0 : index
    %265 = vector.load %arg48[%c0_170, %c0_171] : memref<1x128xf32, #tpu.memory_space<vmem>>, vector<1x128xf32>
    %c0_172 = arith.constant 0 : index
    %c0_173 = arith.constant 0 : index
    %266 = vector.load %arg49[%c0_172, %c0_173] : memref<1x128xf32, #tpu.memory_space<vmem>>, vector<1x128xf32>
    %c0_174 = arith.constant 0 : index
    %c0_175 = arith.constant 0 : index
    %267 = vector.load %arg50[%c0_174, %c0_175] : memref<128x512xbf16, #tpu.memory_space<vmem>>, vector<128x512xbf16>
    %c0_176 = arith.constant 0 : index
    %c0_177 = arith.constant 0 : index
    %268 = vector.load %arg51[%c0_176, %c0_177] : memref<1x512xf32, #tpu.memory_space<vmem>>, vector<1x512xf32>
    %c0_178 = arith.constant 0 : index
    %c0_179 = arith.constant 0 : index
    %269 = vector.load %arg52[%c0_178, %c0_179] : memref<512x128xbf16, #tpu.memory_space<vmem>>, vector<512x128xbf16>
    %c0_180 = arith.constant 0 : index
    %c0_181 = arith.constant 0 : index
    %270 = vector.load %arg53[%c0_180, %c0_181] : memref<1x128xf32, #tpu.memory_space<vmem>>, vector<1x128xf32>
    %cst_182 = arith.constant dense<0.000000e+00> : vector<8xf32>
    %271 = vector.multi_reduction <add>, %254, %cst_182 [1] : vector<8x128xf32> to vector<8xf32>
    %272 = vector.shape_cast %271 : vector<8xf32> to vector<8x1xf32>
    %cst_183 = arith.constant 1.280000e+02 : f32
    %273 = vector.broadcast %cst_183 : f32 to vector<8x1xf32>
    %274 = arith.divf %272, %273 : vector<8x1xf32>
    %275 = vector.broadcast %274 : vector<8x1xf32> to vector<8x128xf32>
    %276 = arith.subf %254, %275 : vector<8x128xf32>
    %277 = arith.mulf %276, %276 : vector<8x128xf32>
    %cst_184 = arith.constant dense<0.000000e+00> : vector<8xf32>
    %278 = vector.multi_reduction <add>, %277, %cst_184 [1] : vector<8x128xf32> to vector<8xf32>
    %279 = vector.shape_cast %278 : vector<8xf32> to vector<8x1xf32>
    %cst_185 = arith.constant 1.280000e+02 : f32
    %280 = vector.broadcast %cst_185 : f32 to vector<8x1xf32>
    %281 = arith.divf %279, %280 : vector<8x1xf32>
    %cst_186 = arith.constant 9.99999974E-6 : f32
    %282 = vector.broadcast %cst_186 : f32 to vector<8x1xf32>
    %283 = arith.addf %281, %282 : vector<8x1xf32>
    %284 = math.rsqrt %283 : vector<8x1xf32>
    %285 = vector.broadcast %284 : vector<8x1xf32> to vector<8x128xf32>
    %286 = arith.mulf %276, %285 : vector<8x128xf32>
    %287 = vector.broadcast %255 : vector<1x128xf32> to vector<8x128xf32>
    %288 = arith.mulf %286, %287 : vector<8x128xf32>
    %289 = vector.broadcast %256 : vector<1x128xf32> to vector<8x128xf32>
    %290 = arith.addf %288, %289 : vector<8x128xf32>
    %291 = arith.truncf %290 : vector<8x128xf32> to vector<8x128xbf16>
    %292 = vector.shape_cast %291 : vector<8x128xbf16> to vector<1x8x128xbf16>
    %293 = vector.shape_cast %292 : vector<1x8x128xbf16> to vector<1x8x128xbf16>
    %294 = vector.broadcast %293 : vector<1x8x128xbf16> to vector<4x8x128xbf16>
    "tpu.trace_start"() <{level = 10 : i32, message = "hmc,hdc->hmd"}> : () -> ()
    %cst_187 = arith.constant dense<0.000000e+00> : vector<4x8x32xf32>
    %295 = tpu.matmul %294, %257, %cst_187 {dimension_numbers = #tpu.dot_dimension_numbers<[2], [2], [1], [1], [0, 0, 0, 1, 1, 1], [0], [0]>} : vector<4x8x128xbf16>, vector<4x32x128xbf16>, vector<4x8x32xf32> -> vector<4x8x32xf32>
    "tpu.trace_stop"() : () -> ()
    %296 = vector.broadcast %260 : vector<4x1x32xf32> to vector<4x8x32xf32>
    %297 = arith.addf %295, %296 : vector<4x8x32xf32>
    "tpu.trace_start"() <{level = 10 : i32, message = "hmc,hdc->hmd"}> : () -> ()
    %cst_188 = arith.constant dense<0.000000e+00> : vector<4x8x32xf32>
    %298 = tpu.matmul %294, %258, %cst_188 {dimension_numbers = #tpu.dot_dimension_numbers<[2], [2], [1], [1], [0, 0, 0, 1, 1, 1], [0], [0]>} : vector<4x8x128xbf16>, vector<4x32x128xbf16>, vector<4x8x32xf32> -> vector<4x8x32xf32>
    "tpu.trace_stop"() : () -> ()
    %299 = vector.broadcast %261 : vector<4x1x32xf32> to vector<4x8x32xf32>
    %300 = arith.addf %298, %299 : vector<4x8x32xf32>
    "tpu.trace_start"() <{level = 10 : i32, message = "hmc,hdc->hmd"}> : () -> ()
    %cst_189 = arith.constant dense<0.000000e+00> : vector<4x8x32xf32>
    %301 = tpu.matmul %294, %259, %cst_189 {dimension_numbers = #tpu.dot_dimension_numbers<[2], [2], [1], [1], [0, 0, 0, 1, 1, 1], [0], [0]>} : vector<4x8x128xbf16>, vector<4x32x128xbf16>, vector<4x8x32xf32> -> vector<4x8x32xf32>
    "tpu.trace_stop"() : () -> ()
    %302 = vector.broadcast %262 : vector<4x1x32xf32> to vector<4x8x32xf32>
    %303 = arith.addf %301, %302 : vector<4x8x32xf32>
    %304 = arith.truncf %297 : vector<4x8x32xf32> to vector<4x8x32xbf16>
    %305 = arith.truncf %300 : vector<4x8x32xf32> to vector<4x8x32xbf16>
    "tpu.trace_start"() <{level = 10 : i32, message = "hmd,hnd->hmn"}> : () -> ()
    %cst_190 = arith.constant dense<0.000000e+00> : vector<4x8x8xf32>
    %306 = tpu.matmul %304, %305, %cst_190 {dimension_numbers = #tpu.dot_dimension_numbers<[2], [2], [1], [1], [0, 0, 0, 1, 1, 1], [0], [0]>} : vector<4x8x32xbf16>, vector<4x8x32xbf16>, vector<4x8x8xf32> -> vector<4x8x8xf32>
    "tpu.trace_stop"() : () -> ()
    %cst_191 = arith.constant 1.250000e-01 : f32
    %307 = vector.broadcast %cst_191 : f32 to vector<4x8x8xf32>
    %308 = arith.mulf %306, %307 : vector<4x8x8xf32>
    %309 = vector.shape_cast %9 : vector<8x8xf32> to vector<1x8x8xf32>
    %310 = vector.broadcast %309 : vector<1x8x8xf32> to vector<4x8x8xf32>
    %311 = arith.addf %308, %310 : vector<4x8x8xf32>
    %cst_192 = arith.constant dense<0xFF800000> : vector<4x8xf32>
    %312 = vector.multi_reduction <maximumf>, %311, %cst_192 [2] : vector<4x8x8xf32> to vector<4x8xf32>
    %313 = vector.shape_cast %312 : vector<4x8xf32> to vector<4x8x1xf32>
    %314 = vector.broadcast %313 : vector<4x8x1xf32> to vector<4x8x8xf32>
    %315 = arith.subf %311, %314 : vector<4x8x8xf32>
    %316 = math.exp %315 : vector<4x8x8xf32>
    %cst_193 = arith.constant dense<0.000000e+00> : vector<4x8xf32>
    %317 = vector.multi_reduction <add>, %316, %cst_193 [2] : vector<4x8x8xf32> to vector<4x8xf32>
    %318 = vector.shape_cast %317 : vector<4x8xf32> to vector<4x8x1xf32>
    %319 = tpu.reciprocal %318 {approx = true} : vector<4x8x1xf32> -> vector<4x8x1xf32>
    %320 = arith.truncf %316 : vector<4x8x8xf32> to vector<4x8x8xbf16>
    %321 = arith.truncf %303 : vector<4x8x32xf32> to vector<4x8x32xbf16>
    "tpu.trace_start"() <{level = 10 : i32, message = "hmn,hnd->hmd"}> : () -> ()
    %cst_194 = arith.constant dense<0.000000e+00> : vector<4x8x32xf32>
    %322 = tpu.matmul %320, %321, %cst_194 {dimension_numbers = #tpu.dot_dimension_numbers<[2], [1], [1], [2], [0, 0, 0, 1, 1, 2], [0], [0]>} : vector<4x8x8xbf16>, vector<4x8x32xbf16>, vector<4x8x32xf32> -> vector<4x8x32xf32>
    "tpu.trace_stop"() : () -> ()
    %323 = vector.broadcast %319 : vector<4x8x1xf32> to vector<4x8x32xf32>
    %324 = arith.mulf %322, %323 : vector<4x8x32xf32>
    %325 = arith.truncf %324 : vector<4x8x32xf32> to vector<4x8x32xbf16>
    "tpu.trace_start"() <{level = 10 : i32, message = "hmd,hdc->hmc"}> : () -> ()
    %cst_195 = arith.constant dense<0.000000e+00> : vector<4x8x128xf32>
    %326 = tpu.matmul %325, %263, %cst_195 {dimension_numbers = #tpu.dot_dimension_numbers<[2], [1], [1], [2], [0, 0, 0, 1, 1, 2], [0], [0]>} : vector<4x8x32xbf16>, vector<4x32x128xbf16>, vector<4x8x128xf32> -> vector<4x8x128xf32>
    "tpu.trace_stop"() : () -> ()
    %cst_196 = arith.constant dense<0.000000e+00> : vector<8x128xf32>
    %327 = vector.multi_reduction <add>, %326, %cst_196 [0] : vector<4x8x128xf32> to vector<8x128xf32>
    %328 = arith.addf %254, %327 : vector<8x128xf32>
    %329 = vector.broadcast %264 : vector<1x128xf32> to vector<8x128xf32>
    %330 = arith.addf %328, %329 : vector<8x128xf32>
    %cst_197 = arith.constant dense<0.000000e+00> : vector<8xf32>
    %331 = vector.multi_reduction <add>, %330, %cst_197 [1] : vector<8x128xf32> to vector<8xf32>
    %332 = vector.shape_cast %331 : vector<8xf32> to vector<8x1xf32>
    %cst_198 = arith.constant 1.280000e+02 : f32
    %333 = vector.broadcast %cst_198 : f32 to vector<8x1xf32>
    %334 = arith.divf %332, %333 : vector<8x1xf32>
    %335 = vector.broadcast %334 : vector<8x1xf32> to vector<8x128xf32>
    %336 = arith.subf %330, %335 : vector<8x128xf32>
    %337 = arith.mulf %336, %336 : vector<8x128xf32>
    %cst_199 = arith.constant dense<0.000000e+00> : vector<8xf32>
    %338 = vector.multi_reduction <add>, %337, %cst_199 [1] : vector<8x128xf32> to vector<8xf32>
    %339 = vector.shape_cast %338 : vector<8xf32> to vector<8x1xf32>
    %cst_200 = arith.constant 1.280000e+02 : f32
    %340 = vector.broadcast %cst_200 : f32 to vector<8x1xf32>
    %341 = arith.divf %339, %340 : vector<8x1xf32>
    %cst_201 = arith.constant 9.99999974E-6 : f32
    %342 = vector.broadcast %cst_201 : f32 to vector<8x1xf32>
    %343 = arith.addf %341, %342 : vector<8x1xf32>
    %344 = math.rsqrt %343 : vector<8x1xf32>
    %345 = vector.broadcast %344 : vector<8x1xf32> to vector<8x128xf32>
    %346 = arith.mulf %336, %345 : vector<8x128xf32>
    %347 = vector.broadcast %265 : vector<1x128xf32> to vector<8x128xf32>
    %348 = arith.mulf %346, %347 : vector<8x128xf32>
    %349 = vector.broadcast %266 : vector<1x128xf32> to vector<8x128xf32>
    %350 = arith.addf %348, %349 : vector<8x128xf32>
    %351 = arith.truncf %350 : vector<8x128xf32> to vector<8x128xbf16>
    %cst_202 = arith.constant dense<0.000000e+00> : vector<8x512xf32>
    %352 = tpu.matmul %351, %267, %cst_202 {dimension_numbers = #tpu.dot_dimension_numbers<[1], [0], [0], [1], [0, 0, 1, 1], [], []>} : vector<8x128xbf16>, vector<128x512xbf16>, vector<8x512xf32> -> vector<8x512xf32>
    %353 = vector.broadcast %268 : vector<1x512xf32> to vector<8x512xf32>
    %354 = arith.addf %352, %353 : vector<8x512xf32>
    %cst_203 = arith.constant 5.000000e-01 : f32
    %355 = vector.broadcast %cst_203 : f32 to vector<8x512xf32>
    %356 = arith.mulf %355, %354 : vector<8x512xf32>
    %cst_204 = arith.constant 4.471500e-02 : f32
    %357 = vector.broadcast %cst_204 : f32 to vector<8x512xf32>
    %358 = arith.mulf %357, %354 : vector<8x512xf32>
    %359 = arith.mulf %358, %354 : vector<8x512xf32>
    %360 = arith.mulf %359, %354 : vector<8x512xf32>
    %361 = arith.addf %354, %360 : vector<8x512xf32>
    %cst_205 = arith.constant 0.797884583 : f32
    %362 = vector.broadcast %cst_205 : f32 to vector<8x512xf32>
    %363 = arith.mulf %362, %361 : vector<8x512xf32>
    %364 = math.tanh %363 : vector<8x512xf32>
    %cst_206 = arith.constant 1.000000e+00 : f32
    %365 = vector.broadcast %cst_206 : f32 to vector<8x512xf32>
    %366 = arith.addf %365, %364 : vector<8x512xf32>
    %367 = arith.mulf %356, %366 : vector<8x512xf32>
    %368 = arith.truncf %367 : vector<8x512xf32> to vector<8x512xbf16>
    %cst_207 = arith.constant dense<0.000000e+00> : vector<8x128xf32>
    %369 = tpu.matmul %368, %269, %cst_207 {dimension_numbers = #tpu.dot_dimension_numbers<[1], [0], [0], [1], [0, 0, 1, 1], [], []>} : vector<8x512xbf16>, vector<512x128xbf16>, vector<8x128xf32> -> vector<8x128xf32>
    %370 = arith.addf %330, %369 : vector<8x128xf32>
    %371 = vector.broadcast %270 : vector<1x128xf32> to vector<8x128xf32>
    %372 = arith.addf %370, %371 : vector<8x128xf32>
    %c0_208 = arith.constant 0 : index
    %c0_209 = arith.constant 0 : index
    %373 = vector.load %arg54[%c0_208, %c0_209] : memref<1x128xf32, #tpu.memory_space<vmem>>, vector<1x128xf32>
    %c0_210 = arith.constant 0 : index
    %c0_211 = arith.constant 0 : index
    %374 = vector.load %arg55[%c0_210, %c0_211] : memref<1x128xf32, #tpu.memory_space<vmem>>, vector<1x128xf32>
    %c0_212 = arith.constant 0 : index
    %c0_213 = arith.constant 0 : index
    %c0_214 = arith.constant 0 : index
    %375 = vector.load %arg56[%c0_212, %c0_213, %c0_214] : memref<4x32x128xbf16, #tpu.memory_space<vmem>>, vector<4x32x128xbf16>
    %c0_215 = arith.constant 0 : index
    %c0_216 = arith.constant 0 : index
    %c0_217 = arith.constant 0 : index
    %376 = vector.load %arg57[%c0_215, %c0_216, %c0_217] : memref<4x32x128xbf16, #tpu.memory_space<vmem>>, vector<4x32x128xbf16>
    %c0_218 = arith.constant 0 : index
    %c0_219 = arith.constant 0 : index
    %c0_220 = arith.constant 0 : index
    %377 = vector.load %arg58[%c0_218, %c0_219, %c0_220] : memref<4x32x128xbf16, #tpu.memory_space<vmem>>, vector<4x32x128xbf16>
    %c0_221 = arith.constant 0 : index
    %c0_222 = arith.constant 0 : index
    %c0_223 = arith.constant 0 : index
    %378 = vector.load %arg59[%c0_221, %c0_222, %c0_223] : memref<4x1x32xf32, #tpu.memory_space<vmem>>, vector<4x1x32xf32>
    %c0_224 = arith.constant 0 : index
    %c0_225 = arith.constant 0 : index
    %c0_226 = arith.constant 0 : index
    %379 = vector.load %arg60[%c0_224, %c0_225, %c0_226] : memref<4x1x32xf32, #tpu.memory_space<vmem>>, vector<4x1x32xf32>
    %c0_227 = arith.constant 0 : index
    %c0_228 = arith.constant 0 : index
    %c0_229 = arith.constant 0 : index
    %380 = vector.load %arg61[%c0_227, %c0_228, %c0_229] : memref<4x1x32xf32, #tpu.memory_space<vmem>>, vector<4x1x32xf32>
    %c0_230 = arith.constant 0 : index
    %c0_231 = arith.constant 0 : index
    %c0_232 = arith.constant 0 : index
    %381 = vector.load %arg62[%c0_230, %c0_231, %c0_232] : memref<4x32x128xbf16, #tpu.memory_space<vmem>>, vector<4x32x128xbf16>
    %c0_233 = arith.constant 0 : index
    %c0_234 = arith.constant 0 : index
    %382 = vector.load %arg63[%c0_233, %c0_234] : memref<1x128xf32, #tpu.memory_space<vmem>>, vector<1x128xf32>
    %c0_235 = arith.constant 0 : index
    %c0_236 = arith.constant 0 : index
    %383 = vector.load %arg64[%c0_235, %c0_236] : memref<1x128xf32, #tpu.memory_space<vmem>>, vector<1x128xf32>
    %c0_237 = arith.constant 0 : index
    %c0_238 = arith.constant 0 : index
    %384 = vector.load %arg65[%c0_237, %c0_238] : memref<1x128xf32, #tpu.memory_space<vmem>>, vector<1x128xf32>
    %c0_239 = arith.constant 0 : index
    %c0_240 = arith.constant 0 : index
    %385 = vector.load %arg66[%c0_239, %c0_240] : memref<128x512xbf16, #tpu.memory_space<vmem>>, vector<128x512xbf16>
    %c0_241 = arith.constant 0 : index
    %c0_242 = arith.constant 0 : index
    %386 = vector.load %arg67[%c0_241, %c0_242] : memref<1x512xf32, #tpu.memory_space<vmem>>, vector<1x512xf32>
    %c0_243 = arith.constant 0 : index
    %c0_244 = arith.constant 0 : index
    %387 = vector.load %arg68[%c0_243, %c0_244] : memref<512x128xbf16, #tpu.memory_space<vmem>>, vector<512x128xbf16>
    %c0_245 = arith.constant 0 : index
    %c0_246 = arith.constant 0 : index
    %388 = vector.load %arg69[%c0_245, %c0_246] : memref<1x128xf32, #tpu.memory_space<vmem>>, vector<1x128xf32>
    %cst_247 = arith.constant dense<0.000000e+00> : vector<8xf32>
    %389 = vector.multi_reduction <add>, %372, %cst_247 [1] : vector<8x128xf32> to vector<8xf32>
    %390 = vector.shape_cast %389 : vector<8xf32> to vector<8x1xf32>
    %cst_248 = arith.constant 1.280000e+02 : f32
    %391 = vector.broadcast %cst_248 : f32 to vector<8x1xf32>
    %392 = arith.divf %390, %391 : vector<8x1xf32>
    %393 = vector.broadcast %392 : vector<8x1xf32> to vector<8x128xf32>
    %394 = arith.subf %372, %393 : vector<8x128xf32>
    %395 = arith.mulf %394, %394 : vector<8x128xf32>
    %cst_249 = arith.constant dense<0.000000e+00> : vector<8xf32>
    %396 = vector.multi_reduction <add>, %395, %cst_249 [1] : vector<8x128xf32> to vector<8xf32>
    %397 = vector.shape_cast %396 : vector<8xf32> to vector<8x1xf32>
    %cst_250 = arith.constant 1.280000e+02 : f32
    %398 = vector.broadcast %cst_250 : f32 to vector<8x1xf32>
    %399 = arith.divf %397, %398 : vector<8x1xf32>
    %cst_251 = arith.constant 9.99999974E-6 : f32
    %400 = vector.broadcast %cst_251 : f32 to vector<8x1xf32>
    %401 = arith.addf %399, %400 : vector<8x1xf32>
    %402 = math.rsqrt %401 : vector<8x1xf32>
    %403 = vector.broadcast %402 : vector<8x1xf32> to vector<8x128xf32>
    %404 = arith.mulf %394, %403 : vector<8x128xf32>
    %405 = vector.broadcast %373 : vector<1x128xf32> to vector<8x128xf32>
    %406 = arith.mulf %404, %405 : vector<8x128xf32>
    %407 = vector.broadcast %374 : vector<1x128xf32> to vector<8x128xf32>
    %408 = arith.addf %406, %407 : vector<8x128xf32>
    %409 = arith.truncf %408 : vector<8x128xf32> to vector<8x128xbf16>
    %410 = vector.shape_cast %409 : vector<8x128xbf16> to vector<1x8x128xbf16>
    %411 = vector.shape_cast %410 : vector<1x8x128xbf16> to vector<1x8x128xbf16>
    %412 = vector.broadcast %411 : vector<1x8x128xbf16> to vector<4x8x128xbf16>
    "tpu.trace_start"() <{level = 10 : i32, message = "hmc,hdc->hmd"}> : () -> ()
    %cst_252 = arith.constant dense<0.000000e+00> : vector<4x8x32xf32>
    %413 = tpu.matmul %412, %375, %cst_252 {dimension_numbers = #tpu.dot_dimension_numbers<[2], [2], [1], [1], [0, 0, 0, 1, 1, 1], [0], [0]>} : vector<4x8x128xbf16>, vector<4x32x128xbf16>, vector<4x8x32xf32> -> vector<4x8x32xf32>
    "tpu.trace_stop"() : () -> ()
    %414 = vector.broadcast %378 : vector<4x1x32xf32> to vector<4x8x32xf32>
    %415 = arith.addf %413, %414 : vector<4x8x32xf32>
    "tpu.trace_start"() <{level = 10 : i32, message = "hmc,hdc->hmd"}> : () -> ()
    %cst_253 = arith.constant dense<0.000000e+00> : vector<4x8x32xf32>
    %416 = tpu.matmul %412, %376, %cst_253 {dimension_numbers = #tpu.dot_dimension_numbers<[2], [2], [1], [1], [0, 0, 0, 1, 1, 1], [0], [0]>} : vector<4x8x128xbf16>, vector<4x32x128xbf16>, vector<4x8x32xf32> -> vector<4x8x32xf32>
    "tpu.trace_stop"() : () -> ()
    %417 = vector.broadcast %379 : vector<4x1x32xf32> to vector<4x8x32xf32>
    %418 = arith.addf %416, %417 : vector<4x8x32xf32>
    "tpu.trace_start"() <{level = 10 : i32, message = "hmc,hdc->hmd"}> : () -> ()
    %cst_254 = arith.constant dense<0.000000e+00> : vector<4x8x32xf32>
    %419 = tpu.matmul %412, %377, %cst_254 {dimension_numbers = #tpu.dot_dimension_numbers<[2], [2], [1], [1], [0, 0, 0, 1, 1, 1], [0], [0]>} : vector<4x8x128xbf16>, vector<4x32x128xbf16>, vector<4x8x32xf32> -> vector<4x8x32xf32>
    "tpu.trace_stop"() : () -> ()
    %420 = vector.broadcast %380 : vector<4x1x32xf32> to vector<4x8x32xf32>
    %421 = arith.addf %419, %420 : vector<4x8x32xf32>
    %422 = arith.truncf %415 : vector<4x8x32xf32> to vector<4x8x32xbf16>
    %423 = arith.truncf %418 : vector<4x8x32xf32> to vector<4x8x32xbf16>
    "tpu.trace_start"() <{level = 10 : i32, message = "hmd,hnd->hmn"}> : () -> ()
    %cst_255 = arith.constant dense<0.000000e+00> : vector<4x8x8xf32>
    %424 = tpu.matmul %422, %423, %cst_255 {dimension_numbers = #tpu.dot_dimension_numbers<[2], [2], [1], [1], [0, 0, 0, 1, 1, 1], [0], [0]>} : vector<4x8x32xbf16>, vector<4x8x32xbf16>, vector<4x8x8xf32> -> vector<4x8x8xf32>
    "tpu.trace_stop"() : () -> ()
    %cst_256 = arith.constant 1.250000e-01 : f32
    %425 = vector.broadcast %cst_256 : f32 to vector<4x8x8xf32>
    %426 = arith.mulf %424, %425 : vector<4x8x8xf32>
    %427 = vector.shape_cast %9 : vector<8x8xf32> to vector<1x8x8xf32>
    %428 = vector.broadcast %427 : vector<1x8x8xf32> to vector<4x8x8xf32>
    %429 = arith.addf %426, %428 : vector<4x8x8xf32>
    %cst_257 = arith.constant dense<0xFF800000> : vector<4x8xf32>
    %430 = vector.multi_reduction <maximumf>, %429, %cst_257 [2] : vector<4x8x8xf32> to vector<4x8xf32>
    %431 = vector.shape_cast %430 : vector<4x8xf32> to vector<4x8x1xf32>
    %432 = vector.broadcast %431 : vector<4x8x1xf32> to vector<4x8x8xf32>
    %433 = arith.subf %429, %432 : vector<4x8x8xf32>
    %434 = math.exp %433 : vector<4x8x8xf32>
    %cst_258 = arith.constant dense<0.000000e+00> : vector<4x8xf32>
    %435 = vector.multi_reduction <add>, %434, %cst_258 [2] : vector<4x8x8xf32> to vector<4x8xf32>
    %436 = vector.shape_cast %435 : vector<4x8xf32> to vector<4x8x1xf32>
    %437 = tpu.reciprocal %436 {approx = true} : vector<4x8x1xf32> -> vector<4x8x1xf32>
    %438 = arith.truncf %434 : vector<4x8x8xf32> to vector<4x8x8xbf16>
    %439 = arith.truncf %421 : vector<4x8x32xf32> to vector<4x8x32xbf16>
    "tpu.trace_start"() <{level = 10 : i32, message = "hmn,hnd->hmd"}> : () -> ()
    %cst_259 = arith.constant dense<0.000000e+00> : vector<4x8x32xf32>
    %440 = tpu.matmul %438, %439, %cst_259 {dimension_numbers = #tpu.dot_dimension_numbers<[2], [1], [1], [2], [0, 0, 0, 1, 1, 2], [0], [0]>} : vector<4x8x8xbf16>, vector<4x8x32xbf16>, vector<4x8x32xf32> -> vector<4x8x32xf32>
    "tpu.trace_stop"() : () -> ()
    %441 = vector.broadcast %437 : vector<4x8x1xf32> to vector<4x8x32xf32>
    %442 = arith.mulf %440, %441 : vector<4x8x32xf32>
    %443 = arith.truncf %442 : vector<4x8x32xf32> to vector<4x8x32xbf16>
    "tpu.trace_start"() <{level = 10 : i32, message = "hmd,hdc->hmc"}> : () -> ()
    %cst_260 = arith.constant dense<0.000000e+00> : vector<4x8x128xf32>
    %444 = tpu.matmul %443, %381, %cst_260 {dimension_numbers = #tpu.dot_dimension_numbers<[2], [1], [1], [2], [0, 0, 0, 1, 1, 2], [0], [0]>} : vector<4x8x32xbf16>, vector<4x32x128xbf16>, vector<4x8x128xf32> -> vector<4x8x128xf32>
    "tpu.trace_stop"() : () -> ()
    %cst_261 = arith.constant dense<0.000000e+00> : vector<8x128xf32>
    %445 = vector.multi_reduction <add>, %444, %cst_261 [0] : vector<4x8x128xf32> to vector<8x128xf32>
    %446 = arith.addf %372, %445 : vector<8x128xf32>
    %447 = vector.broadcast %382 : vector<1x128xf32> to vector<8x128xf32>
    %448 = arith.addf %446, %447 : vector<8x128xf32>
    %cst_262 = arith.constant dense<0.000000e+00> : vector<8xf32>
    %449 = vector.multi_reduction <add>, %448, %cst_262 [1] : vector<8x128xf32> to vector<8xf32>
    %450 = vector.shape_cast %449 : vector<8xf32> to vector<8x1xf32>
    %cst_263 = arith.constant 1.280000e+02 : f32
    %451 = vector.broadcast %cst_263 : f32 to vector<8x1xf32>
    %452 = arith.divf %450, %451 : vector<8x1xf32>
    %453 = vector.broadcast %452 : vector<8x1xf32> to vector<8x128xf32>
    %454 = arith.subf %448, %453 : vector<8x128xf32>
    %455 = arith.mulf %454, %454 : vector<8x128xf32>
    %cst_264 = arith.constant dense<0.000000e+00> : vector<8xf32>
    %456 = vector.multi_reduction <add>, %455, %cst_264 [1] : vector<8x128xf32> to vector<8xf32>
    %457 = vector.shape_cast %456 : vector<8xf32> to vector<8x1xf32>
    %cst_265 = arith.constant 1.280000e+02 : f32
    %458 = vector.broadcast %cst_265 : f32 to vector<8x1xf32>
    %459 = arith.divf %457, %458 : vector<8x1xf32>
    %cst_266 = arith.constant 9.99999974E-6 : f32
    %460 = vector.broadcast %cst_266 : f32 to vector<8x1xf32>
    %461 = arith.addf %459, %460 : vector<8x1xf32>
    %462 = math.rsqrt %461 : vector<8x1xf32>
    %463 = vector.broadcast %462 : vector<8x1xf32> to vector<8x128xf32>
    %464 = arith.mulf %454, %463 : vector<8x128xf32>
    %465 = vector.broadcast %383 : vector<1x128xf32> to vector<8x128xf32>
    %466 = arith.mulf %464, %465 : vector<8x128xf32>
    %467 = vector.broadcast %384 : vector<1x128xf32> to vector<8x128xf32>
    %468 = arith.addf %466, %467 : vector<8x128xf32>
    %469 = arith.truncf %468 : vector<8x128xf32> to vector<8x128xbf16>
    %cst_267 = arith.constant dense<0.000000e+00> : vector<8x512xf32>
    %470 = tpu.matmul %469, %385, %cst_267 {dimension_numbers = #tpu.dot_dimension_numbers<[1], [0], [0], [1], [0, 0, 1, 1], [], []>} : vector<8x128xbf16>, vector<128x512xbf16>, vector<8x512xf32> -> vector<8x512xf32>
    %471 = vector.broadcast %386 : vector<1x512xf32> to vector<8x512xf32>
    %472 = arith.addf %470, %471 : vector<8x512xf32>
    %cst_268 = arith.constant 5.000000e-01 : f32
    %473 = vector.broadcast %cst_268 : f32 to vector<8x512xf32>
    %474 = arith.mulf %473, %472 : vector<8x512xf32>
    %cst_269 = arith.constant 4.471500e-02 : f32
    %475 = vector.broadcast %cst_269 : f32 to vector<8x512xf32>
    %476 = arith.mulf %475, %472 : vector<8x512xf32>
    %477 = arith.mulf %476, %472 : vector<8x512xf32>
    %478 = arith.mulf %477, %472 : vector<8x512xf32>
    %479 = arith.addf %472, %478 : vector<8x512xf32>
    %cst_270 = arith.constant 0.797884583 : f32
    %480 = vector.broadcast %cst_270 : f32 to vector<8x512xf32>
    %481 = arith.mulf %480, %479 : vector<8x512xf32>
    %482 = math.tanh %481 : vector<8x512xf32>
    %cst_271 = arith.constant 1.000000e+00 : f32
    %483 = vector.broadcast %cst_271 : f32 to vector<8x512xf32>
    %484 = arith.addf %483, %482 : vector<8x512xf32>
    %485 = arith.mulf %474, %484 : vector<8x512xf32>
    %486 = arith.truncf %485 : vector<8x512xf32> to vector<8x512xbf16>
    %cst_272 = arith.constant dense<0.000000e+00> : vector<8x128xf32>
    %487 = tpu.matmul %486, %387, %cst_272 {dimension_numbers = #tpu.dot_dimension_numbers<[1], [0], [0], [1], [0, 0, 1, 1], [], []>} : vector<8x512xbf16>, vector<512x128xbf16>, vector<8x128xf32> -> vector<8x128xf32>
    %488 = arith.addf %448, %487 : vector<8x128xf32>
    %489 = vector.broadcast %388 : vector<1x128xf32> to vector<8x128xf32>
    %490 = arith.addf %488, %489 : vector<8x128xf32>
    %c0_273 = arith.constant 0 : index
    %c0_274 = arith.constant 0 : index
    %491 = vector.load %arg70[%c0_273, %c0_274] : memref<128x128xbf16, #tpu.memory_space<vmem>>, vector<128x128xbf16>
    %c0_275 = arith.constant 0 : index
    %c0_276 = arith.constant 0 : index
    %492 = vector.load %arg71[%c0_275, %c0_276] : memref<1x128xf32, #tpu.memory_space<vmem>>, vector<1x128xf32>
    %493 = arith.truncf %490 : vector<8x128xf32> to vector<8x128xbf16>
    %cst_277 = arith.constant dense<0.000000e+00> : vector<8x128xf32>
    %494 = tpu.matmul %493, %491, %cst_277 {dimension_numbers = #tpu.dot_dimension_numbers<[1], [0], [0], [1], [0, 0, 1, 1], [], []>} : vector<8x128xbf16>, vector<128x128xbf16>, vector<8x128xf32> -> vector<8x128xf32>
    %495 = vector.broadcast %492 : vector<1x128xf32> to vector<8x128xf32>
    %496 = arith.addf %494, %495 : vector<8x128xf32>
    %c0_278 = arith.constant 0 : index
    %c0_279 = arith.constant 0 : index
    %c0_280 = arith.constant 0 : index
    %497 = vector.load %arg72[%c0_278, %c0_279, %c0_280] : memref<1x8x128xf32, #tpu.memory_space<vmem>>, vector<1x8x128xf32>
    %498 = vector.shape_cast %497 : vector<1x8x128xf32> to vector<8x128xf32>
    %499 = vector.shape_cast %496 : vector<8x128xf32> to vector<1x8x128xf32>
    tpu.vector_store %arg72[%c0_278, %c0_279, %c0_280], %499 {strides = array<i32>} : memref<1x8x128xf32, #tpu.memory_space<vmem>>, vector<1x8x128xf32>,
    return
  }
  func.func @transform_0(%arg0: i32) -> (i32, i32, i32) {
    %c0_i32 = arith.constant 0 : i32
    %c0_i32_0 = arith.constant 0 : i32
    %c0_i32_1 = arith.constant 0 : i32
    return %arg0, %c0_i32, %c0_i32_0 : i32, i32, i32
  }
  func.func @transform_1(%arg0: i32) -> (i32, i32) {
    %c0_i32 = arith.constant 0 : i32
    %c0_i32_0 = arith.constant 0 : i32
    %c0_i32_1 = arith.constant 0 : i32
    return %c0_i32, %c0_i32_0 : i32, i32
  }
  func.func @transform_2(%arg0: i32) -> (i32, i32) {
    %c0_i32 = arith.constant 0 : i32
    %c0_i32_0 = arith.constant 0 : i32
    %c0_i32_1 = arith.constant 0 : i32
    return %c0_i32, %c0_i32_0 : i32, i32
  }
  func.func @transform_3(%arg0: i32) -> (i32, i32) {
    %c0_i32 = arith.constant 0 : i32
    %c0_i32_0 = arith.constant 0 : i32
    %c0_i32_1 = arith.constant 0 : i32
    return %c0_i32, %c0_i32_0 : i32, i32
  }
  func.func @transform_4(%arg0: i32) -> (i32, i32) {
    %c0_i32 = arith.constant 0 : i32
    %c0_i32_0 = arith.constant 0 : i32
    %c0_i32_1 = arith.constant 0 : i32
    return %c0_i32, %c0_i32_0 : i32, i32
  }
  func.func @transform_5(%arg0: i32) -> (i32, i32, i32) {
    %c0_i32 = arith.constant 0 : i32
    %c0_i32_0 = arith.constant 0 : i32
    %c0_i32_1 = arith.constant 0 : i32
    %c0_i32_2 = arith.constant 0 : i32
    return %c0_i32, %c0_i32_0, %c0_i32_1 : i32, i32, i32
  }
  func.func @transform_6(%arg0: i32) -> (i32, i32, i32) {
    %c0_i32 = arith.constant 0 : i32
    %c0_i32_0 = arith.constant 0 : i32
    %c0_i32_1 = arith.constant 0 : i32
    %c0_i32_2 = arith.constant 0 : i32
    return %c0_i32, %c0_i32_0, %c0_i32_1 : i32, i32, i32
  }
  func.func @transform_7(%arg0: i32) -> (i32, i32, i32) {
    %c0_i32 = arith.constant 0 : i32
    %c0_i32_0 = arith.constant 0 : i32
    %c0_i32_1 = arith.constant 0 : i32
    %c0_i32_2 = arith.constant 0 : i32
    return %c0_i32, %c0_i32_0, %c0_i32_1 : i32, i32, i32
  }
  func.func @transform_8(%arg0: i32) -> (i32, i32, i32) {
    %c0_i32 = arith.constant 0 : i32
    %c0_i32_0 = arith.constant 0 : i32
    %c0_i32_1 = arith.constant 0 : i32
    %c0_i32_2 = arith.constant 0 : i32
    return %c0_i32, %c0_i32_0, %c0_i32_1 : i32, i32, i32
  }
  func.func @transform_9(%arg0: i32) -> (i32, i32, i32) {
    %c0_i32 = arith.constant 0 : i32
    %c0_i32_0 = arith.constant 0 : i32
    %c0_i32_1 = arith.constant 0 : i32
    %c0_i32_2 = arith.constant 0 : i32
    return %c0_i32, %c0_i32_0, %c0_i32_1 : i32, i32, i32
  }
  func.func @transform_10(%arg0: i32) -> (i32, i32, i32) {
    %c0_i32 = arith.constant 0 : i32
    %c0_i32_0 = arith.constant 0 : i32
    %c0_i32_1 = arith.constant 0 : i32
    %c0_i32_2 = arith.constant 0 : i32
    return %c0_i32, %c0_i32_0, %c0_i32_1 : i32, i32, i32
  }
  func.func @transform_11(%arg0: i32) -> (i32, i32, i32) {
    %c0_i32 = arith.constant 0 : i32
    %c0_i32_0 = arith.constant 0 : i32
    %c0_i32_1 = arith.constant 0 : i32
    %c0_i32_2 = arith.constant 0 : i32
    return %c0_i32, %c0_i32_0, %c0_i32_1 : i32, i32, i32
  }
  func.func @transform_12(%arg0: i32) -> (i32, i32) {
    %c0_i32 = arith.constant 0 : i32
    %c0_i32_0 = arith.constant 0 : i32
    %c0_i32_1 = arith.constant 0 : i32
    return %c0_i32, %c0_i32_0 : i32, i32
  }
  func.func @transform_13(%arg0: i32) -> (i32, i32) {
    %c0_i32 = arith.constant 0 : i32
    %c0_i32_0 = arith.constant 0 : i32
    %c0_i32_1 = arith.constant 0 : i32
    return %c0_i32, %c0_i32_0 : i32, i32
  }
  func.func @transform_14(%arg0: i32) -> (i32, i32) {
    %c0_i32 = arith.constant 0 : i32
    %c0_i32_0 = arith.constant 0 : i32
    %c0_i32_1 = arith.constant 0 : i32
    return %c0_i32, %c0_i32_0 : i32, i32
  }
  func.func @transform_15(%arg0: i32) -> (i32, i32) {
    %c0_i32 = arith.constant 0 : i32
    %c0_i32_0 = arith.constant 0 : i32
    %c0_i32_1 = arith.constant 0 : i32
    return %c0_i32, %c0_i32_0 : i32, i32
  }
  func.func @transform_16(%arg0: i32) -> (i32, i32) {
    %c0_i32 = arith.constant 0 : i32
    %c0_i32_0 = arith.constant 0 : i32
    %c0_i32_1 = arith.constant 0 : i32
    return %c0_i32, %c0_i32_0 : i32, i32
  }
  func.func @transform_17(%arg0: i32) -> (i32, i32) {
    %c0_i32 = arith.constant 0 : i32
    %c0_i32_0 = arith.constant 0 : i32
    %c0_i32_1 = arith.constant 0 : i32
    return %c0_i32, %c0_i32_0 : i32, i32
  }
  func.func @transform_18(%arg0: i32) -> (i32, i32) {
    %c0_i32 = arith.constant 0 : i32
    %c0_i32_0 = arith.constant 0 : i32
    %c0_i32_1 = arith.constant 0 : i32
    return %c0_i32, %c0_i32_0 : i32, i32
  }
  func.func @transform_19(%arg0: i32) -> (i32, i32) {
    %c0_i32 = arith.constant 0 : i32
    %c0_i32_0 = arith.constant 0 : i32
    %c0_i32_1 = arith.constant 0 : i32
    return %c0_i32, %c0_i32_0 : i32, i32
  }
  func.func @transform_20(%arg0: i32) -> (i32, i32) {
    %c0_i32 = arith.constant 0 : i32
    %c0_i32_0 = arith.constant 0 : i32
    %c0_i32_1 = arith.constant 0 : i32
    return %c0_i32, %c0_i32_0 : i32, i32
  }
  func.func @transform_21(%arg0: i32) -> (i32, i32, i32) {
    %c0_i32 = arith.constant 0 : i32
    %c0_i32_0 = arith.constant 0 : i32
    %c0_i32_1 = arith.constant 0 : i32
    %c0_i32_2 = arith.constant 0 : i32
    return %c0_i32, %c0_i32_0, %c0_i32_1 : i32, i32, i32
  }
  func.func @transform_22(%arg0: i32) -> (i32, i32, i32) {
    %c0_i32 = arith.constant 0 : i32
    %c0_i32_0 = arith.constant 0 : i32
    %c0_i32_1 = arith.constant 0 : i32
    %c0_i32_2 = arith.constant 0 : i32
    return %c0_i32, %c0_i32_0, %c0_i32_1 : i32, i32, i32
  }
  func.func @transform_23(%arg0: i32) -> (i32, i32, i32) {
    %c0_i32 = arith.constant 0 : i32
    %c0_i32_0 = arith.constant 0 : i32
    %c0_i32_1 = arith.constant 0 : i32
    %c0_i32_2 = arith.constant 0 : i32
    return %c0_i32, %c0_i32_0, %c0_i32_1 : i32, i32, i32
  }
  func.func @transform_24(%arg0: i32) -> (i32, i32, i32) {
    %c0_i32 = arith.constant 0 : i32
    %c0_i32_0 = arith.constant 0 : i32
    %c0_i32_1 = arith.constant 0 : i32
    %c0_i32_2 = arith.constant 0 : i32
    return %c0_i32, %c0_i32_0, %c0_i32_1 : i32, i32, i32
  }
  func.func @transform_25(%arg0: i32) -> (i32, i32, i32) {
    %c0_i32 = arith.constant 0 : i32
    %c0_i32_0 = arith.constant 0 : i32
    %c0_i32_1 = arith.constant 0 : i32
    %c0_i32_2 = arith.constant 0 : i32
    return %c0_i32, %c0_i32_0, %c0_i32_1 : i32, i32, i32
  }
  func.func @transform_26(%arg0: i32) -> (i32, i32, i32) {
    %c0_i32 = arith.constant 0 : i32
    %c0_i32_0 = arith.constant 0 : i32
    %c0_i32_1 = arith.constant 0 : i32
    %c0_i32_2 = arith.constant 0 : i32
    return %c0_i32, %c0_i32_0, %c0_i32_1 : i32, i32, i32
  }
  func.func @transform_27(%arg0: i32) -> (i32, i32, i32) {
    %c0_i32 = arith.constant 0 : i32
    %c0_i32_0 = arith.constant 0 : i32
    %c0_i32_1 = arith.constant 0 : i32
    %c0_i32_2 = arith.constant 0 : i32
    return %c0_i32, %c0_i32_0, %c0_i32_1 : i32, i32, i32
  }
  func.func @transform_28(%arg0: i32) -> (i32, i32) {
    %c0_i32 = arith.constant 0 : i32
    %c0_i32_0 = arith.constant 0 : i32
    %c0_i32_1 = arith.constant 0 : i32
    return %c0_i32, %c0_i32_0 : i32, i32
  }
  func.func @transform_29(%arg0: i32) -> (i32, i32) {
    %c0_i32 = arith.constant 0 : i32
    %c0_i32_0 = arith.constant 0 : i32
    %c0_i32_1 = arith.constant 0 : i32
    return %c0_i32, %c0_i32_0 : i32, i32
  }
  func.func @transform_30(%arg0: i32) -> (i32, i32) {
    %c0_i32 = arith.constant 0 : i32
    %c0_i32_0 = arith.constant 0 : i32
    %c0_i32_1 = arith.constant 0 : i32
    return %c0_i32, %c0_i32_0 : i32, i32
  }
  func.func @transform_31(%arg0: i32) -> (i32, i32) {
    %c0_i32 = arith.constant 0 : i32
    %c0_i32_0 = arith.constant 0 : i32
    %c0_i32_1 = arith.constant 0 : i32
    return %c0_i32, %c0_i32_0 : i32, i32
  }
  func.func @transform_32(%arg0: i32) -> (i32, i32) {
    %c0_i32 = arith.constant 0 : i32
    %c0_i32_0 = arith.constant 0 : i32
    %c0_i32_1 = arith.constant 0 : i32
    return %c0_i32, %c0_i32_0 : i32, i32
  }
  func.func @transform_33(%arg0: i32) -> (i32, i32) {
    %c0_i32 = arith.constant 0 : i32
    %c0_i32_0 = arith.constant 0 : i32
    %c0_i32_1 = arith.constant 0 : i32
    return %c0_i32, %c0_i32_0 : i32, i32
  }
  func.func @transform_34(%arg0: i32) -> (i32, i32) {
    %c0_i32 = arith.constant 0 : i32
    %c0_i32_0 = arith.constant 0 : i32
    %c0_i32_1 = arith.constant 0 : i32
    return %c0_i32, %c0_i32_0 : i32, i32
  }
  func.func @transform_35(%arg0: i32) -> (i32, i32) {
    %c0_i32 = arith.constant 0 : i32
    %c0_i32_0 = arith.constant 0 : i32
    %c0_i32_1 = arith.constant 0 : i32
    return %c0_i32, %c0_i32_0 : i32, i32
  }
  func.func @transform_36(%arg0: i32) -> (i32, i32) {
    %c0_i32 = arith.constant 0 : i32
    %c0_i32_0 = arith.constant 0 : i32
    %c0_i32_1 = arith.constant 0 : i32
    return %c0_i32, %c0_i32_0 : i32, i32
  }
  func.func @transform_37(%arg0: i32) -> (i32, i32) {
    %c0_i32 = arith.constant 0 : i32
    %c0_i32_0 = arith.constant 0 : i32
    %c0_i32_1 = arith.constant 0 : i32
    return %c0_i32, %c0_i32_0 : i32, i32
  }
  func.func @transform_38(%arg0: i32) -> (i32, i32) {
    %c0_i32 = arith.constant 0 : i32
    %c0_i32_0 = arith.constant 0 : i32
    %c0_i32_1 = arith.constant 0 : i32
    return %c0_i32, %c0_i32_0 : i32, i32
  }
  func.func @transform_39(%arg0: i32) -> (i32, i32, i32) {
    %c0_i32 = arith.constant 0 : i32
    %c0_i32_0 = arith.constant 0 : i32
    %c0_i32_1 = arith.constant 0 : i32
    %c0_i32_2 = arith.constant 0 : i32
    return %c0_i32, %c0_i32_0, %c0_i32_1 : i32, i32, i32
  }
  func.func @transform_40(%arg0: i32) -> (i32, i32, i32) {
    %c0_i32 = arith.constant 0 : i32
    %c0_i32_0 = arith.constant 0 : i32
    %c0_i32_1 = arith.constant 0 : i32
    %c0_i32_2 = arith.constant 0 : i32
    return %c0_i32, %c0_i32_0, %c0_i32_1 : i32, i32, i32
  }
  func.func @transform_41(%arg0: i32) -> (i32, i32, i32) {
    %c0_i32 = arith.constant 0 : i32
    %c0_i32_0 = arith.constant 0 : i32
    %c0_i32_1 = arith.constant 0 : i32
    %c0_i32_2 = arith.constant 0 : i32
    return %c0_i32, %c0_i32_0, %c0_i32_1 : i32, i32, i32
  }
  func.func @transform_42(%arg0: i32) -> (i32, i32, i32) {
    %c0_i32 = arith.constant 0 : i32
    %c0_i32_0 = arith.constant 0 : i32
    %c0_i32_1 = arith.constant 0 : i32
    %c0_i32_2 = arith.constant 0 : i32
    return %c0_i32, %c0_i32_0, %c0_i32_1 : i32, i32, i32
  }
  func.func @transform_43(%arg0: i32) -> (i32, i32, i32) {
    %c0_i32 = arith.constant 0 : i32
    %c0_i32_0 = arith.constant 0 : i32
    %c0_i32_1 = arith.constant 0 : i32
    %c0_i32_2 = arith.constant 0 : i32
    return %c0_i32, %c0_i32_0, %c0_i32_1 : i32, i32, i32
  }
  func.func @transform_44(%arg0: i32) -> (i32, i32, i32) {
    %c0_i32 = arith.constant 0 : i32
    %c0_i32_0 = arith.constant 0 : i32
    %c0_i32_1 = arith.constant 0 : i32
    %c0_i32_2 = arith.constant 0 : i32
    return %c0_i32, %c0_i32_0, %c0_i32_1 : i32, i32, i32
  }
  func.func @transform_45(%arg0: i32) -> (i32, i32, i32) {
    %c0_i32 = arith.constant 0 : i32
    %c0_i32_0 = arith.constant 0 : i32
    %c0_i32_1 = arith.constant 0 : i32
    %c0_i32_2 = arith.constant 0 : i32
    return %c0_i32, %c0_i32_0, %c0_i32_1 : i32, i32, i32
  }
  func.func @transform_46(%arg0: i32) -> (i32, i32) {
    %c0_i32 = arith.constant 0 : i32
    %c0_i32_0 = arith.constant 0 : i32
    %c0_i32_1 = arith.constant 0 : i32
    return %c0_i32, %c0_i32_0 : i32, i32
  }
  func.func @transform_47(%arg0: i32) -> (i32, i32) {
    %c0_i32 = arith.constant 0 : i32
    %c0_i32_0 = arith.constant 0 : i32
    %c0_i32_1 = arith.constant 0 : i32
    return %c0_i32, %c0_i32_0 : i32, i32
  }
  func.func @transform_48(%arg0: i32) -> (i32, i32) {
    %c0_i32 = arith.constant 0 : i32
    %c0_i32_0 = arith.constant 0 : i32
    %c0_i32_1 = arith.constant 0 : i32
    return %c0_i32, %c0_i32_0 : i32, i32
  }
  func.func @transform_49(%arg0: i32) -> (i32, i32) {
    %c0_i32 = arith.constant 0 : i32
    %c0_i32_0 = arith.constant 0 : i32
    %c0_i32_1 = arith.constant 0 : i32
    return %c0_i32, %c0_i32_0 : i32, i32
  }
  func.func @transform_50(%arg0: i32) -> (i32, i32) {
    %c0_i32 = arith.constant 0 : i32
    %c0_i32_0 = arith.constant 0 : i32
    %c0_i32_1 = arith.constant 0 : i32
    return %c0_i32, %c0_i32_0 : i32, i32
  }
  func.func @transform_51(%arg0: i32) -> (i32, i32) {
    %c0_i32 = arith.constant 0 : i32
    %c0_i32_0 = arith.constant 0 : i32
    %c0_i32_1 = arith.constant 0 : i32
    return %c0_i32, %c0_i32_0 : i32, i32
  }
  func.func @transform_52(%arg0: i32) -> (i32, i32) {
    %c0_i32 = arith.constant 0 : i32
    %c0_i32_0 = arith.constant 0 : i32
    %c0_i32_1 = arith.constant 0 : i32
    return %c0_i32, %c0_i32_0 : i32, i32
  }
  func.func @transform_53(%arg0: i32) -> (i32, i32) {
    %c0_i32 = arith.constant 0 : i32
    %c0_i32_0 = arith.constant 0 : i32
    %c0_i32_1 = arith.constant 0 : i32
    return %c0_i32, %c0_i32_0 : i32, i32
  }
  func.func @transform_54(%arg0: i32) -> (i32, i32) {
    %c0_i32 = arith.constant 0 : i32
    %c0_i32_0 = arith.constant 0 : i32
    %c0_i32_1 = arith.constant 0 : i32
    return %c0_i32, %c0_i32_0 : i32, i32
  }
  func.func @transform_55(%arg0: i32) -> (i32, i32, i32) {
    %c0_i32 = arith.constant 0 : i32
    %c0_i32_0 = arith.constant 0 : i32
    %c0_i32_1 = arith.constant 0 : i32
    %c0_i32_2 = arith.constant 0 : i32
    return %c0_i32, %c0_i32_0, %c0_i32_1 : i32, i32, i32
  }
  func.func @transform_56(%arg0: i32) -> (i32, i32, i32) {
    %c0_i32 = arith.constant 0 : i32
    %c0_i32_0 = arith.constant 0 : i32
    %c0_i32_1 = arith.constant 0 : i32
    %c0_i32_2 = arith.constant 0 : i32
    return %c0_i32, %c0_i32_0, %c0_i32_1 : i32, i32, i32
  }
  func.func @transform_57(%arg0: i32) -> (i32, i32, i32) {
    %c0_i32 = arith.constant 0 : i32
    %c0_i32_0 = arith.constant 0 : i32
    %c0_i32_1 = arith.constant 0 : i32
    %c0_i32_2 = arith.constant 0 : i32
    return %c0_i32, %c0_i32_0, %c0_i32_1 : i32, i32, i32
  }
  func.func @transform_58(%arg0: i32) -> (i32, i32, i32) {
    %c0_i32 = arith.constant 0 : i32
    %c0_i32_0 = arith.constant 0 : i32
    %c0_i32_1 = arith.constant 0 : i32
    %c0_i32_2 = arith.constant 0 : i32
    return %c0_i32, %c0_i32_0, %c0_i32_1 : i32, i32, i32
  }
  func.func @transform_59(%arg0: i32) -> (i32, i32, i32) {
    %c0_i32 = arith.constant 0 : i32
    %c0_i32_0 = arith.constant 0 : i32
    %c0_i32_1 = arith.constant 0 : i32
    %c0_i32_2 = arith.constant 0 : i32
    return %c0_i32, %c0_i32_0, %c0_i32_1 : i32, i32, i32
  }
  func.func @transform_60(%arg0: i32) -> (i32, i32, i32) {
    %c0_i32 = arith.constant 0 : i32
    %c0_i32_0 = arith.constant 0 : i32
    %c0_i32_1 = arith.constant 0 : i32
    %c0_i32_2 = arith.constant 0 : i32
    return %c0_i32, %c0_i32_0, %c0_i32_1 : i32, i32, i32
  }
  func.func @transform_61(%arg0: i32) -> (i32, i32, i32) {
    %c0_i32 = arith.constant 0 : i32
    %c0_i32_0 = arith.constant 0 : i32
    %c0_i32_1 = arith.constant 0 : i32
    %c0_i32_2 = arith.constant 0 : i32
    return %c0_i32, %c0_i32_0, %c0_i32_1 : i32, i32, i32
  }
  func.func @transform_62(%arg0: i32) -> (i32, i32) {
    %c0_i32 = arith.constant 0 : i32
    %c0_i32_0 = arith.constant 0 : i32
    %c0_i32_1 = arith.constant 0 : i32
    return %c0_i32, %c0_i32_0 : i32, i32
  }
  func.func @transform_63(%arg0: i32) -> (i32, i32) {
    %c0_i32 = arith.constant 0 : i32
    %c0_i32_0 = arith.constant 0 : i32
    %c0_i32_1 = arith.constant 0 : i32
    return %c0_i32, %c0_i32_0 : i32, i32
  }
  func.func @transform_64(%arg0: i32) -> (i32, i32) {
    %c0_i32 = arith.constant 0 : i32
    %c0_i32_0 = arith.constant 0 : i32
    %c0_i32_1 = arith.constant 0 : i32
    return %c0_i32, %c0_i32_0 : i32, i32
  }
  func.func @transform_65(%arg0: i32) -> (i32, i32) {
    %c0_i32 = arith.constant 0 : i32
    %c0_i32_0 = arith.constant 0 : i32
    %c0_i32_1 = arith.constant 0 : i32
    return %c0_i32, %c0_i32_0 : i32, i32
  }
  func.func @transform_66(%arg0: i32) -> (i32, i32) {
    %c0_i32 = arith.constant 0 : i32
    %c0_i32_0 = arith.constant 0 : i32
    %c0_i32_1 = arith.constant 0 : i32
    return %c0_i32, %c0_i32_0 : i32, i32
  }
  func.func @transform_67(%arg0: i32) -> (i32, i32) {
    %c0_i32 = arith.constant 0 : i32
    %c0_i32_0 = arith.constant 0 : i32
    %c0_i32_1 = arith.constant 0 : i32
    return %c0_i32, %c0_i32_0 : i32, i32
  }
  func.func @transform_68(%arg0: i32) -> (i32, i32) {
    %c0_i32 = arith.constant 0 : i32
    %c0_i32_0 = arith.constant 0 : i32
    %c0_i32_1 = arith.constant 0 : i32
    return %c0_i32, %c0_i32_0 : i32, i32
  }
  func.func @transform_69(%arg0: i32) -> (i32, i32) {
    %c0_i32 = arith.constant 0 : i32
    %c0_i32_0 = arith.constant 0 : i32
    %c0_i32_1 = arith.constant 0 : i32
    return %c0_i32, %c0_i32_0 : i32, i32
  }
  func.func @transform_70(%arg0: i32) -> (i32, i32) {
    %c0_i32 = arith.constant 0 : i32
    %c0_i32_0 = arith.constant 0 : i32
    %c0_i32_1 = arith.constant 0 : i32
    return %c0_i32, %c0_i32_0 : i32, i32
  }
  func.func @transform_71(%arg0: i32) -> (i32, i32, i32) {
    %c0_i32 = arith.constant 0 : i32
    %c0_i32_0 = arith.constant 0 : i32
    %c0_i32_1 = arith.constant 0 : i32
    return %arg0, %c0_i32, %c0_i32_0 : i32, i32, i32
  }
}

</mosaic_0001>

<bundles_post_ra>
// kernel: dino_with_head_forward.1
= control target key start
LH: loop header
LB: loop body
LE: loop exit
PB: predicated region body
PF: predicated region fallthrough
CT: control target
= control target key end

     0   :  { %s24927_s6 = smov 1   ;;  %s24928_s10 = smov 2   ;;  %s27835_s0 = inlined_call_operand.smem [shape: u32[72], index: -1, kind: input, shape index: {}] }
   0x1   :  { %s25068_s5 = sld [smem:[%s27835_s0]]   ;;  %s24929_s14 = smov 3  }
   0x2   :  { %s25073_s9 = sld [smem:[%s27835_s0 + %s24927_s6]]   ;;  %s24930_s18 = smov 4  }
   0x3   :  { %s25078_s13 = sld [smem:[%s27835_s0 + %s24928_s10]]   ;;  %s24931_s22 = smov 5  }
   0x4   :  { %s25083_s17 = sld [smem:[%s27835_s0 + %s24929_s14]]   ;;  %s24932_s26 = smov 6  }
   0x5   :  { %s25088_s21 = sld [smem:[%s27835_s0 + %s24930_s18]]   ;;  %s24933_s30 = smov 7  }
   0x6   :  { %s25093_s25 = sld [smem:[%s27835_s0 + %s24931_s22]]   ;;  %s24934_s4 = smov 8  }
   0x7   :  { %27861 = sst [smem:[#allocation108_spill]] %s25068_s5  ;;  %s24935_s10 = smov 9  }
   0x8   :  { %27862 = sst [smem:[#allocation109_spill]] %s25073_s9  ;;  %s24936_s15 = smov 10  }
   0x9   :  { %27863 = sst [smem:[#allocation110_spill]] %s25078_s13  ;;  %s24937_s20 = smov 11  }
   0xa   :  { %s25098_s29 = sld [smem:[%s27835_s0 + %s24932_s26]]   ;;  %s24938_s26 = smov 12  }
   0xb   :  { %27864 = sst [smem:[#allocation111_spill]] %s25088_s21  ;;  %s24939_s1 = smov 13  }
   0xc   :  { %s25103_s3 = sld [smem:[%s27835_s0 + %s24933_s30]]   ;;  %s24940_s7 = smov 14  }
   0xd   :  { %s25108_s8 = sld [smem:[%s27835_s0 + %s24934_s4]]   ;;  %s24942_s22 = smov 16  }
   0xe   :  { %s25113_s14 = sld [smem:[%s27835_s0 + %s24935_s10]]   ;;  %s24943_s28 = smov 17  }
   0xf   :  { %s25118_s19 = sld [smem:[%s27835_s0 + %s24936_s15]]   ;;  %s24941_s15 = smov 15  }
  0x10   :  { %27865 = sst [smem:[#allocation112_spill]] %s25098_s29 }
  0x11   :  { %s25123_s24 = sld [smem:[%s27835_s0 + %s24937_s20]]  }
  0x12   :  { %27866 = sst [smem:[#allocation113_spill]] %s25103_s3 }
  0x13   :  { %27867 = sst [smem:[#allocation114_spill]] %s25108_s8 }
  0x14   :  { %27868 = sst [smem:[#allocation115_spill]] %s25113_s14 }
  0x15   :  { %s25128_s30 = sld [smem:[%s27835_s0 + %s24938_s26]]  }
  0x16   :  { %s25133_s6 = sld [smem:[%s27835_s0 + %s24939_s1]]  }
  0x17   :  { %27869 = sst [smem:[#allocation116_spill]] %s25123_s24 }
  0x18   :  { %s25138_s12 = sld [smem:[%s27835_s0 + %s24940_s7]]   ;;  %s24944_s7 = smov 18  }
  0x19   :  { %s25143_s20 = sld [smem:[%s27835_s0 + %s24941_s15]]   ;;  %s24945_s15 = smov 19  }
  0x1a   :  { %s25148_s27 = sld [smem:[%s27835_s0 + %s24942_s22]]   ;;  %s24946_s22 = smov 20  }
  0x1b   :  { %s25153_s4 = sld [smem:[%s27835_s0 + %s24943_s28]]   ;;  %s24947_s28 = smov 21  }
  0x1c   :  { %27870 = sst [smem:[#allocation117_spill]] %s25133_s6 }
  0x1d   :  { %s25158_s8 = sld [smem:[%s27835_s0 + %s24944_s7]]   ;;  %s24948_s7 = smov 22  }
  0x1e   :  { %s25168_s5 = sld [smem:[%s27835_s0 + %s24946_s22]]   ;;  %s24950_s22 = smov 24  }
  0x1f   :  { %27871 = sst [smem:[#allocation118_spill]] %s25143_s20 }
  0x20   :  { %27872 = sst [smem:[#allocation119_spill]] %s25148_s27 }
  0x21   :  { %27873 = sst [smem:[#allocation120_spill]] %s25153_s4 }
  0x22   :  { %s25163_s20 = sld [smem:[%s27835_s0 + %s24945_s15]]   ;;  %s24949_s15 = smov 23  }
  0x23   :  { %27874 = sst [smem:[#allocation121_spill]] %s25158_s8 }
  0x24   :  { %27876 = sst [smem:[#allocation123_spill]] %s25168_s5 }
  0x25   :  { %s25173_s4 = sld [smem:[%s27835_s0 + %s24947_s28]]   ;;  %s24951_s28 = smov 25  }
  0x26   :  { %s25178_s9 = sld [smem:[%s27835_s0 + %s24948_s7]]   ;;  %s24952_s7 = smov 26  }
  0x27   :  { %s25188_s27 = sld [smem:[%s27835_s0 + %s24950_s22]]   ;;  %s24954_s22 = smov 28  }
  0x28   :  { %27875 = sst [smem:[#allocation122_spill]] %s25163_s20 }
  0x29   :  { %s25183_s20 = sld [smem:[%s27835_s0 + %s24949_s15]]   ;;  %s24953_s15 = smov 27  }
  0x2a   :  { %s25198_s6 = sld [smem:[%s27835_s0 + %s24952_s7]]   ;;  %s24956_s7 = smov 30  }
  0x2b   :  { %27877 = sst [smem:[#allocation124_spill]] %s25173_s4 }
  0x2c   :  { %s25193_s4 = sld [smem:[%s27835_s0 + %s24951_s28]]   ;;  %s24955_s28 = smov 29  }
  0x2d   :  { %s25208_s24 = sld [smem:[%s27835_s0 + %s24954_s22]]   ;;  %s24958_s22 = smov 32  }
  0x2e   :  { %s25218_s14 = sld [smem:[%s27835_s0 + %s24956_s7]]   ;;  %s24960_s7 = smov 34  }
  0x2f   :  { %27878 = sst [smem:[#allocation125_spill]] %s25183_s20 }
  0x30   :  { %27880 = sst [smem:[#allocation127_spill]] %s25198_s6 }
  0x31   :  { %s25203_s20 = sld [smem:[%s27835_s0 + %s24953_s15]]   ;;  %s24957_s15 = smov 31  }
  0x32   :  { %27879 = sst [smem:[#allocation126_spill]] %s25193_s4 }
  0x33   :  { %s25213_s4 = sld [smem:[%s27835_s0 + %s24955_s28]]   ;;  %s24959_s28 = smov 33  }
  0x34   :  { %s25228_s29 = sld [smem:[%s27835_s0 + %s24958_s22]]   ;;  %s24962_s22 = smov 36  }
  0x35   :  { %s25238_s21 = sld [smem:[%s27835_s0 + %s24960_s7]]   ;;  %s24964_s7 = smov 38  }
  0x36   :  { %s25258_s13 = sld [smem:[%s27835_s0 + %s24964_s7]]   ;;  %s24968_s7 = smov 42  }
  0x37   :  { %27881 = sst [smem:[#allocation128_spill]] %s25203_s20 }
  0x38   :  { %s25223_s20 = sld [smem:[%s27835_s0 + %s24957_s15]]   ;;  %s24961_s15 = smov 35  }
  0x39   :  { %27882 = sst [smem:[#allocation129_spill]] %s25213_s4 }
  0x3a   :  { %27884 = sst [smem:[#allocation131_spill]] %s25228_s29 }
  0x3b   :  { %s25233_s4 = sld [smem:[%s27835_s0 + %s24959_s28]]   ;;  %s24963_s28 = smov 37  }
  0x3c   :  { %s25248_s29 = sld [smem:[%s27835_s0 + %s24962_s22]]   ;;  %s24966_s22 = smov 40  }
  0x3d   :  { %27889 = sst [smem:[#allocation136_spill]] %s25258_s13 }
  0x3e   :  { %27883 = sst [smem:[#allocation130_spill]] %s25223_s20 }
  0x3f   :  { %s25243_s20 = sld [smem:[%s27835_s0 + %s24961_s15]]   ;;  %s24965_s15 = smov 39  }
  0x40   :  { %s25278_s13 = sld [smem:[%s27835_s0 + %s24968_s7]]   ;;  %s24972_s7 = smov 46  }
  0x41   :  { %27885 = sst [smem:[#allocation132_spill]] %s25233_s4 }
  0x42   :  { %27887 = sst [smem:[#allocation134_spill]] %s25248_s29 }
  0x43   :  { %s25253_s4 = sld [smem:[%s27835_s0 + %s24963_s28]]   ;;  %s24967_s28 = smov 41  }
  0x44   :  { %s25268_s29 = sld [smem:[%s27835_s0 + %s24966_s22]]   ;;  %s24970_s22 = smov 44  }
  0x45   :  { %27886 = sst [smem:[#allocation133_spill]] %s25243_s20 }
  0x46   :  { %s25263_s20 = sld [smem:[%s27835_s0 + %s24965_s15]]   ;;  %s24969_s15 = smov 43  }
  0x47   :  { %27893 = sst [smem:[#allocation140_spill]] %s25278_s13 }
  0x48   :  { %s25298_s13 = sld [smem:[%s27835_s0 + %s24972_s7]]   ;;  %s24976_s7 = smov 50  }
  0x49   :  { %27888 = sst [smem:[#allocation135_spill]] %s25253_s4 }
  0x4a   :  { %27891 = sst [smem:[#allocation138_spill]] %s25268_s29 }
  0x4b   :  { %s25273_s4 = sld [smem:[%s27835_s0 + %s24967_s28]]   ;;  %s24971_s28 = smov 45  }
  0x4c   :  { %27890 = sst [smem:[#allocation137_spill]] %s25263_s20 }
  0x4d   :  { %s25283_s20 = sld [smem:[%s27835_s0 + %s24969_s15]]   ;;  %s24973_s15 = smov 47  }
  0x4e   :  { %s25288_s29 = sld [smem:[%s27835_s0 + %s24970_s22]]   ;;  %s24974_s22 = smov 48  }
  0x4f   :  { %27897 = sst [smem:[#allocation144_spill]] %s25298_s13 }
  0x50   :  { %s25318_s13 = sld [smem:[%s27835_s0 + %s24976_s7]]   ;;  %s24980_s7 = smov 54  }
  0x51   :  { %27892 = sst [smem:[#allocation139_spill]] %s25273_s4 }
  0x52   :  { %s25293_s4 = sld [smem:[%s27835_s0 + %s24971_s28]]   ;;  %s24975_s28 = smov 49  }
  0x53   :  { %27894 = sst [smem:[#allocation141_spill]] %s25283_s20 }
  0x54   :  { %27895 = sst [smem:[#allocation142_spill]] %s25288_s29 }
  0x55   :  { %s25303_s20 = sld [smem:[%s27835_s0 + %s24973_s15]]   ;;  %s24977_s15 = smov 51  }
  0x56   :  { %s25308_s29 = sld [smem:[%s27835_s0 + %s24974_s22]]   ;;  %s24978_s22 = smov 52  }
  0x57   :  { %27901 = sst [smem:[#allocation148_spill]] %s25318_s13 }
  0x58   :  { %27896 = sst [smem:[#allocation143_spill]] %s25293_s4 }
  0x59   :  { %s25313_s4 = sld [smem:[%s27835_s0 + %s24975_s28]]   ;;  %s24979_s28 = smov 53  }
  0x5a   :  { %s25338_s13 = sld [smem:[%s27835_s0 + %s24980_s7]]   ;;  %s24984_s7 = smov 58  }
  0x5b   :  { %27898 = sst [smem:[#allocation145_spill]] %s25303_s20 }
  0x5c   :  { %27899 = sst [smem:[#allocation146_spill]] %s25308_s29 }
  0x5d   :  { %s25323_s20 = sld [smem:[%s27835_s0 + %s24977_s15]]   ;;  %s24981_s15 = smov 55  }
  0x5e   :  { %s25328_s29 = sld [smem:[%s27835_s0 + %s24978_s22]]   ;;  %s24982_s22 = smov 56  }
  0x5f   :  { %27900 = sst [smem:[#allocation147_spill]] %s25313_s4 }
  0x60   :  { %s25333_s4 = sld [smem:[%s27835_s0 + %s24979_s28]]   ;;  %s24983_s28 = smov 57  }
  0x61   :  { %27905 = sst [smem:[#allocation152_spill]] %s25338_s13 }
  0x62   :  { %s25358_s13 = sld [smem:[%s27835_s0 + %s24984_s7]]   ;;  %s24988_s7 = smov 62  }
  0x63   :  { %27902 = sst [smem:[#allocation149_spill]] %s25323_s20 }
  0x64   :  { %27903 = sst [smem:[#allocation150_spill]] %s25328_s29 }
  0x65   :  { %s25343_s20 = sld [smem:[%s27835_s0 + %s24981_s15]]   ;;  %s24985_s15 = smov 59  }
  0x66   :  { %27904 = sst [smem:[#allocation151_spill]] %s25333_s4 }
  0x67   :  { %s25348_s29 = sld [smem:[%s27835_s0 + %s24982_s22]]   ;;  %s24986_s22 = smov 60  }
  0x68   :  { %s25353_s4 = sld [smem:[%s27835_s0 + %s24983_s28]]   ;;  %s24987_s28 = smov 61  }
  0x69   :  { %27909 = sst [smem:[#allocation156_spill]] %s25358_s13 }
  0x6a   :  { %s25378_s13 = sld [smem:[%s27835_s0 + %s24988_s7]]   ;;  %s24992_s7 = smov 66  }
  0x6b   :  { %27906 = sst [smem:[#allocation153_spill]] %s25343_s20 }
  0x6c   :  { %s25363_s20 = sld [smem:[%s27835_s0 + %s24985_s15]]   ;;  %s24989_s15 = smov 63  }
  0x6d   :  { %27907 = sst [smem:[#allocation154_spill]] %s25348_s29 }
  0x6e   :  { %27908 = sst [smem:[#allocation155_spill]] %s25353_s4 }
  0x6f   :  { %s25368_s29 = sld [smem:[%s27835_s0 + %s24986_s22]]   ;;  %s24990_s22 = smov 64  }
  0x70   :  { %s25373_s4 = sld [smem:[%s27835_s0 + %s24987_s28]]   ;;  %s24991_s28 = smov 65  }
  0x71   :  { %27913 = sst [smem:[#allocation160_spill]] %s25378_s13 }
  0x72   :  { %27910 = sst [smem:[#allocation157_spill]] %s25363_s20 }
  0x73   :  { %s25383_s20 = sld [smem:[%s27835_s0 + %s24989_s15]]   ;;  %s24993_s15 = smov 67  }
  0x74   :  { %s25398_s13 = sld [smem:[%s27835_s0 + %s24992_s7]]   ;;  %s24996_s7 = smov 70  }
  0x75   :  { %27911 = sst [smem:[#allocation158_spill]] %s25368_s29 }
  0x76   :  { %27912 = sst [smem:[#allocation159_spill]] %s25373_s4 }
  0x77   :  { %s25388_s29 = sld [smem:[%s27835_s0 + %s24990_s22]]   ;;  %s24994_s22 = smov 68  }
  0x78   :  { %s25393_s4 = sld [smem:[%s27835_s0 + %s24991_s28]]   ;;  %s24995_s28 = smov 69  }
  0x79   :  { %27914 = sst [smem:[#allocation161_spill]] %s25383_s20 }
  0x7a   :  { %27917 = sst [smem:[#allocation164_spill]] %s25398_s13 }
  0x7b   :  { %s25403_s20 = sld [smem:[%s27835_s0 + %s24993_s15]]   ;;  %s24997_s15 = smov 71  }
  0x7c   :  { %s25418_s13 = sld [smem:[%s27835_s0 + %s24996_s7]]  }
  0x7d   :  { %27915 = sst [smem:[#allocation162_spill]] %s25388_s29 }
  0x7e   :  { %27916 = sst [smem:[#allocation163_spill]] %s25393_s4 }
  0x7f   :  { %s25408_s29 = sld [smem:[%s27835_s0 + %s24994_s22]]  }
  0x80   :  { %s25413_s4 = sld [smem:[%s27835_s0 + %s24995_s28]]  }
  0x81   :  { %27918 = sst [smem:[#allocation165_spill]] %s25403_s20 }
  0x82   :  { %s25423_s20 = sld [smem:[%s27835_s0 + %s24997_s15]]  }
  0x83   :  { %148 = vsyncpa [#allocation3], 0 }
  0x84   :  { %149 = vsyncpa [#allocation5], 0 }
  0x85   :  { %150 = vsyncpa [#allocation8], 0 }
  0x86   :  { %151 = vsyncpa [#allocation11], 0 }
  0x87   :  { %152 = vsyncpa [#allocation14], 0 }
  0x88   :  { %153 = vsyncpa [#allocation17], 0 }
  0x89   :  { %154 = vsyncpa [#allocation20], 0 }
  0x8a   :  { %155 = vsyncpa [#allocation23], 0 }
  0x8b   :  { %156 = vsyncpa [#allocation26], 0 }
  0x8c   :  { %157 = vsyncpa [#allocation29], 0 }
  0x8d   :  { %158 = vsyncpa [#allocation32], 0 }
  0x8e   :  { %159 = vsyncpa [#allocation35], 0 }
  0x8f   :  { %160 = vsyncpa [#allocation38], 0 }
  0x90   :  { %161 = vsyncpa [#allocation41], 0 }
  0x91   :  { %162 = vsyncpa [#allocation44], 0 }
  0x92   :  { %163 = vsyncpa [#allocation47], 0 }
  0x93   :  { %164 = vsyncpa [#allocation50], 0 }
  0x94   :  { %165 = vsyncpa [#allocation53], 0 }
  0x95   :  { %166 = vsyncpa [#allocation56], 0 }
  0x96   :  { %167 = vsyncpa [#allocation59], 0 }
  0x97   :  { %168 = vsyncpa [#allocation62], 0 }
  0x98   :  { %169 = vsyncpa [#allocation65], 0 }
  0x99   :  { %170 = vsyncpa [#allocation68], 0 }
  0x9a   :  { %171 = vsyncpa [#allocation71], 0 }
  0x9b   :  { %172 = vsyncpa [#allocation74], 0 }
  0x9c   :  { %173 = vsyncpa [#allocation77], 0 }
  0x9d   :  { %174 = vsyncpa [#allocation80], 0  ;;  %s25425_s0 = smov 0  }
  0x9e LB: > { %s25431_s22 = sadd.s32 4294967295, %s24925_s0   ;;  %p19638_p0 = scmp.ge.s32.totalorder %s24925_s0, 1  ;;  %s24925_s0 = sphi %s25425_s0, %s180_s0  }
  0x9f   : > { %p1707_p1 = scmp.lt.s32.totalorder %s24925_s0, 3 }
  0xa1   : > { %p25435_p2 = pnand %p19638_p0, %p1707_p1 }
  0xa2   : > { %p22062_p3 = scmp.eq.s32.totalorder (!%p25435_p2), %s25431_s22, 0  ;;  %s24998_s26 = smov (!%p25435_p2), [#allocation4]  }
  0xa3   : > { %s27919_s23 = scalar_select %p25435_p2, 1, 0 }
  0xa4   : > { %1711 = sbr.rel (%p25435_p2) target bundleno = 757 (0x2f5), region = 12  ;;  %s1734_s28 = sshll.u32 (!%p25435_p2), %s24998_s26, 4  ;;  %s1735_s28 = int_to_ptr.vmem [resolvable:$true] %s1734_s28 }
  0xa5   : > { %s24999_s1 = smov (!%p25435_p2), [#allocation7]   ;;  %s23573_s7 = scalar_lea.vmem (!%p25435_p2), %s1735_s28, 32 }
  0xa6   : > { %s1755_s2 = sshll.u32 (!%p25435_p2), %s24999_s1, 4  ;;  %p23574_p4 = scmp.ne.s32.totalorder (!%p25435_p2), %s1735_s28, %s23573_s7  ;;  %s1756_s2 = int_to_ptr.vmem [resolvable:$true] %s1755_s2 }
  0xa7   : > { %p23580_p7 = scmp.lt.s32.totalorder (!%p25435_p2), %s1735_s28, %s1735_s28  ;;  %p23581_p8 = scmp.lt.s32.totalorder (!%p25435_p2), %s23573_s7, %s23573_s7 }
  0xa8   : > { %p23575_p5 = pnand (!%p25435_p2), %p23574_p4, %p22062_p3 }
  0xa9   : > { %p23582_p9 = por %p23581_p8, %p23580_p7 }
  0xaa   : > { %p23576_p6 = pneg %p23575_p5 }
  0xac   : > { %p23583_p10 = pnand %p23582_p9, %p23576_p6 }
  0xae   : > { %23586 = shalt.err (!%p23583_p10)
}
  0xaf   : > { %21857 = dma.hbm_to_vmem [thread:$0]  (%p22062_p3), %s25083_s17, 32, %s1735_s28, [#allocation5]  }
  0xb0   : > { %s23597_s10 = scalar_lea.vmem %s1756_s2, 3072  ;;  %p23604_p0 = scmp.lt.s32.totalorder %s1756_s2, %s1756_s2 }
  0xb1   : > { %p23598_p11 = scmp.ne.s32.totalorder %s1756_s2, %s23597_s10  ;;  %p23605_p1 = scmp.lt.s32.totalorder %s23597_s10, %s23597_s10 }
  0xb3   : > { %p23599_p12 = pnand %p23598_p11, %p22062_p3  ;;  %p23606_p4 = por %p23605_p1, %p23604_p0 }
  0xb5   : > { %p23600_p13 = pneg %p23599_p12 }
  0xb7   : > { %p23607_p5 = pnand %p23606_p4, %p23600_p13 }
  0xb9   : > { %23610 = shalt.err (!%p23607_p5)
}
  0xba   : > { %s27848_s11 = smov 128   ;;  %s27853_s15 = smov 8  }
  0xbb   : > { %21861 = dma.hbm_to_vmem [thread:$0]  (%p22062_p3), %s25093_s25, 3072, %s1756_s2, [#allocation8], %s27848_s11, %s27848_s11, %s27853_s15  }
  0xbc   : > { %s25002_s16 = smov [#allocation10]  }
  0xbd   : > { %s1781_s18 = sshll.u32 %s25002_s16, 4  ;;  %s1782_s18 = int_to_ptr.vmem [resolvable:$true] %s1781_s18 }
  0xbe   : > { %s23621_s26 = scalar_lea.vmem %s1782_s18, 3072  ;;  %p23628_p9 = scmp.lt.s32.totalorder %s1782_s18, %s1782_s18 }
  0xbf   : > { %p23622_p6 = scmp.ne.s32.totalorder %s1782_s18, %s23621_s26  ;;  %p23629_p10 = scmp.lt.s32.totalorder %s23621_s26, %s23621_s26 }
  0xc1   : > { %p23623_p7 = pnand %p23622_p6, %p22062_p3  ;;  %p23630_p11 = por %p23629_p10, %p23628_p9 }
  0xc3   : > { %p23624_p8 = pneg %p23623_p7 }
  0xc5   : > { %p23631_p12 = pnand %p23630_p11, %p23624_p8 }
  0xc7   : > { %23634 = shalt.err (!%p23631_p12)
}
  0xc8   : > { %s27920_s3 = sld [smem:[#allocation113_spill]]  ;;  %s25003_s28 = smov [#allocation13]  }
  0xc9   : > { %s1810_s1 = sshll.u32 %s25003_s28, 4  ;;  %s25004_s2 = smov [#allocation16]   ;;  %s1811_s1 = int_to_ptr.vmem [resolvable:$true] %s1810_s1 }
  0xca   : > { %s1837_s7 = sshll.u32 %s25004_s2, 4  ;;  %s23645_s10 = scalar_lea.vmem %s1811_s1, 192  ;;  %s1838_s7 = int_to_ptr.vmem [resolvable:$true] %s1837_s7 }
  0xcb   : > { %p23646_p13 = scmp.ne.s32.totalorder %s1811_s1, %s23645_s10  ;;  %p23652_p4 = scmp.lt.s32.totalorder %s1811_s1, %s1811_s1 }
  0xcc   : > { %p23653_p5 = scmp.lt.s32.totalorder %s23645_s10, %s23645_s10 }
  0xcd   : > { %p23647_p0 = pnand %p23646_p13, %p22062_p3 }
  0xce   : > { %21865 = dma.hbm_to_vmem [thread:$0]  (%p22062_p3), %s27920_s3, 3072, %s1782_s18, [#allocation11], %s27848_s11, %s27848_s11, %s27853_s15  }
  0xcf   : > { %p23648_p1 = pneg %p23647_p0  ;;  %p23654_p6 = por %p23653_p5, %p23652_p4 }
  0xd1   : > { %p23655_p7 = pnand %p23654_p6, %p23648_p1 }
  0xd3   : > { %23658 = shalt.err (!%p23655_p7)
}
  0xd4   : > { %s27851_s16 = smov 16   ;;  %s27855_s18 = smov 1  }
  0xd5   : > { %21869 = dma.hbm_to_vmem [thread:$0]  (%p22062_p3), %s25118_s19, 192, %s1811_s1, [#allocation14], %s27851_s16, %s27851_s16, %s27855_s18  }
  0xd6   : > { %s23669_s26 = scalar_lea.vmem %s1838_s7, 32  ;;  %p23676_p11 = scmp.lt.s32.totalorder %s1838_s7, %s1838_s7 }
  0xd7   : > { %p23670_p8 = scmp.ne.s32.totalorder %s1838_s7, %s23669_s26  ;;  %p23677_p12 = scmp.lt.s32.totalorder %s23669_s26, %s23669_s26 }
  0xd9   : > { %p23671_p9 = pnand %p23670_p8, %p22062_p3  ;;  %p23678_p13 = por %p23677_p12, %p23676_p11 }
  0xdb   : > { %p23672_p10 = pneg %p23671_p9 }
  0xdd   : > { %p23679_p0 = pnand %p23678_p13, %p23672_p10 }
  0xdf   : > { %23682 = shalt.err (!%p23679_p0)
}
  0xe0   : > { %21873 = dma.hbm_to_vmem [thread:$0]  (%p22062_p3), %s25128_s30, 32, %s1838_s7, [#allocation17]  }
  0xe1   : > { %s25007_s28 = smov [#allocation19]   ;;  %s25008_s10 = smov [#allocation22]  }
  0xe2   : > { %s1859_s2 = sshll.u32 %s25007_s28, 4  ;;  %s1887_s11 = sshll.u32 %s25008_s10, 4  ;;  %s1860_s2 = int_to_ptr.vmem [resolvable:$true] %s1859_s2  ;;  %s1888_s11 = int_to_ptr.vmem [resolvable:$true] %s1887_s11 }
  0xe3   : > { %s23693_s1 = scalar_lea.vmem %s1860_s2, 32  ;;  %p23700_p6 = scmp.lt.s32.totalorder %s1860_s2, %s1860_s2 }
  0xe4   : > { %p23694_p1 = scmp.ne.s32.totalorder %s1860_s2, %s23693_s1  ;;  %p23701_p7 = scmp.lt.s32.totalorder %s23693_s1, %s23693_s1 }
  0xe6   : > { %p23695_p4 = pnand %p23694_p1, %p22062_p3  ;;  %p23702_p8 = por %p23701_p7, %p23700_p6 }
  0xe8   : > { %p23696_p5 = pneg %p23695_p4 }
  0xea   : > { %p23703_p9 = pnand %p23702_p8, %p23696_p5 }
  0xec   : > { %23706 = shalt.err (!%p23703_p9)
}
  0xed   : > { %21877 = dma.hbm_to_vmem [thread:$0]  (%p22062_p3), %s25138_s12, 32, %s1860_s2, [#allocation20]  }
  0xee   : > { %s23717_s7 = scalar_lea.vmem %s1888_s11, 32  ;;  %p23724_p13 = scmp.lt.s32.totalorder %s1888_s11, %s1888_s11 }
  0xef   : > { %p23718_p10 = scmp.ne.s32.totalorder %s1888_s11, %s23717_s7  ;;  %p23725_p0 = scmp.lt.s32.totalorder %s23717_s7, %s23717_s7 }
  0xf1   : > { %p23719_p11 = pnand %p23718_p10, %p22062_p3  ;;  %p23726_p2 = por %p23725_p0, %p23724_p13 }
  0xf3   : > { %p23720_p12 = pneg %p23719_p11 }
  0xf5   : > { %p23727_p1 = pnand %p23726_p2, %p23720_p12 }
  0xf7   : > { %23730 = shalt.err (!%p23727_p1)
}
  0xf8   : > { %s27921_s8 = sld [smem:[#allocation121_spill]]  ;;  %s25009_s26 = smov [#allocation25]  }
  0xf9   : > { %s1909_s28 = sshll.u32 %s25009_s26, 4  ;;  %s25010_s10 = smov [#allocation28]   ;;  %s1910_s28 = int_to_ptr.vmem [resolvable:$true] %s1909_s28 }
  0xfa   : > { %s1932_s1 = sshll.u32 %s25010_s10, 4  ;;  %s23741_s2 = scalar_lea.vmem %s1910_s28, 32  ;;  %s1933_s1 = int_to_ptr.vmem [resolvable:$true] %s1932_s1 }
  0xfb   : > { %p23742_p4 = scmp.ne.s32.totalorder %s1910_s28, %s23741_s2  ;;  %p23748_p7 = scmp.lt.s32.totalorder %s1910_s28, %s1910_s28 }
  0xfc   : > { %p23749_p8 = scmp.lt.s32.totalorder %s23741_s2, %s23741_s2 }
  0xfd   : > { %p23743_p5 = pnand %p23742_p4, %p22062_p3 }
  0xfe   : > { %21881 = dma.hbm_to_vmem [thread:$0]  (%p22062_p3), %s27921_s8, 32, %s1888_s11, [#allocation23]  }
  0xff   : > { %p23744_p6 = pneg %p23743_p5  ;;  %p23750_p2 = por %p23749_p8, %p23748_p7 }
 0x101   : > { %p23751_p9 = pnand %p23750_p2, %p23744_p6 }
 0x103   : > { %23754 = shalt.err (!%p23751_p9)
}
 0x104   : > { %s27922_s5 = sld [smem:[#allocation123_spill]]  ;;  %s23765_s11 = scalar_lea.vmem %s1933_s1, 3072 }
 0x105   : > { %p23766_p10 = scmp.ne.s32.totalorder %s1933_s1, %s23765_s11  ;;  %p23772_p13 = scmp.lt.s32.totalorder %s1933_s1, %s1933_s1 }
 0x106   : > { %p23773_p0 = scmp.lt.s32.totalorder %s23765_s11, %s23765_s11 }
 0x107   : > { %p23767_p11 = pnand %p23766_p10, %p22062_p3 }
 0x108   : > { %p23774_p1 = por %p23773_p0, %p23772_p13 }
 0x109   : > { %p23768_p12 = pneg %p23767_p11 }
 0x10a   : > { %21885 = dma.hbm_to_vmem [thread:$0]  (%p22062_p3), %s27922_s5, 32, %s1910_s28, [#allocation26]  }
 0x10b   : > { %p23775_p4 = pnand %p23774_p1, %p23768_p12 }
 0x10d   : > { %23778 = shalt.err (!%p23775_p4)
}
 0x10e   : > { %s27923_s7 = smov 128   ;;  %s25011_s26 = smov [#allocation31]  }
 0x10f   : > { %21889 = dma.hbm_to_vmem [thread:$0]  (%p22062_p3), %s25178_s9, 3072, %s1933_s1, [#allocation29], %s27923_s7, %s27923_s7, %s27853_s15  }
 0x110   : > { %s1958_s28 = sshll.u32 %s25011_s26, 4  ;;  %s25012_s10 = smov [#allocation34]   ;;  %s1959_s28 = int_to_ptr.vmem [resolvable:$true] %s1958_s28 }
 0x111   : > { %s1984_s2 = sshll.u32 %s25012_s10, 4  ;;  %s23789_s16 = scalar_lea.vmem %s1959_s28, 192  ;;  %s1985_s2 = int_to_ptr.vmem [resolvable:$true] %s1984_s2 }
 0x112   : > { %p23790_p5 = scmp.ne.s32.totalorder %s1959_s28, %s23789_s16  ;;  %p23796_p8 = scmp.lt.s32.totalorder %s1959_s28, %s1959_s28 }
 0x113   : > { %p23797_p2 = scmp.lt.s32.totalorder %s23789_s16, %s23789_s16 }
 0x114   : > { %p23791_p6 = pnand %p23790_p5, %p22062_p3 }
 0x115   : > { %p23798_p9 = por %p23797_p2, %p23796_p8 }
 0x116   : > { %p23792_p7 = pneg %p23791_p6 }
 0x118   : > { %p23799_p10 = pnand %p23798_p9, %p23792_p7 }
 0x11a   : > { %23802 = shalt.err (!%p23799_p10)
}
 0x11b   : > { %s27924_s1 = smov 16   ;;  %s23813_s11 = scalar_lea.vmem %s1985_s2, 192 }
 0x11c   : > { %21893 = dma.hbm_to_vmem [thread:$0]  (%p22062_p3), %s25188_s27, 192, %s1959_s28, [#allocation32], %s27924_s1, %s27924_s1, %s27855_s18  }
 0x11d   : > { %p23814_p11 = scmp.ne.s32.totalorder %s1985_s2, %s23813_s11  ;;  %p23820_p0 = scmp.lt.s32.totalorder %s1985_s2, %s1985_s2 }
 0x11e   : > { %p23821_p1 = scmp.lt.s32.totalorder %s23813_s11, %s23813_s11 }
 0x11f   : > { %p23815_p12 = pnand %p23814_p11, %p22062_p3 }
 0x120   : > { %p23822_p4 = por %p23821_p1, %p23820_p0 }
 0x121   : > { %p23816_p13 = pneg %p23815_p12 }
 0x123   : > { %p23823_p5 = pnand %p23822_p4, %p23816_p13 }
 0x125   : > { %23826 = shalt.err (!%p23823_p5)
}
 0x126   : > { %s27925_s6 = sld [smem:[#allocation127_spill]]  ;;  %s25013_s16 = smov [#allocation37]  }
 0x127   : > { %s2011_s26 = sshll.u32 %s25013_s16, 4  ;;  %s25014_s28 = smov [#allocation40]   ;;  %s2012_s26 = int_to_ptr.vmem [resolvable:$true] %s2011_s26 }
 0x128   : > { %s2033_s10 = sshll.u32 %s25014_s28, 4  ;;  %s23837_s15 = scalar_lea.vmem %s2012_s26, 32  ;;  %s2034_s10 = int_to_ptr.vmem [resolvable:$true] %s2033_s10 }
 0x129   : > { %p23838_p6 = scmp.ne.s32.totalorder %s2012_s26, %s23837_s15  ;;  %p23844_p2 = scmp.lt.s32.totalorder %s2012_s26, %s2012_s26 }
 0x12a   : > { %p23845_p9 = scmp.lt.s32.totalorder %s23837_s15, %s23837_s15 }
 0x12b   : > { %p23839_p7 = pnand %p23838_p6, %p22062_p3 }
 0x12c   : > { %21897 = dma.hbm_to_vmem [thread:$0]  (%p22062_p3), %s27925_s6, 192, %s1985_s2, [#allocation35], %s27924_s1, %s27924_s1, %s27855_s18  }
 0x12d   : > { %p23840_p8 = pneg %p23839_p7  ;;  %p23846_p10 = por %p23845_p9, %p23844_p2 }
 0x12f   : > { %p23847_p11 = pnand %p23846_p10, %p23840_p8 }
 0x131   : > { %23850 = shalt.err (!%p23847_p11)
}
 0x132   : > { %21901 = dma.hbm_to_vmem [thread:$0]  (%p22062_p3), %s25208_s24, 32, %s2012_s26, [#allocation38]  }
 0x133   : > { %s23861_s2 = scalar_lea.vmem %s2034_s10, 32  ;;  %p23868_p1 = scmp.lt.s32.totalorder %s2034_s10, %s2034_s10 }
 0x134   : > { %p23862_p12 = scmp.ne.s32.totalorder %s2034_s10, %s23861_s2  ;;  %p23869_p4 = scmp.lt.s32.totalorder %s23861_s2, %s23861_s2 }
 0x136   : > { %p23863_p13 = pnand %p23862_p12, %p22062_p3  ;;  %p23870_p5 = por %p23869_p4, %p23868_p1 }
 0x138   : > { %p23864_p0 = pneg %p23863_p13 }
 0x13a   : > { %p23871_p6 = pnand %p23870_p5, %p23864_p0 }
 0x13c   : > { %23874 = shalt.err (!%p23871_p6)
}
 0x13d   : > { %21905 = dma.hbm_to_vmem [thread:$0]  (%p22062_p3), %s25218_s14, 32, %s2034_s10, [#allocation41]  }
 0x13e   : > { %s25015_s15 = smov [#allocation43]   ;;  %s25016_s16 = smov [#allocation46]  }
 0x13f   : > { %s2061_s11 = sshll.u32 %s25015_s15, 4  ;;  %s2089_s28 = sshll.u32 %s25016_s16, 4  ;;  %s2062_s11 = int_to_ptr.vmem [resolvable:$true] %s2061_s11  ;;  %s2090_s28 = int_to_ptr.vmem [resolvable:$true] %s2089_s28 }
 0x140   : > { %s23885_s26 = scalar_lea.vmem %s2062_s11, 32  ;;  %p23892_p9 = scmp.lt.s32.totalorder %s2062_s11, %s2062_s11 }
 0x141   : > { %p23886_p7 = scmp.ne.s32.totalorder %s2062_s11, %s23885_s26  ;;  %p23893_p10 = scmp.lt.s32.totalorder %s23885_s26, %s23885_s26 }
 0x143   : > { %p23887_p8 = pnand %p23886_p7, %p22062_p3  ;;  %p23894_p11 = por %p23893_p10, %p23892_p9 }
 0x145   : > { %p23888_p2 = pneg %p23887_p8 }
 0x147   : > { %p23895_p12 = pnand %p23894_p11, %p23888_p2 }
 0x149   : > { %23898 = shalt.err (!%p23895_p12)
}
 0x14a   : > { %21909 = dma.hbm_to_vmem [thread:$0]  (%p22062_p3), %s25238_s21, 32, %s2062_s11, [#allocation44]  }
 0x14b   : > { %s23909_s10 = scalar_lea.vmem %s2090_s28, 16  ;;  %s23915_s2 = scalar_lea.vmem %s2090_s28, 32 }
 0x14c   : > { %p23910_p13 = scmp.ne.s32.totalorder %s2090_s28, %s23909_s10  ;;  %p23916_p4 = scmp.lt.s32.totalorder %s2090_s28, %s2090_s28 }
 0x14d   : > { %p23917_p5 = scmp.lt.s32.totalorder %s23915_s2, %s23909_s10 }
 0x14e   : > { %p23911_p0 = pnand %p23910_p13, %p22062_p3 }
 0x14f   : > { %p23918_p6 = por %p23917_p5, %p23916_p4 }
 0x150   : > { %p23912_p1 = pneg %p23911_p0 }
 0x152   : > { %p23919_p7 = pnand %p23918_p6, %p23912_p1 }
 0x154   : > { %23922 = shalt.err (!%p23919_p7)
}
 0x155   : > { %s27926_s15 = sld [smem:[#allocation136_spill]]  ;;  %s25017_s16 = smov [#allocation49]  }
 0x156   : > { %s2112_s26 = sshll.u32 %s25017_s16, 4  ;;  %s25018_s18 = smov [#allocation52]   ;;  %s2113_s26 = int_to_ptr.vmem [resolvable:$true] %s2112_s26 }
 0x157   : > { %s2138_s11 = sshll.u32 %s25018_s18, 4  ;;  %s23933_s3 = scalar_lea.vmem %s2113_s26, 1024  ;;  %s2139_s11 = int_to_ptr.vmem [resolvable:$true] %s2138_s11 }
 0x158   : > { %p23934_p8 = scmp.ne.s32.totalorder %s2113_s26, %s23933_s3  ;;  %p23940_p10 = scmp.lt.s32.totalorder %s2113_s26, %s2113_s26 }
 0x159   : > { %p23941_p11 = scmp.lt.s32.totalorder %s23933_s3, %s23933_s3 }
 0x15a   : > { %p23935_p2 = pnand %p23934_p8, %p22062_p3 }
 0x15b   : > { %21913 = dma.hbm_to_vmem [thread:$0]  (%p22062_p3), %s27926_s15, 16, %s2090_s28, [#allocation47]  }
 0x15c   : > { %p23936_p9 = pneg %p23935_p2  ;;  %p23942_p12 = por %p23941_p11, %p23940_p10 }
 0x15e   : > { %p23943_p13 = pnand %p23942_p12, %p23936_p9 }
 0x160   : > { %23946 = shalt.err (!%p23943_p13)
}
 0x161   : > { %s27857_s10 = smov 64   ;;  %s27927_s2 = sld [smem:[#allocation138_spill]] }
 0x162   : > { %s27859_s28 = smov 4   ;;  %s23957_s18 = scalar_lea.vmem %s2139_s11, 64 }
 0x163   : > { %p23958_p0 = scmp.ne.s32.totalorder %s2139_s11, %s23957_s18  ;;  %p23964_p5 = scmp.lt.s32.totalorder %s2139_s11, %s2139_s11 }
 0x164   : > { %p23965_p6 = scmp.lt.s32.totalorder %s23957_s18, %s23957_s18 }
 0x165   : > { %p23959_p1 = pnand %p23958_p0, %p22062_p3 }
 0x166   : > { %p23966_p7 = por %p23965_p6, %p23964_p5 }
 0x167   : > { %21917 = dma.hbm_to_vmem [thread:$0]  (%p22062_p3), %s27927_s2, 1024, %s2113_s26, [#allocation50], %s27857_s10, %s27857_s10, %s27859_s28  }
 0x168   : > { %p23960_p4 = pneg %p23959_p1 }
 0x16a   : > { %p23967_p8 = pnand %p23966_p7, %p23960_p4 }
 0x16c   : > { %23970 = shalt.err (!%p23967_p8)
}
 0x16d   : > { %s27928_s3 = smov 1   ;;  %s27929_s15 = sld [smem:[#allocation140_spill]] }
 0x16e   : > { %s25021_s16 = smov [#allocation55]   ;;  %s25022_s2 = smov [#allocation58]  }
 0x16f   : > { %s2164_s26 = sshll.u32 %s25021_s16, 4  ;;  %s2192_s10 = sshll.u32 %s25022_s2, 4  ;;  %s2165_s26 = int_to_ptr.vmem [resolvable:$true] %s2164_s26  ;;  %s2193_s10 = int_to_ptr.vmem [resolvable:$true] %s2192_s10 }
 0x170   : > { %s23981_s28 = scalar_lea.vmem %s2165_s26, 64  ;;  %p23988_p11 = scmp.lt.s32.totalorder %s2165_s26, %s2165_s26 }
 0x171   : > { %p23982_p2 = scmp.ne.s32.totalorder %s2165_s26, %s23981_s28  ;;  %p23989_p12 = scmp.lt.s32.totalorder %s23981_s28, %s23981_s28 }
 0x173   : > { %21921 = dma.hbm_to_vmem [thread:$0]  (%p22062_p3), %s27929_s15, 64, %s2139_s11, [#allocation53], %s27924_s1, %s27924_s1, %s27928_s3  }
 0x174   : > { %p23983_p9 = pnand %p23982_p2, %p22062_p3  ;;  %p23990_p13 = por %p23989_p12, %p23988_p11 }
 0x176   : > { %p23984_p10 = pneg %p23983_p9 }
 0x178   : > { %p23991_p0 = pnand %p23990_p13, %p23984_p10 }
 0x17a   : > { %23994 = shalt.err (!%p23991_p0)
}
 0x17b   : > { %s27930_s11 = sld [smem:[#allocation142_spill]]  ;;  %s24005_s18 = scalar_lea.vmem %s2193_s10, 16 }
 0x17c   : > { %p24006_p1 = scmp.ne.s32.totalorder %s2193_s10, %s24005_s18  ;;  %s24011_s15 = scalar_lea.vmem %s2193_s10, 32 }
 0x17d   : > { %p24012_p6 = scmp.lt.s32.totalorder %s2193_s10, %s2193_s10  ;;  %p24013_p7 = scmp.lt.s32.totalorder %s24011_s15, %s24005_s18 }
 0x17e   : > { %p24007_p4 = pnand %p24006_p1, %p22062_p3 }
 0x17f   : > { %p24014_p8 = por %p24013_p7, %p24012_p6 }
 0x180   : > { %p24008_p5 = pneg %p24007_p4 }
 0x181   : > { %21925 = dma.hbm_to_vmem [thread:$0]  (%p22062_p3), %s27930_s11, 64, %s2165_s26, [#allocation56], %s27924_s1, %s27924_s1, %s27928_s3  }
 0x182   : > { %p24015_p2 = pnand %p24014_p8, %p24008_p5 }
 0x184   : > { %24018 = shalt.err (!%p24015_p2)
}
 0x185   : > { %s27931_s28 = sld [smem:[#allocation145_spill]]  ;;  %s25023_s16 = smov [#allocation61]  }
 0x186   : > { %s2217_s2 = sshll.u32 %s25023_s16, 4  ;;  %s25024_s5 = smov [#allocation64]   ;;  %s2218_s2 = int_to_ptr.vmem [resolvable:$true] %s2217_s2 }
 0x187   : > { %s2242_s26 = sshll.u32 %s25024_s5, 4  ;;  %s24029_s11 = scalar_lea.vmem %s2218_s2, 64  ;;  %s2243_s26 = int_to_ptr.vmem [resolvable:$true] %s2242_s26 }
 0x188   : > { %p24030_p9 = scmp.ne.s32.totalorder %s2218_s2, %s24029_s11  ;;  %p24036_p12 = scmp.lt.s32.totalorder %s2218_s2, %s2218_s2 }
 0x189   : > { %p24037_p13 = scmp.lt.s32.totalorder %s24029_s11, %s24029_s11 }
 0x18a   : > { %p24031_p10 = pnand %p24030_p9, %p22062_p3 }
 0x18b   : > { %21929 = dma.hbm_to_vmem [thread:$0]  (%p22062_p3), %s27931_s28, 16, %s2193_s10, [#allocation59]  }
 0x18c   : > { %p24032_p11 = pneg %p24031_p10  ;;  %p24038_p0 = por %p24037_p13, %p24036_p12 }
 0x18e   : > { %p24039_p1 = pnand %p24038_p0, %p24032_p11 }
 0x190   : > { %24042 = shalt.err (!%p24039_p1)
}
 0x191   : > { %s27932_s18 = sld [smem:[#allocation148_spill]]  ;;  %s24053_s10 = scalar_lea.vmem %s2243_s26, 16 }
 0x192   : > { %p24054_p4 = scmp.ne.s32.totalorder %s2243_s26, %s24053_s10  ;;  %s24059_s5 = scalar_lea.vmem %s2243_s26, 32 }
 0x193   : > { %p24060_p7 = scmp.lt.s32.totalorder %s2243_s26, %s2243_s26  ;;  %p24061_p8 = scmp.lt.s32.totalorder %s24059_s5, %s24053_s10 }
 0x194   : > { %p24055_p5 = pnand %p24054_p4, %p22062_p3 }
 0x195   : > { %p24062_p2 = por %p24061_p8, %p24060_p7 }
 0x196   : > { %p24056_p6 = pneg %p24055_p5 }
 0x197   : > { %21933 = dma.hbm_to_vmem [thread:$0]  (%p22062_p3), %s27932_s18, 64, %s2218_s2, [#allocation62]  }
 0x198   : > { %p24063_p9 = pnand %p24062_p2, %p24056_p6 }
 0x19a   : > { %24066 = shalt.err (!%p24063_p9)
}
 0x19b   : > { %s27933_s15 = sld [smem:[#allocation151_spill]]  ;;  %s25025_s28 = smov [#allocation67]  }
 0x19c   : > { %s2263_s16 = sshll.u32 %s25025_s28, 4  ;;  %s25026_s11 = smov [#allocation70]   ;;  %s2264_s16 = int_to_ptr.vmem [resolvable:$true] %s2263_s16 }
 0x19d   : > { %s2289_s2 = sshll.u32 %s25026_s11, 4  ;;  %s24077_s18 = scalar_lea.vmem %s2264_s16, 1024  ;;  %s2290_s2 = int_to_ptr.vmem [resolvable:$true] %s2289_s2 }
 0x19e   : > { %p24078_p10 = scmp.ne.s32.totalorder %s2264_s16, %s24077_s18  ;;  %p24084_p13 = scmp.lt.s32.totalorder %s2264_s16, %s2264_s16 }
 0x19f   : > { %p24085_p0 = scmp.lt.s32.totalorder %s24077_s18, %s24077_s18 }
 0x1a0   : > { %p24079_p11 = pnand %p24078_p10, %p22062_p3 }
 0x1a1   : > { %21937 = dma.hbm_to_vmem [thread:$0]  (%p22062_p3), %s27933_s15, 16, %s2243_s26, [#allocation65]  }
 0x1a2   : > { %p24080_p12 = pneg %p24079_p11  ;;  %p24086_p1 = por %p24085_p0, %p24084_p13 }
 0x1a4   : > { %p24087_p4 = pnand %p24086_p1, %p24080_p12 }
 0x1a6   : > { %24090 = shalt.err (!%p24087_p4)
}
 0x1a7   : > { %s27934_s10 = smov 4   ;;  %s27935_s26 = smov 64  }
 0x1a8   : > { %s27936_s5 = sld [smem:[#allocation153_spill]]  ;;  %s24101_s15 = scalar_lea.vmem %s2290_s2, 1024 }
 0x1a9   : > { %p24102_p5 = scmp.ne.s32.totalorder %s2290_s2, %s24101_s15  ;;  %p24108_p8 = scmp.lt.s32.totalorder %s2290_s2, %s2290_s2 }
 0x1aa   : > { %p24109_p2 = scmp.lt.s32.totalorder %s24101_s15, %s24101_s15 }
 0x1ab   : > { %p24103_p6 = pnand %p24102_p5, %p22062_p3 }
 0x1ac   : > { %p24110_p9 = por %p24109_p2, %p24108_p8 }
 0x1ad   : > { %p24104_p7 = pneg %p24103_p6 }
 0x1ae   : > { %21941 = dma.hbm_to_vmem [thread:$0]  (%p22062_p3), %s27936_s5, 1024, %s2264_s16, [#allocation68], %s27935_s26, %s27935_s26, %s27934_s10  }
 0x1af   : > { %p24111_p10 = pnand %p24110_p9, %p24104_p7 }
 0x1b1   : > { %24114 = shalt.err (!%p24111_p10)
}
 0x1b2   : > { %s27937_s28 = sld [smem:[#allocation155_spill]]  ;;  %s25027_s11 = smov [#allocation73]  }
 0x1b3   : > { %s2315_s16 = sshll.u32 %s25027_s11, 4  ;;  %s25028_s18 = smov [#allocation76]   ;;  %s2316_s16 = int_to_ptr.vmem [resolvable:$true] %s2315_s16 }
 0x1b4   : > { %s2341_s5 = sshll.u32 %s25028_s18, 4  ;;  %s24125_s6 = scalar_lea.vmem %s2316_s16, 64  ;;  %s2342_s5 = int_to_ptr.vmem [resolvable:$true] %s2341_s5 }
 0x1b5   : > { %p24126_p11 = scmp.ne.s32.totalorder %s2316_s16, %s24125_s6  ;;  %p24132_p0 = scmp.lt.s32.totalorder %s2316_s16, %s2316_s16 }
 0x1b6   : > { %p24133_p1 = scmp.lt.s32.totalorder %s24125_s6, %s24125_s6 }
 0x1b7   : > { %p24127_p12 = pnand %p24126_p11, %p22062_p3 }
 0x1b8   : > { %21945 = dma.hbm_to_vmem [thread:$0]  (%p22062_p3), %s27937_s28, 1024, %s2290_s2, [#allocation71], %s27935_s26, %s27935_s26, %s27934_s10  }
 0x1b9   : > { %p24128_p13 = pneg %p24127_p12  ;;  %p24134_p4 = por %p24133_p1, %p24132_p0 }
 0x1bb   : > { %p24135_p5 = pnand %p24134_p4, %p24128_p13 }
 0x1bd   : > { %24138 = shalt.err (!%p24135_p5)
}
 0x1be   : > { %s27938_s2 = sld [smem:[#allocation157_spill]]  ;;  %s24149_s15 = scalar_lea.vmem %s2342_s5, 1024 }
 0x1bf   : > { %p24150_p6 = scmp.ne.s32.totalorder %s2342_s5, %s24149_s15  ;;  %p24156_p2 = scmp.lt.s32.totalorder %s2342_s5, %s2342_s5 }
 0x1c0   : > { %p24157_p9 = scmp.lt.s32.totalorder %s24149_s15, %s24149_s15 }
 0x1c1   : > { %p24151_p7 = pnand %p24150_p6, %p22062_p3 }
 0x1c2   : > { %p24158_p10 = por %p24157_p9, %p24156_p2 }
 0x1c3   : > { %p24152_p8 = pneg %p24151_p7 }
 0x1c4   : > { %21949 = dma.hbm_to_vmem [thread:$0]  (%p22062_p3), %s27938_s2, 64, %s2316_s16, [#allocation74], %s27924_s1, %s27924_s1, %s27928_s3  }
 0x1c5   : > { %p24159_p11 = pnand %p24158_p10, %p24152_p8 }
 0x1c7   : > { %24162 = shalt.err (!%p24159_p11)
}
 0x1c8   : > { %s27939_s6 = sld [smem:[#allocation159_spill]]  ;;  %s25029_s28 = smov [#allocation2]  }
 0x1c9   : > { %s1723_s11 = sshll.u32 %s25029_s28, 4  ;;  %s25030_s16 = smov [#allocation6]   ;;  %s1724_s11 = int_to_ptr.vmem [resolvable:$true] %s1723_s11 }
 0x1ca   : > { %s1745_s18 = sshll.u32 %s25030_s16, 4  ;;  %s24173_s2 = scalar_lea.vmem %s1724_s11, 256  ;;  %s1746_s18 = int_to_ptr.vmem [resolvable:$true] %s1745_s18 }
 0x1cb   : > { %p24174_p12 = scmp.ne.s32.totalorder %s1724_s11, %s24173_s2  ;;  %p24180_p1 = scmp.lt.s32.totalorder %s1724_s11, %s1724_s11 }
 0x1cc   : > { %p24181_p4 = scmp.lt.s32.totalorder %s24173_s2, %s24173_s2 }
 0x1cd   : > { %p24175_p13 = pnand %p24174_p12, %p22062_p3 }
 0x1ce   : > { %21953 = dma.hbm_to_vmem [thread:$0]  (%p22062_p3), %s27939_s6, 1024, %s2342_s5, [#allocation77], %s27935_s26, %s27935_s26, %s27934_s10  }
 0x1cf   : > { %p24176_p0 = pneg %p24175_p13  ;;  %p24182_p5 = por %p24181_p4, %p24180_p1 }
 0x1d1   : > { %p24183_p6 = pnand %p24182_p5, %p24176_p0 }
 0x1d3   : > { %24186 = shalt.err (!%p24183_p6)
}
 0x1d4   : > { %s27940_s15 = sld [smem:[#allocation110_spill]]  ;;  %s24197_s5 = scalar_lea.vmem %s1746_s18, 32 }
 0x1d5   : > { %p24198_p7 = scmp.ne.s32.totalorder %s1746_s18, %s24197_s5  ;;  %p24204_p9 = scmp.lt.s32.totalorder %s1746_s18, %s1746_s18 }
 0x1d6   : > { %p24205_p10 = scmp.lt.s32.totalorder %s24197_s5, %s24197_s5 }
 0x1d7   : > { %p24199_p8 = pnand %p24198_p7, %p22062_p3 }
 0x1d8   : > { %p24206_p11 = por %p24205_p10, %p24204_p9 }
 0x1d9   : > { %p24200_p2 = pneg %p24199_p8 }
 0x1da   : > { %21855 = dma.hbm_to_vmem [thread:$0]  (%p22062_p3), %s27940_s15, 256, %s1724_s11, [#allocation3]  }
 0x1db   : > { %p24207_p12 = pnand %p24206_p11, %p24200_p2 }
 0x1dd   : > { %24210 = shalt.err (!%p24207_p12)
}
 0x1de   : > { %s27941_s6 = sld [smem:[#allocation111_spill]]  ;;  %s25031_s28 = smov [#allocation9]  }
 0x1df   : > { %s1768_s16 = sshll.u32 %s25031_s28, 4  ;;  %s25032_s11 = smov [#allocation12]   ;;  %s1769_s16 = int_to_ptr.vmem [resolvable:$true] %s1768_s16 }
 0x1e0   : > { %s1797_s2 = sshll.u32 %s25032_s11, 4  ;;  %s24221_s15 = scalar_lea.vmem %s1769_s16, 3072  ;;  %s1798_s2 = int_to_ptr.vmem [resolvable:$true] %s1797_s2 }
 0x1e1   : > { %p24222_p13 = scmp.ne.s32.totalorder %s1769_s16, %s24221_s15  ;;  %p24228_p4 = scmp.lt.s32.totalorder %s1769_s16, %s1769_s16 }
 0x1e2   : > { %p24229_p5 = scmp.lt.s32.totalorder %s24221_s15, %s24221_s15 }
 0x1e3   : > { %p24223_p0 = pnand %p24222_p13, %p22062_p3 }
 0x1e4   : > { %21859 = dma.hbm_to_vmem [thread:$0]  (%p22062_p3), %s27941_s6, 32, %s1746_s18, [#allocation5]  }
 0x1e5   : > { %p24224_p1 = pneg %p24223_p0  ;;  %p24230_p6 = por %p24229_p5, %p24228_p4 }
 0x1e7   : > { %p24231_p7 = pnand %p24230_p6, %p24224_p1 }
 0x1e9   : > { %24234 = shalt.err (!%p24231_p7)
}
 0x1ea   : > { %s27942_s5 = smov 8   ;;  %s27943_s18 = sld [smem:[#allocation112_spill]] }
 0x1eb   : > { %s24245_s6 = scalar_lea.vmem %s1798_s2, 192  ;;  %p24252_p10 = scmp.lt.s32.totalorder %s1798_s2, %s1798_s2 }
 0x1ec   : > { %p24246_p8 = scmp.ne.s32.totalorder %s1798_s2, %s24245_s6  ;;  %p24253_p11 = scmp.lt.s32.totalorder %s24245_s6, %s24245_s6 }
 0x1ee   : > { %p24247_p2 = pnand %p24246_p8, %p22062_p3  ;;  %p24254_p12 = por %p24253_p11, %p24252_p10 }
 0x1f0   : > { %21863 = dma.hbm_to_vmem [thread:$0]  (%p22062_p3), %s27943_s18, 3072, %s1769_s16, [#allocation8], %s27923_s7, %s27923_s7, %s27942_s5  }
 0x1f1   : > { %p24248_p9 = pneg %p24247_p2 }
 0x1f3   : > { %p24255_p13 = pnand %p24254_p12, %p24248_p9 }
 0x1f5   : > { %24258 = shalt.err (!%p24255_p13)
}
 0x1f6   : > { %s27944_s28 = sld [smem:[#allocation115_spill]]  ;;  %s25033_s16 = smov [#allocation15]  }
 0x1f7   : > { %s1823_s11 = sshll.u32 %s25033_s16, 4  ;;  %s25034_s15 = smov [#allocation18]   ;;  %s1824_s11 = int_to_ptr.vmem [resolvable:$true] %s1823_s11 }
 0x1f8   : > { %s1848_s18 = sshll.u32 %s25034_s15, 4  ;;  %s24269_s8 = scalar_lea.vmem %s1824_s11, 3072  ;;  %s1849_s18 = int_to_ptr.vmem [resolvable:$true] %s1848_s18 }
 0x1f9   : > { %p24270_p0 = scmp.ne.s32.totalorder %s1824_s11, %s24269_s8  ;;  %p24276_p5 = scmp.lt.s32.totalorder %s1824_s11, %s1824_s11 }
 0x1fa   : > { %p24277_p6 = scmp.lt.s32.totalorder %s24269_s8, %s24269_s8 }
 0x1fb   : > { %p24271_p1 = pnand %p24270_p0, %p22062_p3 }
 0x1fc   : > { %21867 = dma.hbm_to_vmem [thread:$0]  (%p22062_p3), %s27944_s28, 192, %s1798_s2, [#allocation11], %s27924_s1, %s27924_s1, %s27928_s3  }
 0x1fd   : > { %p24272_p4 = pneg %p24271_p1  ;;  %p24278_p7 = por %p24277_p6, %p24276_p5 }
 0x1ff   : > { %p24279_p8 = pnand %p24278_p7, %p24272_p4 }
 0x201   : > { %24282 = shalt.err (!%p24279_p8)
}
 0x202   : > { %s27945_s2 = sld [smem:[#allocation116_spill]]  ;;  %s24293_s6 = scalar_lea.vmem %s1849_s18, 32 }
 0x203   : > { %p24294_p2 = scmp.ne.s32.totalorder %s1849_s18, %s24293_s6  ;;  %p24300_p11 = scmp.lt.s32.totalorder %s1849_s18, %s1849_s18 }
 0x204   : > { %p24301_p12 = scmp.lt.s32.totalorder %s24293_s6, %s24293_s6 }
 0x205   : > { %p24295_p9 = pnand %p24294_p2, %p22062_p3 }
 0x206   : > { %p24302_p13 = por %p24301_p12, %p24300_p11 }
 0x207   : > { %p24296_p10 = pneg %p24295_p9 }
 0x208   : > { %21871 = dma.hbm_to_vmem [thread:$0]  (%p22062_p3), %s27945_s2, 3072, %s1824_s11, [#allocation14], %s27923_s7, %s27923_s7, %s27942_s5  }
 0x209   : > { %p24303_p0 = pnand %p24302_p13, %p24296_p10 }
 0x20b   : > { %24306 = shalt.err (!%p24303_p0)
}
 0x20c   : > { %s27946_s8 = sld [smem:[#allocation117_spill]]  ;;  %s25035_s28 = smov [#allocation21]  }
 0x20d   : > { %s1873_s16 = sshll.u32 %s25035_s28, 4  ;;  %s25036_s11 = smov [#allocation24]   ;;  %s1874_s16 = int_to_ptr.vmem [resolvable:$true] %s1873_s16 }
 0x20e   : > { %s1898_s15 = sshll.u32 %s25036_s11, 4  ;;  %s24317_s2 = scalar_lea.vmem %s1874_s16, 96  ;;  %s1899_s15 = int_to_ptr.vmem [resolvable:$true] %s1898_s15 }
 0x20f   : > { %p24318_p1 = scmp.ne.s32.totalorder %s1874_s16, %s24317_s2  ;;  %p24324_p6 = scmp.lt.s32.totalorder %s1874_s16, %s1874_s16 }
 0x210   : > { %p24325_p7 = scmp.lt.s32.totalorder %s24317_s2, %s24317_s2 }
 0x211   : > { %p24319_p4 = pnand %p24318_p1, %p22062_p3 }
 0x212   : > { %21875 = dma.hbm_to_vmem [thread:$0]  (%p22062_p3), %s27946_s8, 32, %s1849_s18, [#allocation17]  }
 0x213   : > { %p24320_p5 = pneg %p24319_p4  ;;  %p24326_p8 = por %p24325_p7, %p24324_p6 }
 0x215   : > { %p24327_p2 = pnand %p24326_p8, %p24320_p5 }
 0x217   : > { %24330 = shalt.err (!%p24327_p2)
}
 0x218   : > { %s27947_s6 = sld [smem:[#allocation119_spill]]  ;;  %s24341_s18 = scalar_lea.vmem %s1899_s15, 32 }
 0x219   : > { %p24342_p9 = scmp.ne.s32.totalorder %s1899_s15, %s24341_s18  ;;  %p24348_p12 = scmp.lt.s32.totalorder %s1899_s15, %s1899_s15 }
 0x21a   : > { %p24349_p13 = scmp.lt.s32.totalorder %s24341_s18, %s24341_s18 }
 0x21b   : > { %p24343_p10 = pnand %p24342_p9, %p22062_p3 }
 0x21c   : > { %p24350_p0 = por %p24349_p13, %p24348_p12 }
 0x21d   : > { %p24344_p11 = pneg %p24343_p10 }
 0x21e   : > { %21879 = dma.hbm_to_vmem [thread:$0]  (%p22062_p3), %s27947_s6, 96, %s1874_s16, [#allocation20]  }
 0x21f   : > { %p24351_p1 = pnand %p24350_p0, %p24344_p11 }
 0x221   : > { %24354 = shalt.err (!%p24351_p1)
}
 0x222   : > { %s27948_s8 = sld [smem:[#allocation122_spill]]  ;;  %s25037_s28 = smov [#allocation27]  }
 0x223   : > { %s1919_s11 = sshll.u32 %s25037_s28, 4  ;;  %s25038_s16 = smov [#allocation30]   ;;  %s1920_s11 = int_to_ptr.vmem [resolvable:$true] %s1919_s11 }
 0x224   : > { %s1945_s2 = sshll.u32 %s25038_s16, 4  ;;  %s24365_s6 = scalar_lea.vmem %s1920_s11, 3072  ;;  %s1946_s2 = int_to_ptr.vmem [resolvable:$true] %s1945_s2 }
 0x225   : > { %p24366_p4 = scmp.ne.s32.totalorder %s1920_s11, %s24365_s6  ;;  %p24372_p7 = scmp.lt.s32.totalorder %s1920_s11, %s1920_s11 }
 0x226   : > { %p24373_p8 = scmp.lt.s32.totalorder %s24365_s6, %s24365_s6 }
 0x227   : > { %p24367_p5 = pnand %p24366_p4, %p22062_p3 }
 0x228   : > { %21883 = dma.hbm_to_vmem [thread:$0]  (%p22062_p3), %s27948_s8, 32, %s1899_s15, [#allocation23]  }
 0x229   : > { %p24368_p6 = pneg %p24367_p5  ;;  %p24374_p2 = por %p24373_p8, %p24372_p7 }
 0x22b   : > { %p24375_p9 = pnand %p24374_p2, %p24368_p6 }
 0x22d   : > { %24378 = shalt.err (!%p24375_p9)
}
 0x22e   : > { %s27949_s15 = sld [smem:[#allocation124_spill]]  ;;  %s24389_s18 = scalar_lea.vmem %s1946_s2, 3072 }
 0x22f   : > { %p24390_p10 = scmp.ne.s32.totalorder %s1946_s2, %s24389_s18  ;;  %p24396_p13 = scmp.lt.s32.totalorder %s1946_s2, %s1946_s2 }
 0x230   : > { %p24397_p0 = scmp.lt.s32.totalorder %s24389_s18, %s24389_s18 }
 0x231   : > { %p24391_p11 = pnand %p24390_p10, %p22062_p3 }
 0x232   : > { %p24398_p1 = por %p24397_p0, %p24396_p13 }
 0x233   : > { %p24392_p12 = pneg %p24391_p11 }
 0x234   : > { %21887 = dma.hbm_to_vmem [thread:$0]  (%p22062_p3), %s27949_s15, 3072, %s1920_s11, [#allocation26], %s27923_s7, %s27923_s7, %s27942_s5  }
 0x235   : > { %p24399_p4 = pnand %p24398_p1, %p24392_p12 }
 0x237   : > { %24402 = shalt.err (!%p24399_p4)
}
 0x238   : > { %s27950_s8 = sld [smem:[#allocation125_spill]]  ;;  %s25039_s28 = smov [#allocation33]  }
 0x239   : > { %s1971_s11 = sshll.u32 %s25039_s28, 4  ;;  %s25040_s16 = smov [#allocation36]   ;;  %s1972_s11 = int_to_ptr.vmem [resolvable:$true] %s1971_s11 }
 0x23a   : > { %s1997_s6 = sshll.u32 %s25040_s16, 4  ;;  %s24413_s15 = scalar_lea.vmem %s1972_s11, 192  ;;  %s1998_s6 = int_to_ptr.vmem [resolvable:$true] %s1997_s6 }
 0x23b   : > { %p24414_p5 = scmp.ne.s32.totalorder %s1972_s11, %s24413_s15  ;;  %p24420_p8 = scmp.lt.s32.totalorder %s1972_s11, %s1972_s11 }
 0x23c   : > { %p24421_p2 = scmp.lt.s32.totalorder %s24413_s15, %s24413_s15 }
 0x23d   : > { %p24415_p6 = pnand %p24414_p5, %p22062_p3 }
 0x23e   : > { %21891 = dma.hbm_to_vmem [thread:$0]  (%p22062_p3), %s27950_s8, 3072, %s1946_s2, [#allocation29], %s27923_s7, %s27923_s7, %s27942_s5  }
 0x23f   : > { %p24416_p7 = pneg %p24415_p6  ;;  %p24422_p9 = por %p24421_p2, %p24420_p8 }
 0x241   : > { %p24423_p10 = pnand %p24422_p9, %p24416_p7 }
 0x243   : > { %24426 = shalt.err (!%p24423_p10)
}
 0x244   : > { %s27951_s2 = sld [smem:[#allocation126_spill]]  ;;  %s24437_s18 = scalar_lea.vmem %s1998_s6, 3072 }
 0x245   : > { %p24438_p11 = scmp.ne.s32.totalorder %s1998_s6, %s24437_s18  ;;  %p24444_p0 = scmp.lt.s32.totalorder %s1998_s6, %s1998_s6 }
 0x246   : > { %p24445_p1 = scmp.lt.s32.totalorder %s24437_s18, %s24437_s18 }
 0x247   : > { %p24439_p12 = pnand %p24438_p11, %p22062_p3 }
 0x248   : > { %p24446_p4 = por %p24445_p1, %p24444_p0 }
 0x249   : > { %p24440_p13 = pneg %p24439_p12 }
 0x24a   : > { %21895 = dma.hbm_to_vmem [thread:$0]  (%p22062_p3), %s27951_s2, 192, %s1972_s11, [#allocation32], %s27924_s1, %s27924_s1, %s27928_s3  }
 0x24b   : > { %p24447_p5 = pnand %p24446_p4, %p24440_p13 }
 0x24d   : > { %24450 = shalt.err (!%p24447_p5)
}
 0x24e   : > { %s27952_s8 = sld [smem:[#allocation128_spill]]  ;;  %s25041_s28 = smov [#allocation39]  }
 0x24f   : > { %s2022_s11 = sshll.u32 %s25041_s28, 4  ;;  %s25042_s16 = smov [#allocation42]   ;;  %s2023_s11 = int_to_ptr.vmem [resolvable:$true] %s2022_s11 }
 0x250   : > { %s2047_s15 = sshll.u32 %s25042_s16, 4  ;;  %s24461_s2 = scalar_lea.vmem %s2023_s11, 32  ;;  %s2048_s15 = int_to_ptr.vmem [resolvable:$true] %s2047_s15 }
 0x251   : > { %p24462_p6 = scmp.ne.s32.totalorder %s2023_s11, %s24461_s2  ;;  %p24468_p2 = scmp.lt.s32.totalorder %s2023_s11, %s2023_s11 }
 0x252   : > { %p24469_p9 = scmp.lt.s32.totalorder %s24461_s2, %s24461_s2 }
 0x253   : > { %p24463_p7 = pnand %p24462_p6, %p22062_p3 }
 0x254   : > { %21899 = dma.hbm_to_vmem [thread:$0]  (%p22062_p3), %s27952_s8, 3072, %s1998_s6, [#allocation35], %s27923_s7, %s27923_s7, %s27942_s5  }
 0x255   : > { %p24464_p8 = pneg %p24463_p7  ;;  %p24470_p10 = por %p24469_p9, %p24468_p2 }
 0x257   : > { %p24471_p11 = pnand %p24470_p10, %p24464_p8 }
 0x259   : > { %24474 = shalt.err (!%p24471_p11)
}
 0x25a   : > { %s27953_s18 = sld [smem:[#allocation129_spill]]  ;;  %s24485_s7 = scalar_lea.vmem %s2048_s15, 96 }
 0x25b   : > { %p24486_p12 = scmp.ne.s32.totalorder %s2048_s15, %s24485_s7  ;;  %p24492_p1 = scmp.lt.s32.totalorder %s2048_s15, %s2048_s15 }
 0x25c   : > { %p24493_p4 = scmp.lt.s32.totalorder %s24485_s7, %s24485_s7 }
 0x25d   : > { %p24487_p13 = pnand %p24486_p12, %p22062_p3 }
 0x25e   : > { %p24494_p5 = por %p24493_p4, %p24492_p1 }
 0x25f   : > { %p24488_p0 = pneg %p24487_p13 }
 0x260   : > { %21903 = dma.hbm_to_vmem [thread:$0]  (%p22062_p3), %s27953_s18, 32, %s2023_s11, [#allocation38]  }
 0x261   : > { %p24495_p6 = pnand %p24494_p5, %p24488_p0 }
 0x263   : > { %24498 = shalt.err (!%p24495_p6)
}
 0x264   : > { %s27954_s5 = sld [smem:[#allocation131_spill]]  ;;  %s25043_s6 = smov [#allocation45]  }
 0x265   : > { %s2078_s8 = sshll.u32 %s25043_s6, 4  ;;  %s25044_s28 = smov [#allocation48]   ;;  %s2079_s8 = int_to_ptr.vmem [resolvable:$true] %s2078_s8 }
 0x266   : > { %s2099_s11 = sshll.u32 %s25044_s28, 4  ;;  %s24509_s16 = scalar_lea.vmem %s2079_s8, 16  ;;  %s2100_s11 = int_to_ptr.vmem [resolvable:$true] %s2099_s11 }
 0x267   : > { %p24510_p7 = scmp.ne.s32.totalorder %s2079_s8, %s24509_s16  ;;  %s24515_s2 = scalar_lea.vmem %s2079_s8, 32 }
 0x268   : > { %p24516_p9 = scmp.lt.s32.totalorder %s2079_s8, %s2079_s8  ;;  %p24517_p10 = scmp.lt.s32.totalorder %s24515_s2, %s24509_s16 }
 0x269   : > { %p24511_p8 = pnand %p24510_p7, %p22062_p3 }
 0x26a   : > { %21907 = dma.hbm_to_vmem [thread:$0]  (%p22062_p3), %s27954_s5, 96, %s2048_s15, [#allocation41]  }
 0x26b   : > { %p24512_p2 = pneg %p24511_p8  ;;  %p24518_p11 = por %p24517_p10, %p24516_p9 }
 0x26d   : > { %p24519_p12 = pnand %p24518_p11, %p24512_p2 }
 0x26f   : > { %24522 = shalt.err (!%p24519_p12)
}
 0x270   : > { %s27955_s18 = sld [smem:[#allocation135_spill]]  ;;  %s24533_s15 = scalar_lea.vmem %s2100_s11, 1024 }
 0x271   : > { %p24534_p13 = scmp.ne.s32.totalorder %s2100_s11, %s24533_s15  ;;  %p24540_p4 = scmp.lt.s32.totalorder %s2100_s11, %s2100_s11 }
 0x272   : > { %p24541_p5 = scmp.lt.s32.totalorder %s24533_s15, %s24533_s15 }
 0x273   : > { %p24535_p0 = pnand %p24534_p13, %p22062_p3 }
 0x274   : > { %p24542_p6 = por %p24541_p5, %p24540_p4 }
 0x275   : > { %p24536_p1 = pneg %p24535_p0 }
 0x276   : > { %21911 = dma.hbm_to_vmem [thread:$0]  (%p22062_p3), %s27955_s18, 16, %s2079_s8, [#allocation44]  }
 0x277   : > { %p24543_p7 = pnand %p24542_p6, %p24536_p1 }
 0x279   : > { %24546 = shalt.err (!%p24543_p7)
}
 0x27a   : > { %s27956_s7 = sld [smem:[#allocation137_spill]]  ;;  %s25045_s5 = smov [#allocation51]  }
 0x27b   : > { %s2125_s6 = sshll.u32 %s25045_s5, 4  ;;  %s25046_s8 = smov [#allocation54]   ;;  %s2126_s6 = int_to_ptr.vmem [resolvable:$true] %s2125_s6 }
 0x27c   : > { %s2151_s28 = sshll.u32 %s25046_s8, 4  ;;  %s24557_s16 = scalar_lea.vmem %s2126_s6, 1024  ;;  %s2152_s28 = int_to_ptr.vmem [resolvable:$true] %s2151_s28 }
 0x27d   : > { %p24558_p8 = scmp.ne.s32.totalorder %s2126_s6, %s24557_s16  ;;  %p24564_p10 = scmp.lt.s32.totalorder %s2126_s6, %s2126_s6 }
 0x27e   : > { %p24565_p11 = scmp.lt.s32.totalorder %s24557_s16, %s24557_s16 }
 0x27f   : > { %p24559_p2 = pnand %p24558_p8, %p22062_p3 }
 0x280   : > { %21915 = dma.hbm_to_vmem [thread:$0]  (%p22062_p3), %s27956_s7, 1024, %s2100_s11, [#allocation47], %s27935_s26, %s27935_s26, %s27934_s10  }
 0x281   : > { %p24560_p9 = pneg %p24559_p2  ;;  %p24566_p12 = por %p24565_p11, %p24564_p10 }
 0x283   : > { %p24567_p13 = pnand %p24566_p12, %p24560_p9 }
 0x285   : > { %24570 = shalt.err (!%p24567_p13)
}
 0x286   : > { %s27957_s11 = sld [smem:[#allocation139_spill]]  ;;  %s24581_s2 = scalar_lea.vmem %s2152_s28, 64 }
 0x287   : > { %p24582_p0 = scmp.ne.s32.totalorder %s2152_s28, %s24581_s2  ;;  %p24588_p5 = scmp.lt.s32.totalorder %s2152_s28, %s2152_s28 }
 0x288   : > { %p24589_p6 = scmp.lt.s32.totalorder %s24581_s2, %s24581_s2 }
 0x289   : > { %p24583_p1 = pnand %p24582_p0, %p22062_p3 }
 0x28a   : > { %p24590_p7 = por %p24589_p6, %p24588_p5 }
 0x28b   : > { %p24584_p4 = pneg %p24583_p1 }
 0x28c   : > { %21919 = dma.hbm_to_vmem [thread:$0]  (%p22062_p3), %s27957_s11, 1024, %s2126_s6, [#allocation50], %s27935_s26, %s27935_s26, %s27934_s10  }
 0x28d   : > { %p24591_p8 = pnand %p24590_p7, %p24584_p4 }
 0x28f   : > { %24594 = shalt.err (!%p24591_p8)
}
 0x290   : > { %s27958_s18 = sld [smem:[#allocation141_spill]]  ;;  %s25047_s15 = smov [#allocation57]  }
 0x291   : > { %s2181_s7 = sshll.u32 %s25047_s15, 4  ;;  %s25048_s5 = smov [#allocation60]   ;;  %s2182_s7 = int_to_ptr.vmem [resolvable:$true] %s2181_s7 }
 0x292   : > { %s2203_s6 = sshll.u32 %s25048_s5, 4  ;;  %s24605_s8 = scalar_lea.vmem %s2182_s7, 16  ;;  %s2204_s6 = int_to_ptr.vmem [resolvable:$true] %s2203_s6 }
 0x293   : > { %p24606_p2 = scmp.ne.s32.totalorder %s2182_s7, %s24605_s8  ;;  %s24611_s16 = scalar_lea.vmem %s2182_s7, 32 }
 0x294   : > { %p24612_p11 = scmp.lt.s32.totalorder %s2182_s7, %s2182_s7  ;;  %p24613_p12 = scmp.lt.s32.totalorder %s24611_s16, %s24605_s8 }
 0x295   : > { %p24607_p9 = pnand %p24606_p2, %p22062_p3 }
 0x296   : > { %21923 = dma.hbm_to_vmem [thread:$0]  (%p22062_p3), %s27958_s18, 64, %s2152_s28, [#allocation53], %s27924_s1, %s27924_s1, %s27928_s3  }
 0x297   : > { %p24608_p10 = pneg %p24607_p9  ;;  %p24614_p13 = por %p24613_p12, %p24612_p11 }
 0x299   : > { %p24615_p0 = pnand %p24614_p13, %p24608_p10 }
 0x29b   : > { %24618 = shalt.err (!%p24615_p0)
}
 0x29c   : > { %s27959_s11 = sld [smem:[#allocation144_spill]]  ;;  %s24629_s28 = scalar_lea.vmem %s2204_s6, 16 }
 0x29d   : > { %p24630_p1 = scmp.ne.s32.totalorder %s2204_s6, %s24629_s28  ;;  %s24635_s2 = scalar_lea.vmem %s2204_s6, 32 }
 0x29e   : > { %p24636_p6 = scmp.lt.s32.totalorder %s2204_s6, %s2204_s6  ;;  %p24637_p7 = scmp.lt.s32.totalorder %s24635_s2, %s24629_s28 }
 0x29f   : > { %p24631_p4 = pnand %p24630_p1, %p22062_p3 }
 0x2a0   : > { %p24638_p8 = por %p24637_p7, %p24636_p6 }
 0x2a1   : > { %p24632_p5 = pneg %p24631_p4 }
 0x2a2   : > { %21927 = dma.hbm_to_vmem [thread:$0]  (%p22062_p3), %s27959_s11, 16, %s2182_s7, [#allocation56]  }
 0x2a3   : > { %p24639_p2 = pnand %p24638_p8, %p24632_p5 }
 0x2a5   : > { %24642 = shalt.err (!%p24639_p2)
}
 0x2a6   : > { %s27960_s18 = sld [smem:[#allocation146_spill]]  ;;  %s25049_s15 = smov [#allocation63]  }
 0x2a7   : > { %s2231_s5 = sshll.u32 %s25049_s15, 4  ;;  %s25050_s7 = smov [#allocation66]   ;;  %s2232_s5 = int_to_ptr.vmem [resolvable:$true] %s2231_s5 }
 0x2a8   : > { %s2253_s8 = sshll.u32 %s25050_s7, 4  ;;  %s24653_s16 = scalar_lea.vmem %s2232_s5, 16  ;;  %s2254_s8 = int_to_ptr.vmem [resolvable:$true] %s2253_s8 }
 0x2a9   : > { %p24654_p9 = scmp.ne.s32.totalorder %s2232_s5, %s24653_s16  ;;  %s24659_s11 = scalar_lea.vmem %s2232_s5, 32 }
 0x2aa   : > { %p24660_p12 = scmp.lt.s32.totalorder %s2232_s5, %s2232_s5  ;;  %p24661_p13 = scmp.lt.s32.totalorder %s24659_s11, %s24653_s16 }
 0x2ab   : > { %p24655_p10 = pnand %p24654_p9, %p22062_p3 }
 0x2ac   : > { %21931 = dma.hbm_to_vmem [thread:$0]  (%p22062_p3), %s27960_s18, 16, %s2204_s6, [#allocation59]  }
 0x2ad   : > { %p24656_p11 = pneg %p24655_p10  ;;  %p24662_p0 = por %p24661_p13, %p24660_p12 }
 0x2af   : > { %p24663_p1 = pnand %p24662_p0, %p24656_p11 }
 0x2b1   : > { %24666 = shalt.err (!%p24663_p1)
}
 0x2b2   : > { %s27961_s28 = sld [smem:[#allocation150_spill]]  ;;  %s24677_s6 = scalar_lea.vmem %s2254_s8, 16 }
 0x2b3   : > { %p24678_p4 = scmp.ne.s32.totalorder %s2254_s8, %s24677_s6  ;;  %s24683_s2 = scalar_lea.vmem %s2254_s8, 32 }
 0x2b4   : > { %p24684_p7 = scmp.lt.s32.totalorder %s2254_s8, %s2254_s8  ;;  %p24685_p8 = scmp.lt.s32.totalorder %s24683_s2, %s24677_s6 }
 0x2b5   : > { %p24679_p5 = pnand %p24678_p4, %p22062_p3 }
 0x2b6   : > { %p24686_p2 = por %p24685_p8, %p24684_p7 }
 0x2b7   : > { %p24680_p6 = pneg %p24679_p5 }
 0x2b8   : > { %21935 = dma.hbm_to_vmem [thread:$0]  (%p22062_p3), %s27961_s28, 16, %s2232_s5, [#allocation62]  }
 0x2b9   : > { %p24687_p9 = pnand %p24686_p2, %p24680_p6 }
 0x2bb   : > { %24690 = shalt.err (!%p24687_p9)
}
 0x2bc   : > { %s27962_s18 = sld [smem:[#allocation152_spill]]  ;;  %s25051_s15 = smov [#allocation69]  }
 0x2bd   : > { %s2276_s7 = sshll.u32 %s25051_s15, 4  ;;  %s25052_s5 = smov [#allocation72]   ;;  %s2277_s7 = int_to_ptr.vmem [resolvable:$true] %s2276_s7 }
 0x2be   : > { %s2302_s16 = sshll.u32 %s25052_s5, 4  ;;  %s24701_s11 = scalar_lea.vmem %s2277_s7, 1024  ;;  %s2303_s16 = int_to_ptr.vmem [resolvable:$true] %s2302_s16 }
 0x2bf   : > { %p24702_p10 = scmp.ne.s32.totalorder %s2277_s7, %s24701_s11  ;;  %p24708_p13 = scmp.lt.s32.totalorder %s2277_s7, %s2277_s7 }
 0x2c0   : > { %p24709_p0 = scmp.lt.s32.totalorder %s24701_s11, %s24701_s11 }
 0x2c1   : > { %p24703_p11 = pnand %p24702_p10, %p22062_p3 }
 0x2c2   : > { %21939 = dma.hbm_to_vmem [thread:$0]  (%p22062_p3), %s27962_s18, 16, %s2254_s8, [#allocation65]  }
 0x2c3   : > { %p24704_p12 = pneg %p24703_p11  ;;  %p24710_p1 = por %p24709_p0, %p24708_p13 }
 0x2c5   : > { %p24711_p4 = pnand %p24710_p1, %p24704_p12 }
 0x2c7   : > { %24714 = shalt.err (!%p24711_p4)
}
 0x2c8   : > { %s27963_s8 = sld [smem:[#allocation154_spill]]  ;;  %s24725_s28 = scalar_lea.vmem %s2303_s16, 64 }
 0x2c9   : > { %p24726_p5 = scmp.ne.s32.totalorder %s2303_s16, %s24725_s28  ;;  %p24732_p8 = scmp.lt.s32.totalorder %s2303_s16, %s2303_s16 }
 0x2ca   : > { %p24733_p2 = scmp.lt.s32.totalorder %s24725_s28, %s24725_s28 }
 0x2cb   : > { %p24727_p6 = pnand %p24726_p5, %p22062_p3 }
 0x2cc   : > { %p24734_p9 = por %p24733_p2, %p24732_p8 }
 0x2cd   : > { %p24728_p7 = pneg %p24727_p6 }
 0x2ce   : > { %21943 = dma.hbm_to_vmem [thread:$0]  (%p22062_p3), %s27963_s8, 1024, %s2277_s7, [#allocation68], %s27935_s26, %s27935_s26, %s27934_s10  }
 0x2cf   : > { %p24735_p10 = pnand %p24734_p9, %p24728_p7 }
 0x2d1   : > { %24738 = shalt.err (!%p24735_p10)
}
 0x2d2   : > { %s27964_s6 = sld [smem:[#allocation156_spill]]  ;;  %s25053_s2 = smov [#allocation75]  }
 0x2d3   : > { %s2328_s18 = sshll.u32 %s25053_s2, 4  ;;  %s25054_s15 = smov [#allocation78]   ;;  %s2329_s18 = int_to_ptr.vmem [resolvable:$true] %s2328_s18 }
 0x2d4   : > { %s2355_s7 = sshll.u32 %s25054_s15, 4  ;;  %s24749_s5 = scalar_lea.vmem %s2329_s18, 64  ;;  %s2356_s7 = int_to_ptr.vmem [resolvable:$true] %s2355_s7 }
 0x2d5   : > { %p24750_p11 = scmp.ne.s32.totalorder %s2329_s18, %s24749_s5  ;;  %p24756_p0 = scmp.lt.s32.totalorder %s2329_s18, %s2329_s18 }
 0x2d6   : > { %p24757_p1 = scmp.lt.s32.totalorder %s24749_s5, %s24749_s5 }
 0x2d7   : > { %p24751_p12 = pnand %p24750_p11, %p22062_p3 }
 0x2d8   : > { %21947 = dma.hbm_to_vmem [thread:$0]  (%p22062_p3), %s27964_s6, 64, %s2303_s16, [#allocation71], %s27924_s1, %s27924_s1, %s27928_s3  }
 0x2d9   : > { %p24752_p13 = pneg %p24751_p12  ;;  %p24758_p4 = por %p24757_p1, %p24756_p0 }
 0x2db   : > { %p24759_p5 = pnand %p24758_p4, %p24752_p13 }
 0x2dd   : > { %24762 = shalt.err (!%p24759_p5)
}
 0x2de   : > { %s27965_s16 = sld [smem:[#allocation158_spill]]  ;;  %s24773_s11 = scalar_lea.vmem %s2356_s7, 16 }
 0x2df   : > { %p24774_p6 = scmp.ne.s32.totalorder %s2356_s7, %s24773_s11  ;;  %s24779_s8 = scalar_lea.vmem %s2356_s7, 32 }
 0x2e0   : > { %p24780_p2 = scmp.lt.s32.totalorder %s2356_s7, %s2356_s7  ;;  %p24781_p9 = scmp.lt.s32.totalorder %s24779_s8, %s24773_s11 }
 0x2e1   : > { %p24775_p7 = pnand %p24774_p6, %p22062_p3 }
 0x2e2   : > { %p24782_p10 = por %p24781_p9, %p24780_p2 }
 0x2e3   : > { %p24776_p8 = pneg %p24775_p7 }
 0x2e4   : > { %21951 = dma.hbm_to_vmem [thread:$0]  (%p22062_p3), %s27965_s16, 64, %s2329_s18, [#allocation74], %s27924_s1, %s27924_s1, %s27928_s3  }
 0x2e5   : > { %p24783_p11 = pnand %p24782_p10, %p24776_p8 }
 0x2e7   : > { %24786 = shalt.err (!%p24783_p11)
}
 0x2e8   : > { %s27966_s28 = sld [smem:[#allocation160_spill]]  ;;  %s25055_s6 = smov [#allocation79]  }
 0x2e9   : > { %s2383_s2 = sshll.u32 %s25055_s6, 4  ;;  %s2384_s2 = int_to_ptr.vmem [resolvable:$true] %s2383_s2 }
 0x2ea   : > { %s24797_s1 = scalar_lea.vmem %s2384_s2, 1024  ;;  %p24804_p1 = scmp.lt.s32.totalorder %s2384_s2, %s2384_s2 }
 0x2eb   : > { %p24798_p12 = scmp.ne.s32.totalorder %s2384_s2, %s24797_s1  ;;  %p24805_p4 = scmp.lt.s32.totalorder %s24797_s1, %s24797_s1 }
 0x2ed   : > { %p24799_p13 = pnand %p24798_p12, %p22062_p3  ;;  %p24806_p5 = por %p24805_p4, %p24804_p1 }
 0x2ee   : > { %21955 = dma.hbm_to_vmem [thread:$0]  (%p22062_p3), %s27966_s28, 16, %s2356_s7, [#allocation77]  }
 0x2ef   : > { %p24800_p0 = pneg %p24799_p13 }
 0x2f1   : > { %p24807_p6 = pnand %p24806_p5, %p24800_p0 }
 0x2f3   : > { %24810 = shalt.err (!%p24807_p6)
}
 0x2f4   : > { %21957 = dma.hbm_to_vmem [thread:$0]  (%p22062_p3), %s25413_s4, 1024, %s2384_s2, [#allocation80], %s27935_s26, %s27935_s26, %s27934_s10  }
 0x2f5 PF: > { %p27967_p7 = scmp.ne.s32.totalorder %s27919_s23, 0 }
 0x2f6   : > { %p22114_p8 = scmp.eq.s32.totalorder (!%p27967_p7), %s25431_s22, 0 }
 0x2f7   : > { %2410 = sbr.rel (%p27967_p7) target bundleno = 9985 (0x2701), region = 304 }
 0x2fc   : > { %24816 = dma.done.wait (%p22114_p8), [#allocation3], 256  }
 0x2fd   : > { %24818 = vsyncadd (%p22114_p8), [#allocation3], 4294967040 }
 0x2fe   : > { %24820 = dma.done.wait (%p22114_p8), [#allocation5], 64  }
 0x2ff   : > { %24822 = vsyncadd (%p22114_p8), [#allocation5], 4294967232 }
 0x300   : > { %24824 = dma.done.wait (%p22114_p8), [#allocation8], 6144  }
 0x301   : > { %24826 = vsyncadd (%p22114_p8), [#allocation8], 4294961152 }
 0x302   : > { %24828 = dma.done.wait (%p22114_p8), [#allocation11], 3264  }
 0x303   : > { %24830 = vsyncadd (%p22114_p8), [#allocation11], 4294964032 }
 0x304   : > { %24832 = dma.done.wait (%p22114_p8), [#allocation14], 3264  }
 0x305   : > { %24834 = vsyncadd (%p22114_p8), [#allocation14], 4294964032 }
 0x306   : > { %24836 = dma.done.wait (%p22114_p8), [#allocation17], 64  }
 0x307   : > { %24838 = vsyncadd (%p22114_p8), [#allocation17], 4294967232 }
 0x308   : > { %24840 = dma.done.wait (%p22114_p8), [#allocation20], 128  }
 0x309   : > { %24842 = vsyncadd (%p22114_p8), [#allocation20], 4294967168 }
 0x30a   : > { %24844 = dma.done.wait (%p22114_p8), [#allocation23], 64  }
 0x30b   : > { %24846 = vsyncadd (%p22114_p8), [#allocation23], 4294967232 }
 0x30c   : > { %24848 = dma.done.wait (%p22114_p8), [#allocation26], 3104  }
 0x30d   : > { %24850 = vsyncadd (%p22114_p8), [#allocation26], 4294964192 }
 0x30e   : > { %24852 = dma.done.wait (%p22114_p8), [#allocation29], 6144  }
 0x30f   : > { %24854 = vsyncadd (%p22114_p8), [#allocation29], 4294961152 }
 0x310   : > { %24856 = dma.done.wait (%p22114_p8), [#allocation32], 384  }
 0x311   : > { %24858 = vsyncadd (%p22114_p8), [#allocation32], 4294966912 }
 0x312   : > { %24860 = dma.done.wait (%p22114_p8), [#allocation35], 3264  }
 0x313   : > { %24862 = vsyncadd (%p22114_p8), [#allocation35], 4294964032 }
 0x314   : > { %24864 = dma.done.wait (%p22114_p8), [#allocation38], 64  }
 0x315   : > { %24866 = vsyncadd (%p22114_p8), [#allocation38], 4294967232 }
 0x316   : > { %24868 = dma.done.wait (%p22114_p8), [#allocation41], 128  }
 0x317   : > { %24870 = vsyncadd (%p22114_p8), [#allocation41], 4294967168 }
 0x318   : > { %24872 = dma.done.wait (%p22114_p8), [#allocation44], 48  }
 0x319   : > { %24874 = vsyncadd (%p22114_p8), [#allocation44], 4294967248 }
 0x31a   : > { %24876 = dma.done.wait (%p22114_p8), [#allocation47], 1040  }
 0x31b   : > { %24878 = vsyncadd (%p22114_p8), [#allocation47], 4294966256 }
 0x31c   : > { %24880 = dma.done.wait (%p22114_p8), [#allocation50], 2048  }
 0x31d   : > { %24882 = vsyncadd (%p22114_p8), [#allocation50], 4294965248 }
 0x31e   : > { %24884 = dma.done.wait (%p22114_p8), [#allocation53], 128  }
 0x31f   : > { %24886 = vsyncadd (%p22114_p8), [#allocation53], 4294967168 }
 0x320   : > { %24888 = dma.done.wait (%p22114_p8), [#allocation56], 80  }
 0x321   : > { %24890 = vsyncadd (%p22114_p8), [#allocation56], 4294967216 }
 0x322   : > { %24892 = dma.done.wait (%p22114_p8), [#allocation59], 32  }
 0x323   : > { %24894 = vsyncadd (%p22114_p8), [#allocation59], 4294967264 }
 0x324   : > { %24896 = dma.done.wait (%p22114_p8), [#allocation62], 80  }
 0x325   : > { %24898 = vsyncadd (%p22114_p8), [#allocation62], 4294967216 }
 0x326   : > { %24900 = dma.done.wait (%p22114_p8), [#allocation65], 32  }
 0x327   : > { %24902 = vsyncadd (%p22114_p8), [#allocation65], 4294967264 }
 0x328   : > { %24904 = dma.done.wait (%p22114_p8), [#allocation68], 2048  }
 0x329   : > { %24906 = vsyncadd (%p22114_p8), [#allocation68], 4294965248 }
 0x32a   : > { %24908 = dma.done.wait (%p22114_p8), [#allocation71], 1088  }
 0x32b   : > { %24910 = vsyncadd (%p22114_p8), [#allocation71], 4294966208 }
 0x32c   : > { %24912 = dma.done.wait (%p22114_p8), [#allocation74], 128  }
 0x32d   : > { %24914 = vsyncadd (%p22114_p8), [#allocation74], 4294967168 }
 0x32e   : > { %24916 = dma.done.wait (%p22114_p8), [#allocation77], 1040  }
 0x32f   : > { %24918 = vsyncadd (%p22114_p8), [#allocation77], 4294966256 }
 0x330   : > { %24920 = dma.done.wait (%p22114_p8), [#allocation80], 1024  }
 0x331   : > { %24922 = vsyncadd (%p22114_p8), [#allocation80], 4294966272  ;;  %s27968_s23 = sld [smem:[#allocation109_spill]]  ;;  %p2773_p3 = scmp.lt.s32.totalorder %s25431_s22, 1  ;;  %vm2937_vm0 = vcmask 523264   ;;  %v2810_v28 = vld [vmem:[#allocation2 + $0x8] sm:$0xff]  ;;  %v2811_v55 = vlaneseq }
 0x332   : > { %s27969_s3 = sld [smem:[#allocation108_spill]]  ;;  %v2809_v29 = vld [vmem:[#allocation2] sm:$0xff]  ;;  %v22347_v48 = vld [vmem:[#allocation7] ss:$8 sps:$4 sm:$0xff]   ;;  %v22349_v50 = vld [vmem:[#allocation7 + $0x14] ss:$8 sps:$4 sm:$0xff]  }
 0x333   : > { %s27986_s22 = smov (!%p2773_p3, %s25431_s22), 1  ;;  %v22343_v46 = vld [vmem:[#allocation7 + $0x4] ss:$8 sps:$4 sm:$0xff]   ;;  %v22348_v49 = vld [vmem:[#allocation7 + $0x60] ss:$8 sps:$4 sm:$0xff]   ;;  %v25944_v56 = vshrl.u32 %v2811_v55, 7 }
 0x334   : > { %s20872_s10 = sshll.u32 %s27986_s22, 4  ;;  %v22345_v47 = vld [vmem:[#allocation7 + $0x64] ss:$8 sps:$4 sm:$0xff]   ;;  %19787 = vmatprep.subr.msk.bf16.mxu1 %vm2937_vm0, %v22343_v46  ;;  %v2982_v59 = vld [vmem:[#allocation4] sm:$0x3]  ;;  %vm25057_vm1 = vmmov 0  }
 0x335   : > { %3438 = vmatpush1.bf16.xpose.msra.mxu1 %v22347_v48  ;;  %v22351_v51 = vld [vmem:[#allocation7 + $0x84] ss:$8 sps:$4 sm:$0xff]   ;;  %v25947_v57 = vsub.s32 0, %v25944_v56  ;;  %v25950_v58 = vsub.s32 1, %v25944_v56  ;;  %v2983_v60 = vld [vmem:[#allocation6] sm:$0x3] }
 0x336   : > { %19791 = vmatprep.subr.msk.bf16.mxu1 %vm2937_vm0, %v22349_v50  ;;  %v22403_v46 = vld [vmem:[#allocation9 + $0x34] ss:$8 sps:$4 sm:$0xff]   ;;  %v22407_v48 = vld [vmem:[#allocation9 + $0x30] ss:$8 sps:$4 sm:$0xff]   ;;  %s27970_s18 = sld [smem:[#allocation114_spill]]  ;;  %vm5451_vm2 = vcmask 130048  }
 0x337   : > { %v22307_v0 = vld [vmem:[%s27968_s23 + $0x74] ss:$8 sps:$4 sm:$0xff]   ;;  %v22309_v1 = vld [vmem:[%s27968_s23 + $0x70] ss:$8 sps:$4 sm:$0xff]   ;;  %v22310_v2 = vld [vmem:[%s27968_s23 + $0x64] ss:$8 sps:$4 sm:$0xff]   ;;  %v3312_v61 = vrot.slane %v2982_v59, %v25947_v57  ;;  %v3316_v62 = vrot.slane %v2982_v59, %v25950_v58 }
 0x338   : > { %2941 = vmatprep.subr.bf16.mxu0 %v22307_v0  ;;  %v22312_v3 = vld [vmem:[%s27968_s23 + $0x60] ss:$8 sps:$4 sm:$0xff]   ;;  %v22313_v4 = vld [vmem:[%s27968_s23 + $0x54] ss:$8 sps:$4 sm:$0xff]   ;;  %v22315_v5 = vld [vmem:[%s27968_s23 + $0x50] ss:$8 sps:$4 sm:$0xff]   ;;  %s25909_s26 = scalar_lea.vmem %s27969_s3, %s20872_s10  ;;  %v3325_v0 = vrot.slane %v2983_v60, %v25947_v57 }
 0x339   : > { %2942 = vmatpush1.bf16.msra.mxu0 %v22309_v1  ;;  %v22316_v6 = vld [vmem:[%s27968_s23 + $0x44] ss:$8 sps:$4 sm:$0xff]   ;;  %v22318_v7 = vld [vmem:[%s27968_s23 + $0x40] ss:$8 sps:$4 sm:$0xff]   ;;  %v22319_v8 = vld [vmem:[%s27968_s23 + $0x34] ss:$8 sps:$4 sm:$0xff]   ;;  %v3329_v1 = vrot.slane %v2983_v60, %v25950_v58 }
 0x33a   : > { %2943 = vmatprep.subr.bf16.mxu0 %v22310_v2  ;;  %v22321_v9 = vld [vmem:[%s27968_s23 + $0x30] ss:$8 sps:$4 sm:$0xff]   ;;  %v22322_v10 = vld [vmem:[%s27968_s23 + $0x24] ss:$8 sps:$4 sm:$0xff]   ;;  %v22324_v12 = vld [vmem:[%s27968_s23 + $0x20] ss:$8 sps:$4 sm:$0xff]  }
 0x33b   : > { %v2784_v11 = vld [vmem:[%s25909_s26 + $0x8] sm:$0xff]  ;;  %v22325_v14 = vld [vmem:[%s27968_s23 + $0x14] ss:$8 sps:$4 sm:$0xff]   ;;  %v22327_v15 = vld [vmem:[%s27968_s23 + $0x10] ss:$8 sps:$4 sm:$0xff]   ;;  %vm6176_vm3 = vcmask 1043456  }
 0x33c   : > { %v2816_v13 = vpack.c.bf16 %v2784_v11, %v2784_v11  ;;  %v22328_v16 = vld [vmem:[%s27968_s23 + $0x4] ss:$8 sps:$4 sm:$0xff]   ;;  %v22330_v17 = vld [vmem:[%s27968_s23] ss:$8 sps:$4 sm:$0xff]   ;;  %v22331_v18 = vld [vmem:[%s27968_s23 + $0xb4] ss:$8 sps:$4 sm:$0xff]  }
 0x33d   : > { %2944 = vmatpush1.bf16.msra.mxu0 %v22312_v3  ;;  %v22333_v19 = vld [vmem:[%s27968_s23 + $0xb0] ss:$8 sps:$4 sm:$0xff]   ;;  %v22334_v20 = vld [vmem:[%s27968_s23 + $0xa4] ss:$8 sps:$4 sm:$0xff]   ;;  %v22336_v21 = vld [vmem:[%s27968_s23 + $0xa0] ss:$8 sps:$4 sm:$0xff]  }
 0x33e   : > { %2945 = vmatprep.subr.bf16.mxu0 %v22313_v4  ;;  %19772 = vmatprep.mubr.msk.bf16.mxu0 %vm2937_vm0, %v2816_v13  ;;  %v22337_v22 = vld [vmem:[%s27968_s23 + $0x94] ss:$8 sps:$4 sm:$0xff]   ;;  %v22339_v23 = vld [vmem:[%s27968_s23 + $0x90] ss:$8 sps:$4 sm:$0xff]   ;;  %v22340_v24 = vld [vmem:[%s27968_s23 + $0x84] ss:$8 sps:$4 sm:$0xff]  }
 0x33f   : > { %v22342_v25 = vld [vmem:[%s27968_s23 + $0x80] ss:$8 sps:$4 sm:$0xff]   ;;  %v22354_v11 = vld [vmem:[#allocation7 + $0x80] ss:$8 sps:$4 sm:$0xff]   ;;  %v22419_v60 = vld [vmem:[#allocation9 + $0x70] ss:$8 sps:$4 sm:$0xff]  }
 0x340   : > { %v2783_v26 = vld [vmem:[%s25909_s26] sm:$0xff]  ;;  %v22409_v50 = vld [vmem:[#allocation9 + $0x54] ss:$8 sps:$4 sm:$0xff]   ;;  %vm6028_vm5 = vcmask 64512   ;;  %s27971_s15 = sld [smem:[#allocation118_spill]]  ;;  %vm15448_vm6 = vcmask 261120  }
 0x341   : > { %2946 = vmatpush1.bf16.msra.mxu0 %v22315_v5  ;;  %v2815_v27 = vpack.c.bf16 %v2783_v26, %v2783_v26  ;;  %v22357_v13 = vld [vmem:[#allocation7 + $0xa4] ss:$8 sps:$4 sm:$0xff]   ;;  %v22377_v26 = vld [vmem:[#allocation7 + $0x50] ss:$8 sps:$4 sm:$0xff]   ;;  %s27972_s7 = sld [smem:[#allocation120_spill]] }
 0x342   : > { %2947 = vmatprep.subr.bf16.mxu0 %v22316_v6  ;;  %v22417_v59 = vld [vmem:[#allocation10 + $0x64] ss:$8 sps:$4 sm:$0xff]   ;;  %s27973_s5 = sld [smem:[#allocation130_spill]] }
 0x343   : > { %s27974_s16 = sld [smem:[#allocation132_spill]] }
 0x344   : > { %s27975_s11 = sld [smem:[#allocation133_spill]] }
 0x345   : > { %2948 = vmatpush1.bf16.msra.mxu0 %v22318_v7  ;;  %s27976_s8 = sld [smem:[#allocation134_spill]] }
 0x346   : > { %2949 = vmatprep.subr.bf16.mxu0 %v22319_v8  ;;  %s27977_s28 = sld [smem:[#allocation143_spill]] }
 0x347   : > { %s27978_s6 = sld [smem:[#allocation147_spill]] }
 0x348   : > { %s27979_s2 = sld [smem:[#allocation149_spill]] }
 0x349   : > { %2950 = vmatpush1.bf16.msra.mxu0 %v22321_v9  ;;  %s27980_s1 = sld [smem:[#allocation163_spill]] }
 0x34a   : > { %2951 = vmatprep.subr.bf16.mxu0 %v22322_v10  ;;  %v22353_v10 = vld [vmem:[#allocation7 + $0x10] ss:$8 sps:$4 sm:$0xff]   ;;  %s27981_s3 = sld [smem:[#allocation161_spill]] }
 0x34b   : > { %s27982_s10 = sld [smem:[#allocation162_spill]] }
 0x34c   : > { %s27983_s26 = sld [smem:[#allocation165_spill]] }
 0x34d   : > { %2952 = vmatpush1.bf16.msra.mxu0 %v22324_v12  ;;  %v22355_v12 = vld [vmem:[#allocation7 + $0x24] ss:$8 sps:$4 sm:$0xff]  }
 0x34e   : > { %2953 = vmatprep.subr.bf16.mxu0 %v22325_v14  ;;  %v22359_v14 = vld [vmem:[#allocation7 + $0x20] ss:$8 sps:$4 sm:$0xff]  }
 0x351   : > { %2954 = vmatpush1.bf16.msra.mxu0 %v22327_v15  ;;  %v22360_v15 = vld [vmem:[#allocation7 + $0xa0] ss:$8 sps:$4 sm:$0xff]  }
 0x352   : > { %2955 = vmatprep.subr.bf16.mxu0 %v22328_v16  ;;  %v22361_v16 = vld [vmem:[#allocation7 + $0x34] ss:$8 sps:$4 sm:$0xff]  }
 0x355   : > { %2956 = vmatpush1.bf16.msra.mxu0 %v22330_v17  ;;  %v22363_v17 = vld [vmem:[#allocation9 + $0x4] ss:$8 sps:$4 sm:$0xff]  }
 0x356   : > { %2965 = vmatprep.subr.bf16.mxu0 %v22331_v18  ;;  %v22365_v18 = vld [vmem:[#allocation7 + $0x30] ss:$8 sps:$4 sm:$0xff]  }
 0x359   : > { %2966 = vmatpush2.bf16.msra.mxu0 %v22333_v19  ;;  %v22366_v19 = vld [vmem:[#allocation9] ss:$8 sps:$4 sm:$0xff]  }
 0x35a   : > { %2967 = vmatprep.subr.bf16.mxu0 %v22334_v20  ;;  %v22367_v20 = vld [vmem:[#allocation7 + $0x44] ss:$8 sps:$4 sm:$0xff]  }
 0x35d   : > { %2968 = vmatpush2.bf16.msra.mxu0 %v22336_v21  ;;  %v22369_v21 = vld [vmem:[#allocation9 + $0x24] ss:$8 sps:$4 sm:$0xff]  }
 0x35e   : > { %2969 = vmatprep.subr.bf16.mxu0 %v22337_v22  ;;  %v22371_v22 = vld [vmem:[#allocation7 + $0x40] ss:$8 sps:$4 sm:$0xff]  }
 0x361   : > { %2970 = vmatpush2.bf16.msra.mxu0 %v22339_v23  ;;  %v22372_v23 = vld [vmem:[#allocation9 + $0x20] ss:$8 sps:$4 sm:$0xff]  }
 0x362   : > { %2971 = vmatprep.subr.bf16.mxu0 %v22340_v24  ;;  %v22373_v24 = vld [vmem:[#allocation7 + $0x54] ss:$8 sps:$4 sm:$0xff]  }
 0x365   : > { %2972 = vmatpush2.bf16.msra.mxu0 %v22342_v25  ;;  %v22375_v25 = vld [vmem:[#allocation9 + $0x44] ss:$8 sps:$4 sm:$0xff]  }
 0x366   : > { %19811 = vmatprep.subr.msk.bf16.mxu0 %vm2937_vm0, %v22345_v47  ;;  %v22405_v47 = vld [vmem:[#allocation10 + $0x24] ss:$8 sps:$4 sm:$0xff]  }
 0x368   : > { %2974 = vmatmul.mubr.bf16.vlgmr.msra.gmra.mxu0 %v2815_v27  ;;  %v22378_v27 = vld [vmem:[#allocation9 + $0x40] ss:$8 sps:$4 sm:$0xff]  }
 0x369   : > { %3750 = vmatpush1.bf16.xpose.msra.mxu0 %v22348_v49  ;;  %v22408_v49 = vld [vmem:[#allocation10 + $0x20] ss:$8 sps:$4 sm:$0xff]  }
 0x36a   : > { %19819 = vmatprep.subr.msk.bf16.mxu0 %vm2937_vm0, %v22351_v51  ;;  %v22411_v51 = vld [vmem:[#allocation10 + $0x44] ss:$8 sps:$4 sm:$0xff]  }
 0x428   : > { %v2975_v30 = vpop.f32.mrf.mxu0 }
 0x429   : > { %v25931_v33 = vadd.f32 %v2975_v30, %v2809_v29  ;;  %v22381_v29 = vld [vmem:[#allocation9 + $0x64] ss:$8 sps:$4 sm:$0xff]   ;;  %v22383_v30 = vld [vmem:[#allocation7 + $0x70] ss:$8 sps:$4 sm:$0xff]  }
 0x42a   : > { %v2977_v31 = vpop.f32.mrf.mxu0 }
 0x42b   : > { %v25929_v32 = vadd.f32 %v2977_v31, %v2810_v28  ;;  %v22379_v28 = vld [vmem:[#allocation7 + $0x74] ss:$8 sps:$4 sm:$0xff]   ;;  %v22384_v31 = vld [vmem:[#allocation9 + $0x60] ss:$8 sps:$4 sm:$0xff]  }
 0x42c   : > { %v2979_v34 = vpop.f32.mrf.mxu0 }
 0x42d   : > { %v3289_v35 = vsel %vm2937_vm0, %v25929_v32, 0.0  ;;  %v22385_v34 = vld [vmem:[#allocation7 + $0x94] ss:$8 sps:$4 sm:$0xff]  }
 0x42e   : > { %v2980_v36 = vpop.f32.mrf.mxu0  ;;  %v3290_v37 = vadd.f32 %v3289_v35, %v25931_v33  ;;  %v22387_v35 = vld [vmem:[#allocation9 + $0x84] ss:$8 sps:$4 sm:$0xff]  }
 0x42f   : > { %v22389_v36 = vld [vmem:[#allocation7 + $0x90] ss:$8 sps:$4 sm:$0xff]  }
 0x430   : > { %3291 = vadd.xlane.f32.xlu0 %v3290_v37  ;;  %v22390_v37 = vld [vmem:[#allocation9 + $0x80] ss:$8 sps:$4 sm:$0xff]  }
 0x4b9   : > { %v3292_v38 = vpop.xlane.xlu0 %3291 }
 0x4ba   : > { %v3294_v39 = vmul.f32 0.0052083335, %v3292_v38  ;;  %v22391_v38 = vld [vmem:[#allocation7 + $0xb4] ss:$8 sps:$4 sm:$0xff]  }
 0x4bc   : > { %v3295_v40 = vsub.f32 %v25931_v33, %v3294_v39  ;;  %v3296_v41 = vsub.f32 %v25929_v32, %v3294_v39  ;;  %v22393_v39 = vld [vmem:[#allocation9 + $0xa4] ss:$8 sps:$4 sm:$0xff]  }
 0x4be   : > { %v3297_v42 = vmul.f32 %v3295_v40, %v3295_v40  ;;  %v3298_v43 = vmul.f32 %v3296_v41, %v3296_v41 }
 0x4c0   : > { %v3299_v44 = vsel %vm2937_vm0, %v3298_v43, 0.0  ;;  %v22399_v43 = vld [vmem:[#allocation10 + $0x4] ss:$8 sps:$4 sm:$0xff]  }
 0x4c1   : > { %v3300_v45 = vadd.f32 %v3299_v44, %v3297_v42  ;;  %v22397_v42 = vld [vmem:[#allocation9 + $0x14] ss:$8 sps:$4 sm:$0xff]   ;;  %v22401_v44 = vld [vmem:[#allocation9 + $0x10] ss:$8 sps:$4 sm:$0xff]  }
 0x4c3   : > { %3301 = vadd.xlane.f32.xlu0 %v3300_v45  ;;  %v22402_v45 = vld [vmem:[#allocation10] ss:$8 sps:$4 sm:$0xff]  }
 0x54c   : > { %v3302_v52 = vpop.xlane.xlu0 %3301 }
 0x54d   : > { %v3303_v53 = vmul.f32 0.0052083335, %v3302_v52  ;;  %v22413_v52 = vld [vmem:[#allocation9 + $0x50] ss:$8 sps:$4 sm:$0xff]  }
 0x54f   : > { %v3304_v54 = vadd.f32 1e-06, %v3303_v53  ;;  %v22414_v53 = vld [vmem:[#allocation10 + $0x40] ss:$8 sps:$4 sm:$0xff]  }
 0x551   : > { %23379 = vrsqrt.f32 %v3304_v54  ;;  %v22415_v54 = vld [vmem:[#allocation9 + $0x74] ss:$8 sps:$4 sm:$0xff]  }
 0x55e   : > { %v23380_v63 = vpop.eup %23379 }
 0x55f   : > { %v3306_v2 = vmul.f32 %v23380_v63, %v3295_v40  ;;  %v3307_v3 = vmul.f32 %v23380_v63, %v3296_v41  ;;  %v22395_v40 = vld [vmem:[#allocation7 + $0xb0] ss:$8 sps:$4 sm:$0xff]   ;;  %v22396_v41 = vld [vmem:[#allocation9 + $0xa0] ss:$8 sps:$4 sm:$0xff]   ;;  %v22423_v63 = vld [vmem:[#allocation10 + $0x84] ss:$8 sps:$4 sm:$0xff]  }
 0x561   : > { %v3319_v4 = vmul.f32 %v3312_v61, %v3306_v2  ;;  %v3320_v5 = vmul.f32 %v3316_v62, %v3307_v3  ;;  %v22420_v61 = vld [vmem:[#allocation10 + $0x60] ss:$8 sps:$4 sm:$0xff]   ;;  %v22421_v62 = vld [vmem:[#allocation9 + $0x94] ss:$8 sps:$4 sm:$0xff]   ;;  %v22429_v3 = vld [vmem:[#allocation10 + $0xa4] ss:$8 sps:$4 sm:$0xff]  }
 0x562   : > { %v22427_v2 = vld [vmem:[#allocation9 + $0xb4] ss:$8 sps:$4 sm:$0xff]  }
 0x563   : > { %v3332_v6 = vadd.f32 %v3325_v0, %v3319_v4  ;;  %v3333_v7 = vadd.f32 %v3329_v1, %v3320_v5  ;;  %v22425_v0 = vld [vmem:[#allocation9 + $0x90] ss:$8 sps:$4 sm:$0xff]   ;;  %v22426_v1 = vld [vmem:[#allocation10 + $0x80] ss:$8 sps:$4 sm:$0xff]  }
 0x564   : > { %v22431_v4 = vld [vmem:[#allocation9 + $0xb0] ss:$8 sps:$4 sm:$0xff]   ;;  %v22432_v5 = vld [vmem:[#allocation10 + $0xa0] ss:$8 sps:$4 sm:$0xff]  }
 0x565   : > { %v25956_v8 = vpack.c.bf16 %v3332_v6, %v3332_v6  ;;  %v25958_v9 = vpack.c.bf16 %v3333_v7, %v3333_v7  ;;  %v22433_v6 = vld [vmem:[#allocation10 + $0x14] ss:$8 sps:$4 sm:$0xff]   ;;  %v25056_v7 = vmov 0.0  }
 0x567   : > { %19788 = vmatprep.mubr.msk.bf16.mxu1 %vm2937_vm0, %v25958_v9  ;;  %19812 = vmatprep.mubr.msk.bf16.mxu0 %vm2937_vm0, %v25958_v9 }
 0x568   : > { %3456 = vmatmul.mubr.bf16.vlgmr.msra.gmra.mxu1 %v25956_v8  ;;  %3768 = vmatmul.mubr.bf16.vlgmr.msra.gmra.mxu0 %v25956_v8 }
 0x569   : > { %3490 = vmatpush1.bf16.xpose.msra.mxu1 %v22353_v10  ;;  %19792 = vmatprep.mubr.msk.bf16.mxu1 %vm2937_vm0, %v25958_v9  ;;  %v22435_v10 = vld [vmem:[#allocation10 + $0x10] ss:$8 sps:$4 sm:$0xff]  }
 0x56a   : > { %3854 = vmatpush1.bf16.xpose.msra.mxu0 %v22354_v11  ;;  %19820 = vmatprep.mubr.msk.bf16.mxu0 %vm2937_vm0, %v25958_v9  ;;  %v22436_v11 = vld [vmem:[#allocation10 + $0x34] ss:$8 sps:$4 sm:$0xff]  }
 0x56b   : > { %19795 = vmatprep.subr.msk.bf16.mxu1 %vm2937_vm0, %v22355_v12  ;;  %19827 = vmatprep.subr.msk.bf16.mxu0 %vm2937_vm0, %v22357_v13  ;;  %v22438_v12 = vld [vmem:[#allocation10 + $0x30] ss:$8 sps:$4 sm:$0xff]   ;;  %v22439_v13 = vld [vmem:[#allocation10 + $0x54] ss:$8 sps:$4 sm:$0xff]  }
 0x570   : > { %3508 = vmatmul.mubr.bf16.vlgmr.msra.gmra.mxu1 %v25956_v8 }
 0x571   : > { %3872 = vmatmul.mubr.bf16.vlgmr.msra.gmra.mxu0 %v25956_v8  ;;  %3542 = vmatpush1.bf16.xpose.msra.mxu1 %v22359_v14  ;;  %v22441_v14 = vld [vmem:[#allocation10 + $0x50] ss:$8 sps:$4 sm:$0xff]  }
 0x572   : > { %19796 = vmatprep.mubr.msk.bf16.mxu1 %vm2937_vm0, %v25958_v9  ;;  %3958 = vmatpush1.bf16.xpose.msra.mxu0 %v22360_v15  ;;  %v22442_v15 = vld [vmem:[#allocation10 + $0x74] ss:$8 sps:$4 sm:$0xff]  }
 0x573   : > { %19828 = vmatprep.mubr.msk.bf16.mxu0 %vm2937_vm0, %v25958_v9  ;;  %19799 = vmatprep.subr.msk.bf16.mxu1 %vm2937_vm0, %v22361_v16  ;;  %v22444_v16 = vld [vmem:[#allocation10 + $0x70] ss:$8 sps:$4 sm:$0xff]  }
 0x574   : > { %19847 = vmatprep.subr.msk.bf16.mxu0 %vm2937_vm0, %v22363_v17  ;;  %v22445_v17 = vld [vmem:[#allocation10 + $0x94] ss:$8 sps:$4 sm:$0xff]  }
 0x578   : > { %3560 = vmatmul.mubr.bf16.vlgmr.msra.gmra.mxu1 %v25956_v8 }
 0x579   : > { %3976 = vmatmul.mubr.bf16.vlgmr.msra.gmra.mxu0 %v25956_v8  ;;  %3594 = vmatpush1.bf16.xpose.msra.mxu1 %v22365_v18  ;;  %v22447_v18 = vld [vmem:[#allocation10 + $0x90] ss:$8 sps:$4 sm:$0xff]  }
 0x57a   : > { %19800 = vmatprep.mubr.msk.bf16.mxu1 %vm2937_vm0, %v25958_v9  ;;  %4134 = vmatpush1.bf16.xpose.msra.mxu0 %v22366_v19  ;;  %v22448_v19 = vld [vmem:[#allocation10 + $0xb4] ss:$8 sps:$4 sm:$0xff]  }
 0x57b   : > { %19848 = vmatprep.mubr.msk.bf16.mxu0 %vm2937_vm0, %v25958_v9  ;;  %19803 = vmatprep.subr.msk.bf16.mxu1 %vm2937_vm0, %v22367_v20  ;;  %v22450_v20 = vld [vmem:[#allocation10 + $0xb0] ss:$8 sps:$4 sm:$0xff]  }
 0x57c   : > { %19855 = vmatprep.subr.msk.bf16.mxu0 %vm2937_vm0, %v22369_v21 }
 0x580   : > { %3612 = vmatmul.mubr.bf16.vlgmr.msra.gmra.mxu1 %v25956_v8 }
 0x581   : > { %4152 = vmatmul.mubr.bf16.vlgmr.msra.gmra.mxu0 %v25956_v8  ;;  %3646 = vmatpush1.bf16.xpose.msra.mxu1 %v22371_v22 }
 0x582   : > { %19804 = vmatprep.mubr.msk.bf16.mxu1 %vm2937_vm0, %v25958_v9  ;;  %4238 = vmatpush1.bf16.xpose.msra.mxu0 %v22372_v23 }
 0x583   : > { %19856 = vmatprep.mubr.msk.bf16.mxu0 %vm2937_vm0, %v25958_v9  ;;  %19807 = vmatprep.subr.msk.bf16.mxu1 %vm2937_vm0, %v22373_v24 }
 0x584   : > { %19863 = vmatprep.subr.msk.bf16.mxu0 %vm2937_vm0, %v22375_v25 }
 0x588   : > { %3664 = vmatmul.mubr.bf16.vlgmr.msra.gmra.mxu1 %v25956_v8 }
 0x589   : > { %4256 = vmatmul.mubr.bf16.vlgmr.msra.gmra.mxu0 %v25956_v8  ;;  %3698 = vmatpush1.bf16.xpose.msra.mxu1 %v22377_v26 }
 0x58a   : > { %19808 = vmatprep.mubr.msk.bf16.mxu1 %vm2937_vm0, %v25958_v9  ;;  %4342 = vmatpush1.bf16.xpose.msra.mxu0 %v22378_v27 }
 0x58b   : > { %19864 = vmatprep.mubr.msk.bf16.mxu0 %vm2937_vm0, %v25958_v9  ;;  %19815 = vmatprep.subr.msk.bf16.mxu1 %vm2937_vm0, %v22379_v28 }
 0x58c   : > { %19871 = vmatprep.subr.msk.bf16.mxu0 %vm2937_vm0, %v22381_v29 }
 0x590   : > { %3716 = vmatmul.mubr.bf16.vlgmr.msra.gmra.mxu1 %v25956_v8 }
 0x591   : > { %4360 = vmatmul.mubr.bf16.vlgmr.msra.gmra.mxu0 %v25956_v8  ;;  %3802 = vmatpush1.bf16.xpose.msra.mxu1 %v22383_v30 }
 0x592   : > { %19816 = vmatprep.mubr.msk.bf16.mxu1 %vm2937_vm0, %v25958_v9  ;;  %4446 = vmatpush1.bf16.xpose.msra.mxu0 %v22384_v31 }
 0x593   : > { %19872 = vmatprep.mubr.msk.bf16.mxu0 %vm2937_vm0, %v25958_v9  ;;  %19823 = vmatprep.subr.msk.bf16.mxu1 %vm2937_vm0, %v22385_v34 }
 0x594   : > { %19879 = vmatprep.subr.msk.bf16.mxu0 %vm2937_vm0, %v22387_v35 }
 0x598   : > { %3820 = vmatmul.mubr.bf16.vlgmr.msra.gmra.mxu1 %v25956_v8 }
 0x599   : > { %4464 = vmatmul.mubr.bf16.vlgmr.msra.gmra.mxu0 %v25956_v8  ;;  %3906 = vmatpush1.bf16.xpose.msra.mxu1 %v22389_v36 }
 0x59a   : > { %19824 = vmatprep.mubr.msk.bf16.mxu1 %vm2937_vm0, %v25958_v9  ;;  %4550 = vmatpush1.bf16.xpose.msra.mxu0 %v22390_v37 }
 0x59b   : > { %19880 = vmatprep.mubr.msk.bf16.mxu0 %vm2937_vm0, %v25958_v9  ;;  %19831 = vmatprep.subr.msk.bf16.mxu1 %vm2937_vm0, %v22391_v38 }
 0x59c   : > { %19887 = vmatprep.subr.msk.bf16.mxu0 %vm2937_vm0, %v22393_v39 }
 0x5a0   : > { %3924 = vmatmul.mubr.bf16.vlgmr.msra.gmra.mxu1 %v25956_v8 }
 0x5a1   : > { %4568 = vmatmul.mubr.bf16.vlgmr.msra.gmra.mxu0 %v25956_v8  ;;  %4010 = vmatpush1.bf16.xpose.msra.mxu1 %v22395_v40 }
 0x5a2   : > { %19832 = vmatprep.mubr.msk.bf16.mxu1 %vm2937_vm0, %v25958_v9  ;;  %4654 = vmatpush1.bf16.xpose.msra.mxu0 %v22396_v41 }
 0x5a3   : > { %19888 = vmatprep.mubr.msk.bf16.mxu0 %vm2937_vm0, %v25958_v9  ;;  %19851 = vmatprep.subr.msk.bf16.mxu1 %vm2937_vm0, %v22397_v42 }
 0x5a4   : > { %19907 = vmatprep.subr.msk.bf16.mxu0 %vm2937_vm0, %v22399_v43 }
 0x5a8   : > { %4028 = vmatmul.mubr.bf16.vlgmr.msra.gmra.mxu1 %v25956_v8 }
 0x5a9   : > { %4672 = vmatmul.mubr.bf16.vlgmr.msra.gmra.mxu0 %v25956_v8  ;;  %4186 = vmatpush1.bf16.xpose.msra.mxu1 %v22401_v44 }
 0x5aa   : > { %19852 = vmatprep.mubr.msk.bf16.mxu1 %vm2937_vm0, %v25958_v9  ;;  %4830 = vmatpush1.bf16.xpose.msra.mxu0 %v22402_v45  ;;  %v19833_v45 = vld [vmem:[#allocation12] ss:$0 sm:$0xff] }
 0x5ab   : > { %19908 = vmatprep.mubr.msk.bf16.mxu0 %vm2937_vm0, %v25958_v9  ;;  %19859 = vmatprep.subr.msk.bf16.mxu1 %vm2937_vm0, %v22403_v46 }
 0x5ac   : > { %19915 = vmatprep.subr.msk.bf16.mxu0 %vm2937_vm0, %v22405_v47 }
 0x5b0   : > { %4204 = vmatmul.mubr.bf16.vlgmr.msra.gmra.mxu1 %v25956_v8 }
 0x5b1   : > { %4848 = vmatmul.mubr.bf16.vlgmr.msra.gmra.mxu0 %v25956_v8  ;;  %4290 = vmatpush1.bf16.xpose.msra.mxu1 %v22407_v48 }
 0x5b2   : > { %19860 = vmatprep.mubr.msk.bf16.mxu1 %vm2937_vm0, %v25958_v9  ;;  %4934 = vmatpush1.bf16.xpose.msra.mxu0 %v22408_v49 }
 0x5b3   : > { %19916 = vmatprep.mubr.msk.bf16.mxu0 %vm2937_vm0, %v25958_v9  ;;  %19867 = vmatprep.subr.msk.bf16.mxu1 %vm2937_vm0, %v22409_v50 }
 0x5b4   : > { %19923 = vmatprep.subr.msk.bf16.mxu0 %vm2937_vm0, %v22411_v51 }
 0x5b8   : > { %4308 = vmatmul.mubr.bf16.vlgmr.msra.gmra.mxu1 %v25956_v8 }
 0x5b9   : > { %4952 = vmatmul.mubr.bf16.vlgmr.msra.gmra.mxu0 %v25956_v8  ;;  %4394 = vmatpush1.bf16.xpose.msra.mxu1 %v22413_v52 }
 0x5ba   : > { %19868 = vmatprep.mubr.msk.bf16.mxu1 %vm2937_vm0, %v25958_v9  ;;  %5038 = vmatpush1.bf16.xpose.msra.mxu0 %v22414_v53  ;;  %v19773_v53 = vld [vmem:[%s27970_s18] ss:$0 sm:$0xff] }
 0x5bb   : > { %19924 = vmatprep.mubr.msk.bf16.mxu0 %vm2937_vm0, %v25958_v9  ;;  %19875 = vmatprep.subr.msk.bf16.mxu1 %vm2937_vm0, %v22415_v54 }
 0x5bc   : > { %19931 = vmatprep.subr.msk.bf16.mxu0 %vm2937_vm0, %v22417_v59 }
 0x5c0   : > { %4412 = vmatmul.mubr.bf16.vlgmr.msra.gmra.mxu1 %v25956_v8 }
 0x5c1   : > { %5056 = vmatmul.mubr.bf16.vlgmr.msra.gmra.mxu0 %v25956_v8  ;;  %4498 = vmatpush1.bf16.xpose.msra.mxu1 %v22419_v60 }
 0x5c2   : > { %19876 = vmatprep.mubr.msk.bf16.mxu1 %vm2937_vm0, %v25958_v9  ;;  %5142 = vmatpush1.bf16.xpose.msra.mxu0 %v22420_v61 }
 0x5c3   : > { %19932 = vmatprep.mubr.msk.bf16.mxu0 %vm2937_vm0, %v25958_v9  ;;  %19883 = vmatprep.subr.msk.bf16.mxu1 %vm2937_vm0, %v22421_v62  ;;  %v19835_v62 = vld [vmem:[#allocation12 + $0x2] ss:$0 sm:$0xff] }
 0x5c4   : > { %19939 = vmatprep.subr.msk.bf16.mxu0 %vm2937_vm0, %v22423_v63 }
 0x5c8   : > { %4516 = vmatmul.mubr.bf16.vlgmr.msra.gmra.mxu1 %v25956_v8 }
 0x5c9   : > { %5160 = vmatmul.mubr.bf16.vlgmr.msra.gmra.mxu0 %v25956_v8  ;;  %4602 = vmatpush1.bf16.xpose.msra.mxu1 %v22425_v0 }
 0x5ca   : > { %19884 = vmatprep.mubr.msk.bf16.mxu1 %vm2937_vm0, %v25958_v9  ;;  %5246 = vmatpush1.bf16.xpose.msra.mxu0 %v22426_v1 }
 0x5cb   : > { %19940 = vmatprep.mubr.msk.bf16.mxu0 %vm2937_vm0, %v25958_v9  ;;  %19891 = vmatprep.subr.msk.bf16.mxu1 %vm2937_vm0, %v22427_v2 }
 0x5cc   : > { %19947 = vmatprep.subr.msk.bf16.mxu0 %vm2937_vm0, %v22429_v3 }
 0x5d0   : > { %4620 = vmatmul.mubr.bf16.vlgmr.msra.gmra.mxu1 %v25956_v8 }
 0x5d1   : > { %5264 = vmatmul.mubr.bf16.vlgmr.msra.gmra.mxu0 %v25956_v8  ;;  %4706 = vmatpush1.bf16.xpose.msra.mxu1 %v22431_v4 }
 0x5d2   : > { %19892 = vmatprep.mubr.msk.bf16.mxu1 %vm2937_vm0, %v25958_v9  ;;  %5350 = vmatpush1.bf16.xpose.msra.mxu0 %v22432_v5 }
 0x5d3   : > { %19948 = vmatprep.mubr.msk.bf16.mxu0 %vm2937_vm0, %v25958_v9  ;;  %19911 = vmatprep.subr.msk.bf16.mxu1 %vm2937_vm0, %v22433_v6 }
 0x5d4   : > { %21194 = vmatprep.subr.bf16.mxu0 %v25056_v7 }
 0x5d8   : > { %4724 = vmatmul.mubr.bf16.vlgmr.msra.gmra.mxu1 %v25956_v8 }
 0x5d9   : > { %5368 = vmatmul.mubr.bf16.vlgmr.msra.gmra.mxu0 %v25956_v8  ;;  %4882 = vmatpush1.bf16.xpose.msra.mxu1 %v22435_v10 }
 0x5da   : > { %19912 = vmatprep.mubr.msk.bf16.mxu1 %vm2937_vm0, %v25958_v9  ;;  %19919 = vmatprep.subr.msk.bf16.mxu1 %vm2937_vm0, %v22436_v11  ;;  %v19775_v11 = vld [vmem:[%s27970_s18 + $0x2] ss:$0 sm:$0xff] }
 0x5db   : > { %21196 = vmatprep.mubr.msk.bf16.mxu0 %vm25057_vm1, %v25056_v7 }
 0x5e0   : > { %4900 = vmatmul.mubr.bf16.vlgmr.msra.gmra.mxu1 %v25956_v8 }
 0x5e1   : > { %4986 = vmatpush1.bf16.xpose.msra.mxu1 %v22438_v12  ;;  %19920 = vmatprep.mubr.msk.bf16.mxu1 %vm2937_vm0, %v25958_v9 }
 0x5e2   : > { %19927 = vmatprep.subr.msk.bf16.mxu1 %vm2937_vm0, %v22439_v13 }
 0x5e8   : > { %5004 = vmatmul.mubr.bf16.vlgmr.msra.gmra.mxu1 %v25956_v8 }
 0x5e9   : > { %5090 = vmatpush1.bf16.xpose.msra.mxu1 %v22441_v14  ;;  %19928 = vmatprep.mubr.msk.bf16.mxu1 %vm2937_vm0, %v25958_v9 }
 0x5ea   : > { %19935 = vmatprep.subr.msk.bf16.mxu1 %vm2937_vm0, %v22442_v15 }
 0x5f0   : > { %5108 = vmatmul.mubr.bf16.vlgmr.msra.gmra.mxu1 %v25956_v8 }
 0x5f1   : > { %5194 = vmatpush1.bf16.xpose.msra.mxu1 %v22444_v16  ;;  %19936 = vmatprep.mubr.msk.bf16.mxu1 %vm2937_vm0, %v25958_v9  ;;  %v19837_v16 = vld [vmem:[#allocation12 + $0x4] ss:$0 sm:$0xff] }
 0x5f2   : > { %19943 = vmatprep.subr.msk.bf16.mxu1 %vm2937_vm0, %v22445_v17 }
 0x5f8   : > { %5212 = vmatmul.mubr.bf16.vlgmr.msra.gmra.mxu1 %v25956_v8 }
 0x5f9   : > { %5298 = vmatpush1.bf16.xpose.msra.mxu1 %v22447_v18  ;;  %19944 = vmatprep.mubr.msk.bf16.mxu1 %vm2937_vm0, %v25958_v9 }
 0x5fa   : > { %19951 = vmatprep.subr.msk.bf16.mxu1 %vm2937_vm0, %v22448_v19 }
 0x600   : > { %5316 = vmatmul.mubr.bf16.vlgmr.msra.gmra.mxu1 %v25956_v8 }
 0x601   : > { %5402 = vmatpush1.bf16.xpose.msra.mxu1 %v22450_v20  ;;  %19952 = vmatprep.mubr.msk.bf16.mxu1 %vm2937_vm0, %v25958_v9 }
 0x602   : > { %21200 = vmatprep.subr.bf16.mxu1 %v25056_v7 }
 0x608   : > { %5420 = vmatmul.mubr.bf16.vlgmr.msra.gmra.mxu1 %v25956_v8 }
 0x609   : > { %21202 = vmatprep.mubr.msk.bf16.mxu1 %vm25057_vm1, %v25056_v7 }
 0x628   : > { %v3457_v21 = vpop.f32.mrf.mxu1  ;;  %v26106_v22 = vpop.f32.mrf.mxu0 }
 0x629   : > { %v3458_v63 = vadd.f32 %v19773_v53, %v3457_v21 }
 0x62a   : > { %v3459_v23 = vpop.f32.mrf.mxu1  ;;  %v3771_v24 = vpop.f32.mrf.mxu0 }
 0x62b   : > { %v5427_v5 = vpack.c.bf16 %v3458_v63, %v3458_v63 }
 0x62c   : > { %v3460_v25 = vpop.f32.mrf.mxu1  ;;  %v3772_v26 = vpop.f32.mrf.mxu0 }
 0x62e   : > { %v3461_v27 = vpop.f32.mrf.mxu1  ;;  %v3773_v28 = vpop.f32.mrf.mxu0 }
 0x62f   : > { %v19777_v27 = vld [vmem:[%s27970_s18 + $0x4] ss:$0 sm:$0xff] }
 0x630   : > { %v26108_v29 = vpop.f32.mrf.mxu1 }
 0x631   : > { %v26110_v30 = vpop.f32.mrf.mxu0 }
 0x632   : > { %v3511_v9 = vpop.f32.mrf.mxu1 }
 0x633   : > { %v3875_v31 = vpop.f32.mrf.mxu0 }
 0x634   : > { %v3512_v34 = vpop.f32.mrf.mxu1 }
 0x635   : > { %v3876_v8 = vpop.f32.mrf.mxu0 }
 0x636   : > { %v3513_v35 = vpop.f32.mrf.mxu1  ;;  %v19839_v8 = vld [vmem:[#allocation12 + $0x6] ss:$0 sm:$0xff] }
 0x637   : > { %v3877_v36 = vpop.f32.mrf.mxu0 }
 0x638   : > { %v3561_v37 = vpop.f32.mrf.mxu1 }
 0x639   : > { %v26112_v38 = vpop.f32.mrf.mxu0  ;;  %v3562_v17 = vadd.f32 %v19775_v11, %v3561_v37 }
 0x63a   : > { %v3563_v39 = vpop.f32.mrf.mxu1 }
 0x63b   : > { %v3979_v40 = vpop.f32.mrf.mxu0  ;;  %v5429_v24 = vpack.c.bf16 %v3562_v17, %v3562_v17 }
 0x63c   : > { %v3564_v41 = vpop.f32.mrf.mxu1 }
 0x63d   : > { %v3980_v42 = vpop.f32.mrf.mxu0 }
 0x63e   : > { %v3565_v43 = vpop.f32.mrf.mxu1 }
 0x63f   : > { %v3981_v44 = vpop.f32.mrf.mxu0 }
 0x640   : > { %v26114_v46 = vpop.f32.mrf.mxu1 }
 0x641   : > { %v4153_v47 = vpop.f32.mrf.mxu0 }
 0x642   : > { %v4154_v48 = vadd.f32 %v19833_v45, %v4153_v47  ;;  %v3615_v49 = vpop.f32.mrf.mxu1  ;;  %v19779_v45 = vld [vmem:[%s27970_s18 + $0x6] ss:$0 sm:$0xff] }
 0x643   : > { %v4155_v50 = vpop.f32.mrf.mxu0 }
 0x644   : > { %v5439_v51 = vpack.c.bf16 %v4154_v48, %v4154_v48  ;;  %v3616_v52 = vpop.f32.mrf.mxu1 }
 0x645   : > { %v4156_v54 = vpop.f32.mrf.mxu0  ;;  %v3770_v52 = vadd.f32 %v19779_v45, %v26106_v22  ;;  %v19836_v45 = vld [vmem:[#allocation12 + $0x3] ss:$0 sm:$0xff] }
 0x646   : > { %v5456_v59 = vsel %vm5451_vm2, %v5439_v51, 0  ;;  %v3617_v60 = vpop.f32.mrf.mxu1  ;;  %v19841_v51 = vld [vmem:[#allocation12 + $0x8] ss:$0 sm:$0xff] }
 0x647   : > { %v4157_v61 = vpop.f32.mrf.mxu0  ;;  %21195 = vmatpush3.bf16.xpose.msra.mxu0 %v5456_v59 }
 0x648   : > { %v3665_v0 = vpop.f32.mrf.mxu1  ;;  %21206 = vmatprep.subr.bf16.mxu0 %v25056_v7 }
 0x649   : > { %v4257_v1 = vpop.f32.mrf.mxu0  ;;  %v3666_v35 = vadd.f32 %v19777_v27, %v3665_v0 }
 0x64a   : > { %v4258_v2 = vadd.f32 %v19835_v62, %v4257_v1  ;;  %v3667_v3 = vpop.f32.mrf.mxu1  ;;  %v5433_v62 = vpack.c.bf16 %v3770_v52, %v3770_v52  ;;  %v19781_v1 = vld [vmem:[%s27970_s18 + $0x8] ss:$0 sm:$0xff] }
 0x64b   : > { %v4259_v4 = vpop.f32.mrf.mxu0  ;;  %v5431_v42 = vpack.c.bf16 %v3666_v35, %v3666_v35 }
 0x64c   : > { %v5441_v6 = vpack.c.bf16 %v4258_v2, %v4258_v2  ;;  %v3668_v10 = vpop.f32.mrf.mxu1 }
 0x64d   : > { %v4260_v12 = vpop.f32.mrf.mxu0 }
 0x64e   : > { %v5548_v13 = vsel %vm5451_vm2, %v5441_v6, 0  ;;  %21197 = vmatmul.mubr.msk.bf16.vlgmr.msra.gmra.mxu0 %vm5451_vm2, %v5427_v5  ;;  %v3669_v14 = vpop.f32.mrf.mxu1  ;;  %v19843_v5 = vld [vmem:[#allocation12 + $0xa] ss:$0 sm:$0xff]  ;;  %v3874_v6 = vadd.f32 %v19781_v1, %v26110_v30  ;;  %v19834_v30 = vld [vmem:[#allocation12 + $0x1] ss:$0 sm:$0xff] }
 0x64f   : > { %v4261_v15 = vpop.f32.mrf.mxu0  ;;  %21207 = vmatpush3.bf16.xpose.msra.mxu0 %v5548_v13  ;;  %21208 = vmatprep.mubr.msk.bf16.mxu0 %vm25057_vm1, %v25056_v7  ;;  %v19838_v1 = vld [vmem:[#allocation12 + $0x5] ss:$0 sm:$0xff] }
 0x650   : > { %v26124_v18 = vpop.f32.mrf.mxu1  ;;  %21218 = vmatprep.subr.bf16.mxu0 %v25056_v7  ;;  %v5435_v15 = vpack.c.bf16 %v3874_v6, %v3874_v6 }
 0x651   : > { %v4361_v19 = vpop.f32.mrf.mxu0 }
 0x652   : > { %v4362_v20 = vadd.f32 %v19837_v16, %v4361_v19  ;;  %v3719_v21 = vpop.f32.mrf.mxu1  ;;  %v19783_v19 = vld [vmem:[%s27970_s18 + $0xa] ss:$0 sm:$0xff] }
 0x653   : > { %v4363_v23 = vpop.f32.mrf.mxu0 }
 0x654   : > { %v5443_v25 = vpack.c.bf16 %v4362_v20, %v4362_v20  ;;  %v3720_v26 = vpop.f32.mrf.mxu1 }
 0x655   : > { %v4364_v28 = vpop.f32.mrf.mxu0  ;;  %v3978_v26 = vadd.f32 %v19783_v19, %v26112_v38  ;;  %v19840_v19 = vld [vmem:[#allocation12 + $0x7] ss:$0 sm:$0xff] }
 0x656   : > { %v5640_v9 = vsel %vm5451_vm2, %v5443_v25, 0  ;;  %21209 = vmatmul.mubr.msk.bf16.vlgmr.msra.gmra.mxu0 %vm5451_vm2, %v5429_v24  ;;  %v3721_v31 = vpop.f32.mrf.mxu1  ;;  %v19893_v25 = vld [vmem:[#allocation13] ss:$0 sm:$0xff] }
 0x657   : > { %v4365_v34 = vpop.f32.mrf.mxu0  ;;  %21219 = vmatpush3.bf16.xpose.msra.mxu0 %v5640_v9  ;;  %21220 = vmatprep.mubr.msk.bf16.mxu0 %vm25057_vm1, %v25056_v7 }
 0x658   : > { %v26132_v36 = vpop.f32.mrf.mxu1  ;;  %21230 = vmatprep.subr.bf16.mxu0 %v25056_v7 }
 0x659   : > { %v4465_v37 = vpop.f32.mrf.mxu0 }
 0x65a   : > { %v4466_v39 = vadd.f32 %v19839_v8, %v4465_v37  ;;  %v3823_v40 = vpop.f32.mrf.mxu1  ;;  %v19774_v37 = vld [vmem:[%s27970_s18 + $0x1] ss:$0 sm:$0xff] }
 0x65b   : > { %v4467_v41 = vpop.f32.mrf.mxu0 }
 0x65c   : > { %v5445_v43 = vpack.c.bf16 %v4466_v39, %v4466_v39  ;;  %v3824_v44 = vpop.f32.mrf.mxu1  ;;  %v5437_v39 = vpack.c.bf16 %v3978_v26, %v3978_v26 }
 0x65d   : > { %v4468_v47 = vpop.f32.mrf.mxu0 }
 0x65e   : > { %v5732_v48 = vsel %vm5451_vm2, %v5445_v43, 0  ;;  %21221 = vmatmul.mubr.msk.bf16.vlgmr.msra.gmra.mxu0 %vm5451_vm2, %v5431_v42  ;;  %v3825_v49 = vpop.f32.mrf.mxu1  ;;  %v3510_v47 = vadd.f32 %v19774_v37, %v26108_v29 }
 0x65f   : > { %v4469_v50 = vpop.f32.mrf.mxu0  ;;  %21231 = vmatpush3.bf16.xpose.msra.mxu0 %v5732_v48  ;;  %21232 = vmatprep.mubr.msk.bf16.mxu0 %vm25057_vm1, %v25056_v7 }
 0x660   : > { %v26141_v53 = vpop.f32.mrf.mxu1  ;;  %21242 = vmatprep.subr.bf16.mxu0 %v25056_v7 }
 0x661   : > { %v4569_v54 = vpop.f32.mrf.mxu0 }
 0x662   : > { %v4570_v59 = vadd.f32 %v19841_v51, %v4569_v54  ;;  %v3927_v60 = vpop.f32.mrf.mxu1  ;;  %v5428_v54 = vpack.c.bf16 %v3510_v47, %v3510_v47  ;;  %v19782_v47 = vld [vmem:[%s27970_s18 + $0x9] ss:$0 sm:$0xff] }
 0x663   : > { %v4571_v61 = vpop.f32.mrf.mxu0 }
 0x664   : > { %v5447_v63 = vpack.c.bf16 %v4570_v59, %v4570_v59  ;;  %v3928_v0 = vpop.f32.mrf.mxu1  ;;  %v19776_v61 = vld [vmem:[%s27970_s18 + $0x3] ss:$0 sm:$0xff] }
 0x665   : > { %v4572_v2 = vpop.f32.mrf.mxu0 }
 0x666   : > { %v5824_v3 = vsel %vm5451_vm2, %v5447_v63, 0  ;;  %21233 = vmatmul.mubr.msk.bf16.vlgmr.msra.gmra.mxu0 %vm5451_vm2, %v5433_v62  ;;  %v3929_v4 = vpop.f32.mrf.mxu1  ;;  %v3614_v2 = vadd.f32 %v19776_v61, %v26114_v46 }
 0x667   : > { %v4573_v22 = vpop.f32.mrf.mxu0  ;;  %21243 = vmatpush3.bf16.xpose.msra.mxu0 %v5824_v3  ;;  %21244 = vmatprep.mubr.msk.bf16.mxu0 %vm25057_vm1, %v25056_v7 }
 0x668   : > { %v26150_v10 = vpop.f32.mrf.mxu1  ;;  %21254 = vmatprep.subr.bf16.mxu0 %v25056_v7 }
 0x669   : > { %v4673_v11 = vpop.f32.mrf.mxu0 }
 0x66a   : > { %v4674_v12 = vadd.f32 %v19843_v5, %v4673_v11  ;;  %v4031_v13 = vpop.f32.mrf.mxu1  ;;  %v5430_v11 = vpack.c.bf16 %v3614_v2, %v3614_v2  ;;  %v19784_v2 = vld [vmem:[%s27970_s18 + $0xb] ss:$0 sm:$0xff] }
 0x66b   : > { %v4675_v14 = vpop.f32.mrf.mxu0 }
 0x66c   : > { %v5449_v16 = vpack.c.bf16 %v4674_v12, %v4674_v12  ;;  %v4032_v17 = vpop.f32.mrf.mxu1  ;;  %v19778_v14 = vld [vmem:[%s27970_s18 + $0x5] ss:$0 sm:$0xff] }
 0x66d   : > { %v4676_v20 = vpop.f32.mrf.mxu0 }
 0x66e   : > { %v5916_v21 = vsel %vm5451_vm2, %v5449_v16, 0  ;;  %21245 = vmatmul.mubr.msk.bf16.vlgmr.msra.gmra.mxu0 %vm5451_vm2, %v5435_v15  ;;  %v4033_v23 = vpop.f32.mrf.mxu1  ;;  %v3718_v20 = vadd.f32 %v19778_v14, %v26124_v18 }
 0x66f   : > { %v4677_v24 = vpop.f32.mrf.mxu0  ;;  %21255 = vmatpush3.bf16.xpose.msra.mxu0 %v5916_v21  ;;  %21256 = vmatprep.mubr.msk.bf16.mxu0 %vm25057_vm1, %v25056_v7 }
 0x670   : > { %v4205_v27 = vpop.f32.mrf.mxu1  ;;  %21266 = vmatprep.subr.bf16.mxu0 %v25056_v7  ;;  %v5432_v26 = vpack.c.bf16 %v3718_v20, %v3718_v20 }
 0x671   : > { %v4206_v28 = vadd.f32 %v19834_v30, %v4205_v27  ;;  %v4849_v9 = vpop.f32.mrf.mxu0 }
 0x672   : > { %v4850_v31 = vadd.f32 %v19893_v25, %v4849_v9  ;;  %v4207_v34 = vpop.f32.mrf.mxu1  ;;  %v19780_v9 = vld [vmem:[%s27970_s18 + $0x7] ss:$0 sm:$0xff] }
 0x673   : > { %v5440_v8 = vpack.c.bf16 %v4206_v28, %v4206_v28  ;;  %v4851_v35 = vpop.f32.mrf.mxu0  ;;  %v3822_v37 = vadd.f32 %v19780_v9, %v26132_v36 }
 0x674   : > { %v6161_v40 = vpack.c.bf16 %v4850_v31, %v4850_v31  ;;  %v4208_v41 = vpop.f32.mrf.mxu1  ;;  %v19842_v35 = vld [vmem:[#allocation12 + $0x9] ss:$0 sm:$0xff] }
 0x675   : > { %v5502_v42 = vsel %vm5451_vm2, %v5440_v8, 0  ;;  %v4852_v43 = vpop.f32.mrf.mxu0 }
 0x676   : > { %v6178_v44 = vsel %vm6176_vm3, %v6161_v40, 0  ;;  %21257 = vmatmul.mubr.msk.bf16.vlgmr.msra.gmra.mxu0 %vm5451_vm2, %v5437_v39  ;;  %v4209_v38 = vpop.f32.mrf.mxu1  ;;  %21201 = vmatpush3.bf16.xpose.msra.mxu1 %v5502_v42 }
 0x677   : > { %v4853_v48 = vpop.f32.mrf.mxu0  ;;  %21267 = vmatpush3.bf16.msra.mxu0 %v6178_v44  ;;  %21212 = vmatprep.subr.bf16.mxu1 %v25056_v7  ;;  %v5434_v44 = vpack.c.bf16 %v3822_v37, %v3822_v37 }
 0x678   : > { %v4309_v49 = vpop.f32.mrf.mxu1  ;;  %21268 = vmatprep.mubr.msk.bf16.mxu0 %vm25057_vm1, %v25056_v7  ;;  %21278 = vmatprep.subr.bf16.mxu0 %v25056_v7 }
 0x679   : > { %v4310_v50 = vadd.f32 %v19836_v45, %v4309_v49  ;;  %v26169_v51 = vpop.f32.mrf.mxu0 }
 0x67a   : > { %v4311_v52 = vpop.f32.mrf.mxu1 }
 0x67b   : > { %v5442_v59 = vpack.c.bf16 %v4310_v50, %v4310_v50  ;;  %v4955_v60 = vpop.f32.mrf.mxu0  ;;  %v19844_v52 = vld [vmem:[#allocation12 + $0xb] ss:$0 sm:$0xff] }
 0x67c   : > { %v4312_v62 = vpop.f32.mrf.mxu1 }
 0x67d   : > { %v5594_v29 = vsel %vm5451_vm2, %v5442_v59, 0  ;;  %v4956_v63 = vpop.f32.mrf.mxu0  ;;  %21203 = vmatmul.mubr.msk.bf16.vlgmr.msra.gmra.mxu1 %vm5451_vm2, %v5428_v54  ;;  %v3926_v54 = vadd.f32 %v19782_v47, %v26141_v53  ;;  %v19894_v53 = vld [vmem:[#allocation13 + $0x1] ss:$0 sm:$0xff] }
 0x67e   : > { %v4313_v0 = vpop.f32.mrf.mxu1  ;;  %21213 = vmatpush3.bf16.xpose.msra.mxu1 %v5594_v29  ;;  %21214 = vmatprep.mubr.msk.bf16.mxu1 %vm25057_vm1, %v25056_v7 }
 0x67f   : > { %v4957_v3 = vpop.f32.mrf.mxu0  ;;  %21224 = vmatprep.subr.bf16.mxu1 %v25056_v7  ;;  %v5436_v63 = vpack.c.bf16 %v3926_v54, %v3926_v54 }
 0x680   : > { %v4413_v4 = vpop.f32.mrf.mxu1 }
 0x681   : > { %v4414_v22 = vadd.f32 %v19838_v1, %v4413_v4  ;;  %v26178_v5 = vpop.f32.mrf.mxu0 }
 0x682   : > { %v4415_v6 = vpop.f32.mrf.mxu1 }
 0x683   : > { %v5444_v12 = vpack.c.bf16 %v4414_v22, %v4414_v22  ;;  %v5059_v13 = vpop.f32.mrf.mxu0 }
 0x684   : > { %v4416_v15 = vpop.f32.mrf.mxu1 }
 0x685   : > { %v5686_v16 = vsel %vm5451_vm2, %v5444_v12, 0  ;;  %v5060_v17 = vpop.f32.mrf.mxu0  ;;  %21215 = vmatmul.mubr.msk.bf16.vlgmr.msra.gmra.mxu1 %vm5451_vm2, %v5430_v11  ;;  %v4030_v11 = vadd.f32 %v19784_v2, %v26150_v10 }
 0x686   : > { %v4417_v46 = vpop.f32.mrf.mxu1  ;;  %21225 = vmatpush3.bf16.xpose.msra.mxu1 %v5686_v16  ;;  %21226 = vmatprep.mubr.msk.bf16.mxu1 %vm25057_vm1, %v25056_v7 }
 0x687   : > { %v5061_v21 = vpop.f32.mrf.mxu0  ;;  %21236 = vmatprep.subr.bf16.mxu1 %v25056_v7  ;;  %v5438_v16 = vpack.c.bf16 %v4030_v11, %v4030_v11 }
 0x688   : > { %v4517_v23 = vpop.f32.mrf.mxu1 }
 0x689   : > { %v4518_v30 = vadd.f32 %v19840_v19, %v4517_v23  ;;  %v26187_v24 = vpop.f32.mrf.mxu0 }
 0x68a   : > { %v4519_v25 = vpop.f32.mrf.mxu1 }
 0x68b   : > { %v5446_v27 = vpack.c.bf16 %v4518_v30, %v4518_v30  ;;  %v5163_v28 = vpop.f32.mrf.mxu0 }
 0x68c   : > { %v4520_v31 = vpop.f32.mrf.mxu1 }
 0x68d   : > { %v5778_v34 = vsel %vm5451_vm2, %v5446_v27, 0  ;;  %v5164_v8 = vpop.f32.mrf.mxu0  ;;  %21227 = vmatmul.mubr.msk.bf16.vlgmr.msra.gmra.mxu1 %vm5451_vm2, %v5432_v26 }
 0x68e   : > { %v4521_v18 = vpop.f32.mrf.mxu1  ;;  %21237 = vmatpush3.bf16.xpose.msra.mxu1 %v5778_v34  ;;  %21238 = vmatprep.mubr.msk.bf16.mxu1 %vm25057_vm1, %v25056_v7 }
 0x68f   : > { %v5165_v39 = vpop.f32.mrf.mxu0  ;;  %21248 = vmatprep.subr.bf16.mxu1 %v25056_v7 }
 0x690   : > { %v4621_v40 = vpop.f32.mrf.mxu1 }
 0x691   : > { %v4622_v41 = vadd.f32 %v19842_v35, %v4621_v40  ;;  %v26196_v42 = vpop.f32.mrf.mxu0 }
 0x692   : > { %v4623_v43 = vpop.f32.mrf.mxu1 }
 0x693   : > { %v5448_v38 = vpack.c.bf16 %v4622_v41, %v4622_v41  ;;  %v5267_v45 = vpop.f32.mrf.mxu0 }
 0x694   : > { %v4624_v48 = vpop.f32.mrf.mxu1  ;;  %v25058_v45 = vmov -1e+09  }
 0x695   : > { %v5870_v49 = vsel %vm5451_vm2, %v5448_v38, 0  ;;  %v5268_v50 = vpop.f32.mrf.mxu0  ;;  %21239 = vmatmul.mubr.msk.bf16.vlgmr.msra.gmra.mxu1 %vm5451_vm2, %v5434_v44  ;;  %v2812_v38 = vand.u32 127, %v2811_v55 }
 0x696   : > { %v4625_v36 = vpop.f32.mrf.mxu1  ;;  %21249 = vmatpush3.bf16.xpose.msra.mxu1 %v5870_v49  ;;  %21250 = vmatprep.mubr.msk.bf16.mxu1 %vm25057_vm1, %v25056_v7 }
 0x697   : > { %v5269_v59 = vpop.f32.mrf.mxu0  ;;  %21260 = vmatprep.subr.bf16.mxu1 %v25056_v7  ;;  %vm2813_vm4 = vcmp.lt.s32.totalorder %v2812_v38, 5 }
 0x698   : > { %v4725_v60 = vpop.f32.mrf.mxu1  ;;  %v26230_v47 = vsel %vm2813_vm4, 0.0, %v25058_v45 }
 0x699   : > { %v4726_v61 = vadd.f32 %v19844_v52, %v4725_v60  ;;  %v26205_v62 = vpop.f32.mrf.mxu0 }
 0x69a   : > { %v4727_v29 = vpop.f32.mrf.mxu1 }
 0x69b   : > { %v5450_v0 = vpack.c.bf16 %v4726_v61, %v4726_v61  ;;  %v5371_v1 = vpop.f32.mrf.mxu0 }
 0x69c   : > { %v4728_v3 = vpop.f32.mrf.mxu1 }
 0x69d   : > { %v5962_v4 = vsel %vm5451_vm2, %v5450_v0, 0  ;;  %v5372_v22 = vpop.f32.mrf.mxu0  ;;  %21251 = vmatmul.mubr.msk.bf16.vlgmr.msra.gmra.mxu1 %vm5451_vm2, %v5436_v63 }
 0x69e   : > { %v4729_v6 = vpop.f32.mrf.mxu1  ;;  %21261 = vmatpush3.bf16.xpose.msra.mxu1 %v5962_v4  ;;  %21262 = vmatprep.mubr.msk.bf16.mxu1 %vm25057_vm1, %v25056_v7 }
 0x69f   : > { %v5373_v12 = vpop.f32.mrf.mxu0  ;;  %21272 = vmatprep.subr.bf16.mxu1 %v25056_v7 }
 0x6a0   : > { %v4901_v13 = vpop.f32.mrf.mxu1 }
 0x6a1   : > { %v4902_v14 = vadd.f32 %v19894_v53, %v4901_v13 }
 0x6a2   : > { %v4903_v15 = vpop.f32.mrf.mxu1 }
 0x6a3   : > { %v6162_v17 = vpack.c.bf16 %v4902_v14, %v4902_v14 }
 0x6a4   : > { %v4904_v46 = vpop.f32.mrf.mxu1 }
 0x6a5   : > { %v6224_v19 = vsel %vm6176_vm3, %v6162_v17, 0  ;;  %21263 = vmatmul.mubr.msk.bf16.vlgmr.msra.gmra.mxu1 %vm5451_vm2, %v5438_v16 }
 0x6a6   : > { %v4905_v20 = vpop.f32.mrf.mxu1  ;;  %21273 = vmatpush3.bf16.msra.mxu1 %v6224_v19  ;;  %21274 = vmatprep.mubr.msk.bf16.mxu1 %vm25057_vm1, %v25056_v7 }
 0x6a7   : > { %21284 = vmatprep.subr.bf16.mxu1 %v25056_v7 }
 0x6a8   : > { %v26219_v10 = vpop.f32.mrf.mxu1 }
 0x6aa   : > { %v5007_v21 = vpop.f32.mrf.mxu1 }
 0x6ac   : > { %v5008_v23 = vpop.f32.mrf.mxu1 }
 0x6ae   : > { %v5009_v30 = vpop.f32.mrf.mxu1 }
 0x6b0   : > { %v26221_v25 = vpop.f32.mrf.mxu1 }
 0x6b2   : > { %v5111_v26 = vpop.f32.mrf.mxu1 }
 0x6b4   : > { %v5112_v27 = vpop.f32.mrf.mxu1 }
 0x6b6   : > { %v5113_v28 = vpop.f32.mrf.mxu1 }
 0x6b8   : > { %v26223_v9 = vpop.f32.mrf.mxu1 }
 0x6ba   : > { %v5215_v31 = vpop.f32.mrf.mxu1 }
 0x6bc   : > { %v5216_v34 = vpop.f32.mrf.mxu1 }
 0x6be   : > { %v5217_v8 = vpop.f32.mrf.mxu1 }
 0x6c0   : > { %v26225_v18 = vpop.f32.mrf.mxu1 }
 0x6c2   : > { %v5319_v35 = vpop.f32.mrf.mxu1 }
 0x6c4   : > { %v5320_v37 = vpop.f32.mrf.mxu1 }
 0x6c6   : > { %v5321_v39 = vpop.f32.mrf.mxu1 }
 0x6c8   : > { %v26227_v40 = vpop.f32.mrf.mxu1 }
 0x6ca   : > { %v5423_v41 = vpop.f32.mrf.mxu1 }
 0x6cc   : > { %v5424_v43 = vpop.f32.mrf.mxu1 }
 0x6ce   : > { %v5425_v44 = vpop.f32.mrf.mxu1 }
 0x70e   : > { %v5492_v48 = vpop.f32.mrf.mxu0 }
 0x70f   : > { %v6004_v49 = vmul.f32 0.25, %v5492_v48 }
 0x710   : > { %v21198_v50 = vpop.f32.mrf.mxu0 }
 0x711   : > { %v26233_v36 = vadd.f32 %v6004_v49, %v26230_v47 }
 0x712   : > { %v5495_v52 = vpop.f32.mrf.mxu0 }
 0x713   : > { %v6029_v54 = vsel %vm6028_vm5, %v26233_v36, -inf }
 0x714   : > { %6030 = vmax.xlane.f32.xlu1 %v6029_v54  ;;  %v21199_v59 = vpop.f32.mrf.mxu0 }
 0x716   : > { %v5584_v60 = vpop.f32.mrf.mxu0 }
 0x717   : > { %v6006_v61 = vmul.f32 0.25, %v5584_v60 }
 0x718   : > { %v21210_v55 = vpop.f32.mrf.mxu0 }
 0x719   : > { %v26238_v29 = vadd.f32 %v6006_v61, %v26230_v47 }
 0x71a   : > { %v5587_v63 = vpop.f32.mrf.mxu0 }
 0x71b   : > { %v6035_v0 = vsel %vm6028_vm5, %v26238_v29, -inf }
 0x71c   : > { %6036 = vmax.xlane.f32.xlu0 %v6035_v0  ;;  %v21211_v1 = vpop.f32.mrf.mxu0 }
 0x71e   : > { %v5676_v2 = vpop.f32.mrf.mxu0 }
 0x71f   : > { %v6008_v3 = vmul.f32 0.25, %v5676_v2 }
 0x720   : > { %v21222_v4 = vpop.f32.mrf.mxu0 }
 0x721   : > { %v26243_v22 = vadd.f32 %v6008_v3, %v26230_v47 }
 0x722   : > { %v5679_v6 = vpop.f32.mrf.mxu0 }
 0x723   : > { %v6041_v53 = vsel %vm6028_vm5, %v26243_v22, -inf }
 0x724   : > { %6042 = vmax.xlane.f32.xlu0 %v6041_v53  ;;  %v21223_v11 = vpop.f32.mrf.mxu0 }
 0x726   : > { %v5768_v12 = vpop.f32.mrf.mxu0 }
 0x727   : > { %v6010_v13 = vmul.f32 0.25, %v5768_v12 }
 0x728   : > { %v21234_v14 = vpop.f32.mrf.mxu0 }
 0x729   : > { %v26248_v15 = vadd.f32 %v6010_v13, %v26230_v47 }
 0x72a   : > { %v5771_v16 = vpop.f32.mrf.mxu0 }
 0x72b   : > { %v6047_v17 = vsel %vm6028_vm5, %v26248_v15, -inf }
 0x72c   : > { %6048 = vmax.xlane.f32.xlu0 %v6047_v17  ;;  %v21235_v46 = vpop.f32.mrf.mxu0 }
 0x72e   : > { %v5860_v19 = vpop.f32.mrf.mxu0 }
 0x72f   : > { %v6012_v20 = vmul.f32 0.25, %v5860_v19 }
 0x730   : > { %v21246_v21 = vpop.f32.mrf.mxu0 }
 0x731   : > { %v26253_v23 = vadd.f32 %v6012_v20, %v26230_v47 }
 0x732   : > { %v5863_v30 = vpop.f32.mrf.mxu0 }
 0x733   : > { %v6053_v26 = vsel %vm6028_vm5, %v26253_v23, -inf }
 0x734   : > { %6054 = vmax.xlane.f32.xlu0 %v6053_v26  ;;  %v21247_v27 = vpop.f32.mrf.mxu0 }
 0x736   : > { %v5952_v28 = vpop.f32.mrf.mxu0 }
 0x737   : > { %v6014_v31 = vmul.f32 0.25, %v5952_v28 }
 0x738   : > { %v21258_v34 = vpop.f32.mrf.mxu0 }
 0x739   : > { %v26258_v8 = vadd.f32 %v6014_v31, %v26230_v47 }
 0x73a   : > { %v5955_v35 = vpop.f32.mrf.mxu0 }
 0x73b   : > { %v6059_v37 = vsel %vm6028_vm5, %v26258_v8, -inf }
 0x73c   : > { %6060 = vmax.xlane.f32.xlu0 %v6059_v37  ;;  %v21259_v39 = vpop.f32.mrf.mxu0 }
 0x73d   : > { %v5538_v41 = vpop.f32.mrf.mxu1 }
 0x73e   : > { %v6005_v43 = vmul.f32 0.25, %v5538_v41 }
 0x73f   : > { %v21204_v44 = vpop.f32.mrf.mxu1 }
 0x740   : > { %v26263_v38 = vadd.f32 %v6005_v43, %v26230_v47 }
 0x741   : > { %v5541_v45 = vpop.f32.mrf.mxu1 }
 0x742   : > { %v6032_v48 = vsel %vm6028_vm5, %v26263_v38, -inf }
 0x743   : > { %v21205_v49 = vpop.f32.mrf.mxu1  ;;  %6033 = vmax.xlane.f32.xlu1 %v6032_v48 }
 0x745   : > { %v5630_v50 = vpop.f32.mrf.mxu1 }
 0x746   : > { %v6007_v52 = vmul.f32 0.25, %v5630_v50  ;;  %v19895_v50 = vld [vmem:[#allocation13 + $0x2] ss:$0 sm:$0xff] }
 0x747   : > { %v21216_v54 = vpop.f32.mrf.mxu1 }
 0x748   : > { %v26268_v59 = vadd.f32 %v6007_v52, %v26230_v47  ;;  %v4954_v54 = vadd.f32 %v19895_v50, %v26169_v51 }
 0x749   : > { %v5633_v60 = vpop.f32.mrf.mxu1 }
 0x74a   : > { %v6038_v61 = vsel %vm6028_vm5, %v26268_v59, -inf }
 0x74b   : > { %v21217_v55 = vpop.f32.mrf.mxu1  ;;  %6039 = vmax.xlane.f32.xlu1 %v6038_v61  ;;  %v6163_v61 = vpack.c.bf16 %v4954_v54, %v4954_v54 }
 0x74d   : > { %v5722_v63 = vpop.f32.mrf.mxu1 }
 0x74e   : > { %v6009_v0 = vmul.f32 0.25, %v5722_v63 }
 0x74f   : > { %v21228_v1 = vpop.f32.mrf.mxu1 }
 0x750   : > { %v26273_v2 = vadd.f32 %v6009_v0, %v26230_v47  ;;  %v19897_v0 = vld [vmem:[#allocation13 + $0x4] ss:$0 sm:$0xff] }
 0x751   : > { %v5725_v3 = vpop.f32.mrf.mxu1 }
 0x752   : > { %v6044_v4 = vsel %vm6028_vm5, %v26273_v2, -inf }
 0x753   : > { %v21229_v6 = vpop.f32.mrf.mxu1  ;;  %6045 = vmax.xlane.f32.xlu1 %v6044_v4  ;;  %v6270_v4 = vsel %vm6176_vm3, %v6163_v61, 0 }
 0x755   : > { %v5814_v53 = vpop.f32.mrf.mxu1 }
 0x756   : > { %v6011_v11 = vmul.f32 0.25, %v5814_v53 }
 0x757   : > { %v21240_v12 = vpop.f32.mrf.mxu1 }
 0x758   : > { %v26278_v13 = vadd.f32 %v6011_v11, %v26230_v47  ;;  %v19899_v11 = vld [vmem:[#allocation13 + $0x6] ss:$0 sm:$0xff] }
 0x759   : > { %v5817_v14 = vpop.f32.mrf.mxu1 }
 0x75a   : > { %v6050_v16 = vsel %vm6028_vm5, %v26278_v13, -inf }
 0x75b   : > { %v21241_v17 = vpop.f32.mrf.mxu1  ;;  %6051 = vmax.xlane.f32.xlu1 %v6050_v16 }
 0x75c   : > { %v5162_v17 = vadd.f32 %v19899_v11, %v26187_v24 }
 0x75d   : > { %v5906_v46 = vpop.f32.mrf.mxu1 }
 0x75e   : > { %v6013_v19 = vmul.f32 0.25, %v5906_v46  ;;  %v6167_v46 = vpack.c.bf16 %v5162_v17, %v5162_v17 }
 0x75f   : > { %v21252_v20 = vpop.f32.mrf.mxu1 }
 0x760   : > { %v26283_v21 = vadd.f32 %v6013_v19, %v26230_v47  ;;  %v6454_v24 = vsel %vm6176_vm3, %v6167_v46, 0 }
 0x761   : > { %v5909_v30 = vpop.f32.mrf.mxu1 }
 0x762   : > { %v6056_v26 = vsel %vm6028_vm5, %v26283_v21, -inf  ;;  %v19901_v30 = vld [vmem:[#allocation13 + $0x8] ss:$0 sm:$0xff] }
 0x763   : > { %v21253_v27 = vpop.f32.mrf.mxu1  ;;  %6057 = vmax.xlane.f32.xlu1 %v6056_v26 }
 0x765   : > { %v5998_v28 = vpop.f32.mrf.mxu1 }
 0x766   : > { %v6015_v31 = vmul.f32 0.25, %v5998_v28 }
 0x767   : > { %v21264_v34 = vpop.f32.mrf.mxu1 }
 0x768   : > { %v26288_v35 = vadd.f32 %v6015_v31, %v26230_v47  ;;  %v5266_v31 = vadd.f32 %v19901_v30, %v26196_v42 }
 0x769   : > { %v6001_v37 = vpop.f32.mrf.mxu1 }
 0x76a   : > { %v6062_v39 = vsel %vm6028_vm5, %v26288_v35, -inf  ;;  %v6169_v34 = vpack.c.bf16 %v5266_v31, %v5266_v31 }
 0x76b   : > { %v21265_v41 = vpop.f32.mrf.mxu1  ;;  %6063 = vmax.xlane.f32.xlu1 %v6062_v39 }
 0x76c   : > { %v19903_v41 = vld [vmem:[#allocation13 + $0xa] ss:$0 sm:$0xff]  ;;  %v6546_v42 = vsel %vm6176_vm3, %v6169_v34, 0 }
 0x79d   : > { %v6031_v43 = vpop.xlane.xlu1 %6030 }
 0x79e   : > { %v6065_v44 = vsub.f32 %v26233_v36, %v6031_v43 }
 0x7a0   : > { %v6077_v45 = vmul.f32 1.442695, %v6065_v44 }
 0x7a2   : > { %23381 = vpow2.f32 %v6077_v45 }
 0x7a5   : > { %v6037_v48 = vpop.xlane.xlu0 %6036 }
 0x7a6   : > { %v6067_v49 = vsub.f32 %v26238_v29, %v6037_v48  ;;  %v5058_v29 = vadd.f32 %v19897_v0, %v26178_v5  ;;  %v5370_v48 = vadd.f32 %v19903_v41, %v26205_v62 }
 0x7a8   : > { %v6081_v52 = vmul.f32 1.442695, %v6067_v49  ;;  %v6171_v50 = vpack.c.bf16 %v5370_v48, %v5370_v48 }
 0x7aa   : > { %23383 = vpow2.f32 %v6081_v52  ;;  %v6638_v62 = vsel %vm6176_vm3, %v6171_v50, 0 }
 0x7ad   : > { %v6043_v60 = vpop.xlane.xlu0 %6042 }
 0x7ae   : > { %v6069_v55 = vsub.f32 %v26243_v22, %v6043_v60  ;;  %v6165_v22 = vpack.c.bf16 %v5058_v29, %v5058_v29 }
 0x7af   : > { %v23382_v63 = vpop.eup %23381 }
 0x7b0   : > { %v6085_v1 = vmul.f32 1.442695, %v6069_v55  ;;  %v6101_v3 = vsel %vm6028_vm5, %v23382_v63, 0.0  ;;  %v6149_v36 = vpack.c.bf16 %v23382_v63, %v23382_v63  ;;  %v6362_v5 = vsel %vm6176_vm3, %v6165_v22, 0 }
 0x7b1   : > { %6102 = vadd.xlane.f32.xlu0 %v6101_v3 }
 0x7b2   : > { %23385 = vpow2.f32 %v6085_v1  ;;  %21269 = vmatmul.mubr.msk.bf16.vlgmr.msra.gmra.mxu0 %vm6028_vm5, %v6149_v36 }
 0x7b3   : > { %21279 = vmatpush3.bf16.msra.mxu0 %v6270_v4  ;;  %21280 = vmatprep.mubr.msk.bf16.mxu0 %vm25057_vm1, %v25056_v7 }
 0x7b4   : > { %21290 = vmatprep.subr.bf16.mxu0 %v25056_v7 }
 0x7b5   : > { %v6049_v51 = vpop.xlane.xlu0 %6048 }
 0x7b6   : > { %v6071_v6 = vsub.f32 %v26248_v15, %v6049_v51 }
 0x7b7   : > { %v23384_v53 = vpop.eup %23383 }
 0x7b8   : > { %v6089_v12 = vmul.f32 1.442695, %v6071_v6  ;;  %v6107_v14 = vsel %vm6028_vm5, %v23384_v53, 0.0  ;;  %v6151_v16 = vpack.c.bf16 %v23384_v53, %v23384_v53  ;;  %v19898_v53 = vld [vmem:[#allocation13 + $0x5] ss:$0 sm:$0xff] }
 0x7b9   : > { %6108 = vadd.xlane.f32.xlu0 %v6107_v14 }
 0x7ba   : > { %23387 = vpow2.f32 %v6089_v12  ;;  %21281 = vmatmul.mubr.msk.bf16.vlgmr.msra.gmra.mxu0 %vm6028_vm5, %v6151_v16  ;;  %v5110_v16 = vadd.f32 %v19898_v53, %v26221_v25 }
 0x7bb   : > { %21291 = vmatpush3.bf16.msra.mxu0 %v6362_v5  ;;  %21292 = vmatprep.mubr.msk.bf16.mxu0 %vm25057_vm1, %v25056_v7 }
 0x7bc   : > { %21302 = vmatprep.subr.bf16.mxu0 %v25056_v7 }
 0x7bd   : > { %v6055_v15 = vpop.xlane.xlu0 %6054 }
 0x7be   : > { %v6073_v19 = vsub.f32 %v26253_v23, %v6055_v15  ;;  %v19900_v15 = vld [vmem:[#allocation13 + $0x7] ss:$0 sm:$0xff] }
 0x7bf   : > { %v23386_v20 = vpop.eup %23385  ;;  %v5214_v30 = vadd.f32 %v19900_v15, %v26223_v9 }
 0x7c0   : > { %v6093_v26 = vmul.f32 1.442695, %v6073_v19  ;;  %v6113_v27 = vsel %vm6028_vm5, %v23386_v20, 0.0  ;;  %v6153_v28 = vpack.c.bf16 %v23386_v20, %v23386_v20 }
 0x7c1   : > { %6114 = vadd.xlane.f32.xlu0 %v6113_v27 }
 0x7c2   : > { %23389 = vpow2.f32 %v6093_v26  ;;  %21293 = vmatmul.mubr.msk.bf16.vlgmr.msra.gmra.mxu0 %vm6028_vm5, %v6153_v28  ;;  %v6168_v26 = vpack.c.bf16 %v5214_v30, %v5214_v30 }
 0x7c3   : > { %21303 = vmatpush3.bf16.msra.mxu0 %v6454_v24  ;;  %21304 = vmatprep.mubr.msk.bf16.mxu0 %vm25057_vm1, %v25056_v7  ;;  %v19902_v24 = vld [vmem:[#allocation13 + $0x9] ss:$0 sm:$0xff] }
 0x7c4   : > { %21314 = vmatprep.subr.bf16.mxu0 %v25056_v7  ;;  %v6500_v9 = vsel %vm6176_vm3, %v6168_v26, 0 }
 0x7c5   : > { %v6061_v23 = vpop.xlane.xlu0 %6060 }
 0x7c6   : > { %v6075_v37 = vsub.f32 %v26258_v8, %v6061_v23 }
 0x7c7   : > { %v23388_v39 = vpop.eup %23387 }
 0x7c8   : > { %v6097_v43 = vmul.f32 1.442695, %v6075_v37  ;;  %v6119_v44 = vsel %vm6028_vm5, %v23388_v39, 0.0  ;;  %v6155_v45 = vpack.c.bf16 %v23388_v39, %v23388_v39  ;;  %v5318_v37 = vadd.f32 %v19902_v24, %v26225_v18  ;;  %v22453_v39 = vld [vmem:[#allocation15 + $0x4] ss:$8 sps:$4 sm:$0xff]  }
 0x7c9   : > { %6120 = vadd.xlane.f32.xlu0 %v6119_v44 }
 0x7ca   : > { %23391 = vpow2.f32 %v6097_v43  ;;  %21305 = vmatmul.mubr.msk.bf16.vlgmr.msra.gmra.mxu0 %vm6028_vm5, %v6155_v45  ;;  %v6170_v43 = vpack.c.bf16 %v5318_v37, %v5318_v37 }
 0x7cb   : > { %21315 = vmatpush3.bf16.msra.mxu0 %v6546_v42  ;;  %21316 = vmatprep.mubr.msk.bf16.mxu0 %vm25057_vm1, %v25056_v7  ;;  %v19904_v42 = vld [vmem:[#allocation13 + $0xb] ss:$0 sm:$0xff] }
 0x7cc   : > { %v6034_v49 = vpop.xlane.xlu1 %6033  ;;  %21326 = vmatprep.subr.bf16.mxu0 %v25056_v7  ;;  %v6592_v50 = vsel %vm6176_vm3, %v6170_v43, 0 }
 0x7cd   : > { %v6066_v8 = vsub.f32 %v26263_v38, %v6034_v49  ;;  %v19896_v38 = vld [vmem:[#allocation13 + $0x3] ss:$0 sm:$0xff] }
 0x7ce   : > { %v5006_v4 = vadd.f32 %v19896_v38, %v26219_v10 }
 0x7cf   : > { %v23390_v52 = vpop.eup %23389  ;;  %v6079_v54 = vmul.f32 1.442695, %v6066_v8  ;;  %v25059_v8 = vmov 0  }
 0x7d0   : > { %v6125_v60 = vsel %vm6028_vm5, %v23390_v52, 0.0  ;;  %v6157_v61 = vpack.c.bf16 %v23390_v52, %v23390_v52  ;;  %v6164_v51 = vpack.c.bf16 %v5006_v4, %v5006_v4  ;;  %v5422_v52 = vadd.f32 %v19904_v42, %v26227_v40 }
 0x7d1   : > { %23393 = vpow2.f32 %v6079_v54  ;;  %6126 = vadd.xlane.f32.xlu0 %v6125_v60 }
 0x7d2   : > { %21317 = vmatmul.mubr.msk.bf16.vlgmr.msra.gmra.mxu0 %vm6028_vm5, %v6157_v61  ;;  %v6316_v14 = vsel %vm6176_vm3, %v6164_v51, 0  ;;  %v6172_v54 = vpack.c.bf16 %v5422_v52, %v5422_v52 }
 0x7d3   : > { %21327 = vmatpush3.bf16.msra.mxu0 %v6638_v62  ;;  %21328 = vmatprep.mubr.msk.bf16.mxu0 %vm25057_vm1, %v25056_v7 }
 0x7d4   : > { %v6040_v55 = vpop.xlane.xlu1 %6039  ;;  %6777 = vmatprep.subr.bf16.mxu0 %v22453_v39 }
 0x7d5   : > { %v6068_v63 = vsub.f32 %v26268_v59, %v6040_v55  ;;  %v6684_v55 = vsel %vm6176_vm3, %v6172_v54, 0 }
 0x7d7   : > { %v23392_v0 = vpop.eup %23391  ;;  %v6083_v1 = vmul.f32 1.442695, %v6068_v63 }
 0x7d8   : > { %v6131_v3 = vsel %vm6028_vm5, %v23392_v0, 0.0  ;;  %v6159_v36 = vpack.c.bf16 %v23392_v0, %v23392_v0  ;;  %v22469_v0 = vld [vmem:[#allocation15 + $0x10] ss:$8 sps:$4 sm:$0xff]  }
 0x7d9   : > { %23395 = vpow2.f32 %v6083_v1  ;;  %6132 = vadd.xlane.f32.xlu0 %v6131_v3  ;;  %v22471_v1 = vld [vmem:[#allocation15 + $0x14] ss:$8 sps:$4 sm:$0xff]  }
 0x7da   : > { %21329 = vmatmul.mubr.msk.bf16.vlgmr.msra.gmra.mxu0 %vm6028_vm5, %v6159_v36  ;;  %v22474_v3 = vld [vmem:[#allocation15 + $0x34] ss:$8 sps:$4 sm:$0xff]  }
 0x7db   : > { %6795 = vmatprep.mubr.bf16.mxu0 %v25059_v8 }
 0x7dc   : > { %v6046_v29 = vpop.xlane.xlu1 %6045 }
 0x7dd   : > { %v6070_v22 = vsub.f32 %v26273_v2, %v6046_v29  ;;  %v6166_v2 = vpack.c.bf16 %v5110_v16, %v5110_v16 }
 0x7de   : > { %v23394_v6 = vpop.eup %23393 }
 0x7df   : > { %v6087_v11 = vmul.f32 1.442695, %v6070_v22  ;;  %v6104_v59 = vsel %vm6028_vm5, %v23394_v6, 0.0  ;;  %v6150_v12 = vpack.c.bf16 %v23394_v6, %v23394_v6  ;;  %v6408_v25 = vsel %vm6176_vm3, %v6166_v2, 0 }
 0x7e0   : > { %6105 = vadd.xlane.f32.xlu1 %v6104_v59 }
 0x7e1   : > { %23397 = vpow2.f32 %v6087_v11  ;;  %21275 = vmatmul.mubr.msk.bf16.vlgmr.msra.gmra.mxu1 %vm6028_vm5, %v6150_v12  ;;  %v22454_v11 = vld [vmem:[#allocation15 + $0x20] ss:$8 sps:$4 sm:$0xff]   ;;  %v22459_v12 = vld [vmem:[#allocation15 + $0x44] ss:$8 sps:$4 sm:$0xff]  }
 0x7e2   : > { %21285 = vmatpush3.bf16.msra.mxu1 %v6316_v14  ;;  %21286 = vmatprep.mubr.msk.bf16.mxu1 %vm25057_vm1, %v25056_v7 }
 0x7e3   : > { %21296 = vmatprep.subr.bf16.mxu1 %v25056_v7 }
 0x7e4   : > { %v6052_v10 = vpop.xlane.xlu1 %6051 }
 0x7e5   : > { %v6072_v5 = vsub.f32 %v26278_v13, %v6052_v10 }
 0x7e6   : > { %v23396_v17 = vpop.eup %23395 }
 0x7e7   : > { %v6152_v46 = vpack.c.bf16 %v23396_v17, %v23396_v17  ;;  %v6091_v19 = vmul.f32 1.442695, %v6072_v5  ;;  %v6110_v20 = vsel %vm6028_vm5, %v23396_v17, 0.0 }
 0x7e8   : > { %6111 = vadd.xlane.f32.xlu1 %v6110_v20  ;;  %v22462_v20 = vld [vmem:[#allocation15 + $0x64] ss:$8 sps:$4 sm:$0xff]  }
 0x7e9   : > { %23399 = vpow2.f32 %v6091_v19  ;;  %21287 = vmatmul.mubr.msk.bf16.vlgmr.msra.gmra.mxu1 %vm6028_vm5, %v6152_v46  ;;  %v22457_v46 = vld [vmem:[#allocation15 + $0x40] ss:$8 sps:$4 sm:$0xff]  }
 0x7ea   : > { %21297 = vmatpush3.bf16.msra.mxu1 %v6408_v25  ;;  %21298 = vmatprep.mubr.msk.bf16.mxu1 %vm25057_vm1, %v25056_v7 }
 0x7eb   : > { %21308 = vmatprep.subr.bf16.mxu1 %v25056_v7 }
 0x7ec   : > { %v6058_v13 = vpop.xlane.xlu1 %6057 }
 0x7ed   : > { %v6074_v27 = vsub.f32 %v26283_v21, %v6058_v13  ;;  %v22451_v21 = vld [vmem:[#allocation15] ss:$8 sps:$4 sm:$0xff]  }
 0x7ee   : > { %v23398_v28 = vpop.eup %23397  ;;  %6778 = vmatpush1.bf16.msra.mxu0 %v22451_v21 }
 0x7ef   : > { %v6154_v31 = vpack.c.bf16 %v23398_v28, %v23398_v28  ;;  %v6095_v23 = vmul.f32 1.442695, %v6074_v27  ;;  %v6116_v34 = vsel %vm6028_vm5, %v23398_v28, 0.0 }
 0x7f0   : > { %6117 = vadd.xlane.f32.xlu1 %v6116_v34  ;;  %v22465_v34 = vld [vmem:[#allocation15 + $0x84] ss:$8 sps:$4 sm:$0xff]  }
 0x7f1   : > { %23401 = vpow2.f32 %v6095_v23  ;;  %21299 = vmatmul.mubr.msk.bf16.vlgmr.msra.gmra.mxu1 %vm6028_vm5, %v6154_v31  ;;  %v22460_v31 = vld [vmem:[#allocation15 + $0x60] ss:$8 sps:$4 sm:$0xff]  }
 0x7f2   : > { %21309 = vmatpush3.bf16.msra.mxu1 %v6500_v9  ;;  %21310 = vmatprep.mubr.msk.bf16.mxu1 %vm25057_vm1, %v25056_v7 }
 0x7f3   : > { %21320 = vmatprep.subr.bf16.mxu1 %v25056_v7 }
 0x7f4   : > { %v6064_v41 = vpop.xlane.xlu1 %6063 }
 0x7f5   : > { %v6076_v44 = vsub.f32 %v26288_v35, %v6064_v41  ;;  %v22456_v35 = vld [vmem:[#allocation15 + $0x24] ss:$8 sps:$4 sm:$0xff]  }
 0x7f6   : > { %v23400_v45 = vpop.eup %23399  ;;  %6885 = vmatprep.subr.bf16.mxu0 %v22456_v35 }
 0x7f7   : > { %v6156_v18 = vpack.c.bf16 %v23400_v45, %v23400_v45  ;;  %v6099_v48 = vmul.f32 1.442695, %v6076_v44  ;;  %v6122_v49 = vsel %vm6028_vm5, %v23400_v45, 0.0  ;;  %v22463_v45 = vld [vmem:[#allocation15 + $0x80] ss:$8 sps:$4 sm:$0xff]  }
 0x7f8   : > { %6123 = vadd.xlane.f32.xlu1 %v6122_v49 }
 0x7f9   : > { %23403 = vpow2.f32 %v6099_v48  ;;  %21311 = vmatmul.mubr.msk.bf16.vlgmr.msra.gmra.mxu1 %vm6028_vm5, %v6156_v18  ;;  %v22468_v18 = vld [vmem:[#allocation15 + $0xa4] ss:$8 sps:$4 sm:$0xff]  }
 0x7fa   : > { %21321 = vmatpush3.bf16.msra.mxu1 %v6592_v50  ;;  %21322 = vmatprep.mubr.msk.bf16.mxu1 %vm25057_vm1, %v25056_v7 }
 0x7fb   : > { %21332 = vmatprep.subr.bf16.mxu1 %v25056_v7 }
 0x7fe   : > { %v23402_v60 = vpop.eup %23401 }
 0x7ff   : > { %v6158_v61 = vpack.c.bf16 %v23402_v60, %v23402_v60  ;;  %v6128_v62 = vsel %vm6028_vm5, %v23402_v60, 0.0 }
 0x800   : > { %6129 = vadd.xlane.f32.xlu1 %v6128_v62 }
 0x801   : > { %21323 = vmatmul.mubr.msk.bf16.vlgmr.msra.gmra.mxu1 %vm6028_vm5, %v6158_v61  ;;  %v22466_v61 = vld [vmem:[#allocation15 + $0xa0] ss:$8 sps:$4 sm:$0xff]  }
 0x802   : > { %21333 = vmatpush3.bf16.msra.mxu1 %v6684_v55  ;;  %21334 = vmatprep.mubr.msk.bf16.mxu1 %vm25057_vm1, %v25056_v7 }
 0x803   : > { %6831 = vmatprep.subr.bf16.mxu1 %v22471_v1 }
 0x806   : > { %v23404_v40 = vpop.eup %23403 }
 0x807   : > { %v6160_v63 = vpack.c.bf16 %v23404_v40, %v23404_v40  ;;  %v6134_v38 = vsel %vm6028_vm5, %v23404_v40, 0.0 }
 0x808   : > { %6135 = vadd.xlane.f32.xlu1 %v6134_v38 }
 0x809   : > { %21335 = vmatmul.mubr.msk.bf16.vlgmr.msra.gmra.mxu1 %vm6028_vm5, %v6160_v63 }
 0x80a   : > { %6849 = vmatprep.mubr.bf16.mxu1 %v25059_v8  ;;  %6832 = vmatpush1.bf16.msra.mxu1 %v22469_v0 }
 0x80b   : > { %6939 = vmatprep.subr.bf16.mxu1 %v22474_v3 }
 0x83a   : > { %v6103_v36 = vpop.xlane.xlu0 %6102 }
 0x83b   : > { %23405 = vrcp.f32 %v6103_v36 }
 0x842   : > { %v6109_v4 = vpop.xlane.xlu0 %6108 }
 0x843   : > { %23407 = vrcp.f32 %v6109_v4 }
 0x848   : > { %v23406_v29 = vpop.eup %23405 }
 0x84a   : > { %v6115_v51 = vpop.xlane.xlu0 %6114 }
 0x84b   : > { %23409 = vrcp.f32 %v6115_v51 }
 0x850   : > { %v23408_v10 = vpop.eup %23407 }
 0x852   : > { %v6121_v2 = vpop.xlane.xlu0 %6120 }
 0x853   : > { %23411 = vrcp.f32 %v6121_v2 }
 0x858   : > { %v23410_v13 = vpop.eup %23409 }
 0x85a   : > { %v6127_v26 = vpop.xlane.xlu0 %6126 }
 0x85b   : > { %23413 = vrcp.f32 %v6127_v26 }
 0x860   : > { %v23412_v39 = vpop.eup %23411 }
 0x862   : > { %v6133_v21 = vpop.xlane.xlu0 %6132 }
 0x863   : > { %23415 = vrcp.f32 %v6133_v21 }
 0x868   : > { %v23414_v52 = vpop.eup %23413 }
 0x869   : > { %v6106_v50 = vpop.xlane.xlu1 %6105 }
 0x86a   : > { %23417 = vrcp.f32 %v6106_v50 }
 0x870   : > { %v23416_v38 = vpop.eup %23415 }
 0x871   : > { %v6112_v63 = vpop.xlane.xlu1 %6111 }
 0x872   : > { %v6214_v22 = vpop.f32.mrf.mxu0  ;;  %23419 = vrcp.f32 %v6112_v63 }
 0x873   : > { %v6726_v6 = vmul.f32 %v23406_v29, %v6214_v22 }
 0x874   : > { %v21270_v53 = vpop.f32.mrf.mxu0 }
 0x875   : > { %v6738_v59 = vpack.c.bf16 %v6726_v6, %v6726_v6 }
 0x876   : > { %v6217_v14 = vpop.f32.mrf.mxu0 }
 0x877   : > { %19979 = vmatmul.mubr.msk.bf16.vlgmr.msra.gmra.mxu0 %vm5451_vm2, %v6738_v59  ;;  %v23418_v51 = vpop.eup %23417  ;;  %v22472_v59 = vld [vmem:[#allocation15 + $0x30] ss:$8 sps:$4 sm:$0xff]   ;;  %v22477_v14 = vld [vmem:[#allocation15 + $0x54] ss:$8 sps:$4 sm:$0xff]  }
 0x878   : > { %v21271_v16 = vpop.f32.mrf.mxu0  ;;  %6886 = vmatpush1.bf16.msra.mxu0 %v22454_v11  ;;  %6903 = vmatprep.mubr.bf16.mxu0 %v25059_v8 }
 0x879   : > { %6993 = vmatprep.subr.bf16.mxu0 %v22459_v12  ;;  %v6118_v22 = vpop.xlane.xlu1 %6117 }
 0x87a   : > { %v6306_v5 = vpop.f32.mrf.mxu0  ;;  %23421 = vrcp.f32 %v6118_v22 }
 0x87b   : > { %v6728_v17 = vmul.f32 %v23408_v10, %v6306_v5 }
 0x87c   : > { %v21282_v15 = vpop.f32.mrf.mxu0 }
 0x87d   : > { %v6740_v19 = vpack.c.bf16 %v6728_v17, %v6728_v17 }
 0x87e   : > { %v6309_v25 = vpop.f32.mrf.mxu0 }
 0x87f   : > { %19985 = vmatmul.mubr.msk.bf16.vlgmr.msra.gmra.mxu0 %vm5451_vm2, %v6740_v19  ;;  %v23420_v2 = vpop.eup %23419  ;;  %v22475_v19 = vld [vmem:[#allocation15 + $0x50] ss:$8 sps:$4 sm:$0xff]   ;;  %v22480_v25 = vld [vmem:[#allocation15 + $0x74] ss:$8 sps:$4 sm:$0xff]  }
 0x880   : > { %v21283_v30 = vpop.f32.mrf.mxu0  ;;  %6994 = vmatpush1.bf16.msra.mxu0 %v22457_v46  ;;  %7011 = vmatprep.mubr.bf16.mxu0 %v25059_v8 }
 0x881   : > { %7101 = vmatprep.subr.bf16.mxu0 %v22462_v20  ;;  %v6124_v5 = vpop.xlane.xlu1 %6123 }
 0x882   : > { %v6398_v27 = vpop.f32.mrf.mxu0  ;;  %23423 = vrcp.f32 %v6124_v5 }
 0x883   : > { %v6730_v28 = vmul.f32 %v23410_v13, %v6398_v27 }
 0x884   : > { %v21294_v24 = vpop.f32.mrf.mxu0 }
 0x885   : > { %v6742_v23 = vpack.c.bf16 %v6730_v28, %v6730_v28 }
 0x886   : > { %v6401_v9 = vpop.f32.mrf.mxu0 }
 0x887   : > { %19991 = vmatmul.mubr.msk.bf16.vlgmr.msra.gmra.mxu0 %vm5451_vm2, %v6742_v23  ;;  %v23422_v26 = vpop.eup %23421  ;;  %v22478_v23 = vld [vmem:[#allocation15 + $0x70] ss:$8 sps:$4 sm:$0xff]   ;;  %v22483_v9 = vld [vmem:[#allocation15 + $0x94] ss:$8 sps:$4 sm:$0xff]  }
 0x888   : > { %v21295_v37 = vpop.f32.mrf.mxu0  ;;  %7102 = vmatpush1.bf16.msra.mxu0 %v22460_v31  ;;  %7119 = vmatprep.mubr.bf16.mxu0 %v25059_v8 }
 0x889   : > { %7209 = vmatprep.subr.bf16.mxu0 %v22465_v34  ;;  %v6130_v27 = vpop.xlane.xlu1 %6129 }
 0x88a   : > { %v6490_v41 = vpop.f32.mrf.mxu0  ;;  %23425 = vrcp.f32 %v6130_v27 }
 0x88b   : > { %v6732_v43 = vmul.f32 %v23412_v39, %v6490_v41 }
 0x88c   : > { %v21306_v44 = vpop.f32.mrf.mxu0 }
 0x88d   : > { %v6744_v42 = vpack.c.bf16 %v6732_v43, %v6732_v43 }
 0x88e   : > { %v6493_v48 = vpop.f32.mrf.mxu0 }
 0x88f   : > { %19997 = vmatmul.mubr.msk.bf16.vlgmr.msra.gmra.mxu0 %vm5451_vm2, %v6744_v42  ;;  %v23424_v21 = vpop.eup %23423  ;;  %v22481_v42 = vld [vmem:[#allocation15 + $0x90] ss:$8 sps:$4 sm:$0xff]   ;;  %v22486_v48 = vld [vmem:[#allocation15 + $0xb4] ss:$8 sps:$4 sm:$0xff]  }
 0x890   : > { %v21307_v49 = vpop.f32.mrf.mxu0  ;;  %7210 = vmatpush1.bf16.msra.mxu0 %v22463_v45  ;;  %7227 = vmatprep.mubr.bf16.mxu0 %v25059_v8 }
 0x891   : > { %7317 = vmatprep.subr.bf16.mxu0 %v22468_v18  ;;  %v6136_v41 = vpop.xlane.xlu1 %6135 }
 0x892   : > { %v6582_v35 = vpop.f32.mrf.mxu0  ;;  %23427 = vrcp.f32 %v6136_v41 }
 0x893   : > { %v6734_v54 = vmul.f32 %v23414_v52, %v6582_v35 }
 0x894   : > { %v21318_v60 = vpop.f32.mrf.mxu0 }
 0x895   : > { %v6746_v62 = vpack.c.bf16 %v6734_v54, %v6734_v54 }
 0x896   : > { %v6585_v55 = vpop.f32.mrf.mxu0 }
 0x897   : > { %20003 = vmatmul.mubr.msk.bf16.vlgmr.msra.gmra.mxu0 %vm5451_vm2, %v6746_v62  ;;  %v23426_v52 = vpop.eup %23425 }
 0x898   : > { %v21319_v40 = vpop.f32.mrf.mxu0  ;;  %7318 = vmatpush1.bf16.msra.mxu0 %v22466_v61  ;;  %7335 = vmatprep.mubr.bf16.mxu0 %v25059_v8  ;;  %v22484_v61 = vld [vmem:[#allocation15 + $0xb0] ss:$8 sps:$4 sm:$0xff]  }
 0x89a   : > { %v6674_v0 = vpop.f32.mrf.mxu0 }
 0x89b   : > { %v6736_v1 = vmul.f32 %v23416_v38, %v6674_v0 }
 0x89c   : > { %v21330_v3 = vpop.f32.mrf.mxu0 }
 0x89d   : > { %v6748_v36 = vpack.c.bf16 %v6736_v1, %v6736_v1 }
 0x89e   : > { %v6677_v4 = vpop.f32.mrf.mxu0 }
 0x89f   : > { %20009 = vmatmul.mubr.msk.bf16.vlgmr.msra.gmra.mxu0 %vm5451_vm2, %v6748_v36  ;;  %v23428_v63 = vpop.eup %23427 }
 0x8a0   : > { %v21331_v29 = vpop.f32.mrf.mxu0 }
 0x8a1   : > { %v6260_v6 = vpop.f32.mrf.mxu1 }
 0x8a2   : > { %v6727_v53 = vmul.f32 %v23418_v51, %v6260_v6 }
 0x8a3   : > { %v21276_v11 = vpop.f32.mrf.mxu1 }
 0x8a4   : > { %v6739_v12 = vpack.c.bf16 %v6727_v53, %v6727_v53 }
 0x8a5   : > { %v6263_v16 = vpop.f32.mrf.mxu1 }
 0x8a6   : > { %19982 = vmatmul.mubr.msk.bf16.vlgmr.msra.gmra.mxu1 %vm5451_vm2, %v6739_v12 }
 0x8a7   : > { %v21277_v10 = vpop.f32.mrf.mxu1  ;;  %6940 = vmatpush1.bf16.msra.mxu1 %v22472_v59  ;;  %6957 = vmatprep.mubr.bf16.mxu1 %v25059_v8 }
 0x8a8   : > { %7047 = vmatprep.subr.bf16.mxu1 %v22477_v14 }
 0x8a9   : > { %v6352_v17 = vpop.f32.mrf.mxu1 }
 0x8aa   : > { %v6729_v15 = vmul.f32 %v23420_v2, %v6352_v17 }
 0x8ab   : > { %v21288_v46 = vpop.f32.mrf.mxu1 }
 0x8ac   : > { %v6741_v20 = vpack.c.bf16 %v6729_v15, %v6729_v15 }
 0x8ad   : > { %v6355_v30 = vpop.f32.mrf.mxu1 }
 0x8ae   : > { %19988 = vmatmul.mubr.msk.bf16.vlgmr.msra.gmra.mxu1 %vm5451_vm2, %v6741_v20 }
 0x8af   : > { %v21289_v13 = vpop.f32.mrf.mxu1  ;;  %7048 = vmatpush1.bf16.msra.mxu1 %v22475_v19  ;;  %7065 = vmatprep.mubr.bf16.mxu1 %v25059_v8 }
 0x8b0   : > { %7155 = vmatprep.subr.bf16.mxu1 %v22480_v25 }
 0x8b1   : > { %v6444_v28 = vpop.f32.mrf.mxu1 }
 0x8b2   : > { %v6731_v24 = vmul.f32 %v23422_v26, %v6444_v28 }
 0x8b3   : > { %v21300_v31 = vpop.f32.mrf.mxu1 }
 0x8b4   : > { %v6743_v34 = vpack.c.bf16 %v6731_v24, %v6731_v24 }
 0x8b5   : > { %v6447_v37 = vpop.f32.mrf.mxu1 }
 0x8b6   : > { %19994 = vmatmul.mubr.msk.bf16.vlgmr.msra.gmra.mxu1 %vm5451_vm2, %v6743_v34 }
 0x8b7   : > { %v21301_v39 = vpop.f32.mrf.mxu1  ;;  %7156 = vmatpush1.bf16.msra.mxu1 %v22478_v23  ;;  %7173 = vmatprep.mubr.bf16.mxu1 %v25059_v8 }
 0x8b8   : > { %7263 = vmatprep.subr.bf16.mxu1 %v22483_v9 }
 0x8b9   : > { %v6536_v43 = vpop.f32.mrf.mxu1 }
 0x8ba   : > { %v6733_v44 = vmul.f32 %v23424_v21, %v6536_v43 }
 0x8bb   : > { %v21312_v45 = vpop.f32.mrf.mxu1 }
 0x8bc   : > { %v6745_v18 = vpack.c.bf16 %v6733_v44, %v6733_v44 }
 0x8bd   : > { %v6539_v49 = vpop.f32.mrf.mxu1 }
 0x8be   : > { %20000 = vmatmul.mubr.msk.bf16.vlgmr.msra.gmra.mxu1 %vm5451_vm2, %v6745_v18 }
 0x8bf   : > { %v21313_v50 = vpop.f32.mrf.mxu1  ;;  %7264 = vmatpush1.bf16.msra.mxu1 %v22481_v42  ;;  %7281 = vmatprep.mubr.bf16.mxu1 %v25059_v8 }
 0x8c0   : > { %7371 = vmatprep.subr.bf16.mxu1 %v22486_v48 }
 0x8c1   : > { %v6628_v35 = vpop.f32.mrf.mxu1 }
 0x8c2   : > { %v6735_v54 = vmul.f32 %v23426_v52, %v6628_v35 }
 0x8c3   : > { %v21324_v60 = vpop.f32.mrf.mxu1 }
 0x8c4   : > { %v6747_v62 = vpack.c.bf16 %v6735_v54, %v6735_v54 }
 0x8c5   : > { %v6631_v55 = vpop.f32.mrf.mxu1 }
 0x8c6   : > { %20006 = vmatmul.mubr.msk.bf16.vlgmr.msra.gmra.mxu1 %vm5451_vm2, %v6747_v62 }
 0x8c7   : > { %v21325_v40 = vpop.f32.mrf.mxu1  ;;  %7372 = vmatpush1.bf16.msra.mxu1 %v22484_v61  ;;  %7389 = vmatprep.mubr.bf16.mxu1 %v25059_v8 }
 0x8c9   : > { %v6720_v38 = vpop.f32.mrf.mxu1 }
 0x8ca   : > { %v6737_v0 = vmul.f32 %v23428_v63, %v6720_v38 }
 0x8cb   : > { %v21336_v1 = vpop.f32.mrf.mxu1 }
 0x8cc   : > { %v6749_v3 = vpack.c.bf16 %v6737_v0, %v6737_v0 }
 0x8cd   : > { %v6723_v36 = vpop.f32.mrf.mxu1 }
 0x8ce   : > { %20012 = vmatmul.mubr.msk.bf16.vlgmr.msra.gmra.mxu1 %vm5451_vm2, %v6749_v3 }
 0x8cf   : > { %v21337_v4 = vpop.f32.mrf.mxu1 }
 0x937   : > { %v6797_v29 = vpop.f32.mrf.mxu0 }
 0x939   : > { %v6799_v51 = vpop.f32.mrf.mxu0 }
 0x93a   : > { %v7409_v44 = vsel %vm2937_vm0, %v6799_v51, 0.0 }
 0x93b   : > { %v6801_v22 = vpop.f32.mrf.mxu0 }
 0x93d   : > { %v6802_v6 = vpop.f32.mrf.mxu0 }
 0x93f   : > { %v6905_v53 = vpop.f32.mrf.mxu0 }
 0x941   : > { %v6907_v11 = vpop.f32.mrf.mxu0 }
 0x942   : > { %v7412_v48 = vsel %vm2937_vm0, %v6907_v11, 0.0 }
 0x943   : > { %v6909_v59 = vpop.f32.mrf.mxu0 }
 0x945   : > { %v6910_v12 = vpop.f32.mrf.mxu0 }
 0x947   : > { %v7013_v14 = vpop.f32.mrf.mxu0 }
 0x949   : > { %v7015_v16 = vpop.f32.mrf.mxu0 }
 0x94a   : > { %v7416_v55 = vsel %vm2937_vm0, %v7015_v16, 0.0 }
 0x94b   : > { %v7017_v10 = vpop.f32.mrf.mxu0 }
 0x94d   : > { %v7018_v2 = vpop.f32.mrf.mxu0 }
 0x94f   : > { %v7121_v5 = vpop.f32.mrf.mxu0 }
 0x951   : > { %v7123_v17 = vpop.f32.mrf.mxu0 }
 0x953   : > { %v7125_v15 = vpop.f32.mrf.mxu0 }
 0x955   : > { %v7126_v46 = vpop.f32.mrf.mxu0 }
 0x957   : > { %v7229_v19 = vpop.f32.mrf.mxu0 }
 0x959   : > { %v7231_v20 = vpop.f32.mrf.mxu0 }
 0x95a   : > { %v7424_v16 = vsel %vm2937_vm0, %v7231_v20, 0.0 }
 0x95b   : > { %v7233_v25 = vpop.f32.mrf.mxu0 }
 0x95d   : > { %v7234_v30 = vpop.f32.mrf.mxu0 }
 0x95f   : > { %v7337_v13 = vpop.f32.mrf.mxu0 }
 0x961   : > { %v7339_v26 = vpop.f32.mrf.mxu0 }
 0x963   : > { %v7341_v27 = vpop.f32.mrf.mxu0 }
 0x964   : > { %v7428_v27 = vsel %vm2937_vm0, %v7339_v26, 0.0 }
 0x965   : > { %v7342_v28 = vpop.f32.mrf.mxu0 }
 0x966   : > { %v6851_v24 = vpop.f32.mrf.mxu1 }
 0x967   : > { %v7398_v31 = vadd.f32 %v6851_v24, %v6797_v29  ;;  %v7420_v29 = vsel %vm2937_vm0, %v7123_v17, 0.0  ;;  %v3116_v24 = vld [vmem:[#allocation16] sm:$0x3] }
 0x968   : > { %v6853_v23 = vpop.f32.mrf.mxu1  ;;  %v7438_v26 = vrot.slane %v3116_v24, %v25947_v57 }
 0x969   : > { %v7399_v34 = vadd.f32 %v7398_v31, %v6905_v53  ;;  %v7410_v41 = vsel %vm2937_vm0, %v6853_v23, 0.0 }
 0x96a   : > { %v6855_v9 = vpop.f32.mrf.mxu1  ;;  %v7411_v45 = vadd.f32 %v7410_v41, %v7409_v44 }
 0x96c   : > { %v6856_v37 = vpop.f32.mrf.mxu1  ;;  %v7413_v52 = vadd.f32 %v7412_v48, %v7411_v45  ;;  %v22489_v45 = vld [vmem:[%s27971_s15 + $0x154] ss:$24 sps:$4 sm:$0xff]  }
 0x96d   : > { %7887 = vmatprep.subr.bf16.mxu0 %v22489_v45  ;;  %v22498_v48 = vld [vmem:[%s27971_s15 + $0x12c] ss:$24 sps:$4 sm:$0xff]   ;;  %v22597_v45 = vld [vmem:[%s27972_s7 + $0x74] ss:$8 sps:$4 sm:$0xff]  }
 0x96e   : > { %v6959_v39 = vpop.f32.mrf.mxu1 }
 0x96f   : > { %v7400_v49 = vadd.f32 %v7399_v34, %v6959_v39  ;;  %v7442_v34 = vrot.slane %v3116_v24, %v25950_v58  ;;  %v22538_v24 = vld [vmem:[%s27971_s15 + $0x218] ss:$24 sps:$4 sm:$0xff]  }
 0x970   : > { %v6961_v21 = vpop.f32.mrf.mxu1 }
 0x971   : > { %v7414_v50 = vsel %vm2937_vm0, %v6961_v21, 0.0  ;;  %v7401_v61 = vadd.f32 %v7400_v49, %v7013_v14  ;;  %v22493_v49 = vld [vmem:[%s27971_s15 + $0x120] ss:$24 sps:$4 sm:$0xff]  }
 0x972   : > { %v6963_v43 = vpop.f32.mrf.mxu1  ;;  %v7415_v54 = vadd.f32 %v7414_v50, %v7413_v52  ;;  %v22496_v50 = vld [vmem:[%s27971_s15 + $0x128] ss:$24 sps:$4 sm:$0xff]   ;;  %v22501_v52 = vld [vmem:[%s27971_s15 + $0xf4] ss:$24 sps:$4 sm:$0xff]  }
 0x974   : > { %v6964_v42 = vpop.f32.mrf.mxu1  ;;  %v7417_v38 = vadd.f32 %v7416_v55, %v7415_v54  ;;  %v22499_v54 = vld [vmem:[%s27971_s15 + $0xf0] ss:$24 sps:$4 sm:$0xff]   ;;  %v22505_v55 = vld [vmem:[%s27971_s15 + $0xc0] ss:$24 sps:$4 sm:$0xff]  }
 0x975   : > { %v22490_v42 = vld [vmem:[%s27971_s15 + $0x158] ss:$24 sps:$4 sm:$0xff]  }
 0x976   : > { %v7067_v18 = vpop.f32.mrf.mxu1 }
 0x977   : > { %v7402_v40 = vadd.f32 %v7401_v61, %v7067_v18  ;;  %v22495_v18 = vld [vmem:[%s27971_s15 + $0x124] ss:$24 sps:$4 sm:$0xff]  }
 0x978   : > { %v7069_v35 = vpop.f32.mrf.mxu1  ;;  %v22507_v61 = vld [vmem:[%s27971_s15 + $0xc4] ss:$24 sps:$4 sm:$0xff]  }
 0x979   : > { %v7418_v63 = vsel %vm2937_vm0, %v7069_v35, 0.0  ;;  %v7403_v36 = vadd.f32 %v7402_v40, %v7121_v5  ;;  %v22504_v35 = vld [vmem:[%s27971_s15 + $0xfc] ss:$24 sps:$4 sm:$0xff]   ;;  %v22508_v40 = vld [vmem:[%s27971_s15 + $0xc8] ss:$24 sps:$4 sm:$0xff]  }
 0x97a   : > { %v7071_v60 = vpop.f32.mrf.mxu1  ;;  %v7419_v1 = vadd.f32 %v7418_v63, %v7417_v38  ;;  %v22513_v63 = vld [vmem:[%s27971_s15 + $0x94] ss:$24 sps:$4 sm:$0xff]  }
 0x97b   : > { %v22502_v60 = vld [vmem:[%s27971_s15 + $0xf8] ss:$24 sps:$4 sm:$0xff]   ;;  %v22516_v38 = vld [vmem:[%s27971_s15 + $0x9c] ss:$24 sps:$4 sm:$0xff]  }
 0x97c   : > { %v7072_v62 = vpop.f32.mrf.mxu1  ;;  %v7421_v6 = vadd.f32 %v7420_v29, %v7419_v1  ;;  %v22514_v1 = vld [vmem:[%s27971_s15 + $0x98] ss:$24 sps:$4 sm:$0xff]   ;;  %v22520_v29 = vld [vmem:[%s27971_s15 + $0x68] ss:$24 sps:$4 sm:$0xff]  }
 0x97d   : > { %v22510_v62 = vld [vmem:[%s27971_s15 + $0xcc] ss:$24 sps:$4 sm:$0xff]  }
 0x97e   : > { %v7175_v0 = vpop.f32.mrf.mxu1 }
 0x97f   : > { %v7404_v51 = vadd.f32 %v7403_v36, %v7175_v0  ;;  %v22511_v0 = vld [vmem:[%s27971_s15 + $0x90] ss:$24 sps:$4 sm:$0xff]   ;;  %v22522_v36 = vld [vmem:[%s27971_s15 + $0x6c] ss:$24 sps:$4 sm:$0xff]  }
 0x980   : > { %v7177_v3 = vpop.f32.mrf.mxu1 }
 0x981   : > { %v7422_v22 = vsel %vm2937_vm0, %v7177_v3, 0.0  ;;  %v7405_v12 = vadd.f32 %v7404_v51, %v7229_v19  ;;  %v22519_v3 = vld [vmem:[%s27971_s15 + $0x64] ss:$24 sps:$4 sm:$0xff]  }
 0x982   : > { %v7179_v4 = vpop.f32.mrf.mxu1  ;;  %v7423_v11 = vadd.f32 %v7422_v22, %v7421_v6 }
 0x983   : > { %v22517_v4 = vld [vmem:[%s27971_s15 + $0x60] ss:$24 sps:$4 sm:$0xff]  }
 0x984   : > { %v7180_v53 = vpop.f32.mrf.mxu1  ;;  %v7425_v15 = vadd.f32 %v7424_v16, %v7423_v11  ;;  %v22525_v16 = vld [vmem:[%s27971_s15 + $0x34] ss:$24 sps:$4 sm:$0xff]  }
 0x986   : > { %v7283_v59 = vpop.f32.mrf.mxu1 }
 0x987   : > { %v7406_v10 = vadd.f32 %v7405_v12, %v7283_v59 }
 0x988   : > { %v7285_v14 = vpop.f32.mrf.mxu1 }
 0x989   : > { %v7426_v2 = vsel %vm2937_vm0, %v7285_v14, 0.0  ;;  %v7407_v30 = vadd.f32 %v7406_v10, %v7337_v13  ;;  %v22523_v10 = vld [vmem:[%s27971_s15 + $0x30] ss:$24 sps:$4 sm:$0xff]  }
 0x98a   : > { %v7287_v46 = vpop.f32.mrf.mxu1  ;;  %v7427_v5 = vadd.f32 %v7426_v2, %v7425_v15  ;;  %v22528_v2 = vld [vmem:[%s27971_s15 + $0x3c] ss:$24 sps:$4 sm:$0xff]   ;;  %v22526_v15 = vld [vmem:[%s27971_s15 + $0x38] ss:$24 sps:$4 sm:$0xff]  }
 0x98b   : > { %v22531_v46 = vld [vmem:[%s27971_s15 + $0x4] ss:$24 sps:$4 sm:$0xff]  }
 0x98c   : > { %v7288_v25 = vpop.f32.mrf.mxu1  ;;  %v7429_v19 = vadd.f32 %v7428_v27, %v7427_v5  ;;  %v22529_v5 = vld [vmem:[%s27971_s15] ss:$24 sps:$4 sm:$0xff]   ;;  %v22535_v27 = vld [vmem:[%s27971_s15 + $0x210] ss:$24 sps:$4 sm:$0xff]  }
 0x98d   : > { %v22534_v25 = vld [vmem:[%s27971_s15 + $0xc] ss:$24 sps:$4 sm:$0xff]  }
 0x98e   : > { %v7391_v17 = vpop.f32.mrf.mxu1 }
 0x98f   : > { %v7408_v28 = vadd.f32 %v7407_v30, %v7391_v17  ;;  %v22532_v30 = vld [vmem:[%s27971_s15 + $0x8] ss:$24 sps:$4 sm:$0xff]   ;;  %v22537_v17 = vld [vmem:[%s27971_s15 + $0x214] ss:$24 sps:$4 sm:$0xff]  }
 0x990   : > { %v7393_v31 = vpop.f32.mrf.mxu1 }
 0x991   : > { %v7430_v20 = vsel %vm2937_vm0, %v7393_v31, 0.0  ;;  %v7432_v13 = vadd.f32 %v7408_v28, %v25931_v33  ;;  %v22487_v33 = vld [vmem:[%s27971_s15 + $0x150] ss:$24 sps:$4 sm:$0xff]   ;;  %v22540_v28 = vld [vmem:[%s27971_s15 + $0x21c] ss:$24 sps:$4 sm:$0xff]  }
 0x992   : > { %v7431_v23 = vadd.f32 %v7430_v20, %v7429_v19  ;;  %v7395_v9 = vpop.f32.mrf.mxu1  ;;  %7888 = vmatpush1.bf16.msra.mxu0 %v22487_v33  ;;  %v22543_v31 = vld [vmem:[%s27971_s15 + $0x1e4] ss:$24 sps:$4 sm:$0xff]   ;;  %v22541_v19 = vld [vmem:[%s27971_s15 + $0x1e0] ss:$24 sps:$4 sm:$0xff]  }
 0x993   : > { %v26418_v41 = vadd.f32 %v7438_v26, %v7432_v13  ;;  %7889 = vmatprep.subr.bf16.mxu0 %v22495_v18  ;;  %v22546_v20 = vld [vmem:[%s27971_s15 + $0x1ec] ss:$24 sps:$4 sm:$0xff]   ;;  %v22550_v13 = vld [vmem:[%s27971_s15 + $0x1b8] ss:$24 sps:$4 sm:$0xff]   ;;  %v22552_v26 = vld [vmem:[%s27971_s15 + $0x1bc] ss:$24 sps:$4 sm:$0xff]  }
 0x994   : > { %v7433_v37 = vadd.f32 %v7431_v23, %v25929_v32  ;;  %v7396_v39 = vpop.f32.mrf.mxu1  ;;  %v22492_v32 = vld [vmem:[%s27971_s15 + $0x15c] ss:$24 sps:$4 sm:$0xff]   ;;  %v22544_v23 = vld [vmem:[%s27971_s15 + $0x1e8] ss:$24 sps:$4 sm:$0xff]  }
 0x995   : > { %7928 = vmatprep.subr.bf16.mxu1 %v22492_v32  ;;  %v22549_v9 = vld [vmem:[%s27971_s15 + $0x1b4] ss:$24 sps:$4 sm:$0xff]   ;;  %v22561_v33 = vld [vmem:[%s27971_s15 + $0x164] ss:$24 sps:$4 sm:$0xff]  }
 0x996   : > { %v26416_v21 = vadd.f32 %v7442_v34, %v7433_v37  ;;  %7929 = vmatpush1.bf16.msra.mxu1 %v22490_v42  ;;  %7890 = vmatpush1.bf16.msra.mxu0 %v22493_v49  ;;  %v22547_v34 = vld [vmem:[%s27971_s15 + $0x1b0] ss:$24 sps:$4 sm:$0xff]   ;;  %v22555_v37 = vld [vmem:[%s27971_s15 + $0x184] ss:$24 sps:$4 sm:$0xff]  }
 0x997   : > { %7930 = vmatprep.subr.bf16.mxu1 %v22498_v48  ;;  %7891 = vmatprep.subr.bf16.mxu0 %v22501_v52  ;;  %v22558_v39 = vld [vmem:[%s27971_s15 + $0x18c] ss:$24 sps:$4 sm:$0xff]   ;;  %v3118_v49 = vld [vmem:[#allocation19] sm:$0x3] }
 0x998   : > { %v7447_v43 = vsel %vm2937_vm0, %v26416_v21, 0.0  ;;  %v3117_v48 = vld [vmem:[#allocation18] sm:$0x3] }
 0x999   : > { %v7448_v44 = vadd.f32 %v7447_v43, %v26418_v41  ;;  %v22553_v43 = vld [vmem:[%s27971_s15 + $0x180] ss:$24 sps:$4 sm:$0xff]   ;;  %v7473_v52 = vrot.slane %v3117_v48, %v25950_v58 }
 0x99a   : > { %7931 = vmatpush1.bf16.msra.mxu1 %v22496_v50  ;;  %7892 = vmatpush1.bf16.msra.mxu0 %v22499_v54  ;;  %v7469_v50 = vrot.slane %v3117_v48, %v25947_v57  ;;  %v22604_v48 = vld [vmem:[%s27972_s7 + $0x160] ss:$8 sps:$4 sm:$0xff]  }
 0x99b   : > { %7449 = vadd.xlane.f32.xlu0 %v7448_v44  ;;  %7932 = vmatprep.subr.bf16.mxu1 %v22504_v35  ;;  %v22556_v44 = vld [vmem:[%s27971_s15 + $0x188] ss:$24 sps:$4 sm:$0xff]  }
 0x99c   : > { %7893 = vmatprep.subr.bf16.mxu0 %v22507_v61  ;;  %v7482_v61 = vrot.slane %v3118_v49, %v25947_v57 }
 0x99e   : > { %7933 = vmatpush1.bf16.msra.mxu1 %v22502_v60  ;;  %7894 = vmatpush1.bf16.msra.mxu0 %v22505_v55 }
 0x99f   : > { %7934 = vmatprep.subr.bf16.mxu1 %v22510_v62  ;;  %7895 = vmatprep.subr.bf16.mxu0 %v22513_v63  ;;  %v7486_v62 = vrot.slane %v3118_v49, %v25950_v58  ;;  %v22612_v49 = vld [vmem:[%s27972_s7 + $0x154] ss:$8 sps:$4 sm:$0xff]  }
 0x9a2   : > { %7935 = vmatpush1.bf16.msra.mxu1 %v22508_v40  ;;  %7896 = vmatpush1.bf16.msra.mxu0 %v22511_v0 }
 0x9a3   : > { %7936 = vmatprep.subr.bf16.mxu1 %v22516_v38  ;;  %7897 = vmatprep.subr.bf16.mxu0 %v22519_v3 }
 0x9a6   : > { %7937 = vmatpush1.bf16.msra.mxu1 %v22514_v1  ;;  %7898 = vmatpush1.bf16.msra.mxu0 %v22517_v4  ;;  %v22559_v1 = vld [vmem:[%s27971_s15 + $0x160] ss:$24 sps:$4 sm:$0xff]  }
 0x9a7   : > { %7938 = vmatprep.subr.bf16.mxu1 %v22522_v36  ;;  %7899 = vmatprep.subr.bf16.mxu0 %v22525_v16  ;;  %v22564_v36 = vld [vmem:[%s27971_s15 + $0x134] ss:$24 sps:$4 sm:$0xff]   ;;  %v22595_v4 = vld [vmem:[%s27972_s7 + $0x70] ss:$8 sps:$4 sm:$0xff]  }
 0x9a8   : > { %v22568_v16 = vld [vmem:[%s27971_s15 + $0xd0] ss:$24 sps:$4 sm:$0xff]  }
 0x9aa   : > { %7939 = vmatpush1.bf16.msra.mxu1 %v22520_v29  ;;  %7900 = vmatpush1.bf16.msra.mxu0 %v22523_v10  ;;  %v22603_v29 = vld [vmem:[%s27972_s7 + $0x64] ss:$8 sps:$4 sm:$0xff]  }
 0x9ab   : > { %7940 = vmatprep.subr.bf16.mxu1 %v22528_v2  ;;  %7901 = vmatprep.subr.bf16.mxu0 %v22531_v46  ;;  %v22573_v10 = vld [vmem:[%s27971_s15 + $0xa4] ss:$24 sps:$4 sm:$0xff]   ;;  %v22613_v2 = vld [vmem:[%s27972_s7 + $0x40] ss:$8 sps:$4 sm:$0xff]  }
 0x9ac   : > { %v22571_v46 = vld [vmem:[%s27971_s15 + $0xa0] ss:$24 sps:$4 sm:$0xff]  }
 0x9ae   : > { %7941 = vmatpush1.bf16.msra.mxu1 %v22526_v15  ;;  %7902 = vmatpush1.bf16.msra.mxu0 %v22529_v5  ;;  %v22621_v15 = vld [vmem:[%s27972_s7 + $0x34] ss:$8 sps:$4 sm:$0xff]  }
 0x9af   : > { %7942 = vmatprep.subr.bf16.mxu1 %v22534_v25  ;;  %7911 = vmatprep.subr.bf16.mxu0 %v22537_v17  ;;  %v22576_v5 = vld [vmem:[%s27971_s15 + $0x74] ss:$24 sps:$4 sm:$0xff]   ;;  %v22619_v25 = vld [vmem:[%s27972_s7 + $0x30] ss:$8 sps:$4 sm:$0xff]  }
 0x9b0   : > { %v22574_v17 = vld [vmem:[%s27971_s15 + $0x70] ss:$24 sps:$4 sm:$0xff]  }
 0x9b2   : > { %7943 = vmatpush1.bf16.msra.mxu1 %v22532_v30  ;;  %7912 = vmatpush2.bf16.msra.mxu0 %v22535_v27  ;;  %v22627_v30 = vld [vmem:[%s27972_s7 + $0x24] ss:$8 sps:$4 sm:$0xff]  }
 0x9b3   : > { %7952 = vmatprep.subr.bf16.mxu1 %v22540_v28  ;;  %7913 = vmatprep.subr.bf16.mxu0 %v22543_v31  ;;  %v22579_v27 = vld [vmem:[%s27971_s15 + $0x44] ss:$24 sps:$4 sm:$0xff]   ;;  %v22625_v28 = vld [vmem:[%s27972_s7 + $0x20] ss:$8 sps:$4 sm:$0xff]  }
 0x9b4   : > { %v22577_v31 = vld [vmem:[%s27971_s15 + $0x40] ss:$24 sps:$4 sm:$0xff]  }
 0x9b6   : > { %7953 = vmatpush2.bf16.msra.mxu1 %v22538_v24  ;;  %7914 = vmatpush2.bf16.msra.mxu0 %v22541_v19  ;;  %v22633_v24 = vld [vmem:[%s27972_s7 + $0x14] ss:$8 sps:$4 sm:$0xff]  }
 0x9b7   : > { %7954 = vmatprep.subr.bf16.mxu1 %v22546_v20  ;;  %7915 = vmatprep.subr.bf16.mxu0 %v22549_v9  ;;  %v22582_v19 = vld [vmem:[%s27971_s15 + $0x14] ss:$24 sps:$4 sm:$0xff]   ;;  %v22631_v20 = vld [vmem:[%s27972_s7 + $0x10] ss:$8 sps:$4 sm:$0xff]   ;;  %v22585_v9 = vld [vmem:[%s27971_s15 + $0x224] ss:$24 sps:$4 sm:$0xff]  }
 0x9ba   : > { %7955 = vmatpush2.bf16.msra.mxu1 %v22544_v23  ;;  %7916 = vmatpush2.bf16.msra.mxu0 %v22547_v34  ;;  %v22639_v23 = vld [vmem:[%s27972_s7 + $0x4] ss:$8 sps:$4 sm:$0xff]   ;;  %v22580_v34 = vld [vmem:[%s27971_s15 + $0x10] ss:$24 sps:$4 sm:$0xff]  }
 0x9bb   : > { %7956 = vmatprep.subr.bf16.mxu1 %v22552_v26  ;;  %7917 = vmatprep.subr.bf16.mxu0 %v22555_v37  ;;  %v22583_v26 = vld [vmem:[%s27971_s15 + $0x220] ss:$24 sps:$4 sm:$0xff]   ;;  %v22588_v37 = vld [vmem:[%s27971_s15 + $0x1f4] ss:$24 sps:$4 sm:$0xff]  }
 0x9be   : > { %7957 = vmatpush2.bf16.msra.mxu1 %v22550_v13  ;;  %7918 = vmatpush2.bf16.msra.mxu0 %v22553_v43  ;;  %v22637_v13 = vld [vmem:[%s27972_s7] ss:$8 sps:$4 sm:$0xff]   ;;  %v22591_v43 = vld [vmem:[%s27971_s15 + $0x1c4] ss:$24 sps:$4 sm:$0xff]  }
 0x9bf   : > { %7958 = vmatprep.subr.bf16.mxu1 %v22558_v39  ;;  %7969 = vmatprep.subr.bf16.mxu0 %v22561_v33  ;;  %v22586_v39 = vld [vmem:[%s27971_s15 + $0x1f0] ss:$24 sps:$4 sm:$0xff]   ;;  %v22594_v33 = vld [vmem:[%s27971_s15 + $0x194] ss:$24 sps:$4 sm:$0xff]  }
 0x9c2   : > { %7959 = vmatpush2.bf16.msra.mxu1 %v22556_v44  ;;  %v22589_v44 = vld [vmem:[%s27971_s15 + $0x1c0] ss:$24 sps:$4 sm:$0xff]  }
 0x9c3   : > { %8550 = vmatprep.subr.bf16.mxu1 %v22597_v45  ;;  %v22592_v45 = vld [vmem:[%s27971_s15 + $0x190] ss:$24 sps:$4 sm:$0xff]  }
 0xa24   : > { %v7450_v51 = vpop.xlane.xlu0 %7449 }
 0xa25   : > { %v7451_v22 = vmul.f32 0.0052083335, %v7450_v51  ;;  %v22562_v51 = vld [vmem:[%s27971_s15 + $0x130] ss:$24 sps:$4 sm:$0xff]  }
 0xa27   : > { %v26448_v6 = vsub.f32 %v26418_v41, %v7451_v22  ;;  %v26451_v53 = vsub.f32 %v26416_v21, %v7451_v22  ;;  %v22567_v22 = vld [vmem:[%s27971_s15 + $0x104] ss:$24 sps:$4 sm:$0xff]  }
 0xa29   : > { %v7454_v11 = vmul.f32 %v26448_v6, %v26448_v6  ;;  %v7455_v59 = vmul.f32 %v26451_v53, %v26451_v53 }
 0xa2b   : > { %v7456_v12 = vsel %vm2937_vm0, %v7455_v59, 0.0  ;;  %v22570_v59 = vld [vmem:[%s27971_s15 + $0xd4] ss:$24 sps:$4 sm:$0xff]  }
 0xa2c   : > { %v7457_v14 = vadd.f32 %v7456_v12, %v7454_v11  ;;  %v22565_v11 = vld [vmem:[%s27971_s15 + $0x100] ss:$24 sps:$4 sm:$0xff]  }
 0xa2d   : > { %v22607_v12 = vld [vmem:[%s27972_s7 + $0x50] ss:$8 sps:$4 sm:$0xff]  }
 0xa2e   : > { %7458 = vadd.xlane.f32.xlu1 %v7457_v14  ;;  %v22615_v14 = vld [vmem:[%s27972_s7 + $0x44] ss:$8 sps:$4 sm:$0xff]  }
 0xab7   : > { %v7459_v42 = vpop.xlane.xlu1 %7458 }
 0xab8   : > { %v7460_v32 = vmul.f32 0.0052083335, %v7459_v42  ;;  %v22600_v42 = vld [vmem:[%s27972_s7 + $0x174] ss:$8 sps:$4 sm:$0xff]  }
 0xaba   : > { %v7461_v18 = vadd.f32 1e-06, %v7460_v32  ;;  %v22598_v32 = vld [vmem:[%s27972_s7 + $0x170] ss:$8 sps:$4 sm:$0xff]  }
 0xabc   : > { %23429 = vrsqrt.f32 %v7461_v18  ;;  %v22606_v18 = vld [vmem:[%s27972_s7 + $0x164] ss:$8 sps:$4 sm:$0xff]  }
 0xac9   : > { %v23430_v35 = vpop.eup %23429 }
 0xaca   : > { %v7463_v54 = vmul.f32 %v23430_v35, %v26448_v6  ;;  %v7464_v60 = vmul.f32 %v23430_v35, %v26451_v53  ;;  %v22601_v6 = vld [vmem:[%s27972_s7 + $0x60] ss:$8 sps:$4 sm:$0xff]   ;;  %v22609_v53 = vld [vmem:[%s27972_s7 + $0x54] ss:$8 sps:$4 sm:$0xff]  }
 0xacb   : > { %v22616_v35 = vld [vmem:[%s27972_s7 + $0x140] ss:$8 sps:$4 sm:$0xff]  }
 0xacc   : > { %v7477_v55 = vmul.f32 %v7473_v52, %v7464_v60  ;;  %v7476_v40 = vmul.f32 %v7469_v50, %v7463_v54  ;;  %v22610_v50 = vld [vmem:[%s27972_s7 + $0x150] ss:$8 sps:$4 sm:$0xff]   ;;  %v22618_v52 = vld [vmem:[%s27972_s7 + $0x144] ss:$8 sps:$4 sm:$0xff]   ;;  %v22624_v54 = vld [vmem:[%s27972_s7 + $0x134] ss:$8 sps:$4 sm:$0xff]  }
 0xacd   : > { %v22622_v60 = vld [vmem:[%s27972_s7 + $0x130] ss:$8 sps:$4 sm:$0xff]  }
 0xace   : > { %v7490_v63 = vadd.f32 %v7486_v62, %v7477_v55  ;;  %v7489_v38 = vadd.f32 %v7482_v61, %v7476_v40  ;;  %v22630_v61 = vld [vmem:[%s27972_s7 + $0x124] ss:$8 sps:$4 sm:$0xff]   ;;  %v22628_v62 = vld [vmem:[%s27972_s7 + $0x120] ss:$8 sps:$4 sm:$0xff]   ;;  %v22636_v55 = vld [vmem:[%s27972_s7 + $0x114] ss:$8 sps:$4 sm:$0xff]  }
 0xacf   : > { %v22645_v40 = vld [vmem:[%s27972_s7 + $0xf4] ss:$8 sps:$4 sm:$0xff]  }
 0xad0   : > { %v7492_v0 = vpack.c.bf16 %v7490_v63, %v7490_v63  ;;  %v26491_v3 = vpack.c.bf16 %v7489_v38, %v7489_v38  ;;  %v22643_v63 = vld [vmem:[%s27972_s7 + $0xf0] ss:$8 sps:$4 sm:$0xff]  }
 0xad1   : > { %v22634_v38 = vld [vmem:[%s27972_s7 + $0x110] ss:$8 sps:$4 sm:$0xff]  }
 0xad2   : > { %20085 = vmatprep.mubr.msk.bf16.mxu0 %vm2937_vm0, %v7492_v0  ;;  %20086 = vmatprep.mubr.msk.bf16.mxu1 %vm2937_vm0, %v7492_v0 }
 0xad3   : > { %7920 = vmatmul.mubr.bf16.vlgmr.msra.gmra.mxu0 %v26491_v3  ;;  %7961 = vmatmul.mubr.bf16.vlgmr.msra.gmra.mxu1 %v26491_v3 }
 0xad4   : > { %7970 = vmatpush1.bf16.msra.mxu0 %v22559_v1  ;;  %20087 = vmatprep.mubr.msk.bf16.mxu0 %vm2937_vm0, %v7492_v0  ;;  %v22642_v0 = vld [vmem:[%s27972_s7 + $0x104] ss:$8 sps:$4 sm:$0xff]  }
 0xad5   : > { %7971 = vmatprep.subr.bf16.mxu0 %v22564_v36  ;;  %8551 = vmatpush1.bf16.msra.mxu1 %v22595_v4  ;;  %v22651_v1 = vld [vmem:[%s27972_s7 + $0xe4] ss:$8 sps:$4 sm:$0xff]   ;;  %v22640_v36 = vld [vmem:[%s27972_s7 + $0x100] ss:$8 sps:$4 sm:$0xff]   ;;  %v22648_v4 = vld [vmem:[%s27972_s7 + $0x1f4] ss:$8 sps:$4 sm:$0xff]  }
 0xad6   : > { %8552 = vmatprep.subr.bf16.mxu1 %v22603_v29  ;;  %v22657_v29 = vld [vmem:[%s27972_s7 + $0xd4] ss:$8 sps:$4 sm:$0xff]  }
 0xad8   : > { %7972 = vmatpush1.bf16.msra.mxu0 %v22562_v51  ;;  %v22655_v51 = vld [vmem:[%s27972_s7 + $0xd0] ss:$8 sps:$4 sm:$0xff]  }
 0xad9   : > { %7973 = vmatprep.subr.bf16.mxu0 %v22567_v22  ;;  %8553 = vmatpush1.bf16.msra.mxu1 %v22601_v6  ;;  %v22646_v22 = vld [vmem:[%s27972_s7 + $0x1f0] ss:$8 sps:$4 sm:$0xff]   ;;  %v22654_v6 = vld [vmem:[%s27972_s7 + $0x1e4] ss:$8 sps:$4 sm:$0xff]  }
 0xada   : > { %8554 = vmatprep.subr.bf16.mxu1 %v22609_v53  ;;  %v22661_v53 = vld [vmem:[%s27972_s7 + $0xc0] ss:$8 sps:$4 sm:$0xff]  }
 0xadc   : > { %7974 = vmatpush1.bf16.msra.mxu0 %v22565_v11  ;;  %v22663_v11 = vld [vmem:[%s27972_s7 + $0xc4] ss:$8 sps:$4 sm:$0xff]  }
 0xadd   : > { %7975 = vmatprep.subr.bf16.mxu0 %v22570_v59  ;;  %8555 = vmatpush1.bf16.msra.mxu1 %v22607_v12  ;;  %v22669_v59 = vld [vmem:[%s27972_s7 + $0xb4] ss:$8 sps:$4 sm:$0xff]   ;;  %v22652_v12 = vld [vmem:[%s27972_s7 + $0x1e0] ss:$8 sps:$4 sm:$0xff]  }
 0xade   : > { %8556 = vmatprep.subr.bf16.mxu1 %v22615_v14  ;;  %v22660_v14 = vld [vmem:[%s27972_s7 + $0x1d4] ss:$8 sps:$4 sm:$0xff]  }
 0xae0   : > { %7976 = vmatpush1.bf16.msra.mxu0 %v22568_v16  ;;  %v22667_v16 = vld [vmem:[%s27972_s7 + $0xb0] ss:$8 sps:$4 sm:$0xff]  }
 0xae1   : > { %7977 = vmatprep.subr.bf16.mxu0 %v22573_v10  ;;  %8557 = vmatpush1.bf16.msra.mxu1 %v22613_v2  ;;  %v22675_v10 = vld [vmem:[%s27972_s7 + $0xa4] ss:$8 sps:$4 sm:$0xff]   ;;  %v22658_v2 = vld [vmem:[%s27972_s7 + $0x1d0] ss:$8 sps:$4 sm:$0xff]  }
 0xae2   : > { %8558 = vmatprep.subr.bf16.mxu1 %v22621_v15  ;;  %v22666_v15 = vld [vmem:[%s27972_s7 + $0x1c4] ss:$8 sps:$4 sm:$0xff]  }
 0xae4   : > { %7978 = vmatpush1.bf16.msra.mxu0 %v22571_v46  ;;  %v22673_v46 = vld [vmem:[%s27972_s7 + $0xa0] ss:$8 sps:$4 sm:$0xff]  }
 0xae5   : > { %7979 = vmatprep.subr.bf16.mxu0 %v22576_v5  ;;  %8559 = vmatpush1.bf16.msra.mxu1 %v22619_v25  ;;  %v22681_v5 = vld [vmem:[%s27972_s7 + $0x94] ss:$8 sps:$4 sm:$0xff]   ;;  %v22664_v25 = vld [vmem:[%s27972_s7 + $0x1c0] ss:$8 sps:$4 sm:$0xff]  }
 0xae6   : > { %8560 = vmatprep.subr.bf16.mxu1 %v22627_v30  ;;  %v22672_v30 = vld [vmem:[%s27972_s7 + $0x1b4] ss:$8 sps:$4 sm:$0xff]  }
 0xae8   : > { %7980 = vmatpush1.bf16.msra.mxu0 %v22574_v17  ;;  %v22679_v17 = vld [vmem:[%s27972_s7 + $0x90] ss:$8 sps:$4 sm:$0xff]  }
 0xae9   : > { %7981 = vmatprep.subr.bf16.mxu0 %v22579_v27  ;;  %8561 = vmatpush1.bf16.msra.mxu1 %v22625_v28  ;;  %v22687_v27 = vld [vmem:[%s27972_s7 + $0x84] ss:$8 sps:$4 sm:$0xff]   ;;  %v22670_v28 = vld [vmem:[%s27972_s7 + $0x1b0] ss:$8 sps:$4 sm:$0xff]  }
 0xaea   : > { %8562 = vmatprep.subr.bf16.mxu1 %v22633_v24  ;;  %v22678_v24 = vld [vmem:[%s27972_s7 + $0x1a4] ss:$8 sps:$4 sm:$0xff]  }
 0xaec   : > { %7982 = vmatpush1.bf16.msra.mxu0 %v22577_v31  ;;  %v22685_v31 = vld [vmem:[%s27972_s7 + $0x80] ss:$8 sps:$4 sm:$0xff]  }
 0xaed   : > { %7983 = vmatprep.subr.bf16.mxu0 %v22582_v19  ;;  %8563 = vmatpush1.bf16.msra.mxu1 %v22631_v20  ;;  %v22676_v19 = vld [vmem:[%s27972_s7 + $0x1a0] ss:$8 sps:$4 sm:$0xff]   ;;  %v22684_v20 = vld [vmem:[%s27972_s7 + $0x194] ss:$8 sps:$4 sm:$0xff]  }
 0xaee   : > { %8564 = vmatprep.subr.bf16.mxu1 %v22639_v23  ;;  %v22693_v23 = vld [vmem:[%s27972_s7 + $0x274] ss:$8 sps:$4 sm:$0xff]  }
 0xaf0   : > { %7984 = vmatpush1.bf16.msra.mxu0 %v22580_v34  ;;  %v22682_v34 = vld [vmem:[%s27972_s7 + $0x190] ss:$8 sps:$4 sm:$0xff]  }
 0xaf1   : > { %7993 = vmatprep.subr.bf16.mxu0 %v22585_v9  ;;  %8565 = vmatpush1.bf16.msra.mxu1 %v22637_v13  ;;  %v22690_v9 = vld [vmem:[%s27972_s7 + $0x184] ss:$8 sps:$4 sm:$0xff]   ;;  %v22688_v13 = vld [vmem:[%s27972_s7 + $0x180] ss:$8 sps:$4 sm:$0xff]  }
 0xaf2   : > { %8566 = vmatprep.subr.bf16.mxu1 %v22645_v40 }
 0xaf4   : > { %7994 = vmatpush2.bf16.msra.mxu0 %v22583_v26  ;;  %v26586_v26 = vsub.s32 2, %v25944_v56 }
 0xaf5   : > { %7995 = vmatprep.subr.bf16.mxu0 %v22588_v37  ;;  %8567 = vmatpush2.bf16.msra.mxu1 %v22643_v63  ;;  %v26588_v37 = vld [vmem:[#allocation21] sm:$0x3f] }
 0xaf6   : > { %8568 = vmatprep.subr.bf16.mxu1 %v22651_v1 }
 0xaf8   : > { %7996 = vmatpush2.bf16.msra.mxu0 %v22586_v39  ;;  %v26591_v39 = vsub.s32 3, %v25944_v56 }
 0xaf9   : > { %7997 = vmatprep.subr.bf16.mxu0 %v22591_v43  ;;  %v7497_v43 = vrot.slane %v26588_v37, %v25947_v57 }
 0xafc   : > { %7998 = vmatpush2.bf16.msra.mxu0 %v22589_v44  ;;  %v7505_v44 = vrot.slane %v26588_v37, %v26586_v26 }
 0xafd   : > { %7999 = vmatprep.subr.bf16.mxu0 %v22594_v33 }
 0xb00   : > { %8000 = vmatpush2.bf16.msra.mxu0 %v22592_v45 }
 0xb01   : > { %8591 = vmatprep.subr.bf16.mxu0 %v22600_v42  ;;  %v7501_v42 = vrot.slane %v26588_v37, %v25950_v58 }
 0xb03   : > { %8002 = vmatmul.mubr.bf16.vlgmr.msra.gmra.mxu0 %v26491_v3  ;;  %v22649_v3 = vld [vmem:[%s27972_s7 + $0xe0] ss:$8 sps:$4 sm:$0xff]  }
 0xb04   : > { %8592 = vmatpush1.bf16.msra.mxu0 %v22598_v32  ;;  %8569 = vmatpush2.bf16.msra.mxu1 %v22649_v3  ;;  %v7509_v32 = vrot.slane %v26588_v37, %v26591_v39 }
 0xb05   : > { %8593 = vmatprep.subr.bf16.mxu0 %v22606_v18  ;;  %8570 = vmatprep.subr.bf16.mxu1 %v22657_v29 }
 0xb08   : > { %8594 = vmatpush1.bf16.msra.mxu0 %v22604_v48  ;;  %8571 = vmatpush2.bf16.msra.mxu1 %v22655_v51 }
 0xb09   : > { %8595 = vmatprep.subr.bf16.mxu0 %v22612_v49  ;;  %8572 = vmatprep.subr.bf16.mxu1 %v22663_v11 }
 0xb0c   : > { %8596 = vmatpush1.bf16.msra.mxu0 %v22610_v50  ;;  %8573 = vmatpush2.bf16.msra.mxu1 %v22661_v53 }
 0xb0d   : > { %8597 = vmatprep.subr.bf16.mxu0 %v22618_v52  ;;  %8574 = vmatprep.subr.bf16.mxu1 %v22669_v59 }
 0xb10   : > { %8598 = vmatpush1.bf16.msra.mxu0 %v22616_v35  ;;  %8575 = vmatpush2.bf16.msra.mxu1 %v22667_v16 }
 0xb11   : > { %8599 = vmatprep.subr.bf16.mxu0 %v22624_v54  ;;  %8576 = vmatprep.subr.bf16.mxu1 %v22675_v10 }
 0xb14   : > { %8600 = vmatpush1.bf16.msra.mxu0 %v22622_v60  ;;  %8577 = vmatpush2.bf16.msra.mxu1 %v22673_v46 }
 0xb15   : > { %8601 = vmatprep.subr.bf16.mxu0 %v22630_v61  ;;  %8578 = vmatprep.subr.bf16.mxu1 %v22681_v5 }
 0xb18   : > { %8602 = vmatpush1.bf16.msra.mxu0 %v22628_v62  ;;  %8579 = vmatpush2.bf16.msra.mxu1 %v22679_v17 }
 0xb19   : > { %8603 = vmatprep.subr.bf16.mxu0 %v22636_v55  ;;  %8580 = vmatprep.subr.bf16.mxu1 %v22687_v27 }
 0xb1c   : > { %8604 = vmatpush1.bf16.msra.mxu0 %v22634_v38  ;;  %8581 = vmatpush2.bf16.msra.mxu1 %v22685_v31 }
 0xb1d   : > { %8605 = vmatprep.subr.bf16.mxu0 %v22642_v0  ;;  %8632 = vmatprep.subr.bf16.mxu1 %v22693_v23 }
 0xb20   : > { %8606 = vmatpush1.bf16.msra.mxu0 %v22640_v36 }
 0xb21   : > { %8607 = vmatprep.subr.bf16.mxu0 %v22648_v4 }
 0xb24   : > { %8608 = vmatpush2.bf16.msra.mxu0 %v22646_v22 }
 0xb25   : > { %8609 = vmatprep.subr.bf16.mxu0 %v22654_v6 }
 0xb28   : > { %8610 = vmatpush2.bf16.msra.mxu0 %v22652_v12 }
 0xb29   : > { %8611 = vmatprep.subr.bf16.mxu0 %v22660_v14 }
 0xb2c   : > { %8612 = vmatpush2.bf16.msra.mxu0 %v22658_v2 }
 0xb2d   : > { %8613 = vmatprep.subr.bf16.mxu0 %v22666_v15 }
 0xb30   : > { %8614 = vmatpush2.bf16.msra.mxu0 %v22664_v25 }
 0xb31   : > { %8615 = vmatprep.subr.bf16.mxu0 %v22672_v30 }
 0xb34   : > { %8616 = vmatpush2.bf16.msra.mxu0 %v22670_v28 }
 0xb35   : > { %8617 = vmatprep.subr.bf16.mxu0 %v22678_v24 }
 0xb38   : > { %8618 = vmatpush2.bf16.msra.mxu0 %v22676_v19 }
 0xb39   : > { %8619 = vmatprep.subr.bf16.mxu0 %v22684_v20 }
 0xb3c   : > { %8620 = vmatpush2.bf16.msra.mxu0 %v22682_v34 }
 0xb3d   : > { %8621 = vmatprep.subr.bf16.mxu0 %v22690_v9 }
 0xb40   : > { %8622 = vmatpush2.bf16.msra.mxu0 %v22688_v13 }
 0xb93   : > { %v7921_v33 = vpop.f32.mrf.mxu0  ;;  %v7962_v45 = vpop.f32.mrf.mxu1 }
 0xb94   : > { %v7922_v18 = vadd.f32 %v7921_v33, %v7497_v43  ;;  %v7963_v48 = vadd.f32 %v7962_v45, %v7505_v44  ;;  %v22691_v43 = vld [vmem:[%s27972_s7 + $0x270] ss:$8 sps:$4 sm:$0xff]   ;;  %v22696_v45 = vld [vmem:[%s27972_s7 + $0x264] ss:$8 sps:$4 sm:$0xff]  }
 0xb95   : > { %v7923_v49 = vpop.f32.mrf.mxu0  ;;  %v7964_v50 = vpop.f32.mrf.mxu1 }
 0xb96   : > { %v8016_v52 = vmul.f32 0.044715, %v7922_v18  ;;  %v8018_v35 = vmul.f32 0.044715, %v7963_v48  ;;  %v7924_v54 = vadd.f32 %v7923_v49, %v7501_v42  ;;  %v7965_v60 = vadd.f32 %v7964_v50, %v7509_v32  ;;  %v22694_v32 = vld [vmem:[%s27972_s7 + $0x260] ss:$8 sps:$4 sm:$0xff]  }
 0xb97   : > { %v7925_v61 = vpop.f32.mrf.mxu0  ;;  %v7966_v62 = vpop.f32.mrf.mxu1  ;;  %v8010_v30 = vmul.f32 0.5, %v7922_v18  ;;  %v8012_v27 = vmul.f32 0.5, %v7963_v48  ;;  %v7512_v49 = vsub.s32 4, %v25944_v56  ;;  %v22702_v50 = vld [vmem:[%s27972_s7 + $0x244] ss:$8 sps:$4 sm:$0xff]  }
 0xb98   : > { %v8022_v55 = vmul.f32 %v8016_v52, %v7922_v18  ;;  %v8024_v40 = vmul.f32 %v8018_v35, %v7963_v48  ;;  %v8017_v63 = vmul.f32 0.044715, %v7924_v54  ;;  %v8019_v38 = vmul.f32 0.044715, %v7965_v60  ;;  %v22700_v35 = vld [vmem:[%s27972_s7 + $0x240] ss:$8 sps:$4 sm:$0xff]  }
 0xb99   : > { %v7926_v0 = vpop.f32.mrf.mxu0  ;;  %v7967_v1 = vpop.f32.mrf.mxu1  ;;  %v8011_v28 = vmul.f32 0.5, %v7924_v54  ;;  %v8013_v31 = vmul.f32 0.5, %v7965_v60  ;;  %v7516_v52 = vsub.s32 5, %v25944_v56  ;;  %v22705_v61 = vld [vmem:[%s27972_s7 + $0x234] ss:$8 sps:$4 sm:$0xff]  }
 0xb9a   : > { %v8028_v3 = vmul.f32 %v8022_v55, %v7922_v18  ;;  %v8030_v36 = vmul.f32 %v8024_v40, %v7963_v48  ;;  %v8023_v4 = vmul.f32 %v8017_v63, %v7924_v54  ;;  %v8025_v29 = vmul.f32 %v8019_v38, %v7965_v60  ;;  %v22703_v40 = vld [vmem:[%s27972_s7 + $0x230] ss:$8 sps:$4 sm:$0xff]   ;;  %v22708_v0 = vld [vmem:[%s27972_s7 + $0x224] ss:$8 sps:$4 sm:$0xff]  }
 0xb9c   : > { %v8034_v51 = vadd.f32 %v8028_v3, %v7922_v18  ;;  %v8036_v22 = vadd.f32 %v8030_v36, %v7963_v48  ;;  %v8029_v6 = vmul.f32 %v8023_v4, %v7924_v54  ;;  %v8031_v53 = vmul.f32 %v8025_v29, %v7965_v60  ;;  %v22699_v18 = vld [vmem:[%s27972_s7 + $0x254] ss:$8 sps:$4 sm:$0xff]   ;;  %v22697_v48 = vld [vmem:[%s27972_s7 + $0x250] ss:$8 sps:$4 sm:$0xff]   ;;  %v22706_v4 = vld [vmem:[%s27972_s7 + $0x220] ss:$8 sps:$4 sm:$0xff]  }
 0xb9e   : > { %v8040_v11 = vmul.f32 0.7978846, %v8034_v51  ;;  %v8042_v59 = vmul.f32 0.7978846, %v8036_v22  ;;  %v8035_v12 = vadd.f32 %v8029_v6, %v7924_v54  ;;  %v8037_v14 = vadd.f32 %v8031_v53, %v7965_v60  ;;  %v22711_v51 = vld [vmem:[%s27972_s7 + $0x214] ss:$8 sps:$4 sm:$0xff]  }
 0xb9f   : > { %v7513_v54 = vrot.slane %v26588_v37, %v7512_v49  ;;  %v7517_v60 = vrot.slane %v26588_v37, %v7516_v52  ;;  %v22709_v6 = vld [vmem:[%s27972_s7 + $0x210] ss:$8 sps:$4 sm:$0xff]  }
 0xba0   : > { %23431 = vtanh.f32 %v8040_v11  ;;  %v8041_v16 = vmul.f32 0.7978846, %v8035_v12  ;;  %v8043_v10 = vmul.f32 0.7978846, %v8037_v14  ;;  %v22714_v11 = vld [vmem:[%s27972_s7 + $0x204] ss:$8 sps:$4 sm:$0xff]  }
 0xba1   : > { %23433 = vtanh.f32 %v8042_v59  ;;  %v22712_v14 = vld [vmem:[%s27972_s7 + $0x200] ss:$8 sps:$4 sm:$0xff]  }
 0xba2   : > { %23435 = vtanh.f32 %v8041_v16 }
 0xba3   : > { %23437 = vtanh.f32 %v8043_v10  ;;  %v22717_v10 = vld [vmem:[%s27972_s7 + $0x2f4] ss:$8 sps:$4 sm:$0xff]  }
 0xbad   : > { %v23432_v2 = vpop.eup %23431 }
 0xbae   : > { %v23434_v15 = vpop.eup %23433  ;;  %v8052_v46 = vadd.f32 1.0, %v23432_v2  ;;  %v22715_v2 = vld [vmem:[%s27972_s7 + $0x2f0] ss:$8 sps:$4 sm:$0xff]  }
 0xbaf   : > { %v8054_v5 = vadd.f32 1.0, %v23434_v15  ;;  %v23436_v25 = vpop.eup %23435 }
 0xbb0   : > { %v23438_v17 = vpop.eup %23437  ;;  %v8053_v24 = vadd.f32 1.0, %v23436_v25  ;;  %v8058_v20 = vmul.f32 %v8052_v46, %v8010_v30  ;;  %v22720_v46 = vld [vmem:[%s27972_s7 + $0x2e4] ss:$8 sps:$4 sm:$0xff]   ;;  %v22723_v30 = vld [vmem:[%s27972_s7 + $0x2d4] ss:$8 sps:$4 sm:$0xff]  }
 0xbb1   : > { %v8055_v19 = vadd.f32 1.0, %v23438_v17  ;;  %v8060_v34 = vmul.f32 %v8054_v5, %v8012_v27  ;;  %v22718_v5 = vld [vmem:[%s27972_s7 + $0x2e0] ss:$8 sps:$4 sm:$0xff]   ;;  %v22721_v17 = vld [vmem:[%s27972_s7 + $0x2d0] ss:$8 sps:$4 sm:$0xff]  }
 0xbb2   : > { %v8059_v23 = vmul.f32 %v8053_v24, %v8011_v28  ;;  %v8064_v33 = vpack.c.bf16 %v8058_v20, %v8058_v20  ;;  %v22726_v27 = vld [vmem:[%s27972_s7 + $0x2c4] ss:$8 sps:$4 sm:$0xff]  }
 0xbb3   : > { %v8061_v9 = vmul.f32 %v8055_v19, %v8013_v31  ;;  %v8066_v42 = vpack.c.bf16 %v8060_v34, %v8060_v34  ;;  %v22724_v19 = vld [vmem:[%s27972_s7 + $0x2c0] ss:$8 sps:$4 sm:$0xff]  }
 0xbb4   : > { %v8065_v13 = vpack.c.bf16 %v8059_v23, %v8059_v23  ;;  %v22729_v23 = vld [vmem:[%s27972_s7 + $0x2b4] ss:$8 sps:$4 sm:$0xff]  }
 0xbb5   : > { %v8067_v44 = vpack.c.bf16 %v8061_v9, %v8061_v9  ;;  %v22727_v9 = vld [vmem:[%s27972_s7 + $0x2b0] ss:$8 sps:$4 sm:$0xff]  }
 0xbb6   : > { %8582 = vmatprep.mubr.bf16.mxu1 %v8065_v13  ;;  %v22732_v13 = vld [vmem:[%s27972_s7 + $0x2a4] ss:$8 sps:$4 sm:$0xff]  }
 0xbb7   : > { %8623 = vmatprep.mubr.bf16.mxu0 %v8067_v44  ;;  %8583 = vmatmul.mubr.bf16.vlgmr.msra.gmra.mxu1 %v8064_v33  ;;  %v22735_v44 = vld [vmem:[%s27972_s7 + $0x294] ss:$8 sps:$4 sm:$0xff]  }
 0xbb8   : > { %8624 = vmatmul.mubr.bf16.vlgmr.msra.gmra.mxu0 %v8066_v42  ;;  %8633 = vmatpush1.bf16.msra.mxu1 %v22691_v43  ;;  %v22730_v43 = vld [vmem:[%s27972_s7 + $0x2a0] ss:$8 sps:$4 sm:$0xff]   ;;  %v22738_v42 = vld [vmem:[%s27972_s7 + $0x284] ss:$8 sps:$4 sm:$0xff]  }
 0xbb9   : > { %8634 = vmatprep.subr.bf16.mxu1 %v22696_v45  ;;  %v22733_v45 = vld [vmem:[%s27972_s7 + $0x290] ss:$8 sps:$4 sm:$0xff]  }
 0xbbc   : > { %8635 = vmatpush1.bf16.msra.mxu1 %v22694_v32 }
 0xbbd   : > { %8636 = vmatprep.subr.bf16.mxu1 %v22699_v18 }
 0xbc0   : > { %8637 = vmatpush1.bf16.msra.mxu1 %v22697_v48  ;;  %v22736_v48 = vld [vmem:[%s27972_s7 + $0x280] ss:$8 sps:$4 sm:$0xff]  }
 0xbc1   : > { %8638 = vmatprep.subr.bf16.mxu1 %v22702_v50 }
 0xbc3   : > { %v8003_v62 = vpop.f32.mrf.mxu0 }
 0xbc4   : > { %8639 = vmatpush1.bf16.msra.mxu1 %v22700_v35  ;;  %v26618_v63 = vadd.f32 %v8003_v62, %v7513_v54 }
 0xbc5   : > { %v8005_v55 = vpop.f32.mrf.mxu0  ;;  %8640 = vmatprep.subr.bf16.mxu1 %v22705_v61 }
 0xbc6   : > { %v8006_v38 = vadd.f32 %v8005_v55, %v7517_v60  ;;  %v8020_v37 = vmul.f32 0.044715, %v26618_v63  ;;  %v8014_v18 = vmul.f32 0.5, %v26618_v63 }
 0xbc7   : > { %v8007_v1 = vpop.f32.mrf.mxu0 }
 0xbc8   : > { %v8021_v3 = vmul.f32 0.044715, %v8006_v38  ;;  %8641 = vmatpush1.bf16.msra.mxu1 %v22703_v40  ;;  %v8026_v53 = vmul.f32 %v8020_v37, %v26618_v63  ;;  %v8015_v24 = vmul.f32 0.5, %v8006_v38 }
 0xbc9   : > { %v8008_v36 = vpop.f32.mrf.mxu0  ;;  %8642 = vmatprep.subr.bf16.mxu1 %v22708_v0 }
 0xbca   : > { %v8027_v29 = vmul.f32 %v8021_v3, %v8006_v38  ;;  %v8032_v16 = vmul.f32 %v8026_v53, %v26618_v63 }
 0xbcc   : > { %v8033_v22 = vmul.f32 %v8027_v29, %v8006_v38  ;;  %8643 = vmatpush1.bf16.msra.mxu1 %v22706_v4  ;;  %v8038_v15 = vadd.f32 %v8032_v16, %v26618_v63  ;;  %v3288_v4 = vld [vmem:[#allocation22] sm:$0x3] }
 0xbcd   : > { %8644 = vmatprep.subr.bf16.mxu1 %v22711_v51  ;;  %v8683_v51 = vrot.slane %v3288_v4, %v25950_v58 }
 0xbce   : > { %v8039_v59 = vadd.f32 %v8033_v22, %v8006_v38  ;;  %v8044_v25 = vmul.f32 0.7978846, %v8038_v15 }
 0xbd0   : > { %v8045_v12 = vmul.f32 0.7978846, %v8039_v59  ;;  %8645 = vmatpush1.bf16.msra.mxu1 %v22709_v6  ;;  %v8679_v6 = vrot.slane %v3288_v4, %v25947_v57  ;;  %v22761_v4 = vld [vmem:[#allocation27 + $0x40] ss:$8 sps:$4 sm:$0xff]  }
 0xbd1   : > { %8646 = vmatprep.subr.bf16.mxu1 %v22714_v11 }
 0xbd2   : > { %23439 = vtanh.f32 %v8045_v12 }
 0xbd3   : > { %23441 = vtanh.f32 %v8044_v25 }
 0xbd4   : > { %8647 = vmatpush1.bf16.msra.mxu1 %v22712_v14 }
 0xbd5   : > { %8648 = vmatprep.subr.bf16.mxu1 %v22717_v10 }
 0xbd8   : > { %8649 = vmatpush2.bf16.msra.mxu1 %v22715_v2 }
 0xbd9   : > { %8650 = vmatprep.subr.bf16.mxu1 %v22720_v46 }
 0xbdc   : > { %8651 = vmatpush2.bf16.msra.mxu1 %v22718_v5 }
 0xbdd   : > { %8652 = vmatprep.subr.bf16.mxu1 %v22723_v30 }
 0xbdf   : > { %v23440_v28 = vpop.eup %23439 }
 0xbe0   : > { %v8057_v31 = vadd.f32 1.0, %v23440_v28  ;;  %8653 = vmatpush2.bf16.msra.mxu1 %v22721_v17  ;;  %v23442_v33 = vpop.eup %23441  ;;  %v22739_v17 = vld [vmem:[#allocation27 + $0x4] ss:$8 sps:$4 sm:$0xff]   ;;  %v22743_v28 = vld [vmem:[#allocation27] ss:$8 sps:$4 sm:$0xff]  }
 0xbe1   : > { %8654 = vmatprep.subr.bf16.mxu1 %v22726_v27  ;;  %v8056_v32 = vadd.f32 1.0, %v23442_v33  ;;  %v22741_v27 = vld [vmem:[#allocation27 + $0x34] ss:$8 sps:$4 sm:$0xff]   ;;  %20198 = vmatprep.subr.msk.bf16.mxu0 %vm2937_vm0, %v22739_v17  ;;  %v22791_v17 = vld [vmem:[#allocation28 + $0x20] ss:$8 sps:$4 sm:$0xff]  }
 0xbe2   : > { %v8063_v20 = vmul.f32 %v8057_v31, %v8015_v24  ;;  %v22744_v24 = vld [vmem:[#allocation27 + $0x30] ss:$8 sps:$4 sm:$0xff]   ;;  %9143 = vmatpush1.bf16.xpose.msra.mxu0 %v22743_v28  ;;  %v22745_v31 = vld [vmem:[#allocation27 + $0x14] ss:$8 sps:$4 sm:$0xff]   ;;  %v22793_v28 = vld [vmem:[#allocation28 + $0x44] ss:$8 sps:$4 sm:$0xff]  }
 0xbe3   : > { %v8062_v50 = vmul.f32 %v8056_v32, %v8014_v18  ;;  %20202 = vmatprep.subr.msk.bf16.mxu0 %vm2937_vm0, %v22745_v31  ;;  %v22797_v31 = vld [vmem:[#allocation28 + $0x40] ss:$8 sps:$4 sm:$0xff]  }
 0xbe4   : > { %v8069_v34 = vpack.c.bf16 %v8063_v20, %v8063_v20  ;;  %8655 = vmatpush2.bf16.msra.mxu1 %v22724_v19  ;;  %v22747_v19 = vld [vmem:[#allocation27 + $0x54] ss:$8 sps:$4 sm:$0xff]  }
 0xbe5   : > { %8656 = vmatprep.subr.bf16.mxu1 %v22729_v23  ;;  %v8068_v35 = vpack.c.bf16 %v8062_v50, %v8062_v50 }
 0xbe6   : > { %8664 = vmatprep.mubr.bf16.mxu1 %v8069_v34 }
 0xbe8   : > { %8657 = vmatpush2.bf16.msra.mxu1 %v22727_v9  ;;  %v8688_v9 = vld [vmem:[#allocation24] sm:$0x3] }
 0xbe9   : > { %8658 = vmatprep.subr.bf16.mxu1 %v22732_v13  ;;  %v8689_v13 = vld [vmem:[#allocation25] sm:$0x3] }
 0xbec   : > { %8659 = vmatpush2.bf16.msra.mxu1 %v22730_v43  ;;  %v9017_v43 = vrot.slane %v8688_v9, %v25947_v57 }
 0xbed   : > { %8660 = vmatprep.subr.bf16.mxu1 %v22735_v44  ;;  %v9021_v44 = vrot.slane %v8688_v9, %v25950_v58  ;;  %v22804_v9 = vld [vmem:[#allocation28 + $0xb0] ss:$8 sps:$4 sm:$0xff]  }
 0xbf0   : > { %8661 = vmatpush2.bf16.msra.mxu1 %v22733_v45  ;;  %v9030_v45 = vrot.slane %v8689_v13, %v25947_v57 }
 0xbf1   : > { %8662 = vmatprep.subr.bf16.mxu1 %v22738_v42  ;;  %v9034_v42 = vrot.slane %v8689_v13, %v25950_v58  ;;  %v22805_v13 = vld [vmem:[#allocation28 + $0x84] ss:$8 sps:$4 sm:$0xff]  }
 0xbf4   : > { %8663 = vmatpush2.bf16.msra.mxu1 %v22736_v48 }
 0xbf5   : > { %20210 = vmatprep.subr.msk.bf16.mxu1 %vm2937_vm0, %v22741_v27  ;;  %v22792_v27 = vld [vmem:[#allocation28 + $0x70] ss:$8 sps:$4 sm:$0xff]  }
 0xbf7   : > { %8665 = vmatmul.mubr.bf16.vlgmr.msra.gmra.mxu1 %v8068_v35 }
 0xbf8   : > { %9299 = vmatpush1.bf16.xpose.msra.mxu1 %v22744_v24  ;;  %v22795_v24 = vld [vmem:[#allocation28 + $0x94] ss:$8 sps:$4 sm:$0xff]  }
 0xbf9   : > { %20218 = vmatprep.subr.msk.bf16.mxu1 %vm2937_vm0, %v22747_v19  ;;  %v22798_v19 = vld [vmem:[#allocation28 + $0x90] ss:$8 sps:$4 sm:$0xff]  }
 0xc77   : > { %v8584_v54 = vpop.f32.mrf.mxu1 }
 0xc78   : > { %v8625_v60 = vpop.f32.mrf.mxu0 }
 0xc79   : > { %v8626_v61 = vadd.f32 %v8625_v60, %v8584_v54  ;;  %v8586_v62 = vpop.f32.mrf.mxu1 }
 0xc7a   : > { %v8627_v55 = vpop.f32.mrf.mxu0 }
 0xc7b   : > { %v8588_v40 = vpop.f32.mrf.mxu1  ;;  %v8628_v36 = vadd.f32 %v8627_v55, %v8586_v62  ;;  %v22749_v62 = vld [vmem:[#allocation27 + $0x10] ss:$8 sps:$4 sm:$0xff]  }
 0xc7c   : > { %v8629_v38 = vpop.f32.mrf.mxu0  ;;  %v22750_v55 = vld [vmem:[#allocation27 + $0x50] ss:$8 sps:$4 sm:$0xff]   ;;  %v22751_v40 = vld [vmem:[#allocation27 + $0x24] ss:$8 sps:$4 sm:$0xff]  }
 0xc7d   : > { %v8589_v0 = vpop.f32.mrf.mxu1  ;;  %v22753_v38 = vld [vmem:[#allocation27 + $0x74] ss:$8 sps:$4 sm:$0xff]  }
 0xc7e   : > { %v8630_v1 = vpop.f32.mrf.mxu0  ;;  %v22755_v0 = vld [vmem:[#allocation27 + $0x20] ss:$8 sps:$4 sm:$0xff]  }
 0xc7f   : > { %v22756_v1 = vld [vmem:[#allocation27 + $0x70] ss:$8 sps:$4 sm:$0xff]  }
 0xcb7   : > { %v8666_v3 = vpop.f32.mrf.mxu1 }
 0xcb8   : > { %v8667_v63 = vadd.f32 %v8666_v3, %v8626_v61  ;;  %v22757_v3 = vld [vmem:[#allocation27 + $0x44] ss:$8 sps:$4 sm:$0xff]  }
 0xcb9   : > { %v8668_v37 = vpop.f32.mrf.mxu1 }
 0xcba   : > { %v8669_v29 = vadd.f32 %v8668_v37, %v8628_v36  ;;  %v8673_v22 = vadd.f32 %v8667_v63, %v26418_v41  ;;  %v22759_v36 = vld [vmem:[#allocation27 + $0x94] ss:$8 sps:$4 sm:$0xff]   ;;  %v22762_v63 = vld [vmem:[#allocation27 + $0x90] ss:$8 sps:$4 sm:$0xff]   ;;  %v22763_v37 = vld [vmem:[#allocation27 + $0x64] ss:$8 sps:$4 sm:$0xff]  }
 0xcbb   : > { %v8670_v53 = vpop.f32.mrf.mxu1 }
 0xcbc   : > { %v8674_v11 = vadd.f32 %v8669_v29, %v26416_v21  ;;  %v26653_v14 = vadd.f32 %v8679_v6, %v8673_v22  ;;  %v22765_v29 = vld [vmem:[#allocation27 + $0xb4] ss:$8 sps:$4 sm:$0xff]   ;;  %v22768_v22 = vld [vmem:[#allocation27 + $0xb0] ss:$8 sps:$4 sm:$0xff]   ;;  %v22769_v6 = vld [vmem:[#allocation27 + $0x84] ss:$8 sps:$4 sm:$0xff]  }
 0xcbd   : > { %v8671_v59 = vpop.f32.mrf.mxu1  ;;  %v22771_v53 = vld [vmem:[#allocation28 + $0x14] ss:$8 sps:$4 sm:$0xff]  }
 0xcbe   : > { %v26651_v12 = vadd.f32 %v8683_v51, %v8674_v11  ;;  %v22767_v51 = vld [vmem:[#allocation27 + $0x60] ss:$8 sps:$4 sm:$0xff]   ;;  %v22774_v59 = vld [vmem:[#allocation28 + $0x10] ss:$8 sps:$4 sm:$0xff]  }
 0xcbf   : > { %v22773_v11 = vld [vmem:[#allocation27 + $0x80] ss:$8 sps:$4 sm:$0xff]  }
 0xcc0   : > { %v8995_v16 = vsel %vm2937_vm0, %v26651_v12, 0.0 }
 0xcc1   : > { %v8996_v10 = vadd.f32 %v8995_v16, %v26653_v14  ;;  %v22775_v16 = vld [vmem:[#allocation27 + $0xa4] ss:$8 sps:$4 sm:$0xff]  }
 0xcc3   : > { %8997 = vadd.xlane.f32.xlu0 %v8996_v10  ;;  %v22777_v10 = vld [vmem:[#allocation28 + $0x34] ss:$8 sps:$4 sm:$0xff]  }
 0xd4c   : > { %v8998_v2 = vpop.xlane.xlu0 %8997 }
 0xd4d   : > { %v8999_v15 = vmul.f32 0.0052083335, %v8998_v2  ;;  %v22779_v2 = vld [vmem:[#allocation27 + $0xa0] ss:$8 sps:$4 sm:$0xff]  }
 0xd4f   : > { %v9000_v41 = vsub.f32 %v26653_v14, %v8999_v15  ;;  %v9001_v46 = vsub.f32 %v26651_v12, %v8999_v15  ;;  %v22780_v15 = vld [vmem:[#allocation28 + $0x30] ss:$8 sps:$4 sm:$0xff]  }
 0xd51   : > { %v9002_v5 = vmul.f32 %v9000_v41, %v9000_v41  ;;  %v9003_v25 = vmul.f32 %v9001_v46, %v9001_v46 }
 0xd53   : > { %v9004_v21 = vsel %vm2937_vm0, %v9003_v25, 0.0  ;;  %v22786_v25 = vld [vmem:[#allocation28 + $0x50] ss:$8 sps:$4 sm:$0xff]  }
 0xd54   : > { %v9005_v30 = vadd.f32 %v9004_v21, %v9002_v5  ;;  %v22785_v5 = vld [vmem:[#allocation28] ss:$8 sps:$4 sm:$0xff]   ;;  %v22787_v21 = vld [vmem:[#allocation28 + $0x24] ss:$8 sps:$4 sm:$0xff]  }
 0xd56   : > { %9006 = vadd.xlane.f32.xlu1 %v9005_v30  ;;  %v22789_v30 = vld [vmem:[#allocation28 + $0x74] ss:$8 sps:$4 sm:$0xff]  }
 0xddf   : > { %v9007_v20 = vpop.xlane.xlu1 %9006 }
 0xde0   : > { %v9008_v23 = vmul.f32 0.0052083335, %v9007_v20  ;;  %v22799_v20 = vld [vmem:[#allocation28 + $0x64] ss:$8 sps:$4 sm:$0xff]  }
 0xde2   : > { %v9009_v34 = vadd.f32 1e-06, %v9008_v23  ;;  %v22801_v23 = vld [vmem:[#allocation28 + $0xb4] ss:$8 sps:$4 sm:$0xff]  }
 0xde4   : > { %23443 = vrsqrt.f32 %v9009_v34  ;;  %v22803_v34 = vld [vmem:[#allocation28 + $0x60] ss:$8 sps:$4 sm:$0xff]  }
 0xdf1   : > { %v23444_v33 = vpop.eup %23443 }
 0xdf2   : > { %v9011_v32 = vmul.f32 %v23444_v33, %v9000_v41  ;;  %v9012_v18 = vmul.f32 %v23444_v33, %v9001_v46  ;;  %v22781_v41 = vld [vmem:[#allocation28 + $0x4] ss:$8 sps:$4 sm:$0xff]   ;;  %v22783_v46 = vld [vmem:[#allocation28 + $0x54] ss:$8 sps:$4 sm:$0xff]   ;;  %v22810_v33 = vld [vmem:[#allocation30 + $0x10] ss:$8 sps:$4 sm:$0xff]  }
 0xdf4   : > { %v9024_v48 = vmul.f32 %v9017_v43, %v9011_v32  ;;  %v9025_v50 = vmul.f32 %v9021_v44, %v9012_v18  ;;  %v22807_v43 = vld [vmem:[#allocation30 + $0x14] ss:$8 sps:$4 sm:$0xff]   ;;  %v22809_v44 = vld [vmem:[#allocation28 + $0x80] ss:$8 sps:$4 sm:$0xff]   ;;  %v22816_v18 = vld [vmem:[#allocation30 + $0x30] ss:$8 sps:$4 sm:$0xff]  }
 0xdf5   : > { %v22815_v32 = vld [vmem:[#allocation28 + $0xa0] ss:$8 sps:$4 sm:$0xff]  }
 0xdf6   : > { %v9037_v35 = vadd.f32 %v9030_v45, %v9024_v48  ;;  %v9038_v54 = vadd.f32 %v9034_v42, %v9025_v50  ;;  %v22811_v45 = vld [vmem:[#allocation28 + $0xa4] ss:$8 sps:$4 sm:$0xff]   ;;  %v22813_v42 = vld [vmem:[#allocation30 + $0x34] ss:$8 sps:$4 sm:$0xff]  }
 0xdf7   : > { %v22817_v48 = vld [vmem:[#allocation30 + $0x4] ss:$8 sps:$4 sm:$0xff]   ;;  %v22819_v50 = vld [vmem:[#allocation30 + $0x54] ss:$8 sps:$4 sm:$0xff]  }
 0xdf8   : > { %v26669_v60 = vpack.c.bf16 %v9037_v35, %v9037_v35  ;;  %v26671_v61 = vpack.c.bf16 %v9038_v54, %v9038_v54  ;;  %v22821_v35 = vld [vmem:[#allocation30] ss:$8 sps:$4 sm:$0xff]   ;;  %v22822_v54 = vld [vmem:[#allocation30 + $0x50] ss:$8 sps:$4 sm:$0xff]  }
 0xdfa   : > { %20199 = vmatprep.mubr.msk.bf16.mxu0 %vm2937_vm0, %v26671_v61  ;;  %20211 = vmatprep.mubr.msk.bf16.mxu1 %vm2937_vm0, %v26671_v61 }
 0xdfb   : > { %9161 = vmatmul.mubr.bf16.vlgmr.msra.gmra.mxu0 %v26669_v60  ;;  %9317 = vmatmul.mubr.bf16.vlgmr.msra.gmra.mxu1 %v26669_v60 }
 0xdfc   : > { %9195 = vmatpush1.bf16.xpose.msra.mxu0 %v22749_v62  ;;  %20203 = vmatprep.mubr.msk.bf16.mxu0 %vm2937_vm0, %v26671_v61  ;;  %v22823_v62 = vld [vmem:[#allocation30 + $0x24] ss:$8 sps:$4 sm:$0xff]  }
 0xdfd   : > { %9403 = vmatpush1.bf16.xpose.msra.mxu1 %v22750_v55  ;;  %20219 = vmatprep.mubr.msk.bf16.mxu1 %vm2937_vm0, %v26671_v61  ;;  %v22825_v55 = vld [vmem:[#allocation30 + $0x74] ss:$8 sps:$4 sm:$0xff]  }
 0xdfe   : > { %20206 = vmatprep.subr.msk.bf16.mxu0 %vm2937_vm0, %v22751_v40  ;;  %20226 = vmatprep.subr.msk.bf16.mxu1 %vm2937_vm0, %v22753_v38  ;;  %v22827_v40 = vld [vmem:[#allocation30 + $0x20] ss:$8 sps:$4 sm:$0xff]   ;;  %v22828_v38 = vld [vmem:[#allocation30 + $0x70] ss:$8 sps:$4 sm:$0xff]  }
 0xe03   : > { %9213 = vmatmul.mubr.bf16.vlgmr.msra.gmra.mxu0 %v26669_v60 }
 0xe04   : > { %9421 = vmatmul.mubr.bf16.vlgmr.msra.gmra.mxu1 %v26669_v60  ;;  %9247 = vmatpush1.bf16.xpose.msra.mxu0 %v22755_v0  ;;  %v22829_v0 = vld [vmem:[#allocation30 + $0x44] ss:$8 sps:$4 sm:$0xff]  }
 0xe05   : > { %20207 = vmatprep.mubr.msk.bf16.mxu0 %vm2937_vm0, %v26671_v61  ;;  %9507 = vmatpush1.bf16.xpose.msra.mxu1 %v22756_v1  ;;  %v22831_v1 = vld [vmem:[#allocation30 + $0x94] ss:$8 sps:$4 sm:$0xff]  }
 0xe06   : > { %20227 = vmatprep.mubr.msk.bf16.mxu1 %vm2937_vm0, %v26671_v61  ;;  %20214 = vmatprep.subr.msk.bf16.mxu0 %vm2937_vm0, %v22757_v3  ;;  %v22833_v3 = vld [vmem:[#allocation30 + $0x40] ss:$8 sps:$4 sm:$0xff]  }
 0xe07   : > { %20234 = vmatprep.subr.msk.bf16.mxu1 %vm2937_vm0, %v22759_v36  ;;  %v22834_v36 = vld [vmem:[#allocation30 + $0x90] ss:$8 sps:$4 sm:$0xff]  }
 0xe0b   : > { %9265 = vmatmul.mubr.bf16.vlgmr.msra.gmra.mxu0 %v26669_v60 }
 0xe0c   : > { %9525 = vmatmul.mubr.bf16.vlgmr.msra.gmra.mxu1 %v26669_v60  ;;  %9351 = vmatpush1.bf16.xpose.msra.mxu0 %v22761_v4  ;;  %v22835_v4 = vld [vmem:[#allocation30 + $0x64] ss:$8 sps:$4 sm:$0xff]  }
 0xe0d   : > { %20215 = vmatprep.mubr.msk.bf16.mxu0 %vm2937_vm0, %v26671_v61  ;;  %9611 = vmatpush1.bf16.xpose.msra.mxu1 %v22762_v63  ;;  %v22837_v63 = vld [vmem:[#allocation30 + $0xb4] ss:$8 sps:$4 sm:$0xff]  }
 0xe0e   : > { %20235 = vmatprep.mubr.msk.bf16.mxu1 %vm2937_vm0, %v26671_v61  ;;  %20222 = vmatprep.subr.msk.bf16.mxu0 %vm2937_vm0, %v22763_v37  ;;  %v22839_v37 = vld [vmem:[#allocation30 + $0x60] ss:$8 sps:$4 sm:$0xff]  }
 0xe0f   : > { %20242 = vmatprep.subr.msk.bf16.mxu1 %vm2937_vm0, %v22765_v29  ;;  %v22840_v29 = vld [vmem:[#allocation30 + $0xb0] ss:$8 sps:$4 sm:$0xff]  }
 0xe13   : > { %9369 = vmatmul.mubr.bf16.vlgmr.msra.gmra.mxu0 %v26669_v60 }
 0xe14   : > { %9629 = vmatmul.mubr.bf16.vlgmr.msra.gmra.mxu1 %v26669_v60  ;;  %9455 = vmatpush1.bf16.xpose.msra.mxu0 %v22767_v51  ;;  %v22841_v51 = vld [vmem:[#allocation30 + $0x84] ss:$8 sps:$4 sm:$0xff]  }
 0xe15   : > { %20223 = vmatprep.mubr.msk.bf16.mxu0 %vm2937_vm0, %v26671_v61  ;;  %9715 = vmatpush1.bf16.xpose.msra.mxu1 %v22768_v22  ;;  %v22843_v22 = vld [vmem:[#allocation30 + $0x80] ss:$8 sps:$4 sm:$0xff]  }
 0xe16   : > { %20243 = vmatprep.mubr.msk.bf16.mxu1 %vm2937_vm0, %v26671_v61  ;;  %20230 = vmatprep.subr.msk.bf16.mxu0 %vm2937_vm0, %v22769_v6  ;;  %v22844_v6 = vld [vmem:[#allocation30 + $0xa4] ss:$8 sps:$4 sm:$0xff]  }
 0xe17   : > { %20262 = vmatprep.subr.msk.bf16.mxu1 %vm2937_vm0, %v22771_v53  ;;  %v22846_v53 = vld [vmem:[#allocation30 + $0xa0] ss:$8 sps:$4 sm:$0xff]  }
 0xe1b   : > { %9473 = vmatmul.mubr.bf16.vlgmr.msra.gmra.mxu0 %v26669_v60 }
 0xe1c   : > { %9733 = vmatmul.mubr.bf16.vlgmr.msra.gmra.mxu1 %v26669_v60  ;;  %9559 = vmatpush1.bf16.xpose.msra.mxu0 %v22773_v11 }
 0xe1d   : > { %20231 = vmatprep.mubr.msk.bf16.mxu0 %vm2937_vm0, %v26671_v61  ;;  %9891 = vmatpush1.bf16.xpose.msra.mxu1 %v22774_v59 }
 0xe1e   : > { %20263 = vmatprep.mubr.msk.bf16.mxu1 %vm2937_vm0, %v26671_v61  ;;  %20238 = vmatprep.subr.msk.bf16.mxu0 %vm2937_vm0, %v22775_v16 }
 0xe1f   : > { %20270 = vmatprep.subr.msk.bf16.mxu1 %vm2937_vm0, %v22777_v10 }
 0xe23   : > { %9577 = vmatmul.mubr.bf16.vlgmr.msra.gmra.mxu0 %v26669_v60 }
 0xe24   : > { %9909 = vmatmul.mubr.bf16.vlgmr.msra.gmra.mxu1 %v26669_v60  ;;  %9663 = vmatpush1.bf16.xpose.msra.mxu0 %v22779_v2 }
 0xe25   : > { %20239 = vmatprep.mubr.msk.bf16.mxu0 %vm2937_vm0, %v26671_v61  ;;  %9995 = vmatpush1.bf16.xpose.msra.mxu1 %v22780_v15 }
 0xe26   : > { %20271 = vmatprep.mubr.msk.bf16.mxu1 %vm2937_vm0, %v26671_v61  ;;  %20258 = vmatprep.subr.msk.bf16.mxu0 %vm2937_vm0, %v22781_v41 }
 0xe27   : > { %20278 = vmatprep.subr.msk.bf16.mxu1 %vm2937_vm0, %v22783_v46 }
 0xe2b   : > { %9681 = vmatmul.mubr.bf16.vlgmr.msra.gmra.mxu0 %v26669_v60 }
 0xe2c   : > { %10013 = vmatmul.mubr.bf16.vlgmr.msra.gmra.mxu1 %v26669_v60  ;;  %9839 = vmatpush1.bf16.xpose.msra.mxu0 %v22785_v5 }
 0xe2d   : > { %20259 = vmatprep.mubr.msk.bf16.mxu0 %vm2937_vm0, %v26671_v61  ;;  %10099 = vmatpush1.bf16.xpose.msra.mxu1 %v22786_v25 }
 0xe2e   : > { %20279 = vmatprep.mubr.msk.bf16.mxu1 %vm2937_vm0, %v26671_v61  ;;  %20266 = vmatprep.subr.msk.bf16.mxu0 %vm2937_vm0, %v22787_v21 }
 0xe2f   : > { %20286 = vmatprep.subr.msk.bf16.mxu1 %vm2937_vm0, %v22789_v30 }
 0xe33   : > { %9857 = vmatmul.mubr.bf16.vlgmr.msra.gmra.mxu0 %v26669_v60 }
 0xe34   : > { %10117 = vmatmul.mubr.bf16.vlgmr.msra.gmra.mxu1 %v26669_v60  ;;  %9943 = vmatpush1.bf16.xpose.msra.mxu0 %v22791_v17 }
 0xe35   : > { %20267 = vmatprep.mubr.msk.bf16.mxu0 %vm2937_vm0, %v26671_v61  ;;  %10203 = vmatpush1.bf16.xpose.msra.mxu1 %v22792_v27 }
 0xe36   : > { %20287 = vmatprep.mubr.msk.bf16.mxu1 %vm2937_vm0, %v26671_v61  ;;  %20274 = vmatprep.subr.msk.bf16.mxu0 %vm2937_vm0, %v22793_v28 }
 0xe37   : > { %20294 = vmatprep.subr.msk.bf16.mxu1 %vm2937_vm0, %v22795_v24 }
 0xe3b   : > { %9961 = vmatmul.mubr.bf16.vlgmr.msra.gmra.mxu0 %v26669_v60 }
 0xe3c   : > { %10221 = vmatmul.mubr.bf16.vlgmr.msra.gmra.mxu1 %v26669_v60  ;;  %10047 = vmatpush1.bf16.xpose.msra.mxu0 %v22797_v31 }
 0xe3d   : > { %20275 = vmatprep.mubr.msk.bf16.mxu0 %vm2937_vm0, %v26671_v61  ;;  %10307 = vmatpush1.bf16.xpose.msra.mxu1 %v22798_v19 }
 0xe3e   : > { %20295 = vmatprep.mubr.msk.bf16.mxu1 %vm2937_vm0, %v26671_v61  ;;  %20282 = vmatprep.subr.msk.bf16.mxu0 %vm2937_vm0, %v22799_v20 }
 0xe3f   : > { %20302 = vmatprep.subr.msk.bf16.mxu1 %vm2937_vm0, %v22801_v23 }
 0xe43   : > { %10065 = vmatmul.mubr.bf16.vlgmr.msra.gmra.mxu0 %v26669_v60 }
 0xe44   : > { %10325 = vmatmul.mubr.bf16.vlgmr.msra.gmra.mxu1 %v26669_v60  ;;  %10151 = vmatpush1.bf16.xpose.msra.mxu0 %v22803_v34 }
 0xe45   : > { %20283 = vmatprep.mubr.msk.bf16.mxu0 %vm2937_vm0, %v26671_v61  ;;  %10411 = vmatpush1.bf16.xpose.msra.mxu1 %v22804_v9 }
 0xe46   : > { %20303 = vmatprep.mubr.msk.bf16.mxu1 %vm2937_vm0, %v26671_v61  ;;  %20290 = vmatprep.subr.msk.bf16.mxu0 %vm2937_vm0, %v22805_v13 }
 0xe47   : > { %20322 = vmatprep.subr.msk.bf16.mxu1 %vm2937_vm0, %v22807_v43 }
 0xe4b   : > { %10169 = vmatmul.mubr.bf16.vlgmr.msra.gmra.mxu0 %v26669_v60 }
 0xe4c   : > { %10429 = vmatmul.mubr.bf16.vlgmr.msra.gmra.mxu1 %v26669_v60  ;;  %10255 = vmatpush1.bf16.xpose.msra.mxu0 %v22809_v44 }
 0xe4d   : > { %20291 = vmatprep.mubr.msk.bf16.mxu0 %vm2937_vm0, %v26671_v61  ;;  %10587 = vmatpush1.bf16.xpose.msra.mxu1 %v22810_v33 }
 0xe4e   : > { %20323 = vmatprep.mubr.msk.bf16.mxu1 %vm2937_vm0, %v26671_v61  ;;  %20298 = vmatprep.subr.msk.bf16.mxu0 %vm2937_vm0, %v22811_v45 }
 0xe4f   : > { %20330 = vmatprep.subr.msk.bf16.mxu1 %vm2937_vm0, %v22813_v42 }
 0xe53   : > { %10273 = vmatmul.mubr.bf16.vlgmr.msra.gmra.mxu0 %v26669_v60 }
 0xe54   : > { %10605 = vmatmul.mubr.bf16.vlgmr.msra.gmra.mxu1 %v26669_v60  ;;  %10359 = vmatpush1.bf16.xpose.msra.mxu0 %v22815_v32 }
 0xe55   : > { %20299 = vmatprep.mubr.msk.bf16.mxu0 %vm2937_vm0, %v26671_v61  ;;  %10691 = vmatpush1.bf16.xpose.msra.mxu1 %v22816_v18 }
 0xe56   : > { %20331 = vmatprep.mubr.msk.bf16.mxu1 %vm2937_vm0, %v26671_v61  ;;  %20318 = vmatprep.subr.msk.bf16.mxu0 %vm2937_vm0, %v22817_v48 }
 0xe57   : > { %20338 = vmatprep.subr.msk.bf16.mxu1 %vm2937_vm0, %v22819_v50 }
 0xe5b   : > { %10377 = vmatmul.mubr.bf16.vlgmr.msra.gmra.mxu0 %v26669_v60 }
 0xe5c   : > { %10709 = vmatmul.mubr.bf16.vlgmr.msra.gmra.mxu1 %v26669_v60  ;;  %10535 = vmatpush1.bf16.xpose.msra.mxu0 %v22821_v35 }
 0xe5d   : > { %20319 = vmatprep.mubr.msk.bf16.mxu0 %vm2937_vm0, %v26671_v61  ;;  %10795 = vmatpush1.bf16.xpose.msra.mxu1 %v22822_v54 }
 0xe5e   : > { %20339 = vmatprep.mubr.msk.bf16.mxu1 %vm2937_vm0, %v26671_v61  ;;  %20326 = vmatprep.subr.msk.bf16.mxu0 %vm2937_vm0, %v22823_v62 }
 0xe5f   : > { %20346 = vmatprep.subr.msk.bf16.mxu1 %vm2937_vm0, %v22825_v55 }
 0xe63   : > { %10553 = vmatmul.mubr.bf16.vlgmr.msra.gmra.mxu0 %v26669_v60 }
 0xe64   : > { %10813 = vmatmul.mubr.bf16.vlgmr.msra.gmra.mxu1 %v26669_v60  ;;  %10639 = vmatpush1.bf16.xpose.msra.mxu0 %v22827_v40 }
 0xe65   : > { %20327 = vmatprep.mubr.msk.bf16.mxu0 %vm2937_vm0, %v26671_v61  ;;  %10899 = vmatpush1.bf16.xpose.msra.mxu1 %v22828_v38 }
 0xe66   : > { %20347 = vmatprep.mubr.msk.bf16.mxu1 %vm2937_vm0, %v26671_v61  ;;  %20334 = vmatprep.subr.msk.bf16.mxu0 %vm2937_vm0, %v22829_v0  ;;  %v20245_v0 = vld [vmem:[#allocation33 + $0x1] ss:$0 sm:$0xff] }
 0xe67   : > { %20354 = vmatprep.subr.msk.bf16.mxu1 %vm2937_vm0, %v22831_v1 }
 0xe6b   : > { %10657 = vmatmul.mubr.bf16.vlgmr.msra.gmra.mxu0 %v26669_v60 }
 0xe6c   : > { %10917 = vmatmul.mubr.bf16.vlgmr.msra.gmra.mxu1 %v26669_v60  ;;  %10743 = vmatpush1.bf16.xpose.msra.mxu0 %v22833_v3 }
 0xe6d   : > { %20335 = vmatprep.mubr.msk.bf16.mxu0 %vm2937_vm0, %v26671_v61  ;;  %11003 = vmatpush1.bf16.xpose.msra.mxu1 %v22834_v36 }
 0xe6e   : > { %20355 = vmatprep.mubr.msk.bf16.mxu1 %vm2937_vm0, %v26671_v61  ;;  %20342 = vmatprep.subr.msk.bf16.mxu0 %vm2937_vm0, %v22835_v4 }
 0xe6f   : > { %20362 = vmatprep.subr.msk.bf16.mxu1 %vm2937_vm0, %v22837_v63 }
 0xe73   : > { %10761 = vmatmul.mubr.bf16.vlgmr.msra.gmra.mxu0 %v26669_v60 }
 0xe74   : > { %11021 = vmatmul.mubr.bf16.vlgmr.msra.gmra.mxu1 %v26669_v60  ;;  %10847 = vmatpush1.bf16.xpose.msra.mxu0 %v22839_v37 }
 0xe75   : > { %20343 = vmatprep.mubr.msk.bf16.mxu0 %vm2937_vm0, %v26671_v61  ;;  %11107 = vmatpush1.bf16.xpose.msra.mxu1 %v22840_v29 }
 0xe76   : > { %20363 = vmatprep.mubr.msk.bf16.mxu1 %vm2937_vm0, %v26671_v61  ;;  %20350 = vmatprep.subr.msk.bf16.mxu0 %vm2937_vm0, %v22841_v51  ;;  %v20185_v51 = vld [vmem:[#allocation31 + $0x1] ss:$0 sm:$0xff] }
 0xe77   : > { %21344 = vmatprep.subr.bf16.mxu1 %v25056_v7 }
 0xe7b   : > { %10865 = vmatmul.mubr.bf16.vlgmr.msra.gmra.mxu0 %v26669_v60 }
 0xe7c   : > { %11125 = vmatmul.mubr.bf16.vlgmr.msra.gmra.mxu1 %v26669_v60  ;;  %10951 = vmatpush1.bf16.xpose.msra.mxu0 %v22843_v22 }
 0xe7d   : > { %20351 = vmatprep.mubr.msk.bf16.mxu0 %vm2937_vm0, %v26671_v61  ;;  %20358 = vmatprep.subr.msk.bf16.mxu0 %vm2937_vm0, %v22844_v6 }
 0xe7e   : > { %21346 = vmatprep.mubr.msk.bf16.mxu1 %vm25057_vm1, %v25056_v7 }
 0xe83   : > { %10969 = vmatmul.mubr.bf16.vlgmr.msra.gmra.mxu0 %v26669_v60 }
 0xe84   : > { %11055 = vmatpush1.bf16.xpose.msra.mxu0 %v22846_v53  ;;  %20359 = vmatprep.mubr.msk.bf16.mxu0 %vm2937_vm0, %v26671_v61 }
 0xe85   : > { %21338 = vmatprep.subr.bf16.mxu0 %v25056_v7 }
 0xe8b   : > { %11073 = vmatmul.mubr.bf16.vlgmr.msra.gmra.mxu0 %v26669_v60 }
 0xe8c   : > { %21340 = vmatprep.mubr.msk.bf16.mxu0 %vm25057_vm1, %v25056_v7 }
 0xebb   : > { %v26819_v11 = vpop.f32.mrf.mxu0  ;;  %v26821_v59 = vpop.f32.mrf.mxu1 }
 0xebd   : > { %v9164_v16 = vpop.f32.mrf.mxu0  ;;  %v9320_v10 = vpop.f32.mrf.mxu1 }
 0xebe   : > { %v20247_v10 = vld [vmem:[#allocation33 + $0x3] ss:$0 sm:$0xff] }
 0xebf   : > { %v9165_v2 = vpop.f32.mrf.mxu0  ;;  %v9321_v15 = vpop.f32.mrf.mxu1 }
 0xec1   : > { %v9166_v41 = vpop.f32.mrf.mxu0  ;;  %v9322_v46 = vpop.f32.mrf.mxu1 }
 0xec3   : > { %v9214_v5 = vpop.f32.mrf.mxu0 }
 0xec4   : > { %v26823_v25 = vpop.f32.mrf.mxu1  ;;  %v9215_v2 = vadd.f32 %v20185_v51, %v9214_v5 }
 0xec5   : > { %v9216_v61 = vpop.f32.mrf.mxu0 }
 0xec6   : > { %v9424_v21 = vpop.f32.mrf.mxu1 }
 0xec7   : > { %v9217_v30 = vpop.f32.mrf.mxu0 }
 0xec8   : > { %v9425_v60 = vpop.f32.mrf.mxu1  ;;  %v11133_v30 = vpack.c.bf16 %v9215_v2, %v9215_v2 }
 0xec9   : > { %v9218_v17 = vpop.f32.mrf.mxu0 }
 0xeca   : > { %v9426_v27 = vpop.f32.mrf.mxu1 }
 0xecb   : > { %v26825_v28 = vpop.f32.mrf.mxu0  ;;  %v20187_v27 = vld [vmem:[#allocation31 + $0x3] ss:$0 sm:$0xff] }
 0xecc   : > { %v26827_v24 = vpop.f32.mrf.mxu1 }
 0xecd   : > { %v9268_v31 = vpop.f32.mrf.mxu0 }
 0xece   : > { %v9528_v19 = vpop.f32.mrf.mxu1 }
 0xecf   : > { %v9269_v20 = vpop.f32.mrf.mxu0 }
 0xed0   : > { %v9529_v23 = vpop.f32.mrf.mxu1 }
 0xed1   : > { %v9270_v34 = vpop.f32.mrf.mxu0  ;;  %v20244_v23 = vld [vmem:[#allocation33] ss:$0 sm:$0xff] }
 0xed2   : > { %v9530_v9 = vpop.f32.mrf.mxu1  ;;  %v20249_v34 = vld [vmem:[#allocation33 + $0x5] ss:$0 sm:$0xff] }
 0xed3   : > { %v26829_v13 = vpop.f32.mrf.mxu0  ;;  %v9319_v9 = vadd.f32 %v20187_v27, %v26821_v59 }
 0xed4   : > { %v26831_v43 = vpop.f32.mrf.mxu1 }
 0xed5   : > { %v9372_v44 = vpop.f32.mrf.mxu0 }
 0xed6   : > { %v9632_v33 = vpop.f32.mrf.mxu1 }
 0xed7   : > { %v9373_v45 = vpop.f32.mrf.mxu0 }
 0xed8   : > { %v9633_v42 = vpop.f32.mrf.mxu1 }
 0xed9   : > { %v9374_v32 = vpop.f32.mrf.mxu0 }
 0xeda   : > { %v9634_v18 = vpop.f32.mrf.mxu1 }
 0xedb   : > { %v26833_v48 = vpop.f32.mrf.mxu0 }
 0xedc   : > { %v26835_v50 = vpop.f32.mrf.mxu1 }
 0xedd   : > { %v9476_v35 = vpop.f32.mrf.mxu0 }
 0xede   : > { %v9736_v54 = vpop.f32.mrf.mxu1 }
 0xedf   : > { %v9477_v62 = vpop.f32.mrf.mxu0  ;;  %v20184_v54 = vld [vmem:[#allocation31] ss:$0 sm:$0xff] }
 0xee0   : > { %v9737_v55 = vpop.f32.mrf.mxu1  ;;  %v11135_v62 = vpack.c.bf16 %v9319_v9, %v9319_v9 }
 0xee1   : > { %v9478_v40 = vpop.f32.mrf.mxu0 }
 0xee2   : > { %v9738_v38 = vpop.f32.mrf.mxu1 }
 0xee3   : > { %v26837_v1 = vpop.f32.mrf.mxu0  ;;  %v20189_v38 = vld [vmem:[#allocation31 + $0x5] ss:$0 sm:$0xff] }
 0xee4   : > { %v9910_v3 = vpop.f32.mrf.mxu1  ;;  %v9423_v51 = vadd.f32 %v20189_v38, %v26823_v25 }
 0xee5   : > { %v9911_v36 = vadd.f32 %v20245_v0, %v9910_v3  ;;  %v9580_v4 = vpop.f32.mrf.mxu0 }
 0xee6   : > { %v9912_v63 = vpop.f32.mrf.mxu1  ;;  %v20246_v4 = vld [vmem:[#allocation33 + $0x2] ss:$0 sm:$0xff] }
 0xee7   : > { %v11145_v37 = vpack.c.bf16 %v9911_v36, %v9911_v36  ;;  %v9581_v29 = vpop.f32.mrf.mxu0  ;;  %v9163_v63 = vadd.f32 %v20184_v54, %v26819_v11  ;;  %v20188_v54 = vld [vmem:[#allocation31 + $0x4] ss:$0 sm:$0xff] }
 0xee8   : > { %v9913_v22 = vpop.f32.mrf.mxu1  ;;  %v20251_v29 = vld [vmem:[#allocation33 + $0x7] ss:$0 sm:$0xff] }
 0xee9   : > { %v11206_v6 = vsel %vm5451_vm2, %v11145_v37, 0  ;;  %v9582_v53 = vpop.f32.mrf.mxu0  ;;  %v11132_v2 = vpack.c.bf16 %v9163_v63, %v9163_v63  ;;  %v20255_v63 = vld [vmem:[#allocation33 + $0xb] ss:$0 sm:$0xff] }
 0xeea   : > { %v9914_v16 = vpop.f32.mrf.mxu1  ;;  %21345 = vmatpush3.bf16.xpose.msra.mxu1 %v11206_v6 }
 0xeeb   : > { %v26840_v15 = vpop.f32.mrf.mxu0  ;;  %21356 = vmatprep.subr.bf16.mxu1 %v25056_v7 }
 0xeec   : > { %v10014_v41 = vpop.f32.mrf.mxu1 }
 0xeed   : > { %v10015_v46 = vadd.f32 %v20247_v10, %v10014_v41  ;;  %v9684_v61 = vpop.f32.mrf.mxu0 }
 0xeee   : > { %v10016_v21 = vpop.f32.mrf.mxu1  ;;  %v20186_v61 = vld [vmem:[#allocation31 + $0x2] ss:$0 sm:$0xff] }
 0xeef   : > { %v11147_v60 = vpack.c.bf16 %v10015_v46, %v10015_v46  ;;  %v9685_v17 = vpop.f32.mrf.mxu0  ;;  %v11137_v46 = vpack.c.bf16 %v9423_v51, %v9423_v51 }
 0xef0   : > { %v10017_v31 = vpop.f32.mrf.mxu1 }
 0xef1   : > { %v11298_v19 = vsel %vm5451_vm2, %v11147_v60, 0  ;;  %21347 = vmatmul.mubr.msk.bf16.vlgmr.msra.gmra.mxu1 %vm5451_vm2, %v11133_v30  ;;  %v9686_v20 = vpop.f32.mrf.mxu0  ;;  %v20191_v60 = vld [vmem:[#allocation31 + $0x7] ss:$0 sm:$0xff] }
 0xef2   : > { %v10018_v5 = vpop.f32.mrf.mxu1  ;;  %21357 = vmatpush3.bf16.xpose.msra.mxu1 %v11298_v19  ;;  %21358 = vmatprep.mubr.msk.bf16.mxu1 %vm25057_vm1, %v25056_v7  ;;  %v20248_v19 = vld [vmem:[#allocation33 + $0x4] ss:$0 sm:$0xff]  ;;  %v9267_v20 = vadd.f32 %v20186_v61, %v26825_v28 }
 0xef3   : > { %v9858_v44 = vpop.f32.mrf.mxu0  ;;  %21368 = vmatprep.subr.bf16.mxu1 %v25056_v7  ;;  %v20253_v5 = vld [vmem:[#allocation33 + $0x9] ss:$0 sm:$0xff] }
 0xef4   : > { %v9859_v33 = vadd.f32 %v20244_v23, %v9858_v44  ;;  %v10118_v45 = vpop.f32.mrf.mxu1 }
 0xef5   : > { %v10119_v42 = vadd.f32 %v20249_v34, %v10118_v45  ;;  %v9860_v32 = vpop.f32.mrf.mxu0  ;;  %v9527_v34 = vadd.f32 %v20191_v60, %v26827_v24  ;;  %v20193_v24 = vld [vmem:[#allocation31 + $0x9] ss:$0 sm:$0xff] }
 0xef6   : > { %v11144_v18 = vpack.c.bf16 %v9859_v33, %v9859_v33  ;;  %v10120_v35 = vpop.f32.mrf.mxu1 }
 0xef7   : > { %v11149_v55 = vpack.c.bf16 %v10119_v42, %v10119_v42  ;;  %v9861_v40 = vpop.f32.mrf.mxu0  ;;  %v11134_v42 = vpack.c.bf16 %v9267_v20, %v9267_v20  ;;  %v11139_v35 = vpack.c.bf16 %v9527_v34, %v9527_v34 }
 0xef8   : > { %v11160_v0 = vsel %vm5451_vm2, %v11144_v18, 0  ;;  %v10121_v3 = vpop.f32.mrf.mxu1 }
 0xef9   : > { %v11390_v36 = vsel %vm5451_vm2, %v11149_v55, 0  ;;  %21359 = vmatmul.mubr.msk.bf16.vlgmr.msra.gmra.mxu1 %vm5451_vm2, %v11135_v62  ;;  %v9862_v59 = vpop.f32.mrf.mxu0  ;;  %21339 = vmatpush3.bf16.xpose.msra.mxu0 %v11160_v0 }
 0xefa   : > { %v10122_v37 = vpop.f32.mrf.mxu1  ;;  %21369 = vmatpush3.bf16.xpose.msra.mxu1 %v11390_v36  ;;  %21370 = vmatprep.mubr.msk.bf16.mxu1 %vm25057_vm1, %v25056_v7  ;;  %v20250_v36 = vld [vmem:[#allocation33 + $0x6] ss:$0 sm:$0xff]  ;;  %v9371_v59 = vadd.f32 %v20188_v54, %v26829_v13 }
 0xefb   : > { %v9962_v22 = vpop.f32.mrf.mxu0  ;;  %21350 = vmatprep.subr.bf16.mxu0 %v25056_v7  ;;  %21380 = vmatprep.subr.bf16.mxu1 %v25056_v7  ;;  %v9631_v37 = vadd.f32 %v20193_v24, %v26831_v43  ;;  %v20195_v43 = vld [vmem:[#allocation31 + $0xb] ss:$0 sm:$0xff] }
 0xefc   : > { %v9963_v6 = vadd.f32 %v20246_v4, %v9962_v22  ;;  %v10222_v53 = vpop.f32.mrf.mxu1 }
 0xefd   : > { %v10223_v16 = vadd.f32 %v20251_v29, %v10222_v53  ;;  %v9964_v10 = vpop.f32.mrf.mxu0  ;;  %v11136_v53 = vpack.c.bf16 %v9371_v59, %v9371_v59 }
 0xefe   : > { %v11146_v41 = vpack.c.bf16 %v9963_v6, %v9963_v6  ;;  %v10224_v11 = vpop.f32.mrf.mxu1 }
 0xeff   : > { %v11151_v21 = vpack.c.bf16 %v10223_v16, %v10223_v16  ;;  %v9965_v30 = vpop.f32.mrf.mxu0 }
 0xf00   : > { %v11252_v17 = vsel %vm5451_vm2, %v11146_v41, 0  ;;  %v10225_v25 = vpop.f32.mrf.mxu1  ;;  %21341 = vmatmul.mubr.msk.bf16.vlgmr.msra.gmra.mxu0 %vm5451_vm2, %v11132_v2  ;;  %v11141_v2 = vpack.c.bf16 %v9631_v37, %v9631_v37  ;;  %v20190_v41 = vld [vmem:[#allocation31 + $0x6] ss:$0 sm:$0xff] }
 0xf01   : > { %v11482_v27 = vsel %vm5451_vm2, %v11151_v21, 0  ;;  %21371 = vmatmul.mubr.msk.bf16.vlgmr.msra.gmra.mxu1 %vm5451_vm2, %v11137_v46  ;;  %v9966_v31 = vpop.f32.mrf.mxu0  ;;  %21351 = vmatpush3.bf16.xpose.msra.mxu0 %v11252_v17  ;;  %v20252_v17 = vld [vmem:[#allocation33 + $0x8] ss:$0 sm:$0xff]  ;;  %v9475_v25 = vadd.f32 %v20190_v41, %v26833_v48 }
 0xf02   : > { %v10226_v23 = vpop.f32.mrf.mxu1  ;;  %21381 = vmatpush3.bf16.xpose.msra.mxu1 %v11482_v27  ;;  %21352 = vmatprep.mubr.msk.bf16.mxu0 %vm25057_vm1, %v25056_v7  ;;  %v20305_v31 = vld [vmem:[#allocation34 + $0x1] ss:$0 sm:$0xff] }
 0xf03   : > { %v10066_v9 = vpop.f32.mrf.mxu0  ;;  %21382 = vmatprep.mubr.msk.bf16.mxu1 %vm25057_vm1, %v25056_v7  ;;  %21362 = vmatprep.subr.bf16.mxu0 %v25056_v7 }
 0xf04   : > { %v10067_v44 = vadd.f32 %v20248_v19, %v10066_v9  ;;  %v10326_v33 = vpop.f32.mrf.mxu1  ;;  %21392 = vmatprep.subr.bf16.mxu1 %v25056_v7  ;;  %v9735_v19 = vadd.f32 %v20195_v43, %v26835_v50  ;;  %v11138_v9 = vpack.c.bf16 %v9475_v25, %v9475_v25 }
 0xf05   : > { %v10327_v45 = vadd.f32 %v20253_v5, %v10326_v33  ;;  %v10068_v28 = vpop.f32.mrf.mxu0 }
 0xf06   : > { %v11148_v32 = vpack.c.bf16 %v10067_v44, %v10067_v44  ;;  %v10328_v18 = vpop.f32.mrf.mxu1  ;;  %v20192_v28 = vld [vmem:[#allocation31 + $0x8] ss:$0 sm:$0xff] }
 0xf07   : > { %v11153_v62 = vpack.c.bf16 %v10327_v45, %v10327_v45  ;;  %v10069_v55 = vpop.f32.mrf.mxu0  ;;  %v11143_v45 = vpack.c.bf16 %v9735_v19, %v9735_v19 }
 0xf08   : > { %v11344_v40 = vsel %vm5451_vm2, %v11148_v32, 0  ;;  %v10329_v38 = vpop.f32.mrf.mxu1  ;;  %21353 = vmatmul.mubr.msk.bf16.vlgmr.msra.gmra.mxu0 %vm5451_vm2, %v11134_v42  ;;  %v9579_v55 = vadd.f32 %v20192_v28, %v26837_v1 }
 0xf09   : > { %v11574_v0 = vsel %vm5451_vm2, %v11153_v62, 0  ;;  %21383 = vmatmul.mubr.msk.bf16.vlgmr.msra.gmra.mxu1 %vm5451_vm2, %v11139_v35  ;;  %v10070_v3 = vpop.f32.mrf.mxu0  ;;  %21363 = vmatpush3.bf16.xpose.msra.mxu0 %v11344_v40  ;;  %v20254_v62 = vld [vmem:[#allocation33 + $0xa] ss:$0 sm:$0xff] }
 0xf0a   : > { %v10330_v4 = vpop.f32.mrf.mxu1  ;;  %21393 = vmatpush3.bf16.xpose.msra.mxu1 %v11574_v0  ;;  %21364 = vmatprep.mubr.msk.bf16.mxu0 %vm25057_vm1, %v25056_v7 }
 0xf0b   : > { %v10170_v29 = vpop.f32.mrf.mxu0  ;;  %21394 = vmatprep.mubr.msk.bf16.mxu1 %vm25057_vm1, %v25056_v7  ;;  %21374 = vmatprep.subr.bf16.mxu0 %v25056_v7  ;;  %v20194_v4 = vld [vmem:[#allocation31 + $0xa] ss:$0 sm:$0xff] }
 0xf0c   : > { %v10171_v51 = vadd.f32 %v20250_v36, %v10170_v29  ;;  %v10430_v22 = vpop.f32.mrf.mxu1  ;;  %21404 = vmatprep.subr.bf16.mxu1 %v25056_v7  ;;  %v11140_v36 = vpack.c.bf16 %v9579_v55, %v9579_v55 }
 0xf0d   : > { %v10431_v6 = vadd.f32 %v20255_v63, %v10430_v22  ;;  %v10172_v13 = vpop.f32.mrf.mxu0  ;;  %v20304_v22 = vld [vmem:[#allocation34] ss:$0 sm:$0xff] }
 0xf0e   : > { %v11150_v16 = vpack.c.bf16 %v10171_v51, %v10171_v51  ;;  %v10432_v10 = vpop.f32.mrf.mxu1 }
 0xf0f   : > { %v11155_v11 = vpack.c.bf16 %v10431_v6, %v10431_v6  ;;  %v10173_v46 = vpop.f32.mrf.mxu0  ;;  %v9683_v6 = vadd.f32 %v20194_v4, %v26840_v15 }
 0xf10   : > { %v11436_v61 = vsel %vm5451_vm2, %v11150_v16, 0  ;;  %v10433_v21 = vpop.f32.mrf.mxu1  ;;  %21365 = vmatmul.mubr.msk.bf16.vlgmr.msra.gmra.mxu0 %vm5451_vm2, %v11136_v53 }
 0xf11   : > { %v11666_v30 = vsel %vm5451_vm2, %v11155_v11, 0  ;;  %21395 = vmatmul.mubr.msk.bf16.vlgmr.msra.gmra.mxu1 %vm5451_vm2, %v11141_v2  ;;  %v10174_v60 = vpop.f32.mrf.mxu0  ;;  %21375 = vmatpush3.bf16.xpose.msra.mxu0 %v11436_v61  ;;  %v11142_v41 = vpack.c.bf16 %v9683_v6, %v9683_v6 }
 0xf12   : > { %v10434_v27 = vpop.f32.mrf.mxu1  ;;  %21405 = vmatpush3.bf16.xpose.msra.mxu1 %v11666_v30  ;;  %21376 = vmatprep.mubr.msk.bf16.mxu0 %vm25057_vm1, %v25056_v7 }
 0xf13   : > { %v10274_v20 = vpop.f32.mrf.mxu0  ;;  %21406 = vmatprep.mubr.msk.bf16.mxu1 %vm25057_vm1, %v25056_v7  ;;  %21386 = vmatprep.subr.bf16.mxu0 %v25056_v7 }
 0xf14   : > { %v10275_v23 = vadd.f32 %v20252_v17, %v10274_v20  ;;  %v10606_v5 = vpop.f32.mrf.mxu1  ;;  %21416 = vmatprep.subr.bf16.mxu1 %v25056_v7 }
 0xf15   : > { %v10607_v34 = vadd.f32 %v20305_v31, %v10606_v5  ;;  %v10276_v48 = vpop.f32.mrf.mxu0 }
 0xf16   : > { %v11152_v44 = vpack.c.bf16 %v10275_v23, %v10275_v23  ;;  %v10608_v33 = vpop.f32.mrf.mxu1 }
 0xf17   : > { %v11865_v42 = vpack.c.bf16 %v10607_v34, %v10607_v34  ;;  %v10277_v32 = vpop.f32.mrf.mxu0 }
 0xf18   : > { %v11528_v50 = vsel %vm5451_vm2, %v11152_v44, 0  ;;  %v10609_v18 = vpop.f32.mrf.mxu1  ;;  %21377 = vmatmul.mubr.msk.bf16.vlgmr.msra.gmra.mxu0 %vm5451_vm2, %v11138_v9 }
 0xf19   : > { %v11926_v35 = vsel %vm6176_vm3, %v11865_v42, 0  ;;  %21407 = vmatmul.mubr.msk.bf16.vlgmr.msra.gmra.mxu1 %vm5451_vm2, %v11143_v45  ;;  %v10278_v54 = vpop.f32.mrf.mxu0  ;;  %21387 = vmatpush3.bf16.xpose.msra.mxu0 %v11528_v50 }
 0xf1a   : > { %v10610_v24 = vpop.f32.mrf.mxu1  ;;  %21417 = vmatpush3.bf16.msra.mxu1 %v11926_v35  ;;  %21388 = vmatprep.mubr.msk.bf16.mxu0 %vm25057_vm1, %v25056_v7 }
 0xf1b   : > { %v10378_v40 = vpop.f32.mrf.mxu0  ;;  %21398 = vmatprep.subr.bf16.mxu0 %v25056_v7  ;;  %21418 = vmatprep.mubr.msk.bf16.mxu1 %vm25057_vm1, %v25056_v7 }
 0xf1c   : > { %v10379_v38 = vadd.f32 %v20254_v62, %v10378_v40  ;;  %v26904_v0 = vpop.f32.mrf.mxu1  ;;  %21428 = vmatprep.subr.bf16.mxu1 %v25056_v7 }
 0xf1d   : > { %v10380_v3 = vpop.f32.mrf.mxu0 }
 0xf1e   : > { %v11154_v59 = vpack.c.bf16 %v10379_v38, %v10379_v38  ;;  %v10712_v1 = vpop.f32.mrf.mxu1 }
 0xf1f   : > { %v10381_v63 = vpop.f32.mrf.mxu0 }
 0xf20   : > { %v11620_v37 = vsel %vm5451_vm2, %v11154_v59, 0  ;;  %v10713_v29 = vpop.f32.mrf.mxu1  ;;  %21389 = vmatmul.mubr.msk.bf16.vlgmr.msra.gmra.mxu0 %vm5451_vm2, %v11140_v36 }
 0xf21   : > { %v10382_v51 = vpop.f32.mrf.mxu0  ;;  %21399 = vmatpush3.bf16.xpose.msra.mxu0 %v11620_v37  ;;  %21400 = vmatprep.mubr.msk.bf16.mxu0 %vm25057_vm1, %v25056_v7 }
 0xf22   : > { %v10714_v13 = vpop.f32.mrf.mxu1  ;;  %21410 = vmatprep.subr.bf16.mxu0 %v25056_v7 }
 0xf23   : > { %v10554_v53 = vpop.f32.mrf.mxu0 }
 0xf24   : > { %v10555_v16 = vadd.f32 %v20304_v22, %v10554_v53  ;;  %v26913_v10 = vpop.f32.mrf.mxu1 }
 0xf25   : > { %v10556_v2 = vpop.f32.mrf.mxu0 }
 0xf26   : > { %v11864_v11 = vpack.c.bf16 %v10555_v16, %v10555_v16  ;;  %v10816_v46 = vpop.f32.mrf.mxu1 }
 0xf27   : > { %v10557_v43 = vpop.f32.mrf.mxu0 }
 0xf28   : > { %v11880_v61 = vsel %vm6176_vm3, %v11864_v11, 0  ;;  %v10817_v21 = vpop.f32.mrf.mxu1  ;;  %21401 = vmatmul.mubr.msk.bf16.vlgmr.msra.gmra.mxu0 %vm5451_vm2, %v11142_v41 }
 0xf29   : > { %v10558_v30 = vpop.f32.mrf.mxu0  ;;  %21411 = vmatpush3.bf16.msra.mxu0 %v11880_v61  ;;  %21412 = vmatprep.mubr.msk.bf16.mxu0 %vm25057_vm1, %v25056_v7 }
 0xf2a   : > { %v10818_v15 = vpop.f32.mrf.mxu1  ;;  %21422 = vmatprep.subr.bf16.mxu0 %v25056_v7 }
 0xf2b   : > { %v26920_v60 = vpop.f32.mrf.mxu0 }
 0xf2c   : > { %v26922_v17 = vpop.f32.mrf.mxu1 }
 0xf2d   : > { %v10660_v25 = vpop.f32.mrf.mxu0 }
 0xf2e   : > { %v10920_v27 = vpop.f32.mrf.mxu1 }
 0xf2f   : > { %v10661_v31 = vpop.f32.mrf.mxu0 }
 0xf30   : > { %v10921_v19 = vpop.f32.mrf.mxu1 }
 0xf31   : > { %v10662_v20 = vpop.f32.mrf.mxu0 }
 0xf32   : > { %v10922_v23 = vpop.f32.mrf.mxu1 }
 0xf33   : > { %v26924_v5 = vpop.f32.mrf.mxu0 }
 0xf34   : > { %v26926_v34 = vpop.f32.mrf.mxu1 }
 0xf35   : > { %v10764_v48 = vpop.f32.mrf.mxu0 }
 0xf36   : > { %v11024_v9 = vpop.f32.mrf.mxu1 }
 0xf37   : > { %v10765_v44 = vpop.f32.mrf.mxu0 }
 0xf38   : > { %v11025_v33 = vpop.f32.mrf.mxu1 }
 0xf39   : > { %v10766_v45 = vpop.f32.mrf.mxu0 }
 0xf3a   : > { %v11026_v28 = vpop.f32.mrf.mxu1 }
 0xf3b   : > { %v26928_v42 = vpop.f32.mrf.mxu0 }
 0xf3c   : > { %v26930_v32 = vpop.f32.mrf.mxu1 }
 0xf3d   : > { %v10868_v50 = vpop.f32.mrf.mxu0 }
 0xf3e   : > { %v11128_v18 = vpop.f32.mrf.mxu1 }
 0xf3f   : > { %v10869_v35 = vpop.f32.mrf.mxu0 }
 0xf40   : > { %v11129_v54 = vpop.f32.mrf.mxu1 }
 0xf41   : > { %v10870_v62 = vpop.f32.mrf.mxu0 }
 0xf42   : > { %v11130_v55 = vpop.f32.mrf.mxu1 }
 0xf43   : > { %v26932_v24 = vpop.f32.mrf.mxu0 }
 0xf45   : > { %v10972_v40 = vpop.f32.mrf.mxu0 }
 0xf47   : > { %v10973_v38 = vpop.f32.mrf.mxu0 }
 0xf49   : > { %v10974_v3 = vpop.f32.mrf.mxu0 }
 0xf4b   : > { %v26934_v36 = vpop.f32.mrf.mxu0 }
 0xf4d   : > { %v11076_v59 = vpop.f32.mrf.mxu0 }
 0xf4f   : > { %v11077_v1 = vpop.f32.mrf.mxu0 }
 0xf51   : > { %v11078_v4 = vpop.f32.mrf.mxu0 }
 0xfb1   : > { %v11242_v63 = vpop.f32.mrf.mxu1 }
 0xfb2   : > { %v11709_v37 = vmul.f32 0.25, %v11242_v63 }
 0xfb3   : > { %v21348_v29 = vpop.f32.mrf.mxu1 }
 0xfb4   : > { %v26937_v51 = vadd.f32 %v11709_v37, %v26230_v47 }
 0xfb5   : > { %v11245_v22 = vpop.f32.mrf.mxu1 }
 0xfb6   : > { %v11735_v6 = vsel %vm6028_vm5, %v26937_v51, -inf }
 0xfb7   : > { %11736 = vmax.xlane.f32.xlu1 %v11735_v6  ;;  %v21349_v13 = vpop.f32.mrf.mxu1 }
 0xfb9   : > { %v11334_v53 = vpop.f32.mrf.mxu1 }
 0xfba   : > { %v11711_v16 = vmul.f32 0.25, %v11334_v53 }
 0xfbb   : > { %v21360_v2 = vpop.f32.mrf.mxu1 }
 0xfbc   : > { %v26942_v41 = vadd.f32 %v11711_v16, %v26230_v47 }
 0xfbd   : > { %v11337_v11 = vpop.f32.mrf.mxu1 }
 0xfbe   : > { %v11741_v46 = vsel %vm6028_vm5, %v26942_v41, -inf }
 0xfbf   : > { %11742 = vmax.xlane.f32.xlu1 %v11741_v46  ;;  %v21361_v43 = vpop.f32.mrf.mxu1 }
 0xfc0   : > { %v11196_v61 = vpop.f32.mrf.mxu0 }
 0xfc1   : > { %v11708_v21 = vmul.f32 0.25, %v11196_v61  ;;  %v11426_v30 = vpop.f32.mrf.mxu1 }
 0xfc2   : > { %v11713_v15 = vmul.f32 0.25, %v11426_v30  ;;  %v21342_v25 = vpop.f32.mrf.mxu0 }
 0xfc3   : > { %v21372_v27 = vpop.f32.mrf.mxu1  ;;  %v26947_v31 = vadd.f32 %v11708_v21, %v26230_v47 }
 0xfc4   : > { %v11199_v19 = vpop.f32.mrf.mxu0  ;;  %v26950_v20 = vadd.f32 %v11713_v15, %v26230_v47 }
 0xfc5   : > { %v11429_v23 = vpop.f32.mrf.mxu1  ;;  %v11732_v48 = vsel %vm6028_vm5, %v26947_v31, -inf }
 0xfc6   : > { %v11747_v9 = vsel %vm6028_vm5, %v26950_v20, -inf  ;;  %11733 = vmax.xlane.f32.xlu0 %v11732_v48  ;;  %v21343_v44 = vpop.f32.mrf.mxu0 }
 0xfc7   : > { %11748 = vmax.xlane.f32.xlu1 %v11747_v9  ;;  %v21373_v33 = vpop.f32.mrf.mxu1 }
 0xfc8   : > { %v11288_v45 = vpop.f32.mrf.mxu0 }
 0xfc9   : > { %v11710_v28 = vmul.f32 0.25, %v11288_v45  ;;  %v11518_v50 = vpop.f32.mrf.mxu1 }
 0xfca   : > { %v11715_v18 = vmul.f32 0.25, %v11518_v50  ;;  %v21354_v35 = vpop.f32.mrf.mxu0 }
 0xfcb   : > { %v21384_v54 = vpop.f32.mrf.mxu1  ;;  %v26957_v62 = vadd.f32 %v11710_v28, %v26230_v47 }
 0xfcc   : > { %v11291_v55 = vpop.f32.mrf.mxu0  ;;  %v26960_v40 = vadd.f32 %v11715_v18, %v26230_v47 }
 0xfcd   : > { %v11521_v38 = vpop.f32.mrf.mxu1  ;;  %v11738_v3 = vsel %vm6028_vm5, %v26957_v62, -inf }
 0xfce   : > { %v11753_v59 = vsel %vm6028_vm5, %v26960_v40, -inf  ;;  %11739 = vmax.xlane.f32.xlu0 %v11738_v3  ;;  %v21355_v1 = vpop.f32.mrf.mxu0 }
 0xfcf   : > { %11754 = vmax.xlane.f32.xlu1 %v11753_v59  ;;  %v21385_v4 = vpop.f32.mrf.mxu1 }
 0xfd0   : > { %v11380_v63 = vpop.f32.mrf.mxu0 }
 0xfd1   : > { %v11712_v37 = vmul.f32 0.25, %v11380_v63  ;;  %v11610_v29 = vpop.f32.mrf.mxu1 }
 0xfd2   : > { %v11717_v22 = vmul.f32 0.25, %v11610_v29  ;;  %v21366_v6 = vpop.f32.mrf.mxu0 }
 0xfd3   : > { %v21396_v13 = vpop.f32.mrf.mxu1  ;;  %v26967_v53 = vadd.f32 %v11712_v37, %v26230_v47 }
 0xfd4   : > { %v11383_v16 = vpop.f32.mrf.mxu0  ;;  %v26970_v2 = vadd.f32 %v11717_v22, %v26230_v47 }
 0xfd5   : > { %v11613_v11 = vpop.f32.mrf.mxu1  ;;  %v11744_v46 = vsel %vm6028_vm5, %v26967_v53, -inf }
 0xfd6   : > { %v11759_v43 = vsel %vm6028_vm5, %v26970_v2, -inf  ;;  %11745 = vmax.xlane.f32.xlu0 %v11744_v46  ;;  %v21367_v61 = vpop.f32.mrf.mxu0 }
 0xfd7   : > { %11760 = vmax.xlane.f32.xlu1 %v11759_v43  ;;  %v21397_v21 = vpop.f32.mrf.mxu1 }
 0xfd8   : > { %v11472_v30 = vpop.f32.mrf.mxu0  ;;  %v20307_v21 = vld [vmem:[#allocation34 + $0x3] ss:$0 sm:$0xff] }
 0xfd9   : > { %v11714_v15 = vmul.f32 0.25, %v11472_v30  ;;  %v11702_v25 = vpop.f32.mrf.mxu1 }
 0xfda   : > { %v11719_v27 = vmul.f32 0.25, %v11702_v25  ;;  %v21378_v19 = vpop.f32.mrf.mxu0 }
 0xfdb   : > { %v21408_v23 = vpop.f32.mrf.mxu1  ;;  %v26977_v48 = vadd.f32 %v11714_v15, %v26230_v47  ;;  %v10711_v15 = vadd.f32 %v20307_v21, %v26904_v0  ;;  %v20313_v21 = vld [vmem:[#allocation34 + $0x9] ss:$0 sm:$0xff] }
 0xfdc   : > { %v11475_v9 = vpop.f32.mrf.mxu0  ;;  %v26980_v44 = vadd.f32 %v11719_v27, %v26230_v47 }
 0xfdd   : > { %v11705_v33 = vpop.f32.mrf.mxu1  ;;  %v11750_v45 = vsel %vm6028_vm5, %v26977_v48, -inf  ;;  %v11867_v23 = vpack.c.bf16 %v10711_v15, %v10711_v15 }
 0xfde   : > { %v11765_v28 = vsel %vm6028_vm5, %v26980_v44, -inf  ;;  %11751 = vmax.xlane.f32.xlu0 %v11750_v45  ;;  %v21379_v50 = vpop.f32.mrf.mxu0  ;;  %v20309_v45 = vld [vmem:[#allocation34 + $0x5] ss:$0 sm:$0xff] }
 0xfdf   : > { %11766 = vmax.xlane.f32.xlu1 %v11765_v28  ;;  %v21409_v18 = vpop.f32.mrf.mxu1  ;;  %v10815_v0 = vadd.f32 %v20309_v45, %v26913_v10 }
 0xfe0   : > { %v11564_v35 = vpop.f32.mrf.mxu0 }
 0xfe1   : > { %v11716_v54 = vmul.f32 0.25, %v11564_v35 }
 0xfe2   : > { %v21390_v55 = vpop.f32.mrf.mxu0 }
 0xfe3   : > { %v26987_v38 = vadd.f32 %v11716_v54, %v26230_v47  ;;  %v11869_v54 = vpack.c.bf16 %v10815_v0, %v10815_v0  ;;  %v20306_v55 = vld [vmem:[#allocation34 + $0x2] ss:$0 sm:$0xff] }
 0xfe4   : > { %v11567_v3 = vpop.f32.mrf.mxu0 }
 0xfe5   : > { %v11756_v59 = vsel %vm6028_vm5, %v26987_v38, -inf }
 0xfe6   : > { %11757 = vmax.xlane.f32.xlu0 %v11756_v59  ;;  %v21391_v1 = vpop.f32.mrf.mxu0 }
 0xfe7   : > { %v20311_v1 = vld [vmem:[#allocation34 + $0x7] ss:$0 sm:$0xff] }
 0xfe8   : > { %v11656_v4 = vpop.f32.mrf.mxu0 }
 0xfe9   : > { %v11718_v63 = vmul.f32 0.25, %v11656_v4 }
 0xfea   : > { %v21402_v37 = vpop.f32.mrf.mxu0 }
 0xfeb   : > { %v26992_v29 = vadd.f32 %v11718_v63, %v26230_v47 }
 0xfec   : > { %v11659_v22 = vpop.f32.mrf.mxu0 }
 0xfed   : > { %v11762_v6 = vsel %vm6028_vm5, %v26992_v29, -inf  ;;  %v10659_v22 = vadd.f32 %v20306_v55, %v26920_v60 }
 0xfee   : > { %11763 = vmax.xlane.f32.xlu0 %v11762_v6  ;;  %v21403_v13 = vpop.f32.mrf.mxu0  ;;  %v12110_v6 = vsel %vm6176_vm3, %v11869_v54, 0 }
 0xfef   : > { %v10919_v13 = vadd.f32 %v20311_v1, %v26922_v17 }
0x1040   : > { %v11737_v16 = vpop.xlane.xlu1 %11736 }
0x1041   : > { %v11769_v11 = vsub.f32 %v26937_v51, %v11737_v16 }
0x1043   : > { %v11782_v46 = vmul.f32 1.442695, %v11769_v11 }
0x1045   : > { %23445 = vpow2.f32 %v11782_v46  ;;  %v11871_v46 = vpack.c.bf16 %v10919_v13, %v10919_v13 }
0x1048   : > { %v11743_v43 = vpop.xlane.xlu1 %11742 }
0x1049   : > { %v11771_v61 = vsub.f32 %v26942_v41, %v11743_v43  ;;  %v12018_v41 = vsel %vm6176_vm3, %v11867_v23, 0  ;;  %v20308_v43 = vld [vmem:[#allocation34 + $0x4] ss:$0 sm:$0xff] }
0x104b   : > { %v11786_v30 = vmul.f32 1.442695, %v11771_v61 }
0x104d   : > { %23447 = vpow2.f32 %v11786_v30 }
0x104f   : > { %v11734_v25 = vpop.xlane.xlu0 %11733 }
0x1050   : > { %v11749_v27 = vpop.xlane.xlu1 %11748  ;;  %v11768_v19 = vsub.f32 %v26947_v31, %v11734_v25 }
0x1051   : > { %v11773_v9 = vsub.f32 %v26950_v20, %v11749_v27 }
0x1052   : > { %v23446_v33 = vpop.eup %23445  ;;  %v11780_v51 = vmul.f32 1.442695, %v11768_v19 }
0x1053   : > { %v11853_v28 = vpack.c.bf16 %v23446_v33, %v23446_v33  ;;  %v11790_v50 = vmul.f32 1.442695, %v11773_v9  ;;  %v11807_v18 = vsel %vm6028_vm5, %v23446_v33, 0.0  ;;  %v11023_v33 = vadd.f32 %v20313_v21, %v26926_v34  ;;  %v20314_v21 = vld [vmem:[#allocation34 + $0xa] ss:$0 sm:$0xff] }
0x1054   : > { %23449 = vpow2.f32 %v11780_v51  ;;  %11808 = vadd.xlane.f32.xlu1 %v11807_v18  ;;  %v20310_v18 = vld [vmem:[#allocation34 + $0x6] ss:$0 sm:$0xff] }
0x1055   : > { %23451 = vpow2.f32 %v11790_v50  ;;  %21419 = vmatmul.mubr.msk.bf16.vlgmr.msra.gmra.mxu1 %vm6028_vm5, %v11853_v28  ;;  %v11873_v50 = vpack.c.bf16 %v11023_v33, %v11023_v33  ;;  %v10867_v1 = vadd.f32 %v20310_v18, %v26928_v42  ;;  %v22852_v18 = vld [vmem:[#allocation36 + $0x34] ss:$8 sps:$4 sm:$0xff]  }
0x1056   : > { %21429 = vmatpush3.bf16.msra.mxu1 %v12018_v41  ;;  %21430 = vmatprep.mubr.msk.bf16.mxu1 %vm25057_vm1, %v25056_v7 }
0x1057   : > { %v11740_v31 = vpop.xlane.xlu0 %11739  ;;  %21440 = vmatprep.subr.bf16.mxu1 %v25056_v7  ;;  %v11870_v42 = vpack.c.bf16 %v10867_v1, %v10867_v1 }
0x1058   : > { %v11755_v20 = vpop.xlane.xlu1 %11754  ;;  %v11770_v35 = vsub.f32 %v26957_v62, %v11740_v31  ;;  %v20315_v31 = vld [vmem:[#allocation34 + $0xb] ss:$0 sm:$0xff] }
0x1059   : > { %v11775_v3 = vsub.f32 %v26960_v40, %v11755_v20  ;;  %v11866_v40 = vpack.c.bf16 %v10659_v22, %v10659_v22  ;;  %v20312_v22 = vld [vmem:[#allocation34 + $0x8] ss:$0 sm:$0xff] }
0x105a   : > { %v23448_v59 = vpop.eup %23447  ;;  %v11784_v10 = vmul.f32 1.442695, %v11770_v35 }
0x105b   : > { %v11855_v4 = vpack.c.bf16 %v23448_v59, %v23448_v59  ;;  %v11794_v63 = vmul.f32 1.442695, %v11775_v3  ;;  %v11813_v37 = vsel %vm6028_vm5, %v23448_v59, 0.0  ;;  %v11972_v9 = vsel %vm6176_vm3, %v11866_v40, 0 }
0x105c   : > { %23453 = vpow2.f32 %v11784_v10  ;;  %11814 = vadd.xlane.f32.xlu1 %v11813_v37  ;;  %v11127_v10 = vadd.f32 %v20315_v31, %v26930_v32  ;;  %v22861_v31 = vld [vmem:[#allocation36 + $0x24] ss:$8 sps:$4 sm:$0xff]  }
0x105d   : > { %23455 = vpow2.f32 %v11794_v63  ;;  %21431 = vmatmul.mubr.msk.bf16.vlgmr.msra.gmra.mxu1 %vm6028_vm5, %v11855_v4 }
0x105e   : > { %21441 = vmatpush3.bf16.msra.mxu1 %v12110_v6  ;;  %21442 = vmatprep.mubr.msk.bf16.mxu1 %vm25057_vm1, %v25056_v7  ;;  %v11875_v37 = vpack.c.bf16 %v11127_v10, %v11127_v10 }
0x105f   : > { %v11746_v62 = vpop.xlane.xlu0 %11745  ;;  %21452 = vmatprep.subr.bf16.mxu1 %v25056_v7 }
0x1060   : > { %v11761_v16 = vpop.xlane.xlu1 %11760  ;;  %v11772_v60 = vsub.f32 %v26967_v53, %v11746_v62  ;;  %v10763_v53 = vadd.f32 %v20308_v43, %v26924_v5 }
0x1061   : > { %v23450_v11 = vpop.eup %23449  ;;  %v11777_v61 = vsub.f32 %v26970_v2, %v11761_v16  ;;  %v12202_v2 = vsel %vm6176_vm3, %v11871_v46, 0  ;;  %v10971_v46 = vadd.f32 %v20312_v22, %v26932_v24 }
0x1062   : > { %v23452_v17 = vpop.eup %23451  ;;  %v11852_v30 = vpack.c.bf16 %v23450_v11, %v23450_v11  ;;  %v11788_v15 = vmul.f32 1.442695, %v11772_v60  ;;  %v11804_v25 = vsel %vm6028_vm5, %v23450_v11, 0.0  ;;  %v11868_v5 = vpack.c.bf16 %v10763_v53, %v10763_v53 }
0x1063   : > { %v11857_v27 = vpack.c.bf16 %v23452_v17, %v23452_v17  ;;  %v11798_v19 = vmul.f32 1.442695, %v11777_v61  ;;  %v11819_v23 = vsel %vm6028_vm5, %v23452_v17, 0.0  ;;  %11805 = vadd.xlane.f32.xlu0 %v11804_v25  ;;  %v12156_v11 = vsel %vm6176_vm3, %v11870_v42, 0 }
0x1064   : > { %23457 = vpow2.f32 %v11788_v15  ;;  %11820 = vadd.xlane.f32.xlu1 %v11819_v23  ;;  %21413 = vmatmul.mubr.msk.bf16.vlgmr.msra.gmra.mxu0 %vm6028_vm5, %v11852_v30  ;;  %v11872_v24 = vpack.c.bf16 %v10971_v46, %v10971_v46  ;;  %v11075_v53 = vadd.f32 %v20314_v21, %v26934_v36 }
0x1065   : > { %23459 = vpow2.f32 %v11798_v19  ;;  %21423 = vmatpush3.bf16.msra.mxu0 %v11972_v9  ;;  %21443 = vmatmul.mubr.msk.bf16.vlgmr.msra.gmra.mxu1 %vm6028_vm5, %v11857_v27 }
0x1066   : > { %21453 = vmatpush3.bf16.msra.mxu1 %v12202_v2  ;;  %21454 = vmatprep.mubr.msk.bf16.mxu1 %vm25057_vm1, %v25056_v7  ;;  %v12248_v9 = vsel %vm6176_vm3, %v11872_v24, 0 }
0x1067   : > { %v11752_v45 = vpop.xlane.xlu0 %11751  ;;  %21464 = vmatprep.subr.bf16.mxu1 %v25056_v7  ;;  %21424 = vmatprep.mubr.msk.bf16.mxu0 %vm25057_vm1, %v25056_v7 }
0x1068   : > { %v11767_v51 = vpop.xlane.xlu1 %11766  ;;  %v11774_v28 = vsub.f32 %v26977_v48, %v11752_v45  ;;  %21434 = vmatprep.subr.bf16.mxu0 %v25056_v7  ;;  %v12064_v48 = vsel %vm6176_vm3, %v11868_v5, 0 }
0x1069   : > { %v23454_v34 = vpop.eup %23453  ;;  %v11779_v41 = vsub.f32 %v26980_v44, %v11767_v51  ;;  %v12294_v44 = vsel %vm6176_vm3, %v11873_v50, 0  ;;  %v22847_v50 = vld [vmem:[#allocation36 + $0x10] ss:$8 sps:$4 sm:$0xff]  }
0x106a   : > { %v23456_v0 = vpop.eup %23455  ;;  %v11854_v20 = vpack.c.bf16 %v23454_v34, %v23454_v34  ;;  %v11792_v35 = vmul.f32 1.442695, %v11774_v28  ;;  %v11810_v54 = vsel %vm6028_vm5, %v23454_v34, 0.0  ;;  %v22849_v34 = vld [vmem:[#allocation36 + $0x14] ss:$8 sps:$4 sm:$0xff]  }
0x106b   : > { %v11859_v55 = vpack.c.bf16 %v23456_v0, %v23456_v0  ;;  %v11802_v3 = vmul.f32 1.442695, %v11779_v41  ;;  %v11825_v59 = vsel %vm6028_vm5, %v23456_v0, 0.0  ;;  %11811 = vadd.xlane.f32.xlu0 %v11810_v54  ;;  %v22853_v41 = vld [vmem:[#allocation36] ss:$8 sps:$4 sm:$0xff]  }
0x106c   : > { %23461 = vpow2.f32 %v11792_v35  ;;  %11826 = vadd.xlane.f32.xlu1 %v11825_v59  ;;  %21425 = vmatmul.mubr.msk.bf16.vlgmr.msra.gmra.mxu0 %vm6028_vm5, %v11854_v20  ;;  %v22855_v0 = vld [vmem:[#allocation36 + $0x4] ss:$8 sps:$4 sm:$0xff]  }
0x106d   : > { %23463 = vpow2.f32 %v11802_v3  ;;  %21435 = vmatpush3.bf16.msra.mxu0 %v12064_v48  ;;  %21455 = vmatmul.mubr.msk.bf16.vlgmr.msra.gmra.mxu1 %vm6028_vm5, %v11859_v55 }
0x106e   : > { %21465 = vmatpush3.bf16.msra.mxu1 %v12294_v44  ;;  %21466 = vmatprep.mubr.msk.bf16.mxu1 %vm25057_vm1, %v25056_v7  ;;  %v22850_v44 = vld [vmem:[#allocation36 + $0x30] ss:$8 sps:$4 sm:$0xff]  }
0x106f   : > { %v11758_v4 = vpop.xlane.xlu0 %11757  ;;  %21476 = vmatprep.subr.bf16.mxu1 %v25056_v7  ;;  %21436 = vmatprep.mubr.msk.bf16.mxu0 %vm25057_vm1, %v25056_v7 }
0x1070   : > { %v11776_v63 = vsub.f32 %v26987_v38, %v11758_v4  ;;  %21446 = vmatprep.subr.bf16.mxu0 %v25056_v7  ;;  %v12386_v38 = vsel %vm6176_vm3, %v11875_v37, 0  ;;  %v22858_v4 = vld [vmem:[#allocation36 + $0x54] ss:$8 sps:$4 sm:$0xff]  }
0x1071   : > { %v23458_v32 = vpop.eup %23457 }
0x1072   : > { %v23460_v6 = vpop.eup %23459  ;;  %v11856_v13 = vpack.c.bf16 %v23458_v32, %v23458_v32  ;;  %v11796_v62 = vmul.f32 1.442695, %v11776_v63  ;;  %v11816_v40 = vsel %vm6028_vm5, %v23458_v32, 0.0 }
0x1073   : > { %v11861_v16 = vpack.c.bf16 %v23460_v6, %v23460_v6  ;;  %v11831_v60 = vsel %vm6028_vm5, %v23460_v6, 0.0  ;;  %11817 = vadd.xlane.f32.xlu0 %v11816_v40  ;;  %v22856_v40 = vld [vmem:[#allocation36 + $0x50] ss:$8 sps:$4 sm:$0xff]  }
0x1074   : > { %23465 = vpow2.f32 %v11796_v62  ;;  %11832 = vadd.xlane.f32.xlu1 %v11831_v60  ;;  %21437 = vmatmul.mubr.msk.bf16.vlgmr.msra.gmra.mxu0 %vm6028_vm5, %v11856_v13  ;;  %v22864_v60 = vld [vmem:[#allocation36 + $0x74] ss:$8 sps:$4 sm:$0xff]  }
0x1075   : > { %21447 = vmatpush3.bf16.msra.mxu0 %v12156_v11  ;;  %21467 = vmatmul.mubr.msk.bf16.vlgmr.msra.gmra.mxu1 %vm6028_vm5, %v11861_v16 }
0x1076   : > { %21477 = vmatpush3.bf16.msra.mxu1 %v12386_v38  ;;  %21478 = vmatprep.mubr.msk.bf16.mxu1 %vm25057_vm1, %v25056_v7 }
0x1077   : > { %v11764_v43 = vpop.xlane.xlu0 %11763  ;;  %21448 = vmatprep.mubr.msk.bf16.mxu0 %vm25057_vm1, %v25056_v7  ;;  %21458 = vmatprep.subr.bf16.mxu0 %v25056_v7 }
0x1078   : > { %v11778_v61 = vsub.f32 %v26992_v29, %v11764_v43  ;;  %v11874_v29 = vpack.c.bf16 %v11075_v53, %v11075_v53  ;;  %12533 = vmatprep.subr.bf16.mxu1 %v22849_v34 }
0x1079   : > { %v23462_v17 = vpop.eup %23461 }
0x107a   : > { %v23464_v30 = vpop.eup %23463  ;;  %v11858_v15 = vpack.c.bf16 %v23462_v17, %v23462_v17  ;;  %v11800_v25 = vmul.f32 1.442695, %v11778_v61  ;;  %v11822_v27 = vsel %vm6028_vm5, %v23462_v17, 0.0  ;;  %v12340_v36 = vsel %vm6176_vm3, %v11874_v29, 0 }
0x107b   : > { %v11863_v19 = vpack.c.bf16 %v23464_v30, %v23464_v30  ;;  %v11837_v23 = vsel %vm6028_vm5, %v23464_v30, 0.0  ;;  %11823 = vadd.xlane.f32.xlu0 %v11822_v27  ;;  %v22859_v27 = vld [vmem:[#allocation36 + $0x20] ss:$8 sps:$4 sm:$0xff]  }
0x107c   : > { %23467 = vpow2.f32 %v11800_v25  ;;  %11838 = vadd.xlane.f32.xlu1 %v11837_v23  ;;  %21449 = vmatmul.mubr.msk.bf16.vlgmr.msra.gmra.mxu0 %vm6028_vm5, %v11858_v15 }
0x107d   : > { %21459 = vmatpush3.bf16.msra.mxu0 %v12248_v9  ;;  %21479 = vmatmul.mubr.msk.bf16.vlgmr.msra.gmra.mxu1 %vm6028_vm5, %v11863_v19  ;;  %v22862_v9 = vld [vmem:[#allocation36 + $0x70] ss:$8 sps:$4 sm:$0xff]  }
0x107e   : > { %21460 = vmatprep.mubr.msk.bf16.mxu0 %vm25057_vm1, %v25056_v7  ;;  %21470 = vmatprep.subr.bf16.mxu0 %v25056_v7 }
0x107f   : > { %12551 = vmatprep.mubr.bf16.mxu1 %v25059_v8  ;;  %12534 = vmatpush1.bf16.msra.mxu1 %v22847_v50 }
0x1080   : > { %12641 = vmatprep.subr.bf16.mxu1 %v22852_v18 }
0x1081   : > { %v23466_v2 = vpop.eup %23465 }
0x1082   : > { %v11860_v33 = vpack.c.bf16 %v23466_v2, %v23466_v2  ;;  %v11828_v45 = vsel %vm6028_vm5, %v23466_v2, 0.0  ;;  %v22867_v2 = vld [vmem:[#allocation36 + $0x44] ss:$8 sps:$4 sm:$0xff]  }
0x1083   : > { %11829 = vadd.xlane.f32.xlu0 %v11828_v45  ;;  %v22870_v45 = vld [vmem:[#allocation36 + $0x94] ss:$8 sps:$4 sm:$0xff]  }
0x1084   : > { %21461 = vmatmul.mubr.msk.bf16.vlgmr.msra.gmra.mxu0 %vm6028_vm5, %v11860_v33 }
0x1085   : > { %21471 = vmatpush3.bf16.msra.mxu0 %v12340_v36  ;;  %21472 = vmatprep.mubr.msk.bf16.mxu0 %vm25057_vm1, %v25056_v7 }
0x1086   : > { %12479 = vmatprep.subr.bf16.mxu0 %v22855_v0 }
0x1089   : > { %v23468_v5 = vpop.eup %23467 }
0x108a   : > { %v11862_v51 = vpack.c.bf16 %v23468_v5, %v23468_v5  ;;  %v11834_v28 = vsel %vm6028_vm5, %v23468_v5, 0.0 }
0x108b   : > { %11835 = vadd.xlane.f32.xlu0 %v11834_v28 }
0x108c   : > { %21473 = vmatmul.mubr.msk.bf16.vlgmr.msra.gmra.mxu0 %vm6028_vm5, %v11862_v51 }
0x108d   : > { %12497 = vmatprep.mubr.bf16.mxu0 %v25059_v8  ;;  %12480 = vmatpush1.bf16.msra.mxu0 %v22853_v41 }
0x108e   : > { %12587 = vmatprep.subr.bf16.mxu0 %v22861_v31 }
0x10dd   : > { %v11809_v20 = vpop.xlane.xlu1 %11808 }
0x10de   : > { %23469 = vrcp.f32 %v11809_v20 }
0x10e5   : > { %v11815_v35 = vpop.xlane.xlu1 %11814 }
0x10e6   : > { %23471 = vrcp.f32 %v11815_v35  ;;  %v22865_v35 = vld [vmem:[#allocation36 + $0x40] ss:$8 sps:$4 sm:$0xff]  }
0x10eb   : > { %v23470_v55 = vpop.eup %23469 }
0x10ec   : > { %v11806_v54 = vpop.xlane.xlu0 %11805 }
0x10ed   : > { %v11821_v3 = vpop.xlane.xlu1 %11820  ;;  %23473 = vrcp.f32 %v11806_v54 }
0x10ee   : > { %23475 = vrcp.f32 %v11821_v3  ;;  %v22868_v3 = vld [vmem:[#allocation36 + $0x90] ss:$8 sps:$4 sm:$0xff]  }
0x10f3   : > { %v23472_v37 = vpop.eup %23471 }
0x10f4   : > { %v11812_v32 = vpop.xlane.xlu0 %11811 }
0x10f5   : > { %v11827_v22 = vpop.xlane.xlu1 %11826  ;;  %23477 = vrcp.f32 %v11812_v32 }
0x10f6   : > { %23479 = vrcp.f32 %v11827_v22 }
0x10fa   : > { %v23474_v38 = vpop.eup %23473 }
0x10fb   : > { %v23476_v61 = vpop.eup %23475 }
0x10fc   : > { %v11818_v43 = vpop.xlane.xlu0 %11817 }
0x10fd   : > { %v11833_v17 = vpop.xlane.xlu1 %11832  ;;  %23481 = vrcp.f32 %v11818_v43 }
0x10fe   : > { %23483 = vrcp.f32 %v11833_v17 }
0x1102   : > { %v23478_v51 = vpop.eup %23477 }
0x1103   : > { %v23480_v50 = vpop.eup %23479 }
0x1104   : > { %v11824_v28 = vpop.xlane.xlu0 %11823 }
0x1105   : > { %v11839_v18 = vpop.xlane.xlu1 %11838  ;;  %23485 = vrcp.f32 %v11824_v28 }
0x1106   : > { %23487 = vrcp.f32 %v11839_v18 }
0x110c   : > { %v11830_v32 = vpop.xlane.xlu0 %11829 }
0x110d   : > { %23489 = vrcp.f32 %v11830_v32 }
0x1115   : > { %v11962_v59 = vpop.f32.mrf.mxu1 }
0x1116   : > { %v12429_v48 = vmul.f32 %v23470_v55, %v11962_v59 }
0x1117   : > { %v21420_v1 = vpop.f32.mrf.mxu1 }
0x1118   : > { %v12441_v10 = vpack.c.bf16 %v12429_v48, %v12429_v48  ;;  %v22873_v1 = vld [vmem:[#allocation36 + $0x64] ss:$8 sps:$4 sm:$0xff]  }
0x1119   : > { %v11965_v42 = vpop.f32.mrf.mxu1 }
0x111a   : > { %20393 = vmatmul.mubr.msk.bf16.vlgmr.msra.gmra.mxu1 %vm5451_vm2, %v12441_v10  ;;  %v22876_v10 = vld [vmem:[#allocation36 + $0xb4] ss:$8 sps:$4 sm:$0xff]  }
0x111b   : > { %v21421_v63 = vpop.f32.mrf.mxu1  ;;  %12642 = vmatpush1.bf16.msra.mxu1 %v22850_v44  ;;  %12659 = vmatprep.mubr.bf16.mxu1 %v25059_v8 }
0x111c   : > { %12749 = vmatprep.subr.bf16.mxu1 %v22858_v4  ;;  %v23482_v63 = vpop.eup %23481 }
0x111d   : > { %v12054_v6 = vpop.f32.mrf.mxu1  ;;  %v23484_v22 = vpop.eup %23483 }
0x111e   : > { %v12431_v13 = vmul.f32 %v23472_v37, %v12054_v6 }
0x111f   : > { %v21432_v62 = vpop.f32.mrf.mxu1 }
0x1120   : > { %v12443_v16 = vpack.c.bf16 %v12431_v13, %v12431_v13 }
0x1121   : > { %v12057_v11 = vpop.f32.mrf.mxu1 }
0x1122   : > { %20399 = vmatmul.mubr.msk.bf16.vlgmr.msra.gmra.mxu1 %vm5451_vm2, %v12443_v16  ;;  %v22871_v16 = vld [vmem:[#allocation36 + $0x60] ss:$8 sps:$4 sm:$0xff]  }
0x1123   : > { %v21433_v46 = vpop.f32.mrf.mxu1  ;;  %12750 = vmatpush1.bf16.msra.mxu1 %v22856_v40  ;;  %12767 = vmatprep.mubr.bf16.mxu1 %v25059_v8 }
0x1124   : > { %v11916_v24 = vpop.f32.mrf.mxu0  ;;  %12857 = vmatprep.subr.bf16.mxu1 %v22864_v60  ;;  %v22874_v46 = vld [vmem:[#allocation36 + $0xb0] ss:$8 sps:$4 sm:$0xff]  }
0x1125   : > { %v12428_v21 = vmul.f32 %v23474_v38, %v11916_v24  ;;  %v12146_v30 = vpop.f32.mrf.mxu1  ;;  %v22879_v24 = vld [vmem:[#allocation36 + $0x84] ss:$8 sps:$4 sm:$0xff]  }
0x1126   : > { %v12433_v15 = vmul.f32 %v23476_v61, %v12146_v30  ;;  %v21414_v25 = vpop.f32.mrf.mxu0  ;;  %v23486_v30 = vpop.eup %23485 }
0x1127   : > { %v12440_v19 = vpack.c.bf16 %v12428_v21, %v12428_v21  ;;  %v21444_v23 = vpop.f32.mrf.mxu1 }
0x1128   : > { %v12445_v53 = vpack.c.bf16 %v12433_v15, %v12433_v15  ;;  %v11919_v29 = vpop.f32.mrf.mxu0  ;;  %v11836_v15 = vpop.xlane.xlu0 %11835 }
0x1129   : > { %v12149_v33 = vpop.f32.mrf.mxu1  ;;  %20390 = vmatmul.mubr.msk.bf16.vlgmr.msra.gmra.mxu0 %vm5451_vm2, %v12440_v19  ;;  %v22877_v29 = vld [vmem:[#allocation36 + $0x80] ss:$8 sps:$4 sm:$0xff]   ;;  %23491 = vrcp.f32 %v11836_v15 }
0x112a   : > { %20405 = vmatmul.mubr.msk.bf16.vlgmr.msra.gmra.mxu1 %vm5451_vm2, %v12445_v53  ;;  %v21415_v36 = vpop.f32.mrf.mxu0  ;;  %12588 = vmatpush1.bf16.msra.mxu0 %v22859_v27  ;;  %v23488_v27 = vpop.eup %23487 }
0x112b   : > { %v21445_v5 = vpop.f32.mrf.mxu1  ;;  %12858 = vmatpush1.bf16.msra.mxu1 %v22862_v9  ;;  %12605 = vmatprep.mubr.bf16.mxu0 %v25059_v8 }
0x112c   : > { %v12008_v34 = vpop.f32.mrf.mxu0  ;;  %12875 = vmatprep.mubr.bf16.mxu1 %v25059_v8  ;;  %12695 = vmatprep.subr.bf16.mxu0 %v22867_v2 }
0x112d   : > { %v12430_v41 = vmul.f32 %v23478_v51, %v12008_v34  ;;  %v12238_v0 = vpop.f32.mrf.mxu1  ;;  %12965 = vmatprep.subr.bf16.mxu1 %v22870_v45  ;;  %v22882_v45 = vld [vmem:[#allocation36 + $0xa4] ss:$8 sps:$4 sm:$0xff]  }
0x112e   : > { %v12435_v31 = vmul.f32 %v23480_v50, %v12238_v0  ;;  %v21426_v20 = vpop.f32.mrf.mxu0  ;;  %v23490_v50 = vpop.eup %23489 }
0x112f   : > { %v12442_v54 = vpack.c.bf16 %v12430_v41, %v12430_v41  ;;  %v21456_v55 = vpop.f32.mrf.mxu1 }
0x1130   : > { %v12447_v59 = vpack.c.bf16 %v12435_v31, %v12435_v31  ;;  %v12011_v48 = vpop.f32.mrf.mxu0  ;;  %v22880_v31 = vld [vmem:[#allocation36 + $0xa0] ss:$8 sps:$4 sm:$0xff]  }
0x1131   : > { %v12241_v44 = vpop.f32.mrf.mxu1  ;;  %20396 = vmatmul.mubr.msk.bf16.vlgmr.msra.gmra.mxu0 %vm5451_vm2, %v12442_v54 }
0x1132   : > { %20411 = vmatmul.mubr.msk.bf16.vlgmr.msra.gmra.mxu1 %vm5451_vm2, %v12447_v59  ;;  %v21427_v4 = vpop.f32.mrf.mxu0  ;;  %12696 = vmatpush1.bf16.msra.mxu0 %v22865_v35 }
0x1133   : > { %v21457_v42 = vpop.f32.mrf.mxu1  ;;  %12966 = vmatpush1.bf16.msra.mxu1 %v22868_v3  ;;  %12713 = vmatprep.mubr.bf16.mxu0 %v25059_v8 }
0x1134   : > { %v12100_v37 = vpop.f32.mrf.mxu0  ;;  %12983 = vmatprep.mubr.bf16.mxu1 %v25059_v8  ;;  %12803 = vmatprep.subr.bf16.mxu0 %v22873_v1 }
0x1135   : > { %v12432_v6 = vmul.f32 %v23482_v63, %v12100_v37  ;;  %v12330_v13 = vpop.f32.mrf.mxu1  ;;  %13073 = vmatprep.subr.bf16.mxu1 %v22876_v10 }
0x1136   : > { %v12437_v62 = vmul.f32 %v23484_v22, %v12330_v13  ;;  %v21438_v40 = vpop.f32.mrf.mxu0  ;;  %v23492_v55 = vpop.eup %23491 }
0x1137   : > { %v12444_v60 = vpack.c.bf16 %v12432_v6, %v12432_v6  ;;  %v21468_v11 = vpop.f32.mrf.mxu1 }
0x1138   : > { %v12449_v38 = vpack.c.bf16 %v12437_v62, %v12437_v62  ;;  %v12103_v43 = vpop.f32.mrf.mxu0 }
0x1139   : > { %v12333_v61 = vpop.f32.mrf.mxu1  ;;  %20402 = vmatmul.mubr.msk.bf16.vlgmr.msra.gmra.mxu0 %vm5451_vm2, %v12444_v60 }
0x113a   : > { %20417 = vmatmul.mubr.msk.bf16.vlgmr.msra.gmra.mxu1 %vm5451_vm2, %v12449_v38  ;;  %v21439_v17 = vpop.f32.mrf.mxu0  ;;  %12804 = vmatpush1.bf16.msra.mxu0 %v22871_v16 }
0x113b   : > { %v21469_v21 = vpop.f32.mrf.mxu1  ;;  %13074 = vmatpush1.bf16.msra.mxu1 %v22874_v46  ;;  %12821 = vmatprep.mubr.bf16.mxu0 %v25059_v8 }
0x113c   : > { %v12192_v25 = vpop.f32.mrf.mxu0  ;;  %13091 = vmatprep.mubr.bf16.mxu1 %v25059_v8  ;;  %12911 = vmatprep.subr.bf16.mxu0 %v22879_v24 }
0x113d   : > { %v12434_v19 = vmul.f32 %v23486_v30, %v12192_v25  ;;  %v12422_v23 = vpop.f32.mrf.mxu1 }
0x113e   : > { %v12439_v9 = vmul.f32 %v23488_v27, %v12422_v23  ;;  %v21450_v53 = vpop.f32.mrf.mxu0 }
0x113f   : > { %v12446_v2 = vpack.c.bf16 %v12434_v19, %v12434_v19  ;;  %v21480_v33 = vpop.f32.mrf.mxu1 }
0x1140   : > { %v12451_v36 = vpack.c.bf16 %v12439_v9, %v12439_v9  ;;  %v12195_v5 = vpop.f32.mrf.mxu0 }
0x1141   : > { %v12425_v51 = vpop.f32.mrf.mxu1  ;;  %20408 = vmatmul.mubr.msk.bf16.vlgmr.msra.gmra.mxu0 %vm5451_vm2, %v12446_v2 }
0x1142   : > { %20423 = vmatmul.mubr.msk.bf16.vlgmr.msra.gmra.mxu1 %vm5451_vm2, %v12451_v36  ;;  %v21451_v28 = vpop.f32.mrf.mxu0  ;;  %12912 = vmatpush1.bf16.msra.mxu0 %v22877_v29 }
0x1143   : > { %v21481_v34 = vpop.f32.mrf.mxu1  ;;  %12929 = vmatprep.mubr.bf16.mxu0 %v25059_v8  ;;  %13019 = vmatprep.subr.bf16.mxu0 %v22882_v45 }
0x1144   : > { %v12284_v18 = vpop.f32.mrf.mxu0 }
0x1145   : > { %v12436_v41 = vmul.f32 %v23490_v50, %v12284_v18 }
0x1146   : > { %v21462_v0 = vpop.f32.mrf.mxu0 }
0x1147   : > { %v12448_v20 = vpack.c.bf16 %v12436_v41, %v12436_v41 }
0x1148   : > { %v12287_v35 = vpop.f32.mrf.mxu0 }
0x1149   : > { %20414 = vmatmul.mubr.msk.bf16.vlgmr.msra.gmra.mxu0 %vm5451_vm2, %v12448_v20 }
0x114a   : > { %v21463_v54 = vpop.f32.mrf.mxu0  ;;  %13020 = vmatpush1.bf16.msra.mxu0 %v22880_v31  ;;  %13037 = vmatprep.mubr.bf16.mxu0 %v25059_v8 }
0x114c   : > { %v12376_v3 = vpop.f32.mrf.mxu0 }
0x114d   : > { %v12438_v59 = vmul.f32 %v23492_v55, %v12376_v3 }
0x114e   : > { %v21474_v48 = vpop.f32.mrf.mxu0 }
0x114f   : > { %v12450_v1 = vpack.c.bf16 %v12438_v59, %v12438_v59 }
0x1150   : > { %v12379_v44 = vpop.f32.mrf.mxu0 }
0x1151   : > { %20420 = vmatmul.mubr.msk.bf16.vlgmr.msra.gmra.mxu0 %vm5451_vm2, %v12450_v1 }
0x1152   : > { %v21475_v10 = vpop.f32.mrf.mxu0 }
0x11da   : > { %v12553_v4 = vpop.f32.mrf.mxu1 }
0x11dc   : > { %v12555_v42 = vpop.f32.mrf.mxu1 }
0x11dd   : > { %v13112_v53 = vsel %vm2937_vm0, %v12555_v42, 0.0 }
0x11de   : > { %v12557_v63 = vpop.f32.mrf.mxu1 }
0x11e0   : > { %v12558_v32 = vpop.f32.mrf.mxu1 }
0x11e2   : > { %v12661_v37 = vpop.f32.mrf.mxu1 }
0x11e4   : > { %v12663_v22 = vpop.f32.mrf.mxu1 }
0x11e5   : > { %v13116_v41 = vsel %vm2937_vm0, %v12663_v22, 0.0 }
0x11e6   : > { %v12665_v6 = vpop.f32.mrf.mxu1 }
0x11e8   : > { %v12666_v13 = vpop.f32.mrf.mxu1 }
0x11e9   : > { %v12499_v62 = vpop.f32.mrf.mxu0 }
0x11ea   : > { %v12769_v40 = vpop.f32.mrf.mxu1  ;;  %v13100_v27 = vadd.f32 %v12553_v4, %v12499_v62 }
0x11eb   : > { %v12501_v16 = vpop.f32.mrf.mxu0 }
0x11ec   : > { %v12771_v60 = vpop.f32.mrf.mxu1  ;;  %v13111_v19 = vsel %vm2937_vm0, %v12501_v16, 0.0 }
0x11ed   : > { %v12503_v11 = vpop.f32.mrf.mxu0  ;;  %v13113_v45 = vadd.f32 %v13112_v53, %v13111_v19  ;;  %v13120_v10 = vsel %vm2937_vm0, %v12771_v60, 0.0  ;;  %v8822_v53 = vld [vmem:[#allocation37] sm:$0x3] }
0x11ee   : > { %v12773_v46 = vpop.f32.mrf.mxu1 }
0x11ef   : > { %v12504_v38 = vpop.f32.mrf.mxu0 }
0x11f0   : > { %v12774_v43 = vpop.f32.mrf.mxu1 }
0x11f1   : > { %v12607_v24 = vpop.f32.mrf.mxu0 }
0x11f2   : > { %v12877_v61 = vpop.f32.mrf.mxu1  ;;  %v13101_v29 = vadd.f32 %v13100_v27, %v12607_v24 }
0x11f3   : > { %v12609_v17 = vpop.f32.mrf.mxu0 }
0x11f4   : > { %v12879_v21 = vpop.f32.mrf.mxu1  ;;  %v13114_v2 = vsel %vm2937_vm0, %v12609_v17, 0.0  ;;  %v13102_v34 = vadd.f32 %v13101_v29, %v12661_v37 }
0x11f5   : > { %v12611_v30 = vpop.f32.mrf.mxu0  ;;  %v13115_v51 = vadd.f32 %v13114_v2, %v13113_v45  ;;  %v13124_v11 = vsel %vm2937_vm0, %v12879_v21, 0.0  ;;  %v13144_v45 = vrot.slane %v8822_v53, %v25950_v58 }
0x11f6   : > { %v12881_v15 = vpop.f32.mrf.mxu1 }
0x11f7   : > { %v12612_v25 = vpop.f32.mrf.mxu0  ;;  %v13117_v35 = vadd.f32 %v13116_v41, %v13115_v51  ;;  %v22883_v41 = vld [vmem:[%s27973_s5 + $0x150] ss:$24 sps:$4 sm:$0xff]  }
0x11f8   : > { %v12882_v23 = vpop.f32.mrf.mxu1 }
0x11f9   : > { %v12715_v9 = vpop.f32.mrf.mxu0 }
0x11fa   : > { %v12985_v33 = vpop.f32.mrf.mxu1  ;;  %v13103_v0 = vadd.f32 %v13102_v34, %v12715_v9 }
0x11fb   : > { %v12717_v36 = vpop.f32.mrf.mxu0 }
0x11fc   : > { %v12987_v5 = vpop.f32.mrf.mxu1  ;;  %v13118_v31 = vsel %vm2937_vm0, %v12717_v36, 0.0  ;;  %v13104_v48 = vadd.f32 %v13103_v0, %v12769_v40  ;;  %v22886_v0 = vld [vmem:[%s27973_s5 + $0x158] ss:$24 sps:$4 sm:$0xff]  }
0x11fd   : > { %v12719_v28 = vpop.f32.mrf.mxu0  ;;  %v13119_v3 = vadd.f32 %v13118_v31, %v13117_v35  ;;  %v13128_v15 = vsel %vm2937_vm0, %v12987_v5, 0.0  ;;  %v13140_v5 = vrot.slane %v8822_v53, %v25947_v57  ;;  %v22888_v31 = vld [vmem:[%s27973_s5 + $0x15c] ss:$24 sps:$4 sm:$0xff]   ;;  %v22889_v35 = vld [vmem:[%s27973_s5 + $0x120] ss:$24 sps:$4 sm:$0xff]  }
0x11fe   : > { %v12989_v50 = vpop.f32.mrf.mxu1  ;;  %13630 = vmatprep.subr.bf16.mxu1 %v22888_v31  ;;  %v22936_v53 = vld [vmem:[%s27973_s5 + $0x21c] ss:$24 sps:$4 sm:$0xff]   ;;  %v22952_v31 = vld [vmem:[%s27973_s5 + $0x188] ss:$24 sps:$4 sm:$0xff]  }
0x11ff   : > { %v12720_v18 = vpop.f32.mrf.mxu0  ;;  %v13121_v32 = vadd.f32 %v13120_v10, %v13119_v3  ;;  %13631 = vmatpush1.bf16.msra.mxu1 %v22886_v0  ;;  %v22900_v3 = vld [vmem:[%s27973_s5 + $0xfc] ss:$24 sps:$4 sm:$0xff]   ;;  %v22901_v10 = vld [vmem:[%s27973_s5 + $0xc0] ss:$24 sps:$4 sm:$0xff]  }
0x1200   : > { %v12990_v20 = vpop.f32.mrf.mxu1  ;;  %v22949_v0 = vld [vmem:[%s27973_s5 + $0x180] ss:$24 sps:$4 sm:$0xff]  }
0x1201   : > { %v12823_v54 = vpop.f32.mrf.mxu0  ;;  %v22891_v20 = vld [vmem:[%s27973_s5 + $0x124] ss:$24 sps:$4 sm:$0xff]  }
0x1202   : > { %v13093_v55 = vpop.f32.mrf.mxu1  ;;  %v13105_v4 = vadd.f32 %v13104_v48, %v12823_v54  ;;  %v22892_v54 = vld [vmem:[%s27973_s5 + $0x128] ss:$24 sps:$4 sm:$0xff]   ;;  %v22898_v48 = vld [vmem:[%s27973_s5 + $0xf8] ss:$24 sps:$4 sm:$0xff]  }
0x1203   : > { %v12825_v59 = vpop.f32.mrf.mxu0 }
0x1204   : > { %v13095_v1 = vpop.f32.mrf.mxu1  ;;  %v13122_v42 = vsel %vm2937_vm0, %v12825_v59, 0.0  ;;  %v13106_v62 = vadd.f32 %v13105_v4, %v12877_v61  ;;  %v22895_v59 = vld [vmem:[%s27973_s5 + $0xf0] ss:$24 sps:$4 sm:$0xff]  }
0x1205   : > { %v12827_v44 = vpop.f32.mrf.mxu0  ;;  %v13123_v6 = vadd.f32 %v13122_v42, %v13121_v32  ;;  %v13132_v29 = vsel %vm2937_vm0, %v13095_v1, 0.0  ;;  %v22903_v1 = vld [vmem:[%s27973_s5 + $0xc4] ss:$24 sps:$4 sm:$0xff]   ;;  %v22904_v4 = vld [vmem:[%s27973_s5 + $0xc8] ss:$24 sps:$4 sm:$0xff]  }
0x1206   : > { %v13097_v63 = vpop.f32.mrf.mxu1  ;;  %v22906_v44 = vld [vmem:[%s27973_s5 + $0xcc] ss:$24 sps:$4 sm:$0xff]   ;;  %v22907_v32 = vld [vmem:[%s27973_s5 + $0x90] ss:$24 sps:$4 sm:$0xff]  }
0x1207   : > { %v12828_v37 = vpop.f32.mrf.mxu0  ;;  %v13125_v38 = vadd.f32 %v13124_v11, %v13123_v6  ;;  %v22909_v42 = vld [vmem:[%s27973_s5 + $0x94] ss:$24 sps:$4 sm:$0xff]  }
0x1208   : > { %v13098_v22 = vpop.f32.mrf.mxu1  ;;  %v22912_v63 = vld [vmem:[%s27973_s5 + $0x9c] ss:$24 sps:$4 sm:$0xff]   ;;  %v22910_v37 = vld [vmem:[%s27973_s5 + $0x98] ss:$24 sps:$4 sm:$0xff]   ;;  %v22918_v6 = vld [vmem:[%s27973_s5 + $0x6c] ss:$24 sps:$4 sm:$0xff]  }
0x1209   : > { %v12931_v13 = vpop.f32.mrf.mxu0  ;;  %v22915_v22 = vld [vmem:[%s27973_s5 + $0x64] ss:$24 sps:$4 sm:$0xff]  }
0x120a   : > { %v13107_v46 = vadd.f32 %v13106_v62, %v12931_v13  ;;  %v22913_v13 = vld [vmem:[%s27973_s5 + $0x60] ss:$24 sps:$4 sm:$0xff]  }
0x120b   : > { %v12933_v16 = vpop.f32.mrf.mxu0  ;;  %v22916_v62 = vld [vmem:[%s27973_s5 + $0x68] ss:$24 sps:$4 sm:$0xff]  }
0x120c   : > { %v13126_v40 = vsel %vm2937_vm0, %v12933_v16, 0.0  ;;  %v13108_v17 = vadd.f32 %v13107_v46, %v12985_v33 }
0x120d   : > { %v12935_v43 = vpop.f32.mrf.mxu0  ;;  %v13127_v24 = vadd.f32 %v13126_v40, %v13125_v38 }
0x120f   : > { %v12936_v60 = vpop.f32.mrf.mxu0  ;;  %v13129_v19 = vadd.f32 %v13128_v15, %v13127_v24  ;;  %v22924_v15 = vld [vmem:[%s27973_s5 + $0x3c] ss:$24 sps:$4 sm:$0xff]  }
0x1211   : > { %v13039_v30 = vpop.f32.mrf.mxu0 }
0x1212   : > { %v13109_v25 = vadd.f32 %v13108_v17, %v13039_v30  ;;  %v22921_v17 = vld [vmem:[%s27973_s5 + $0x34] ss:$24 sps:$4 sm:$0xff]   ;;  %v22919_v30 = vld [vmem:[%s27973_s5 + $0x30] ss:$24 sps:$4 sm:$0xff]  }
0x1213   : > { %v13041_v27 = vpop.f32.mrf.mxu0 }
0x1214   : > { %v13110_v23 = vadd.f32 %v13109_v25, %v13093_v55  ;;  %v13130_v61 = vsel %vm2937_vm0, %v13041_v27, 0.0  ;;  %v22897_v55 = vld [vmem:[%s27973_s5 + $0xf4] ss:$24 sps:$4 sm:$0xff]   ;;  %v22922_v25 = vld [vmem:[%s27973_s5 + $0x38] ss:$24 sps:$4 sm:$0xff]  }
0x1215   : > { %v13131_v9 = vadd.f32 %v13130_v61, %v13129_v19  ;;  %v13043_v21 = vpop.f32.mrf.mxu0  ;;  %v22927_v27 = vld [vmem:[%s27973_s5 + $0x4] ss:$24 sps:$4 sm:$0xff]   ;;  %v22925_v19 = vld [vmem:[%s27973_s5] ss:$24 sps:$4 sm:$0xff]  }
0x1216   : > { %v13134_v36 = vadd.f32 %v13110_v23, %v26653_v14  ;;  %v22885_v14 = vld [vmem:[%s27973_s5 + $0x154] ss:$24 sps:$4 sm:$0xff]   ;;  %v22928_v61 = vld [vmem:[%s27973_s5 + $0x8] ss:$24 sps:$4 sm:$0xff]  }
0x1217   : > { %v13133_v2 = vadd.f32 %v13132_v29, %v13131_v9  ;;  %v13044_v33 = vpop.f32.mrf.mxu0  ;;  %13589 = vmatprep.subr.bf16.mxu0 %v22885_v14  ;;  %v22930_v23 = vld [vmem:[%s27973_s5 + $0xc] ss:$24 sps:$4 sm:$0xff]   ;;  %v22931_v21 = vld [vmem:[%s27973_s5 + $0x210] ss:$24 sps:$4 sm:$0xff]  }
0x1218   : > { %v27122_v34 = vadd.f32 %v13140_v5, %v13134_v36  ;;  %13590 = vmatpush1.bf16.msra.mxu0 %v22883_v41  ;;  %v22933_v9 = vld [vmem:[%s27973_s5 + $0x214] ss:$24 sps:$4 sm:$0xff]   ;;  %v22934_v29 = vld [vmem:[%s27973_s5 + $0x218] ss:$24 sps:$4 sm:$0xff]   ;;  %v22940_v36 = vld [vmem:[%s27973_s5 + $0x1e8] ss:$24 sps:$4 sm:$0xff]  }
0x1219   : > { %v13135_v51 = vadd.f32 %v13133_v2, %v26651_v12  ;;  %v22894_v12 = vld [vmem:[%s27973_s5 + $0x12c] ss:$24 sps:$4 sm:$0xff]   ;;  %13591 = vmatprep.subr.bf16.mxu0 %v22891_v20  ;;  %v22937_v33 = vld [vmem:[%s27973_s5 + $0x1e0] ss:$24 sps:$4 sm:$0xff]   ;;  %v22943_v5 = vld [vmem:[%s27973_s5 + $0x1b0] ss:$24 sps:$4 sm:$0xff]  }
0x121a   : > { %13632 = vmatprep.subr.bf16.mxu1 %v22894_v12  ;;  %v22939_v2 = vld [vmem:[%s27973_s5 + $0x1e4] ss:$24 sps:$4 sm:$0xff]  }
0x121b   : > { %v27120_v28 = vadd.f32 %v13144_v45, %v13135_v51  ;;  %13633 = vmatpush1.bf16.msra.mxu1 %v22892_v54  ;;  %v22942_v45 = vld [vmem:[%s27973_s5 + $0x1ec] ss:$24 sps:$4 sm:$0xff]   ;;  %v22993_v12 = vld [vmem:[%s27974_s16 + $0x74] ss:$8 sps:$4 sm:$0xff]  }
0x121c   : > { %13592 = vmatpush1.bf16.msra.mxu0 %v22889_v35  ;;  %13634 = vmatprep.subr.bf16.mxu1 %v22900_v3  ;;  %v22945_v51 = vld [vmem:[%s27973_s5 + $0x1b4] ss:$24 sps:$4 sm:$0xff]   ;;  %v22951_v41 = vld [vmem:[%s27973_s5 + $0x184] ss:$24 sps:$4 sm:$0xff]  }
0x121d   : > { %v13149_v50 = vsel %vm2937_vm0, %v27120_v28, 0.0  ;;  %13593 = vmatprep.subr.bf16.mxu0 %v22897_v55  ;;  %v22954_v14 = vld [vmem:[%s27973_s5 + $0x18c] ss:$24 sps:$4 sm:$0xff]  }
0x121e   : > { %v13150_v18 = vadd.f32 %v13149_v50, %v27122_v34  ;;  %v22946_v50 = vld [vmem:[%s27973_s5 + $0x1b8] ss:$24 sps:$4 sm:$0xff]   ;;  %v22957_v20 = vld [vmem:[%s27973_s5 + $0x164] ss:$24 sps:$4 sm:$0xff]  }
0x121f   : > { %13635 = vmatpush1.bf16.msra.mxu1 %v22898_v48  ;;  %v8823_v3 = vld [vmem:[#allocation39] sm:$0x3] }
0x1220   : > { %13151 = vadd.xlane.f32.xlu0 %v13150_v18  ;;  %13594 = vmatpush1.bf16.msra.mxu0 %v22895_v59  ;;  %v22948_v18 = vld [vmem:[%s27973_s5 + $0x1bc] ss:$24 sps:$4 sm:$0xff]   ;;  %v8824_v59 = vld [vmem:[#allocation40] sm:$0x3]  ;;  %v13171_v48 = vrot.slane %v8823_v3, %v25947_v57 }
0x1221   : > { %13595 = vmatprep.subr.bf16.mxu0 %v22903_v1  ;;  %13636 = vmatprep.subr.bf16.mxu1 %v22906_v44  ;;  %v13175_v1 = vrot.slane %v8823_v3, %v25950_v58  ;;  %v22988_v3 = vld [vmem:[%s27973_s5 + $0x190] ss:$24 sps:$4 sm:$0xff]  }
0x1223   : > { %13637 = vmatpush1.bf16.msra.mxu1 %v22904_v4 }
0x1224   : > { %13596 = vmatpush1.bf16.msra.mxu0 %v22901_v10  ;;  %13638 = vmatprep.subr.bf16.mxu1 %v22912_v63  ;;  %v13188_v63 = vrot.slane %v8824_v59, %v25950_v58 }
0x1225   : > { %13597 = vmatprep.subr.bf16.mxu0 %v22909_v42  ;;  %v13184_v42 = vrot.slane %v8824_v59, %v25947_v57  ;;  %v22996_v59 = vld [vmem:[%s27974_s16 + $0x174] ss:$8 sps:$4 sm:$0xff]  }
0x1227   : > { %13639 = vmatpush1.bf16.msra.mxu1 %v22910_v37 }
0x1228   : > { %13598 = vmatpush1.bf16.msra.mxu0 %v22907_v32  ;;  %13640 = vmatprep.subr.bf16.mxu1 %v22918_v6 }
0x1229   : > { %13599 = vmatprep.subr.bf16.mxu0 %v22915_v22 }
0x122b   : > { %13641 = vmatpush1.bf16.msra.mxu1 %v22916_v62  ;;  %v22955_v62 = vld [vmem:[%s27973_s5 + $0x160] ss:$24 sps:$4 sm:$0xff]  }
0x122c   : > { %13600 = vmatpush1.bf16.msra.mxu0 %v22913_v13  ;;  %13642 = vmatprep.subr.bf16.mxu1 %v22924_v15  ;;  %v23003_v15 = vld [vmem:[%s27974_s16 + $0x50] ss:$8 sps:$4 sm:$0xff]  }
0x122d   : > { %13601 = vmatprep.subr.bf16.mxu0 %v22921_v17  ;;  %v22961_v17 = vld [vmem:[%s27973_s5 + $0x100] ss:$24 sps:$4 sm:$0xff]  }
0x122f   : > { %13643 = vmatpush1.bf16.msra.mxu1 %v22922_v25  ;;  %v23011_v25 = vld [vmem:[%s27974_s16 + $0x44] ss:$8 sps:$4 sm:$0xff]  }
0x1230   : > { %13602 = vmatpush1.bf16.msra.mxu0 %v22919_v30  ;;  %13644 = vmatprep.subr.bf16.mxu1 %v22930_v23  ;;  %v22966_v30 = vld [vmem:[%s27973_s5 + $0xd4] ss:$24 sps:$4 sm:$0xff]   ;;  %v23009_v23 = vld [vmem:[%s27974_s16 + $0x40] ss:$8 sps:$4 sm:$0xff]  }
0x1231   : > { %13603 = vmatprep.subr.bf16.mxu0 %v22927_v27  ;;  %v22964_v27 = vld [vmem:[%s27973_s5 + $0xd0] ss:$24 sps:$4 sm:$0xff]  }
0x1233   : > { %13645 = vmatpush1.bf16.msra.mxu1 %v22928_v61  ;;  %v23017_v61 = vld [vmem:[%s27974_s16 + $0x34] ss:$8 sps:$4 sm:$0xff]  }
0x1234   : > { %13604 = vmatpush1.bf16.msra.mxu0 %v22925_v19  ;;  %13654 = vmatprep.subr.bf16.mxu1 %v22936_v53  ;;  %v22969_v19 = vld [vmem:[%s27973_s5 + $0xa4] ss:$24 sps:$4 sm:$0xff]   ;;  %v23015_v53 = vld [vmem:[%s27974_s16 + $0x30] ss:$8 sps:$4 sm:$0xff]  }
0x1235   : > { %13613 = vmatprep.subr.bf16.mxu0 %v22933_v9  ;;  %v22967_v9 = vld [vmem:[%s27973_s5 + $0xa0] ss:$24 sps:$4 sm:$0xff]  }
0x1237   : > { %13655 = vmatpush2.bf16.msra.mxu1 %v22934_v29  ;;  %v23023_v29 = vld [vmem:[%s27974_s16 + $0x24] ss:$8 sps:$4 sm:$0xff]  }
0x1238   : > { %13614 = vmatpush2.bf16.msra.mxu0 %v22931_v21  ;;  %13656 = vmatprep.subr.bf16.mxu1 %v22942_v45  ;;  %v22972_v21 = vld [vmem:[%s27973_s5 + $0x74] ss:$24 sps:$4 sm:$0xff]   ;;  %v23021_v45 = vld [vmem:[%s27974_s16 + $0x20] ss:$8 sps:$4 sm:$0xff]  }
0x1239   : > { %13615 = vmatprep.subr.bf16.mxu0 %v22939_v2  ;;  %v22970_v2 = vld [vmem:[%s27973_s5 + $0x70] ss:$24 sps:$4 sm:$0xff]  }
0x123b   : > { %13657 = vmatpush2.bf16.msra.mxu1 %v22940_v36  ;;  %v23029_v36 = vld [vmem:[%s27974_s16 + $0x14] ss:$8 sps:$4 sm:$0xff]  }
0x123c   : > { %13616 = vmatpush2.bf16.msra.mxu0 %v22937_v33  ;;  %13658 = vmatprep.subr.bf16.mxu1 %v22948_v18  ;;  %v22975_v33 = vld [vmem:[%s27973_s5 + $0x44] ss:$24 sps:$4 sm:$0xff]  }
0x123d   : > { %13617 = vmatprep.subr.bf16.mxu0 %v22945_v51  ;;  %v22978_v51 = vld [vmem:[%s27973_s5 + $0x14] ss:$24 sps:$4 sm:$0xff]  }
0x123e   : > { %v23035_v18 = vld [vmem:[%s27974_s16 + $0x4] ss:$8 sps:$4 sm:$0xff]  }
0x123f   : > { %13659 = vmatpush2.bf16.msra.mxu1 %v22946_v50  ;;  %v23027_v50 = vld [vmem:[%s27974_s16 + $0x10] ss:$8 sps:$4 sm:$0xff]  }
0x1240   : > { %13618 = vmatpush2.bf16.msra.mxu0 %v22943_v5  ;;  %13660 = vmatprep.subr.bf16.mxu1 %v22954_v14  ;;  %v22973_v5 = vld [vmem:[%s27973_s5 + $0x40] ss:$24 sps:$4 sm:$0xff]   ;;  %v22981_v14 = vld [vmem:[%s27973_s5 + $0x224] ss:$24 sps:$4 sm:$0xff]  }
0x1241   : > { %13619 = vmatprep.subr.bf16.mxu0 %v22951_v41  ;;  %v22976_v41 = vld [vmem:[%s27973_s5 + $0x10] ss:$24 sps:$4 sm:$0xff]  }
0x1243   : > { %13661 = vmatpush2.bf16.msra.mxu1 %v22952_v31  ;;  %v22979_v31 = vld [vmem:[%s27973_s5 + $0x220] ss:$24 sps:$4 sm:$0xff]  }
0x1244   : > { %13620 = vmatpush2.bf16.msra.mxu0 %v22949_v0  ;;  %14252 = vmatprep.subr.bf16.mxu1 %v22993_v12  ;;  %v23033_v0 = vld [vmem:[%s27974_s16] ss:$8 sps:$4 sm:$0xff]  }
0x1245   : > { %13671 = vmatprep.subr.bf16.mxu0 %v22957_v20  ;;  %v22984_v20 = vld [vmem:[%s27973_s5 + $0x1f4] ss:$24 sps:$4 sm:$0xff]   ;;  %v22982_v12 = vld [vmem:[%s27973_s5 + $0x1f0] ss:$24 sps:$4 sm:$0xff]  }
0x12a9   : > { %v13152_v16 = vpop.xlane.xlu0 %13151 }
0x12aa   : > { %v13153_v11 = vmul.f32 0.0052083335, %v13152_v16 }
0x12ac   : > { %v27152_v46 = vsub.f32 %v27122_v34, %v13153_v11  ;;  %v27155_v40 = vsub.f32 %v27120_v28, %v13153_v11  ;;  %v22960_v11 = vld [vmem:[%s27973_s5 + $0x134] ss:$24 sps:$4 sm:$0xff]  }
0x12ae   : > { %v13156_v38 = vmul.f32 %v27152_v46, %v27152_v46  ;;  %v13157_v43 = vmul.f32 %v27155_v40, %v27155_v40 }
0x12b0   : > { %v13158_v24 = vsel %vm2937_vm0, %v13157_v43, 0.0  ;;  %v22963_v43 = vld [vmem:[%s27973_s5 + $0x104] ss:$24 sps:$4 sm:$0xff]  }
0x12b1   : > { %v13159_v60 = vadd.f32 %v13158_v24, %v13156_v38  ;;  %v22958_v38 = vld [vmem:[%s27973_s5 + $0x130] ss:$24 sps:$4 sm:$0xff]  }
0x12b2   : > { %v22997_v24 = vld [vmem:[%s27974_s16 + $0x60] ss:$8 sps:$4 sm:$0xff]  }
0x12b3   : > { %13160 = vadd.xlane.f32.xlu1 %v13159_v60  ;;  %v23005_v60 = vld [vmem:[%s27974_s16 + $0x54] ss:$8 sps:$4 sm:$0xff]  }
0x133c   : > { %v13161_v35 = vpop.xlane.xlu1 %13160 }
0x133d   : > { %v13162_v54 = vmul.f32 0.0052083335, %v13161_v35  ;;  %v22987_v35 = vld [vmem:[%s27973_s5 + $0x1c4] ss:$24 sps:$4 sm:$0xff]  }
0x133f   : > { %v13163_v55 = vadd.f32 1e-06, %v13162_v54  ;;  %v22985_v54 = vld [vmem:[%s27973_s5 + $0x1c0] ss:$24 sps:$4 sm:$0xff]  }
0x1341   : > { %23493 = vrsqrt.f32 %v13163_v55  ;;  %v22990_v55 = vld [vmem:[%s27973_s5 + $0x194] ss:$24 sps:$4 sm:$0xff]  }
0x134e   : > { %v23494_v44 = vpop.eup %23493 }
0x134f   : > { %v13165_v10 = vmul.f32 %v23494_v44, %v27152_v46  ;;  %v13166_v4 = vmul.f32 %v23494_v44, %v27155_v40  ;;  %v22991_v46 = vld [vmem:[%s27974_s16 + $0x70] ss:$8 sps:$4 sm:$0xff]   ;;  %v22999_v40 = vld [vmem:[%s27974_s16 + $0x64] ss:$8 sps:$4 sm:$0xff]   ;;  %v23000_v44 = vld [vmem:[%s27974_s16 + $0x160] ss:$8 sps:$4 sm:$0xff]  }
0x1351   : > { %v13179_v32 = vmul.f32 %v13175_v1, %v13166_v4  ;;  %v13178_v37 = vmul.f32 %v13171_v48, %v13165_v10  ;;  %v22994_v48 = vld [vmem:[%s27974_s16 + $0x170] ss:$8 sps:$4 sm:$0xff]   ;;  %v23002_v1 = vld [vmem:[%s27974_s16 + $0x164] ss:$8 sps:$4 sm:$0xff]   ;;  %v23008_v10 = vld [vmem:[%s27974_s16 + $0x154] ss:$8 sps:$4 sm:$0xff]  }
0x1352   : > { %v23006_v4 = vld [vmem:[%s27974_s16 + $0x150] ss:$8 sps:$4 sm:$0xff]  }
0x1353   : > { %v13192_v22 = vadd.f32 %v13188_v63, %v13179_v32  ;;  %v13191_v6 = vadd.f32 %v13184_v42, %v13178_v37  ;;  %v23014_v42 = vld [vmem:[%s27974_s16 + $0x144] ss:$8 sps:$4 sm:$0xff]   ;;  %v23012_v63 = vld [vmem:[%s27974_s16 + $0x140] ss:$8 sps:$4 sm:$0xff]   ;;  %v23020_v32 = vld [vmem:[%s27974_s16 + $0x134] ss:$8 sps:$4 sm:$0xff]  }
0x1354   : > { %v23018_v37 = vld [vmem:[%s27974_s16 + $0x130] ss:$8 sps:$4 sm:$0xff]  }
0x1355   : > { %v13194_v13 = vpack.c.bf16 %v13192_v22, %v13192_v22  ;;  %v27195_v16 = vpack.c.bf16 %v13191_v6, %v13191_v6  ;;  %v23026_v22 = vld [vmem:[%s27974_s16 + $0x124] ss:$8 sps:$4 sm:$0xff]   ;;  %v23024_v6 = vld [vmem:[%s27974_s16 + $0x120] ss:$8 sps:$4 sm:$0xff]  }
0x1357   : > { %20496 = vmatprep.mubr.msk.bf16.mxu0 %vm2937_vm0, %v13194_v13  ;;  %20497 = vmatprep.mubr.msk.bf16.mxu1 %vm2937_vm0, %v13194_v13 }
0x1358   : > { %13622 = vmatmul.mubr.bf16.vlgmr.msra.gmra.mxu0 %v27195_v16  ;;  %13663 = vmatmul.mubr.bf16.vlgmr.msra.gmra.mxu1 %v27195_v16 }
0x1359   : > { %13672 = vmatpush1.bf16.msra.mxu0 %v22955_v62  ;;  %20498 = vmatprep.mubr.msk.bf16.mxu0 %vm2937_vm0, %v13194_v13  ;;  %v23032_v13 = vld [vmem:[%s27974_s16 + $0x114] ss:$8 sps:$4 sm:$0xff]  }
0x135a   : > { %13673 = vmatprep.subr.bf16.mxu0 %v22960_v11  ;;  %14253 = vmatpush1.bf16.msra.mxu1 %v22991_v46  ;;  %v23041_v62 = vld [vmem:[%s27974_s16 + $0xf4] ss:$8 sps:$4 sm:$0xff]   ;;  %v23030_v11 = vld [vmem:[%s27974_s16 + $0x110] ss:$8 sps:$4 sm:$0xff]   ;;  %v23038_v46 = vld [vmem:[%s27974_s16 + $0x104] ss:$8 sps:$4 sm:$0xff]  }
0x135b   : > { %14254 = vmatprep.subr.bf16.mxu1 %v22999_v40  ;;  %v23047_v40 = vld [vmem:[%s27974_s16 + $0xe4] ss:$8 sps:$4 sm:$0xff]  }
0x135d   : > { %13674 = vmatpush1.bf16.msra.mxu0 %v22958_v38  ;;  %v23045_v38 = vld [vmem:[%s27974_s16 + $0xe0] ss:$8 sps:$4 sm:$0xff]  }
0x135e   : > { %13675 = vmatprep.subr.bf16.mxu0 %v22963_v43  ;;  %14255 = vmatpush1.bf16.msra.mxu1 %v22997_v24  ;;  %v23036_v43 = vld [vmem:[%s27974_s16 + $0x100] ss:$8 sps:$4 sm:$0xff]   ;;  %v23044_v24 = vld [vmem:[%s27974_s16 + $0x1f4] ss:$8 sps:$4 sm:$0xff]  }
0x135f   : > { %14256 = vmatprep.subr.bf16.mxu1 %v23005_v60  ;;  %v23053_v60 = vld [vmem:[%s27974_s16 + $0xd4] ss:$8 sps:$4 sm:$0xff]  }
0x1361   : > { %13676 = vmatpush1.bf16.msra.mxu0 %v22961_v17  ;;  %v23051_v17 = vld [vmem:[%s27974_s16 + $0xd0] ss:$8 sps:$4 sm:$0xff]  }
0x1362   : > { %13677 = vmatprep.subr.bf16.mxu0 %v22966_v30  ;;  %14257 = vmatpush1.bf16.msra.mxu1 %v23003_v15  ;;  %v23042_v30 = vld [vmem:[%s27974_s16 + $0x1f0] ss:$8 sps:$4 sm:$0xff]   ;;  %v23050_v15 = vld [vmem:[%s27974_s16 + $0x1e4] ss:$8 sps:$4 sm:$0xff]  }
0x1363   : > { %14258 = vmatprep.subr.bf16.mxu1 %v23011_v25  ;;  %v23057_v25 = vld [vmem:[%s27974_s16 + $0xc0] ss:$8 sps:$4 sm:$0xff]  }
0x1365   : > { %13678 = vmatpush1.bf16.msra.mxu0 %v22964_v27  ;;  %v23059_v27 = vld [vmem:[%s27974_s16 + $0xc4] ss:$8 sps:$4 sm:$0xff]  }
0x1366   : > { %13679 = vmatprep.subr.bf16.mxu0 %v22969_v19  ;;  %14259 = vmatpush1.bf16.msra.mxu1 %v23009_v23  ;;  %v23065_v19 = vld [vmem:[%s27974_s16 + $0xb4] ss:$8 sps:$4 sm:$0xff]   ;;  %v23048_v23 = vld [vmem:[%s27974_s16 + $0x1e0] ss:$8 sps:$4 sm:$0xff]  }
0x1367   : > { %14260 = vmatprep.subr.bf16.mxu1 %v23017_v61  ;;  %v23056_v61 = vld [vmem:[%s27974_s16 + $0x1d4] ss:$8 sps:$4 sm:$0xff]  }
0x1369   : > { %13680 = vmatpush1.bf16.msra.mxu0 %v22967_v9  ;;  %v23063_v9 = vld [vmem:[%s27974_s16 + $0xb0] ss:$8 sps:$4 sm:$0xff]  }
0x136a   : > { %13681 = vmatprep.subr.bf16.mxu0 %v22972_v21  ;;  %14261 = vmatpush1.bf16.msra.mxu1 %v23015_v53  ;;  %v23071_v21 = vld [vmem:[%s27974_s16 + $0xa4] ss:$8 sps:$4 sm:$0xff]   ;;  %v23054_v53 = vld [vmem:[%s27974_s16 + $0x1d0] ss:$8 sps:$4 sm:$0xff]  }
0x136b   : > { %14262 = vmatprep.subr.bf16.mxu1 %v23023_v29  ;;  %v23062_v29 = vld [vmem:[%s27974_s16 + $0x1c4] ss:$8 sps:$4 sm:$0xff]  }
0x136d   : > { %13682 = vmatpush1.bf16.msra.mxu0 %v22970_v2  ;;  %v23069_v2 = vld [vmem:[%s27974_s16 + $0xa0] ss:$8 sps:$4 sm:$0xff]  }
0x136e   : > { %13683 = vmatprep.subr.bf16.mxu0 %v22975_v33  ;;  %14263 = vmatpush1.bf16.msra.mxu1 %v23021_v45  ;;  %v23077_v33 = vld [vmem:[%s27974_s16 + $0x94] ss:$8 sps:$4 sm:$0xff]   ;;  %v23060_v45 = vld [vmem:[%s27974_s16 + $0x1c0] ss:$8 sps:$4 sm:$0xff]  }
0x136f   : > { %14264 = vmatprep.subr.bf16.mxu1 %v23029_v36  ;;  %v23068_v36 = vld [vmem:[%s27974_s16 + $0x1b4] ss:$8 sps:$4 sm:$0xff]  }
0x1371   : > { %13684 = vmatpush1.bf16.msra.mxu0 %v22973_v5  ;;  %v23075_v5 = vld [vmem:[%s27974_s16 + $0x90] ss:$8 sps:$4 sm:$0xff]  }
0x1372   : > { %13685 = vmatprep.subr.bf16.mxu0 %v22978_v51  ;;  %14265 = vmatpush1.bf16.msra.mxu1 %v23027_v50  ;;  %v23083_v51 = vld [vmem:[%s27974_s16 + $0x84] ss:$8 sps:$4 sm:$0xff]   ;;  %v23066_v50 = vld [vmem:[%s27974_s16 + $0x1b0] ss:$8 sps:$4 sm:$0xff]  }
0x1373   : > { %14266 = vmatprep.subr.bf16.mxu1 %v23035_v18  ;;  %v23074_v18 = vld [vmem:[%s27974_s16 + $0x1a4] ss:$8 sps:$4 sm:$0xff]  }
0x1375   : > { %13686 = vmatpush1.bf16.msra.mxu0 %v22976_v41  ;;  %v23081_v41 = vld [vmem:[%s27974_s16 + $0x80] ss:$8 sps:$4 sm:$0xff]  }
0x1376   : > { %13695 = vmatprep.subr.bf16.mxu0 %v22981_v14  ;;  %14267 = vmatpush1.bf16.msra.mxu1 %v23033_v0  ;;  %v23072_v14 = vld [vmem:[%s27974_s16 + $0x1a0] ss:$8 sps:$4 sm:$0xff]   ;;  %v23080_v0 = vld [vmem:[%s27974_s16 + $0x194] ss:$8 sps:$4 sm:$0xff]  }
0x1377   : > { %14268 = vmatprep.subr.bf16.mxu1 %v23041_v62 }
0x1379   : > { %13696 = vmatpush2.bf16.msra.mxu0 %v22979_v31  ;;  %v23089_v31 = vld [vmem:[%s27974_s16 + $0x274] ss:$8 sps:$4 sm:$0xff]  }
0x137a   : > { %13697 = vmatprep.subr.bf16.mxu0 %v22984_v20  ;;  %v23078_v20 = vld [vmem:[%s27974_s16 + $0x190] ss:$8 sps:$4 sm:$0xff]  }
0x137d   : > { %13698 = vmatpush2.bf16.msra.mxu0 %v22982_v12  ;;  %v23086_v12 = vld [vmem:[%s27974_s16 + $0x184] ss:$8 sps:$4 sm:$0xff]  }
0x137e   : > { %13699 = vmatprep.subr.bf16.mxu0 %v22987_v35  ;;  %v23084_v35 = vld [vmem:[%s27974_s16 + $0x180] ss:$8 sps:$4 sm:$0xff]  }
0x1381   : > { %13700 = vmatpush2.bf16.msra.mxu0 %v22985_v54  ;;  %v27290_v54 = vld [vmem:[#allocation42] sm:$0x3f] }
0x1382   : > { %13701 = vmatprep.subr.bf16.mxu0 %v22990_v55  ;;  %v13199_v55 = vrot.slane %v27290_v54, %v25947_v57 }
0x1385   : > { %13702 = vmatpush2.bf16.msra.mxu0 %v22988_v3  ;;  %v13207_v3 = vrot.slane %v27290_v54, %v26586_v26 }
0x1386   : > { %14293 = vmatprep.subr.bf16.mxu0 %v22996_v59 }
0x1388   : > { %13704 = vmatmul.mubr.bf16.vlgmr.msra.gmra.mxu0 %v27195_v16  ;;  %v23039_v16 = vld [vmem:[%s27974_s16 + $0xf0] ss:$8 sps:$4 sm:$0xff]  }
0x1389   : > { %14294 = vmatpush1.bf16.msra.mxu0 %v22994_v48  ;;  %14269 = vmatpush2.bf16.msra.mxu1 %v23039_v16 }
0x138a   : > { %14295 = vmatprep.subr.bf16.mxu0 %v23002_v1  ;;  %14270 = vmatprep.subr.bf16.mxu1 %v23047_v40  ;;  %v13203_v1 = vrot.slane %v27290_v54, %v25950_v58 }
0x138d   : > { %14296 = vmatpush1.bf16.msra.mxu0 %v23000_v44  ;;  %14271 = vmatpush2.bf16.msra.mxu1 %v23045_v38  ;;  %v13211_v44 = vrot.slane %v27290_v54, %v26591_v39 }
0x138e   : > { %14297 = vmatprep.subr.bf16.mxu0 %v23008_v10  ;;  %14272 = vmatprep.subr.bf16.mxu1 %v23053_v60 }
0x1391   : > { %14298 = vmatpush1.bf16.msra.mxu0 %v23006_v4  ;;  %14273 = vmatpush2.bf16.msra.mxu1 %v23051_v17 }
0x1392   : > { %14299 = vmatprep.subr.bf16.mxu0 %v23014_v42  ;;  %14274 = vmatprep.subr.bf16.mxu1 %v23059_v27 }
0x1395   : > { %14300 = vmatpush1.bf16.msra.mxu0 %v23012_v63  ;;  %14275 = vmatpush2.bf16.msra.mxu1 %v23057_v25 }
0x1396   : > { %14301 = vmatprep.subr.bf16.mxu0 %v23020_v32  ;;  %14276 = vmatprep.subr.bf16.mxu1 %v23065_v19 }
0x1399   : > { %14302 = vmatpush1.bf16.msra.mxu0 %v23018_v37  ;;  %14277 = vmatpush2.bf16.msra.mxu1 %v23063_v9 }
0x139a   : > { %14303 = vmatprep.subr.bf16.mxu0 %v23026_v22  ;;  %14278 = vmatprep.subr.bf16.mxu1 %v23071_v21 }
0x139d   : > { %14304 = vmatpush1.bf16.msra.mxu0 %v23024_v6  ;;  %14279 = vmatpush2.bf16.msra.mxu1 %v23069_v2 }
0x139e   : > { %14305 = vmatprep.subr.bf16.mxu0 %v23032_v13  ;;  %14280 = vmatprep.subr.bf16.mxu1 %v23077_v33 }
0x13a1   : > { %14306 = vmatpush1.bf16.msra.mxu0 %v23030_v11  ;;  %14281 = vmatpush2.bf16.msra.mxu1 %v23075_v5 }
0x13a2   : > { %14307 = vmatprep.subr.bf16.mxu0 %v23038_v46  ;;  %14282 = vmatprep.subr.bf16.mxu1 %v23083_v51 }
0x13a5   : > { %14308 = vmatpush1.bf16.msra.mxu0 %v23036_v43  ;;  %14283 = vmatpush2.bf16.msra.mxu1 %v23081_v41 }
0x13a6   : > { %14309 = vmatprep.subr.bf16.mxu0 %v23044_v24  ;;  %14334 = vmatprep.subr.bf16.mxu1 %v23089_v31 }
0x13a9   : > { %14310 = vmatpush2.bf16.msra.mxu0 %v23042_v30 }
0x13aa   : > { %14311 = vmatprep.subr.bf16.mxu0 %v23050_v15 }
0x13ad   : > { %14312 = vmatpush2.bf16.msra.mxu0 %v23048_v23 }
0x13ae   : > { %14313 = vmatprep.subr.bf16.mxu0 %v23056_v61 }
0x13b1   : > { %14314 = vmatpush2.bf16.msra.mxu0 %v23054_v53 }
0x13b2   : > { %14315 = vmatprep.subr.bf16.mxu0 %v23062_v29 }
0x13b5   : > { %14316 = vmatpush2.bf16.msra.mxu0 %v23060_v45 }
0x13b6   : > { %14317 = vmatprep.subr.bf16.mxu0 %v23068_v36 }
0x13b9   : > { %14318 = vmatpush2.bf16.msra.mxu0 %v23066_v50 }
0x13ba   : > { %14319 = vmatprep.subr.bf16.mxu0 %v23074_v18 }
0x13bd   : > { %14320 = vmatpush2.bf16.msra.mxu0 %v23072_v14 }
0x13be   : > { %14321 = vmatprep.subr.bf16.mxu0 %v23080_v0 }
0x13c1   : > { %14322 = vmatpush2.bf16.msra.mxu0 %v23078_v20 }
0x13c2   : > { %14323 = vmatprep.subr.bf16.mxu0 %v23086_v12 }
0x13c5   : > { %14324 = vmatpush2.bf16.msra.mxu0 %v23084_v35 }
0x13c6   : > { %14498 = vmatprep.subr.bf16.mxu0 %v25059_v8 }
0x1418   : > { %v13623_v59 = vpop.f32.mrf.mxu0  ;;  %v13664_v48 = vpop.f32.mrf.mxu1 }
0x1419   : > { %v13624_v10 = vadd.f32 %v13623_v59, %v13199_v55  ;;  %v13665_v4 = vadd.f32 %v13664_v48, %v13207_v3  ;;  %v23087_v59 = vld [vmem:[%s27974_s16 + $0x270] ss:$8 sps:$4 sm:$0xff]  }
0x141a   : > { %v13625_v42 = vpop.f32.mrf.mxu0  ;;  %v13666_v63 = vpop.f32.mrf.mxu1 }
0x141b   : > { %v13718_v32 = vmul.f32 0.044715, %v13624_v10  ;;  %v13720_v37 = vmul.f32 0.044715, %v13665_v4  ;;  %v13626_v22 = vadd.f32 %v13625_v42, %v13203_v1  ;;  %v13667_v6 = vadd.f32 %v13666_v63, %v13211_v44  ;;  %v23092_v44 = vld [vmem:[%s27974_s16 + $0x264] ss:$8 sps:$4 sm:$0xff]  }
0x141c   : > { %v13627_v13 = vpop.f32.mrf.mxu0  ;;  %v13668_v62 = vpop.f32.mrf.mxu1  ;;  %v13712_v51 = vmul.f32 0.5, %v13624_v10  ;;  %v13714_v18 = vmul.f32 0.5, %v13665_v4  ;;  %v23095_v42 = vld [vmem:[%s27974_s16 + $0x254] ss:$8 sps:$4 sm:$0xff]   ;;  %v23093_v63 = vld [vmem:[%s27974_s16 + $0x250] ss:$8 sps:$4 sm:$0xff]  }
0x141d   : > { %v13724_v16 = vmul.f32 %v13718_v32, %v13624_v10  ;;  %v13726_v11 = vmul.f32 %v13720_v37, %v13665_v4  ;;  %v13719_v46 = vmul.f32 0.044715, %v13626_v22  ;;  %v13721_v40 = vmul.f32 0.044715, %v13667_v6  ;;  %v23098_v32 = vld [vmem:[%s27974_s16 + $0x244] ss:$8 sps:$4 sm:$0xff]  }
0x141e   : > { %v13628_v38 = vpop.f32.mrf.mxu0  ;;  %v13669_v43 = vpop.f32.mrf.mxu1  ;;  %v13713_v41 = vmul.f32 0.5, %v13626_v22  ;;  %v13715_v0 = vmul.f32 0.5, %v13667_v6  ;;  %v23096_v37 = vld [vmem:[%s27974_s16 + $0x240] ss:$8 sps:$4 sm:$0xff]   ;;  %v23101_v13 = vld [vmem:[%s27974_s16 + $0x234] ss:$8 sps:$4 sm:$0xff]  }
0x141f   : > { %v13730_v24 = vmul.f32 %v13724_v16, %v13624_v10  ;;  %v13732_v60 = vmul.f32 %v13726_v11, %v13665_v4  ;;  %v13725_v17 = vmul.f32 %v13719_v46, %v13626_v22  ;;  %v13727_v30 = vmul.f32 %v13721_v40, %v13667_v6  ;;  %v23099_v11 = vld [vmem:[%s27974_s16 + $0x230] ss:$8 sps:$4 sm:$0xff]   ;;  %v23104_v38 = vld [vmem:[%s27974_s16 + $0x224] ss:$8 sps:$4 sm:$0xff]  }
0x1421   : > { %v13736_v15 = vadd.f32 %v13730_v24, %v13624_v10  ;;  %v13738_v25 = vadd.f32 %v13732_v60, %v13665_v4  ;;  %v13731_v27 = vmul.f32 %v13725_v17, %v13626_v22  ;;  %v13733_v19 = vmul.f32 %v13727_v30, %v13667_v6  ;;  %v23090_v4 = vld [vmem:[%s27974_s16 + $0x260] ss:$8 sps:$4 sm:$0xff]   ;;  %v23107_v60 = vld [vmem:[%s27974_s16 + $0x214] ss:$8 sps:$4 sm:$0xff]   ;;  %v23105_v30 = vld [vmem:[%s27974_s16 + $0x210] ss:$8 sps:$4 sm:$0xff]  }
0x1422   : > { %v23102_v24 = vld [vmem:[%s27974_s16 + $0x220] ss:$8 sps:$4 sm:$0xff]  }
0x1423   : > { %v13742_v23 = vmul.f32 0.7978846, %v13736_v15  ;;  %v13744_v61 = vmul.f32 0.7978846, %v13738_v25  ;;  %v13737_v9 = vadd.f32 %v13731_v27, %v13626_v22  ;;  %v13739_v21 = vadd.f32 %v13733_v19, %v13667_v6  ;;  %v23110_v25 = vld [vmem:[%s27974_s16 + $0x204] ss:$8 sps:$4 sm:$0xff]  }
0x1424   : > { %v13215_v22 = vrot.slane %v27290_v54, %v7512_v49  ;;  %v13219_v6 = vrot.slane %v27290_v54, %v7516_v52 }
0x1425   : > { %23495 = vtanh.f32 %v13742_v23  ;;  %v13743_v53 = vmul.f32 0.7978846, %v13737_v9  ;;  %v13745_v29 = vmul.f32 0.7978846, %v13739_v21  ;;  %v23108_v23 = vld [vmem:[%s27974_s16 + $0x200] ss:$8 sps:$4 sm:$0xff]  }
0x1426   : > { %23497 = vtanh.f32 %v13744_v61  ;;  %v23113_v9 = vld [vmem:[%s27974_s16 + $0x2f4] ss:$8 sps:$4 sm:$0xff]   ;;  %v23111_v21 = vld [vmem:[%s27974_s16 + $0x2f0] ss:$8 sps:$4 sm:$0xff]  }
0x1427   : > { %23499 = vtanh.f32 %v13743_v53 }
0x1428   : > { %23501 = vtanh.f32 %v13745_v29  ;;  %v23116_v29 = vld [vmem:[%s27974_s16 + $0x2e4] ss:$8 sps:$4 sm:$0xff]  }
0x1432   : > { %v23496_v2 = vpop.eup %23495 }
0x1433   : > { %v23498_v33 = vpop.eup %23497  ;;  %v13754_v45 = vadd.f32 1.0, %v23496_v2  ;;  %v23114_v2 = vld [vmem:[%s27974_s16 + $0x2e0] ss:$8 sps:$4 sm:$0xff]  }
0x1434   : > { %v13756_v36 = vadd.f32 1.0, %v23498_v33  ;;  %v23500_v5 = vpop.eup %23499 }
0x1435   : > { %v23502_v50 = vpop.eup %23501  ;;  %v13755_v14 = vadd.f32 1.0, %v23500_v5  ;;  %v13760_v20 = vmul.f32 %v13754_v45, %v13712_v51  ;;  %v23119_v45 = vld [vmem:[%s27974_s16 + $0x2d4] ss:$8 sps:$4 sm:$0xff]   ;;  %v23122_v5 = vld [vmem:[%s27974_s16 + $0x2c4] ss:$8 sps:$4 sm:$0xff]  }
0x1436   : > { %v13757_v31 = vadd.f32 1.0, %v23502_v50  ;;  %v13762_v35 = vmul.f32 %v13756_v36, %v13714_v18  ;;  %v23117_v36 = vld [vmem:[%s27974_s16 + $0x2d0] ss:$8 sps:$4 sm:$0xff]  }
0x1437   : > { %v13761_v12 = vmul.f32 %v13755_v14, %v13713_v41  ;;  %v13766_v1 = vpack.c.bf16 %v13760_v20, %v13760_v20  ;;  %v23120_v41 = vld [vmem:[%s27974_s16 + $0x2c0] ss:$8 sps:$4 sm:$0xff]   ;;  %v23123_v20 = vld [vmem:[%s27974_s16 + $0x2b0] ss:$8 sps:$4 sm:$0xff]  }
0x1438   : > { %v13763_v55 = vmul.f32 %v13757_v31, %v13715_v0  ;;  %v13768_v10 = vpack.c.bf16 %v13762_v35, %v13762_v35  ;;  %v23125_v0 = vld [vmem:[%s27974_s16 + $0x2b4] ss:$8 sps:$4 sm:$0xff]   ;;  %v23126_v35 = vld [vmem:[%s27974_s16 + $0x2a0] ss:$8 sps:$4 sm:$0xff]  }
0x1439   : > { %v13767_v3 = vpack.c.bf16 %v13761_v12, %v13761_v12  ;;  %v23128_v12 = vld [vmem:[%s27974_s16 + $0x2a4] ss:$8 sps:$4 sm:$0xff]  }
0x143a   : > { %v13769_v48 = vpack.c.bf16 %v13763_v55, %v13763_v55  ;;  %v23131_v55 = vld [vmem:[%s27974_s16 + $0x294] ss:$8 sps:$4 sm:$0xff]  }
0x143b   : > { %14284 = vmatprep.mubr.bf16.mxu1 %v13767_v3 }
0x143c   : > { %14325 = vmatprep.mubr.bf16.mxu0 %v13769_v48  ;;  %14285 = vmatmul.mubr.bf16.vlgmr.msra.gmra.mxu1 %v13766_v1  ;;  %v23134_v48 = vld [vmem:[%s27974_s16 + $0x284] ss:$8 sps:$4 sm:$0xff]  }
0x143d   : > { %14326 = vmatmul.mubr.bf16.vlgmr.msra.gmra.mxu0 %v13768_v10  ;;  %14335 = vmatpush1.bf16.msra.mxu1 %v23087_v59  ;;  %v23129_v59 = vld [vmem:[%s27974_s16 + $0x290] ss:$8 sps:$4 sm:$0xff]   ;;  %v23132_v10 = vld [vmem:[%s27974_s16 + $0x280] ss:$8 sps:$4 sm:$0xff]  }
0x143e   : > { %14336 = vmatprep.subr.bf16.mxu1 %v23092_v44 }
0x1441   : > { %14337 = vmatpush1.bf16.msra.mxu1 %v23090_v4 }
0x1442   : > { %14338 = vmatprep.subr.bf16.mxu1 %v23095_v42 }
0x1445   : > { %14339 = vmatpush1.bf16.msra.mxu1 %v23093_v63  ;;  %v23135_v63 = vld [vmem:[%s27975_s11 + $0x38] sm:$0xff]  }
0x1446   : > { %14340 = vmatprep.subr.bf16.mxu1 %v23098_v32  ;;  %14499 = vmatpush1.bf16.msra.mxu0 %v23135_v63  ;;  %v23136_v32 = vld [vmem:[%s27975_s11 + $0x30] sm:$0xff]  }
0x1447   : > { %14500 = vmatprep.subr.bf16.mxu0 %v25059_v8  ;;  %v20610_v63 = vld [vmem:[#allocation46] ss:$0 sm:$0xff] }
0x1448   : > { %v13705_v62 = vpop.f32.mrf.mxu0 }
0x1449   : > { %14341 = vmatpush1.bf16.msra.mxu1 %v23096_v37  ;;  %v27315_v46 = vadd.f32 %v13705_v62, %v13215_v22  ;;  %v23137_v37 = vld [vmem:[%s27975_s11 + $0x28] sm:$0xff]   ;;  %v23138_v22 = vld [vmem:[%s27975_s11 + $0x20] sm:$0xff]  }
0x144a   : > { %v13707_v16 = vpop.f32.mrf.mxu0  ;;  %14342 = vmatprep.subr.bf16.mxu1 %v23101_v13  ;;  %14501 = vmatpush1.bf16.msra.mxu0 %v23136_v32  ;;  %v23140_v13 = vld [vmem:[%s27975_s11 + $0x10] sm:$0xff]   ;;  %v23141_v62 = vld [vmem:[%s27975_s11 + $0x8] sm:$0xff]  }
0x144b   : > { %v13708_v40 = vadd.f32 %v13707_v16, %v13219_v6  ;;  %v13722_v52 = vmul.f32 0.044715, %v27315_v46  ;;  %v13716_v44 = vmul.f32 0.5, %v27315_v46  ;;  %14502 = vmatprep.subr.bf16.mxu0 %v25059_v8  ;;  %v23139_v6 = vld [vmem:[%s27975_s11 + $0x18] sm:$0xff]   ;;  %v23142_v16 = vld [vmem:[%s27975_s11] sm:$0xff]  }
0x144c   : > { %v13709_v49 = vpop.f32.mrf.mxu0 }
0x144d   : > { %v13723_v43 = vmul.f32 0.044715, %v13708_v40  ;;  %14343 = vmatpush1.bf16.msra.mxu1 %v23099_v11  ;;  %v13728_v15 = vmul.f32 %v13722_v52, %v27315_v46  ;;  %v13717_v50 = vmul.f32 0.5, %v13708_v40  ;;  %v23143_v11 = vld [vmem:[%s27975_s11 + $0x58] sm:$0xff]  }
0x144e   : > { %v13710_v56 = vpop.f32.mrf.mxu0  ;;  %14344 = vmatprep.subr.bf16.mxu1 %v23104_v38  ;;  %14503 = vmatpush1.bf16.msra.mxu0 %v23137_v37  ;;  %v23146_v38 = vld [vmem:[%s27975_s11 + $0x40] sm:$0xff]  }
0x144f   : > { %v13729_v54 = vmul.f32 %v13723_v43, %v13708_v40  ;;  %v13734_v61 = vmul.f32 %v13728_v15, %v27315_v46  ;;  %14504 = vmatprep.subr.bf16.mxu0 %v25059_v8  ;;  %v8994_v15 = vld [vmem:[#allocation43] sm:$0x3] }
0x1451   : > { %v13735_v17 = vmul.f32 %v13729_v54, %v13708_v40  ;;  %14345 = vmatpush1.bf16.msra.mxu1 %v23102_v24  ;;  %v13740_v53 = vadd.f32 %v13734_v61, %v27315_v46  ;;  %v23144_v46 = vld [vmem:[%s27975_s11 + $0x50] sm:$0xff]  }
0x1452   : > { %14346 = vmatprep.subr.bf16.mxu1 %v23107_v60  ;;  %14505 = vmatpush1.bf16.msra.mxu0 %v23138_v22  ;;  %v23151_v22 = vld [vmem:[#allocation48 + $0x18] sm:$0xff]  }
0x1453   : > { %v13741_v27 = vadd.f32 %v13735_v17, %v13708_v40  ;;  %v13746_v33 = vmul.f32 0.7978846, %v13740_v53  ;;  %14506 = vmatprep.subr.bf16.mxu0 %v25059_v8  ;;  %v23145_v40 = vld [vmem:[%s27975_s11 + $0x48] sm:$0xff]   ;;  %v14385_v53 = vrot.slane %v8994_v15, %v25950_v58 }
0x1455   : > { %v13747_v19 = vmul.f32 0.7978846, %v13741_v27  ;;  %14347 = vmatpush1.bf16.msra.mxu1 %v23105_v30 }
0x1456   : > { %14348 = vmatprep.subr.bf16.mxu1 %v23110_v25  ;;  %14507 = vmatpush1.bf16.msra.mxu0 %v23139_v6  ;;  %v23152_v6 = vld [vmem:[#allocation49 + $0x28] sm:$0xff]  }
0x1457   : > { %23503 = vtanh.f32 %v13747_v19  ;;  %14508 = vmatprep.subr.bf16.mxu0 %v25059_v8 }
0x1458   : > { %23505 = vtanh.f32 %v13746_v33 }
0x1459   : > { %14349 = vmatpush1.bf16.msra.mxu1 %v23108_v23  ;;  %v14381_v23 = vrot.slane %v8994_v15, %v25947_v57  ;;  %v23168_v15 = vld [vmem:[#allocation51 + $0x10] sm:$0xff]  }
0x145a   : > { %14350 = vmatprep.subr.bf16.mxu1 %v23113_v9  ;;  %14509 = vmatpush1.bf16.msra.mxu0 %v23140_v13 }
0x145b   : > { %14510 = vmatprep.subr.bf16.mxu0 %v25059_v8 }
0x145d   : > { %14351 = vmatpush2.bf16.msra.mxu1 %v23111_v21 }
0x145e   : > { %14352 = vmatprep.subr.bf16.mxu1 %v23116_v29  ;;  %14511 = vmatpush1.bf16.msra.mxu0 %v23141_v62  ;;  %v23153_v62 = vld [vmem:[#allocation48 + $0x10] sm:$0xff]  }
0x145f   : > { %14512 = vmatprep.subr.bf16.mxu0 %v25059_v8 }
0x1461   : > { %14353 = vmatpush2.bf16.msra.mxu1 %v23114_v2 }
0x1462   : > { %14354 = vmatprep.subr.bf16.mxu1 %v23119_v45  ;;  %14513 = vmatpush1.bf16.msra.mxu0 %v23142_v16  ;;  %v23154_v16 = vld [vmem:[#allocation49 + $0x20] sm:$0xff]  }
0x1463   : > { %14522 = vmatprep.subr.bf16.mxu0 %v25059_v8 }
0x1464   : > { %v23504_v51 = vpop.eup %23503 }
0x1465   : > { %v13759_v18 = vadd.f32 1.0, %v23504_v51  ;;  %14355 = vmatpush2.bf16.msra.mxu1 %v23117_v36  ;;  %v23506_v3 = vpop.eup %23505 }
0x1466   : > { %14356 = vmatprep.subr.bf16.mxu1 %v23122_v5  ;;  %v13758_v1 = vadd.f32 1.0, %v23506_v3  ;;  %14523 = vmatpush2.bf16.msra.mxu0 %v23143_v11  ;;  %v23149_v3 = vld [vmem:[#allocation48] sm:$0xff]   ;;  %v23155_v11 = vld [vmem:[#allocation48 + $0x28] sm:$0xff]  }
0x1467   : > { %v13765_v14 = vmul.f32 %v13759_v18, %v13717_v50  ;;  %14524 = vmatprep.subr.bf16.mxu0 %v25059_v8  ;;  %v20595_v50 = vld [vmem:[%s27976_s8] ss:$0 sm:$0xff]  ;;  %s27984_s8 = sld [smem:[#allocation164_spill]] }
0x1468   : > { %v13764_v4 = vmul.f32 %v13758_v1, %v13716_v44 }
0x1469   : > { %v13771_v31 = vpack.c.bf16 %v13765_v14, %v13765_v14  ;;  %14357 = vmatpush2.bf16.msra.mxu1 %v23120_v41 }
0x146a   : > { %14358 = vmatprep.subr.bf16.mxu1 %v23125_v0  ;;  %v13770_v42 = vpack.c.bf16 %v13764_v4, %v13764_v4  ;;  %14525 = vmatpush2.bf16.msra.mxu0 %v23144_v46  ;;  %v20609_v4 = vld [vmem:[#allocation45] ss:$0 sm:$0xff]  ;;  %v23156_v46 = vld [vmem:[#allocation51 + $0x8] sm:$0xff]  }
0x146b   : > { %14366 = vmatprep.mubr.bf16.mxu1 %v13771_v31  ;;  %14526 = vmatprep.subr.bf16.mxu0 %v25059_v8 }
0x146d   : > { %14359 = vmatpush2.bf16.msra.mxu1 %v23123_v20 }
0x146e   : > { %14360 = vmatprep.subr.bf16.mxu1 %v23128_v12  ;;  %14527 = vmatpush2.bf16.msra.mxu0 %v23145_v40  ;;  %v23157_v40 = vld [vmem:[#allocation48 + $0x20] sm:$0xff]  }
0x146f   : > { %14528 = vmatprep.subr.bf16.mxu0 %v25059_v8 }
0x1471   : > { %14361 = vmatpush2.bf16.msra.mxu1 %v23126_v35  ;;  %v23147_v35 = vld [vmem:[#allocation48 + $0x8] sm:$0xff]  }
0x1472   : > { %14362 = vmatprep.subr.bf16.mxu1 %v23131_v55  ;;  %14529 = vmatpush2.bf16.msra.mxu0 %v23146_v38  ;;  %v23148_v55 = vld [vmem:[#allocation49 + $0x8] sm:$0xff]   ;;  %v23158_v38 = vld [vmem:[#allocation51] sm:$0xff]  }
0x1473   : > { %21514 = vmatprep.subr.bf16.mxu0 %v25056_v7 }
0x1475   : > { %14363 = vmatpush2.bf16.msra.mxu1 %v23129_v59  ;;  %v23150_v59 = vld [vmem:[#allocation49] sm:$0xff]  }
0x1476   : > { %14364 = vmatprep.subr.bf16.mxu1 %v23134_v48 }
0x1479   : > { %14365 = vmatpush2.bf16.msra.mxu1 %v23132_v10 }
0x147a   : > { %21482 = vmatprep.subr.bf16.mxu1 %v25056_v7 }
0x147c   : > { %14367 = vmatmul.mubr.bf16.vlgmr.msra.gmra.mxu1 %v13770_v42 }
0x147d   : > { %21486 = vmatprep.mubr.msk.bf16.mxu1 %vm25057_vm1, %v25056_v7  ;;  %21483 = vmatpush3.bf16.xpose.msra.mxu1 %v23147_v35 }
0x147e   : > { %21484 = vmatprep.subr.bf16.mxu1 %v25056_v7 }
0x1485   : > { %21485 = vmatpush3.bf16.xpose.msra.mxu1 %v23149_v3 }
0x1486   : > { %21490 = vmatprep.subr.bf16.mxu1 %v25056_v7 }
0x14fc   : > { %v14286_v49 = vpop.f32.mrf.mxu1 }
0x14fd   : > { %v14327_v43 = vpop.f32.mrf.mxu0 }
0x14fe   : > { %v14328_v56 = vadd.f32 %v14327_v43, %v14286_v49  ;;  %v14288_v24 = vpop.f32.mrf.mxu1  ;;  %v23159_v49 = vld [vmem:[#allocation48 + $0x38] sm:$0xff]   ;;  %v23160_v43 = vld [vmem:[#allocation51 + $0x28] sm:$0xff]  }
0x14ff   : > { %v14329_v52 = vpop.f32.mrf.mxu0 }
0x1500   : > { %v14290_v54 = vpop.f32.mrf.mxu1  ;;  %v14330_v27 = vadd.f32 %v14329_v52, %v14288_v24  ;;  %v23162_v24 = vld [vmem:[#allocation51 + $0x20] sm:$0xff]   ;;  %v23163_v52 = vld [vmem:[#allocation49 + $0x18] sm:$0xff]  }
0x1501   : > { %v14331_v60 = vpop.f32.mrf.mxu0  ;;  %v23164_v54 = vld [vmem:[#allocation49 + $0x10] sm:$0xff]  }
0x1502   : > { %v14291_v17 = vpop.f32.mrf.mxu1  ;;  %v23165_v60 = vld [vmem:[#allocation49 + $0x38] sm:$0xff]  }
0x1503   : > { %v14332_v30 = vpop.f32.mrf.mxu0  ;;  %v23166_v17 = vld [vmem:[#allocation49 + $0x30] sm:$0xff]  }
0x1504   : > { %v23167_v30 = vld [vmem:[#allocation51 + $0x18] sm:$0xff]  }
0x153c   : > { %v14368_v25 = vpop.f32.mrf.mxu1 }
0x153d   : > { %v14369_v19 = vadd.f32 %v14368_v25, %v14328_v56  ;;  %v23161_v56 = vld [vmem:[#allocation48 + $0x30] sm:$0xff]   ;;  %v23169_v25 = vld [vmem:[#allocation51 + $0x38] sm:$0xff]  }
0x153e   : > { %v14370_v61 = vpop.f32.mrf.mxu1 }
0x153f   : > { %v14375_v9 = vadd.f32 %v14369_v19, %v27122_v34  ;;  %v14371_v21 = vadd.f32 %v14370_v61, %v14330_v27  ;;  %v23170_v27 = vld [vmem:[#allocation51 + $0x30] sm:$0xff]   ;;  %v20623_v19 = vld [vmem:[#allocation54] ss:$0 sm:$0xff] }
0x1540   : > { %v14372_v29 = vpop.f32.mrf.mxu1 }
0x1541   : > { %v14376_v2 = vadd.f32 %v14371_v21, %v27120_v28  ;;  %v14388_v33 = vadd.f32 %v14381_v23, %v14375_v9 }
0x1542   : > { %v14373_v45 = vpop.f32.mrf.mxu1 }
0x1543   : > { %v14389_v36 = vadd.f32 %v14385_v53, %v14376_v2  ;;  %v14415_v51 = vpack.c.bf16 %v14388_v33, %v14388_v33  ;;  %v20611_v2 = vld [vmem:[#allocation52] ss:$0 sm:$0xff] }
0x1545   : > { %v14416_v5 = vpack.c.bf16 %v14389_v36, %v14389_v36 }
0x1547   : > { %20608 = vmatprep.mubr.msk.bf16.mxu0 %vm2937_vm0, %v14416_v5 }
0x1548   : > { %14531 = vmatmul.mubr.bf16.vlgmr.msra.gmra.mxu0 %v14415_v51 }
0x1549   : > { %21518 = vmatprep.mubr.msk.bf16.mxu0 %vm25057_vm1, %v25056_v7  ;;  %21515 = vmatpush3.bf16.xpose.msra.mxu0 %v23148_v55 }
0x154a   : > { %21516 = vmatprep.subr.bf16.mxu0 %v25056_v7 }
0x1551   : > { %21517 = vmatpush3.bf16.xpose.msra.mxu0 %v23150_v59 }
0x1552   : > { %21530 = vmatprep.subr.bf16.mxu0 %v25056_v7 }
0x1608   : > { %v14532_v18 = vpop.f32.mrf.mxu0 }
0x1609   : > { %v27379_v34 = vadd.f32 %v20595_v50, %v14532_v18 }
0x160a   : > { %v14534_v41 = vpop.f32.mrf.mxu0 }
0x160b   : > { %14717 = vadd.xlane.f32.xlu0 %v27379_v34  ;;  %v20625_v41 = vld [vmem:[#allocation54 + $0x2] ss:$0 sm:$0xff] }
0x160c   : > { %v14535_v14 = vpop.f32.mrf.mxu0 }
0x160e   : > { %v14536_v28 = vpop.f32.mrf.mxu0 }
0x1694   : > { %v14718_v0 = vpop.xlane.xlu0 %14717 }
0x1695   : > { %v14720_v31 = vmul.f32 0.0078125, %v14718_v0 }
0x1697   : > { %v14721_v20 = vsub.f32 %v27379_v34, %v14720_v31 }
0x1699   : > { %v14722_v12 = vmul.f32 %v14721_v20, %v14721_v20 }
0x169b   : > { %14723 = vadd.xlane.f32.xlu1 %v14722_v12 }
0x1724   : > { %v14724_v48 = vpop.xlane.xlu1 %14723 }
0x1725   : > { %v14725_v1 = vmul.f32 0.0078125, %v14724_v48 }
0x1727   : > { %v14726_v44 = vadd.f32 1e-05, %v14725_v1  ;;  %v20613_v1 = vld [vmem:[#allocation52 + $0x2] ss:$0 sm:$0xff] }
0x1729   : > { %23507 = vrsqrt.f32 %v14726_v44  ;;  %v20635_v44 = vld [vmem:[#allocation55] ss:$0 sm:$0xff] }
0x1736   : > { %v23508_v10 = vpop.eup %23507 }
0x1737   : > { %v14728_v42 = vmul.f32 %v23508_v10, %v14721_v20 }
0x1739   : > { %v14735_v32 = vmul.f32 %v20609_v4, %v14728_v42 }
0x173b   : > { %v14742_v37 = vadd.f32 %v20610_v63, %v14735_v32 }
0x173d   : > { %v27387_v13 = vpack.c.bf16 %v14742_v37, %v14742_v37 }
0x173f   : > { %21487 = vmatmul.mubr.bf16.vlgmr.msra.gmra.mxu1 %v27387_v13  ;;  %21519 = vmatmul.mubr.bf16.vlgmr.msra.gmra.mxu0 %v27387_v13 }
0x1740   : > { %21491 = vmatpush3.bf16.xpose.msra.mxu1 %v23151_v22  ;;  %21531 = vmatpush3.bf16.xpose.msra.mxu0 %v23152_v6 }
0x1741   : > { %21492 = vmatprep.subr.bf16.mxu1 %v25056_v7  ;;  %21532 = vmatprep.subr.bf16.mxu0 %v25056_v7 }
0x1742   : > { %21494 = vmatprep.mubr.msk.bf16.mxu1 %vm25057_vm1, %v25056_v7  ;;  %21534 = vmatprep.mubr.msk.bf16.mxu0 %vm25057_vm1, %v25056_v7 }
0x1748   : > { %21493 = vmatpush3.bf16.xpose.msra.mxu1 %v23153_v62  ;;  %21533 = vmatpush3.bf16.xpose.msra.mxu0 %v23154_v16 }
0x1749   : > { %21498 = vmatprep.subr.bf16.mxu1 %v25056_v7  ;;  %21546 = vmatprep.subr.bf16.mxu0 %v25056_v7 }
0x174f   : > { %21495 = vmatmul.mubr.bf16.vlgmr.msra.gmra.mxu1 %v27387_v13  ;;  %21535 = vmatmul.mubr.bf16.vlgmr.msra.gmra.mxu0 %v27387_v13 }
0x1750   : > { %21499 = vmatpush3.bf16.xpose.msra.mxu1 %v23155_v11  ;;  %21547 = vmatpush3.bf16.xpose.msra.mxu0 %v23156_v46 }
0x1751   : > { %21500 = vmatprep.subr.bf16.mxu1 %v25056_v7  ;;  %21548 = vmatprep.subr.bf16.mxu0 %v25056_v7 }
0x1752   : > { %21502 = vmatprep.mubr.msk.bf16.mxu1 %vm25057_vm1, %v25056_v7  ;;  %21550 = vmatprep.mubr.msk.bf16.mxu0 %vm25057_vm1, %v25056_v7 }
0x1758   : > { %21501 = vmatpush3.bf16.xpose.msra.mxu1 %v23157_v40  ;;  %21549 = vmatpush3.bf16.xpose.msra.mxu0 %v23158_v38 }
0x1759   : > { %21506 = vmatprep.subr.bf16.mxu1 %v25056_v7  ;;  %21562 = vmatprep.subr.bf16.mxu0 %v25056_v7 }
0x175f   : > { %21503 = vmatmul.mubr.bf16.vlgmr.msra.gmra.mxu1 %v27387_v13  ;;  %21551 = vmatmul.mubr.bf16.vlgmr.msra.gmra.mxu0 %v27387_v13 }
0x1760   : > { %21507 = vmatpush3.bf16.xpose.msra.mxu1 %v23159_v49  ;;  %21563 = vmatpush3.bf16.xpose.msra.mxu0 %v23160_v43 }
0x1761   : > { %21508 = vmatprep.subr.bf16.mxu1 %v25056_v7  ;;  %21564 = vmatprep.subr.bf16.mxu0 %v25056_v7 }
0x1762   : > { %21510 = vmatprep.mubr.msk.bf16.mxu1 %vm25057_vm1, %v25056_v7  ;;  %21566 = vmatprep.mubr.msk.bf16.mxu0 %vm25057_vm1, %v25056_v7 }
0x1768   : > { %21509 = vmatpush3.bf16.xpose.msra.mxu1 %v23161_v56  ;;  %21565 = vmatpush3.bf16.xpose.msra.mxu0 %v23162_v24 }
0x1769   : > { %21522 = vmatprep.subr.bf16.mxu1 %v25056_v7  ;;  %21578 = vmatprep.subr.bf16.mxu0 %v25056_v7 }
0x176f   : > { %21511 = vmatmul.mubr.bf16.vlgmr.msra.gmra.mxu1 %v27387_v13  ;;  %21567 = vmatmul.mubr.bf16.vlgmr.msra.gmra.mxu0 %v27387_v13 }
0x1770   : > { %21523 = vmatpush3.bf16.xpose.msra.mxu1 %v23163_v52  ;;  %21526 = vmatprep.mubr.msk.bf16.mxu1 %vm25057_vm1, %v25056_v7 }
0x1771   : > { %21524 = vmatprep.subr.bf16.mxu1 %v25056_v7  ;;  %21580 = vmatprep.mubr.msk.bf16.mxu0 %vm25057_vm1, %v25056_v7 }
0x1778   : > { %21525 = vmatpush3.bf16.xpose.msra.mxu1 %v23164_v54 }
0x1779   : > { %21538 = vmatprep.subr.bf16.mxu1 %v25056_v7 }
0x177f   : > { %21527 = vmatmul.mubr.bf16.vlgmr.msra.gmra.mxu1 %v27387_v13 }
0x1780   : > { %21539 = vmatpush3.bf16.xpose.msra.mxu1 %v23165_v60  ;;  %21542 = vmatprep.mubr.msk.bf16.mxu1 %vm25057_vm1, %v25056_v7  ;;  %v20624_v60 = vld [vmem:[#allocation54 + $0x1] ss:$0 sm:$0xff] }
0x1781   : > { %21540 = vmatprep.subr.bf16.mxu1 %v25056_v7 }
0x1788   : > { %21541 = vmatpush3.bf16.xpose.msra.mxu1 %v23166_v17 }
0x1789   : > { %21554 = vmatprep.subr.bf16.mxu1 %v25056_v7 }
0x178f   : > { %21543 = vmatmul.mubr.bf16.vlgmr.msra.gmra.mxu1 %v27387_v13 }
0x1790   : > { %21555 = vmatpush3.bf16.xpose.msra.mxu1 %v23167_v30  ;;  %21558 = vmatprep.mubr.msk.bf16.mxu1 %vm25057_vm1, %v25056_v7 }
0x1791   : > { %21556 = vmatprep.subr.bf16.mxu1 %v25056_v7 }
0x1798   : > { %21557 = vmatpush3.bf16.xpose.msra.mxu1 %v23168_v15 }
0x1799   : > { %21570 = vmatprep.subr.bf16.mxu1 %v25056_v7 }
0x179f   : > { %21559 = vmatmul.mubr.bf16.vlgmr.msra.gmra.mxu1 %v27387_v13 }
0x17a0   : > { %21571 = vmatpush3.bf16.xpose.msra.mxu1 %v23169_v25  ;;  %21574 = vmatprep.mubr.msk.bf16.mxu1 %vm25057_vm1, %v25056_v7 }
0x17a1   : > { %21572 = vmatprep.subr.bf16.mxu1 %v25056_v7 }
0x17a8   : > { %21573 = vmatpush3.bf16.xpose.msra.mxu1 %v23170_v27  ;;  %v20612_v27 = vld [vmem:[#allocation52 + $0x1] ss:$0 sm:$0xff] }
0x17a9   : > { %21584 = vmatprep.subr.bf16.mxu1 %v25056_v7 }
0x17af   : > { %21575 = vmatmul.mubr.bf16.vlgmr.msra.gmra.mxu1 %v27387_v13 }
0x17b0   : > { %21586 = vmatprep.mubr.msk.bf16.mxu1 %vm25057_vm1, %v25056_v7 }
0x17ff   : > { %v14814_v23 = vpop.f32.mrf.mxu1  ;;  %v15046_v61 = vpop.f32.mrf.mxu0 }
0x1800   : > { %v15047_v9 = vadd.f32 %v20623_v19, %v15046_v61  ;;  %v14815_v50 = vadd.f32 %v20611_v2, %v14814_v23 }
0x1801   : > { %v21488_v21 = vpop.f32.mrf.mxu1  ;;  %v21520_v53 = vpop.f32.mrf.mxu0 }
0x1802   : > { %v15444_v29 = vpack.c.bf16 %v15047_v9, %v15047_v9  ;;  %v15440_v18 = vpack.c.bf16 %v14815_v50, %v14815_v50  ;;  %v20626_v53 = vld [vmem:[#allocation54 + $0x3] ss:$0 sm:$0xff] }
0x1803   : > { %v14817_v33 = vpop.f32.mrf.mxu1  ;;  %v15049_v45 = vpop.f32.mrf.mxu0 }
0x1804   : > { %v15453_v36 = vsel %vm15448_vm6, %v15444_v29, 0 }
0x1805   : > { %v21489_v5 = vpop.f32.mrf.mxu1  ;;  %v21521_v51 = vpop.f32.mrf.mxu0  ;;  %21579 = vmatpush3.bf16.xpose.msra.mxu0 %v15453_v36  ;;  %v20614_v36 = vld [vmem:[#allocation52 + $0x3] ss:$0 sm:$0xff] }
0x1806   : > { %21590 = vmatprep.subr.bf16.mxu0 %v25056_v7 }
0x180c   : > { %21581 = vmatmul.mubr.msk.bf16.vlgmr.msra.gmra.mxu0 %vm15448_vm6, %v15440_v18 }
0x180d   : > { %21592 = vmatprep.mubr.msk.bf16.mxu0 %vm25057_vm1, %v25056_v7 }
0x180f   : > { %v14866_v14 = vpop.f32.mrf.mxu1  ;;  %v15150_v28 = vpop.f32.mrf.mxu0 }
0x1810   : > { %v15151_v0 = vadd.f32 %v20625_v41, %v15150_v28  ;;  %v14867_v9 = vadd.f32 %v20612_v27, %v14866_v14  ;;  %v20636_v14 = vld [vmem:[#allocation55 + $0x1] ss:$0 sm:$0xff] }
0x1811   : > { %v21496_v31 = vpop.f32.mrf.mxu1  ;;  %v21536_v20 = vpop.f32.mrf.mxu0 }
0x1812   : > { %v15446_v12 = vpack.c.bf16 %v15151_v0, %v15151_v0  ;;  %v15441_v21 = vpack.c.bf16 %v14867_v9, %v14867_v9 }
0x1813   : > { %v14869_v35 = vpop.f32.mrf.mxu1  ;;  %v15153_v55 = vpop.f32.mrf.mxu0 }
0x1814   : > { %v15545_v3 = vsel %vm15448_vm6, %v15446_v12, 0 }
0x1815   : > { %v21497_v59 = vpop.f32.mrf.mxu1  ;;  %v21537_v48 = vpop.f32.mrf.mxu0  ;;  %21591 = vmatpush3.bf16.xpose.msra.mxu0 %v15545_v3 }
0x1816   : > { %21602 = vmatprep.subr.bf16.mxu0 %v25056_v7 }
0x181f   : > { %v14918_v10 = vpop.f32.mrf.mxu1  ;;  %v15278_v4 = vpop.f32.mrf.mxu0 }
0x1820   : > { %v14919_v42 = vadd.f32 %v20613_v1, %v14918_v10  ;;  %v15279_v63 = vadd.f32 %v20635_v44, %v15278_v4 }
0x1821   : > { %v21504_v32 = vpop.f32.mrf.mxu1  ;;  %v21552_v37 = vpop.f32.mrf.mxu0 }
0x1822   : > { %v15442_v22 = vpack.c.bf16 %v14919_v42, %v14919_v42  ;;  %v15685_v6 = vpack.c.bf16 %v15279_v63, %v15279_v63 }
0x1823   : > { %v14921_v13 = vpop.f32.mrf.mxu1  ;;  %v15281_v62 = vpop.f32.mrf.mxu0 }
0x1824   : > { %v15693_v16 = vsel %vm6176_vm3, %v15685_v6, 0  ;;  %21593 = vmatmul.mubr.msk.bf16.vlgmr.msra.gmra.mxu0 %vm15448_vm6, %v15442_v22 }
0x1825   : > { %v21505_v11 = vpop.f32.mrf.mxu1  ;;  %v21553_v46 = vpop.f32.mrf.mxu0  ;;  %21603 = vmatpush3.bf16.msra.mxu0 %v15693_v16  ;;  %21604 = vmatprep.mubr.msk.bf16.mxu0 %vm25057_vm1, %v25056_v7 }
0x1826   : > { %21614 = vmatprep.subr.bf16.mxu0 %v25056_v7 }
0x182f   : > { %v14970_v40 = vpop.f32.mrf.mxu1  ;;  %v27457_v38 = vpop.f32.mrf.mxu0 }
0x1830   : > { %v14971_v18 = vadd.f32 %v20614_v36, %v14970_v40 }
0x1831   : > { %v21512_v49 = vpop.f32.mrf.mxu1  ;;  %v21568_v43 = vpop.f32.mrf.mxu0 }
0x1832   : > { %v15443_v41 = vpack.c.bf16 %v14971_v18, %v14971_v18 }
0x1833   : > { %v14973_v56 = vpop.f32.mrf.mxu1  ;;  %v15385_v24 = vpop.f32.mrf.mxu0 }
0x1835   : > { %v21513_v52 = vpop.f32.mrf.mxu1  ;;  %v21569_v54 = vpop.f32.mrf.mxu0 }
0x183f   : > { %v15098_v17 = vpop.f32.mrf.mxu1 }
0x1840   : > { %v15099_v30 = vadd.f32 %v20624_v60, %v15098_v17 }
0x1841   : > { %v21528_v15 = vpop.f32.mrf.mxu1 }
0x1842   : > { %v15445_v25 = vpack.c.bf16 %v15099_v30, %v15099_v30 }
0x1843   : > { %v15101_v19 = vpop.f32.mrf.mxu1 }
0x1844   : > { %v15499_v23 = vsel %vm15448_vm6, %v15445_v25, 0 }
0x1845   : > { %v21529_v61 = vpop.f32.mrf.mxu1  ;;  %21585 = vmatpush3.bf16.xpose.msra.mxu1 %v15499_v23 }
0x1846   : > { %21596 = vmatprep.subr.bf16.mxu1 %v25056_v7 }
0x184c   : > { %21587 = vmatmul.mubr.msk.bf16.vlgmr.msra.gmra.mxu1 %vm15448_vm6, %v15441_v21  ;;  %v20637_v21 = vld [vmem:[#allocation55 + $0x2] ss:$0 sm:$0xff] }
0x184d   : > { %21598 = vmatprep.mubr.msk.bf16.mxu1 %vm25057_vm1, %v25056_v7 }
0x184f   : > { %v15202_v29 = vpop.f32.mrf.mxu1 }
0x1850   : > { %v15203_v2 = vadd.f32 %v20626_v53, %v15202_v29  ;;  %v15383_v53 = vadd.f32 %v20637_v21, %v27457_v38 }
0x1851   : > { %v21544_v33 = vpop.f32.mrf.mxu1 }
0x1852   : > { %v15447_v45 = vpack.c.bf16 %v15203_v2, %v15203_v2  ;;  %v15687_v29 = vpack.c.bf16 %v15383_v53, %v15383_v53  ;;  %v23177_v53 = vld [vmem:[%s27977_s28 + $0x38] sm:$0xff]  }
0x1853   : > { %v15205_v5 = vpop.f32.mrf.mxu1 }
0x1854   : > { %v15591_v51 = vsel %vm15448_vm6, %v15447_v45, 0  ;;  %v15785_v36 = vsel %vm6176_vm3, %v15687_v29, 0 }
0x1855   : > { %v21545_v50 = vpop.f32.mrf.mxu1  ;;  %21597 = vmatpush3.bf16.xpose.msra.mxu1 %v15591_v51 }
0x1856   : > { %21608 = vmatprep.subr.bf16.mxu1 %v25056_v7 }
0x185c   : > { %21599 = vmatmul.mubr.msk.bf16.vlgmr.msra.gmra.mxu1 %vm15448_vm6, %v15443_v41 }
0x185d   : > { %21610 = vmatprep.mubr.msk.bf16.mxu1 %vm25057_vm1, %v25056_v7 }
0x185f   : > { %v15330_v28 = vpop.f32.mrf.mxu1 }
0x1860   : > { %v15331_v0 = vadd.f32 %v20636_v14, %v15330_v28  ;;  %v23171_v14 = vld [vmem:[%s27977_s28 + $0x8] sm:$0xff]  }
0x1861   : > { %v21560_v31 = vpop.f32.mrf.mxu1 }
0x1862   : > { %v15686_v20 = vpack.c.bf16 %v15331_v0, %v15331_v0 }
0x1863   : > { %v15333_v12 = vpop.f32.mrf.mxu1 }
0x1864   : > { %v15739_v35 = vsel %vm6176_vm3, %v15686_v20, 0  ;;  %v20638_v20 = vld [vmem:[#allocation55 + $0x3] ss:$0 sm:$0xff] }
0x1865   : > { %v21561_v55 = vpop.f32.mrf.mxu1  ;;  %21609 = vmatpush3.bf16.msra.mxu1 %v15739_v35 }
0x1866   : > { %21620 = vmatprep.subr.bf16.mxu1 %v25056_v7 }
0x186f   : > { %v27471_v3 = vpop.f32.mrf.mxu1 }
0x1870   : > { %v15435_v12 = vadd.f32 %v20638_v20, %v27471_v3  ;;  %v23172_v3 = vld [vmem:[%s27977_s28] sm:$0xff]  }
0x1871   : > { %v21576_v59 = vpop.f32.mrf.mxu1 }
0x1872   : > { %v15688_v55 = vpack.c.bf16 %v15435_v12, %v15435_v12 }
0x1873   : > { %v15437_v48 = vpop.f32.mrf.mxu1 }
0x1875   : > { %v21577_v1 = vpop.f32.mrf.mxu1 }
0x18cc   : > { %v15489_v44 = vpop.f32.mrf.mxu0 }
0x18cd   : > { %v15633_v10 = vmul.f32 0.125, %v15489_v44 }
0x18ce   : > { %v21582_v4 = vpop.f32.mrf.mxu0 }
0x18cf   : > { %v15637_v42 = vadd.f32 %v15633_v10, %v26230_v47  ;;  %v15831_v4 = vsel %vm6176_vm3, %v15688_v55, 0 }
0x18d0   : > { %v15492_v63 = vpop.f32.mrf.mxu0 }
0x18d1   : > { %v15641_v32 = vsel %vm6028_vm5, %v15637_v42, -inf }
0x18d2   : > { %15642 = vmax.xlane.f32.xlu0 %v15641_v32  ;;  %v21583_v37 = vpop.f32.mrf.mxu0 }
0x18d3   : > { %v23175_v37 = vld [vmem:[%s27977_s28 + $0x18] sm:$0xff]  }
0x18e4   : > { %v15581_v22 = vpop.f32.mrf.mxu0 }
0x18e5   : > { %v15635_v6 = vmul.f32 0.125, %v15581_v22  ;;  %v23176_v22 = vld [vmem:[%s27977_s28 + $0x10] sm:$0xff]  }
0x18e6   : > { %v21594_v13 = vpop.f32.mrf.mxu0 }
0x18e7   : > { %v15639_v62 = vadd.f32 %v15635_v6, %v26230_v47 }
0x18e8   : > { %v15584_v16 = vpop.f32.mrf.mxu0 }
0x18e9   : > { %v15647_v11 = vsel %vm6028_vm5, %v15639_v62, -inf }
0x18ea   : > { %15648 = vmax.xlane.f32.xlu0 %v15647_v11  ;;  %v21595_v46 = vpop.f32.mrf.mxu0 }
0x18eb   : > { %v23173_v46 = vld [vmem:[%s27977_s28 + $0x28] sm:$0xff]  }
0x190c   : > { %v15535_v40 = vpop.f32.mrf.mxu1 }
0x190d   : > { %v15634_v49 = vmul.f32 0.125, %v15535_v40 }
0x190e   : > { %v21588_v43 = vpop.f32.mrf.mxu1 }
0x190f   : > { %v15638_v56 = vadd.f32 %v15634_v49, %v26230_v47 }
0x1910   : > { %v15538_v24 = vpop.f32.mrf.mxu1 }
0x1911   : > { %v15644_v52 = vsel %vm6028_vm5, %v15638_v56, -inf }
0x1912   : > { %15645 = vmax.xlane.f32.xlu1 %v15644_v52  ;;  %v21589_v54 = vpop.f32.mrf.mxu1 }
0x191c   : > { %v15627_v60 = vpop.f32.mrf.mxu1 }
0x191d   : > { %v15636_v17 = vmul.f32 0.125, %v15627_v60 }
0x191e   : > { %v21600_v30 = vpop.f32.mrf.mxu1 }
0x191f   : > { %v15640_v15 = vadd.f32 %v15636_v17, %v26230_v47 }
0x1920   : > { %v15630_v25 = vpop.f32.mrf.mxu1 }
0x1921   : > { %v15650_v27 = vsel %vm6028_vm5, %v15640_v15, -inf }
0x1922   : > { %15651 = vmax.xlane.f32.xlu1 %v15650_v27  ;;  %v21601_v19 = vpop.f32.mrf.mxu1 }
0x195b   : > { %v15643_v23 = vpop.xlane.xlu0 %15642 }
0x195c   : > { %v15653_v61 = vsub.f32 %v15637_v42, %v15643_v23 }
0x195e   : > { %v15657_v9 = vmul.f32 1.442695, %v15653_v61 }
0x1960   : > { %23509 = vpow2.f32 %v15657_v9 }
0x196d   : > { %v23510_v2 = vpop.eup %23509 }
0x196e   : > { %v15681_v33 = vpack.c.bf16 %v23510_v2, %v23510_v2  ;;  %v15665_v45 = vsel %vm6028_vm5, %v23510_v2, 0.0 }
0x196f   : > { %15666 = vadd.xlane.f32.xlu0 %v15665_v45  ;;  %v23178_v45 = vld [vmem:[%s27977_s28 + $0x30] sm:$0xff]  }
0x1970   : > { %21605 = vmatmul.mubr.msk.bf16.vlgmr.msra.gmra.mxu0 %vm6028_vm5, %v15681_v33 }
0x1971   : > { %21615 = vmatpush3.bf16.msra.mxu0 %v15785_v36  ;;  %21616 = vmatprep.mubr.msk.bf16.mxu0 %vm25057_vm1, %v25056_v7 }
0x1972   : > { %21626 = vmatprep.subr.bf16.mxu0 %v25056_v7 }
0x1973   : > { %v15649_v5 = vpop.xlane.xlu0 %15648 }
0x1974   : > { %v15655_v51 = vsub.f32 %v15639_v62, %v15649_v5 }
0x1976   : > { %v15661_v38 = vmul.f32 1.442695, %v15655_v51 }
0x1978   : > { %23511 = vpow2.f32 %v15661_v38 }
0x1985   : > { %v23512_v50 = vpop.eup %23511 }
0x1986   : > { %v15683_v18 = vpack.c.bf16 %v23512_v50, %v23512_v50  ;;  %v15671_v41 = vsel %vm6028_vm5, %v23512_v50, 0.0 }
0x1987   : > { %15672 = vadd.xlane.f32.xlu0 %v15671_v41 }
0x1988   : > { %21617 = vmatmul.mubr.msk.bf16.vlgmr.msra.gmra.mxu0 %vm6028_vm5, %v15683_v18 }
0x1989   : > { %21630 = vmatprep.mubr.msk.bf16.mxu0 %vm25057_vm1, %v25056_v7  ;;  %21627 = vmatpush3.bf16.msra.mxu0 %v23171_v14 }
0x198a   : > { %21628 = vmatprep.subr.bf16.mxu0 %v25056_v7 }
0x198d   : > { %21629 = vmatpush3.bf16.msra.mxu0 %v23172_v3 }
0x198e   : > { %21642 = vmatprep.subr.bf16.mxu0 %v25056_v7 }
0x199b   : > { %v15646_v28 = vpop.xlane.xlu1 %15645 }
0x199c   : > { %v15654_v0 = vsub.f32 %v15638_v56, %v15646_v28  ;;  %v23174_v56 = vld [vmem:[%s27977_s28 + $0x20] sm:$0xff]  }
0x199e   : > { %v15659_v31 = vmul.f32 1.442695, %v15654_v0 }
0x19a0   : > { %23513 = vpow2.f32 %v15659_v31 }
0x19ab   : > { %v15652_v35 = vpop.xlane.xlu1 %15651 }
0x19ac   : > { %v15656_v59 = vsub.f32 %v15640_v15, %v15652_v35 }
0x19ad   : > { %v23514_v48 = vpop.eup %23513 }
0x19ae   : > { %v15682_v1 = vpack.c.bf16 %v23514_v48, %v23514_v48  ;;  %v15663_v44 = vmul.f32 1.442695, %v15656_v59  ;;  %v15668_v10 = vsel %vm6028_vm5, %v23514_v48, 0.0 }
0x19af   : > { %15669 = vadd.xlane.f32.xlu1 %v15668_v10 }
0x19b0   : > { %23515 = vpow2.f32 %v15663_v44  ;;  %21611 = vmatmul.mubr.msk.bf16.vlgmr.msra.gmra.mxu1 %vm6028_vm5, %v15682_v1 }
0x19b1   : > { %21621 = vmatpush3.bf16.msra.mxu1 %v15831_v4  ;;  %21622 = vmatprep.mubr.msk.bf16.mxu1 %vm25057_vm1, %v25056_v7 }
0x19b2   : > { %21634 = vmatprep.subr.bf16.mxu1 %v25056_v7 }
0x19bd   : > { %v23516_v42 = vpop.eup %23515 }
0x19be   : > { %v15684_v63 = vpack.c.bf16 %v23516_v42, %v23516_v42  ;;  %v15674_v32 = vsel %vm6028_vm5, %v23516_v42, 0.0 }
0x19bf   : > { %15675 = vadd.xlane.f32.xlu1 %v15674_v32  ;;  %v20667_v32 = vld [vmem:[#allocation57] ss:$0 sm:$0xff] }
0x19c0   : > { %21623 = vmatmul.mubr.msk.bf16.vlgmr.msra.gmra.mxu1 %vm6028_vm5, %v15684_v63 }
0x19c1   : > { %21638 = vmatprep.mubr.msk.bf16.mxu1 %vm25057_vm1, %v25056_v7  ;;  %21635 = vmatpush3.bf16.msra.mxu1 %v23175_v37 }
0x19c2   : > { %21636 = vmatprep.subr.bf16.mxu1 %v25056_v7 }
0x19c5   : > { %21637 = vmatpush3.bf16.msra.mxu1 %v23176_v22 }
0x19c6   : > { %21650 = vmatprep.subr.bf16.mxu1 %v25056_v7 }
0x19f8   : > { %v15667_v6 = vpop.xlane.xlu0 %15666 }
0x19f9   : > { %23517 = vrcp.f32 %v15667_v6 }
0x1a06   : > { %v23518_v13 = vpop.eup %23517 }
0x1a10   : > { %v15673_v24 = vpop.xlane.xlu0 %15672 }
0x1a11   : > { %23519 = vrcp.f32 %v15673_v24 }
0x1a1e   : > { %v23520_v52 = vpop.eup %23519 }
0x1a30   : > { %v15729_v62 = vpop.f32.mrf.mxu0 }
0x1a31   : > { %v15873_v16 = vmul.f32 %v23518_v13, %v15729_v62  ;;  %v23179_v62 = vld [vmem:[%s27978_s6 + $0xe0] ss:$16 sps:$4 sm:$0xff]  }
0x1a32   : > { %v21606_v11 = vpop.f32.mrf.mxu0 }
0x1a33   : > { %v15877_v40 = vpack.c.bf16 %v15873_v16, %v15873_v16  ;;  %v23181_v16 = vld [vmem:[%s27978_s6 + $0xe4] ss:$16 sps:$4 sm:$0xff]   ;;  %v23182_v11 = vld [vmem:[%s27978_s6 + $0xe8] ss:$16 sps:$4 sm:$0xff]  }
0x1a34   : > { %v15732_v49 = vpop.f32.mrf.mxu0 }
0x1a35   : > { %21631 = vmatmul.mubr.msk.bf16.vlgmr.msra.gmra.mxu0 %vm15448_vm6, %v15877_v40  ;;  %v23187_v40 = vld [vmem:[%s27978_s6 + $0xc4] ss:$16 sps:$4 sm:$0xff]   ;;  %v23190_v49 = vld [vmem:[%s27978_s6 + $0xcc] ss:$16 sps:$4 sm:$0xff]  }
0x1a36   : > { %v21607_v43 = vpop.f32.mrf.mxu0  ;;  %21643 = vmatpush3.bf16.msra.mxu0 %v23173_v46  ;;  %21646 = vmatprep.mubr.msk.bf16.mxu0 %vm25057_vm1, %v25056_v7  ;;  %v23184_v46 = vld [vmem:[%s27978_s6 + $0xec] ss:$16 sps:$4 sm:$0xff]  }
0x1a37   : > { %21644 = vmatprep.subr.bf16.mxu0 %v25056_v7  ;;  %v23188_v43 = vld [vmem:[%s27978_s6 + $0xc8] ss:$16 sps:$4 sm:$0xff]  }
0x1a38   : > { %v15670_v27 = vpop.xlane.xlu1 %15669 }
0x1a39   : > { %23521 = vrcp.f32 %v15670_v27  ;;  %v23202_v27 = vld [vmem:[%s27978_s6 + $0x8c] ss:$16 sps:$4 sm:$0xff]  }
0x1a3a   : > { %21645 = vmatpush3.bf16.msra.mxu0 %v23174_v56 }
0x1a3b   : > { %16319 = vmatprep.subr.bf16.mxu0 %v23181_v16  ;;  %v23238_v16 = vld [vmem:[%s27979_s2 + $0xa8] sm:$0xff]  }
0x1a46   : > { %v23522_v19 = vpop.eup %23521 }
0x1a48   : > { %v15821_v54 = vpop.f32.mrf.mxu0  ;;  %v15676_v23 = vpop.xlane.xlu1 %15675 }
0x1a49   : > { %v15875_v60 = vmul.f32 %v23520_v52, %v15821_v54  ;;  %23523 = vrcp.f32 %v15676_v23  ;;  %v23200_v23 = vld [vmem:[%s27978_s6 + $0x88] ss:$16 sps:$4 sm:$0xff]  }
0x1a4a   : > { %v21618_v17 = vpop.f32.mrf.mxu0 }
0x1a4b   : > { %v15879_v30 = vpack.c.bf16 %v15875_v60, %v15875_v60  ;;  %v23193_v60 = vld [vmem:[%s27978_s6 + $0xa4] ss:$16 sps:$4 sm:$0xff]   ;;  %v23196_v17 = vld [vmem:[%s27978_s6 + $0xac] ss:$16 sps:$4 sm:$0xff]  }
0x1a4c   : > { %v15824_v15 = vpop.f32.mrf.mxu0 }
0x1a4d   : > { %21647 = vmatmul.mubr.msk.bf16.vlgmr.msra.gmra.mxu0 %vm15448_vm6, %v15879_v30  ;;  %v23191_v30 = vld [vmem:[%s27978_s6 + $0xa0] ss:$16 sps:$4 sm:$0xff]   ;;  %v23194_v15 = vld [vmem:[%s27978_s6 + $0xa8] ss:$16 sps:$4 sm:$0xff]  }
0x1a4e   : > { %v21619_v25 = vpop.f32.mrf.mxu0  ;;  %16351 = vmatprep.mubr.bf16.mxu0 %v25059_v8  ;;  %16320 = vmatpush1.bf16.msra.mxu0 %v23179_v62  ;;  %v23237_v62 = vld [vmem:[%s27979_s2 + $0x28] sm:$0xff]  }
0x1a4f   : > { %16321 = vmatprep.subr.bf16.mxu0 %v23187_v40  ;;  %v23199_v25 = vld [vmem:[%s27978_s6 + $0x84] ss:$16 sps:$4 sm:$0xff]  }
0x1a50   : > { %v23241_v40 = vld [vmem:[%s27979_s2 + $0x20] sm:$0xff]  }
0x1a56   : > { %v23524_v36 = vpop.eup %23523 }
0x1a70   : > { %v15775_v61 = vpop.f32.mrf.mxu1 }
0x1a71   : > { %v15874_v9 = vmul.f32 %v23522_v19, %v15775_v61  ;;  %v23197_v19 = vld [vmem:[%s27978_s6 + $0x80] ss:$16 sps:$4 sm:$0xff]   ;;  %v23205_v61 = vld [vmem:[%s27978_s6 + $0x64] ss:$16 sps:$4 sm:$0xff]  }
0x1a72   : > { %v21612_v21 = vpop.f32.mrf.mxu1 }
0x1a73   : > { %v15878_v29 = vpack.c.bf16 %v15874_v9, %v15874_v9  ;;  %v23208_v9 = vld [vmem:[%s27978_s6 + $0x6c] ss:$16 sps:$4 sm:$0xff]   ;;  %v23203_v21 = vld [vmem:[%s27978_s6 + $0x60] ss:$16 sps:$4 sm:$0xff]  }
0x1a74   : > { %v15778_v2 = vpop.f32.mrf.mxu1 }
0x1a75   : > { %21639 = vmatmul.mubr.msk.bf16.vlgmr.msra.gmra.mxu1 %vm15448_vm6, %v15878_v29  ;;  %v23211_v29 = vld [vmem:[%s27978_s6 + $0x44] ss:$16 sps:$4 sm:$0xff]   ;;  %v23214_v2 = vld [vmem:[%s27978_s6 + $0x4c] ss:$16 sps:$4 sm:$0xff]  }
0x1a76   : > { %v21613_v33 = vpop.f32.mrf.mxu1  ;;  %21651 = vmatpush3.bf16.msra.mxu1 %v23177_v53  ;;  %21654 = vmatprep.mubr.msk.bf16.mxu1 %vm25057_vm1, %v25056_v7  ;;  %v23206_v53 = vld [vmem:[%s27978_s6 + $0x68] ss:$16 sps:$4 sm:$0xff]  }
0x1a77   : > { %21652 = vmatprep.subr.bf16.mxu1 %v25056_v7  ;;  %v23209_v33 = vld [vmem:[%s27978_s6 + $0x40] ss:$16 sps:$4 sm:$0xff]  }
0x1a7a   : > { %21653 = vmatpush3.bf16.msra.mxu1 %v23178_v45  ;;  %v23212_v45 = vld [vmem:[%s27978_s6 + $0x48] ss:$16 sps:$4 sm:$0xff]  }
0x1a7b   : > { %16360 = vmatprep.subr.bf16.mxu1 %v23184_v46  ;;  %v23240_v46 = vld [vmem:[%s27979_s2 + $0xe0] sm:$0xff]  }
0x1a80   : > { %v15867_v5 = vpop.f32.mrf.mxu1 }
0x1a81   : > { %v15876_v51 = vmul.f32 %v23524_v36, %v15867_v5  ;;  %v23217_v36 = vld [vmem:[%s27978_s6 + $0x24] ss:$16 sps:$4 sm:$0xff]   ;;  %v23220_v5 = vld [vmem:[%s27978_s6 + $0x2c] ss:$16 sps:$4 sm:$0xff]  }
0x1a82   : > { %v21624_v38 = vpop.f32.mrf.mxu1 }
0x1a83   : > { %v15880_v50 = vpack.c.bf16 %v15876_v51, %v15876_v51  ;;  %v23215_v51 = vld [vmem:[%s27978_s6 + $0x20] ss:$16 sps:$4 sm:$0xff]   ;;  %v23218_v38 = vld [vmem:[%s27978_s6 + $0x28] ss:$16 sps:$4 sm:$0xff]  }
0x1a84   : > { %v15870_v18 = vpop.f32.mrf.mxu1 }
0x1a85   : > { %21655 = vmatmul.mubr.msk.bf16.vlgmr.msra.gmra.mxu1 %vm15448_vm6, %v15880_v50  ;;  %v23223_v50 = vld [vmem:[%s27978_s6 + $0x4] ss:$16 sps:$4 sm:$0xff]   ;;  %v23226_v18 = vld [vmem:[%s27978_s6 + $0xc] ss:$16 sps:$4 sm:$0xff]  }
0x1a86   : > { %v21625_v41 = vpop.f32.mrf.mxu1  ;;  %16392 = vmatprep.mubr.bf16.mxu1 %v25059_v8  ;;  %16361 = vmatpush1.bf16.msra.mxu1 %v23182_v11  ;;  %v23239_v11 = vld [vmem:[%s27979_s2 + $0x60] sm:$0xff]  }
0x1a87   : > { %16362 = vmatprep.subr.bf16.mxu1 %v23190_v49  ;;  %v23221_v41 = vld [vmem:[%s27978_s6] ss:$16 sps:$4 sm:$0xff]  }
0x1a88   : > { %v23242_v49 = vld [vmem:[%s27979_s2 + $0xa0] sm:$0xff]  }
0x1a8a   : > { %16363 = vmatpush1.bf16.msra.mxu1 %v23188_v43  ;;  %v23244_v43 = vld [vmem:[%s27979_s2 + $0xd8] sm:$0xff]  }
0x1a8b   : > { %16364 = vmatprep.subr.bf16.mxu1 %v23196_v17  ;;  %v23250_v17 = vld [vmem:[%s27979_s2 + $0x90] sm:$0xff]  }
0x1a8e   : > { %16365 = vmatpush1.bf16.msra.mxu1 %v23194_v15  ;;  %v23252_v15 = vld [vmem:[%s27979_s2 + $0xc8] sm:$0xff]  }
0x1a8f   : > { %16366 = vmatprep.subr.bf16.mxu1 %v23202_v27  ;;  %v23254_v27 = vld [vmem:[%s27979_s2 + $0x88] sm:$0xff]  }
0x1a92   : > { %16367 = vmatpush1.bf16.msra.mxu1 %v23200_v23  ;;  %v23256_v23 = vld [vmem:[%s27979_s2 + $0xc0] sm:$0xff]  }
0x1a93   : > { %16368 = vmatprep.subr.bf16.mxu1 %v23208_v9  ;;  %v23258_v9 = vld [vmem:[%s27979_s2 + $0x80] sm:$0xff]  }
0x1a96   : > { %16369 = vmatpush1.bf16.msra.mxu1 %v23206_v53 }
0x1a97   : > { %16370 = vmatprep.subr.bf16.mxu1 %v23214_v2 }
0x1a9a   : > { %16371 = vmatpush1.bf16.msra.mxu1 %v23212_v45 }
0x1a9b   : > { %16372 = vmatprep.subr.bf16.mxu1 %v23220_v5 }
0x1a9e   : > { %16373 = vmatpush1.bf16.msra.mxu1 %v23218_v38 }
0x1a9f   : > { %16374 = vmatprep.subr.bf16.mxu1 %v23226_v18 }
0x1af5   : > { %v15930_v14 = vpop.f32.mrf.mxu0 }
0x1af7   : > { %v21632_v28 = vpop.f32.mrf.mxu0 }
0x1af9   : > { %v15933_v0 = vpop.f32.mrf.mxu0 }
0x1afb   : > { %v21633_v31 = vpop.f32.mrf.mxu0 }
0x1b0d   : > { %v16040_v20 = vpop.f32.mrf.mxu0 }
0x1b0f   : > { %v21648_v12 = vpop.f32.mrf.mxu0 }
0x1b10   : > { %v20668_v12 = vld [vmem:[#allocation58] ss:$0 sm:$0xff] }
0x1b11   : > { %v16043_v35 = vpop.f32.mrf.mxu0 }
0x1b13   : > { %v21649_v55 = vpop.f32.mrf.mxu0 }
0x1b14   : > { %v20669_v55 = vld [vmem:[#allocation60] ss:$0 sm:$0xff] }
0x1b35   : > { %v15985_v59 = vpop.f32.mrf.mxu1 }
0x1b36   : > { %v16101_v10 = vadd.f32 %v15985_v59, %v15930_v14  ;;  %v23224_v14 = vld [vmem:[%s27978_s6 + $0x8] ss:$16 sps:$4 sm:$0xff]  }
0x1b37   : > { %v21640_v48 = vpop.f32.mrf.mxu1  ;;  %16375 = vmatpush1.bf16.msra.mxu1 %v23224_v14 }
0x1b38   : > { %v16102_v4 = vadd.f32 %v16101_v10, %v16040_v20  ;;  %v23228_v10 = vld [vmem:[%s27979_s2 + $0xf8] sm:$0xff]  }
0x1b39   : > { %v15988_v1 = vpop.f32.mrf.mxu1  ;;  %21055 = vmatprep.subr.bf16.mxu1 %v23228_v10 }
0x1b3b   : > { %v21641_v44 = vpop.f32.mrf.mxu1 }
0x1b3c   : > { %v23227_v44 = vld [vmem:[%s27979_s2 + $0x78] sm:$0xff]  }
0x1b45   : > { %v16095_v3 = vpop.f32.mrf.mxu1 }
0x1b46   : > { %v16103_v42 = vadd.f32 %v16102_v4, %v16095_v3  ;;  %v23229_v4 = vld [vmem:[%s27979_s2 + $0x38] sm:$0xff]  }
0x1b47   : > { %v21656_v63 = vpop.f32.mrf.mxu1  ;;  %v23230_v3 = vld [vmem:[%s27979_s2 + $0xb8] sm:$0xff]  }
0x1b48   : > { %v16104_v37 = vadd.f32 %v16103_v42, %v27379_v34  ;;  %v23185_v34 = vld [vmem:[%s27978_s6 + $0xc0] ss:$16 sps:$4 sm:$0xff]  }
0x1b49   : > { %v16098_v22 = vpop.f32.mrf.mxu1  ;;  %16322 = vmatpush1.bf16.msra.mxu0 %v23185_v34  ;;  %v23231_v42 = vld [vmem:[%s27979_s2 + $0x70] sm:$0xff]   ;;  %v23243_v34 = vld [vmem:[%s27979_s2 + $0x58] sm:$0xff]  }
0x1b4a   : > { %v27528_v6 = vadd.f32 %v20667_v32, %v16104_v37  ;;  %16323 = vmatprep.subr.bf16.mxu0 %v23193_v60  ;;  %v23232_v63 = vld [vmem:[%s27979_s2 + $0xf0] sm:$0xff]   ;;  %v23235_v22 = vld [vmem:[%s27979_s2 + $0x68] sm:$0xff]  }
0x1b4b   : > { %v21657_v13 = vpop.f32.mrf.mxu1  ;;  %v23233_v32 = vld [vmem:[%s27979_s2 + $0x30] sm:$0xff]  }
0x1b4c   : > { %16112 = vadd.xlane.f32.xlu0 %v27528_v6  ;;  %v23234_v37 = vld [vmem:[%s27979_s2 + $0xb0] sm:$0xff]   ;;  %v23236_v13 = vld [vmem:[%s27979_s2 + $0xe8] sm:$0xff]  }
0x1b4d   : > { %16324 = vmatpush1.bf16.msra.mxu0 %v23191_v30  ;;  %v23249_v60 = vld [vmem:[%s27979_s2 + $0x10] sm:$0xff]   ;;  %v23251_v30 = vld [vmem:[%s27979_s2 + $0x48] sm:$0xff]  }
0x1b4e   : > { %16325 = vmatprep.subr.bf16.mxu0 %v23199_v25  ;;  %v23253_v25 = vld [vmem:[%s27979_s2 + $0x8] sm:$0xff]  }
0x1b51   : > { %16326 = vmatpush1.bf16.msra.mxu0 %v23197_v19  ;;  %v23255_v19 = vld [vmem:[%s27979_s2 + $0x40] sm:$0xff]  }
0x1b52   : > { %16327 = vmatprep.subr.bf16.mxu0 %v23205_v61  ;;  %v23257_v61 = vld [vmem:[%s27979_s2] sm:$0xff]  }
0x1b55   : > { %16328 = vmatpush1.bf16.msra.mxu0 %v23203_v21  ;;  %v14651_v21 = vld [vmem:[#allocation61] sm:$0xf] }
0x1b56   : > { %16329 = vmatprep.subr.bf16.mxu0 %v23211_v29  ;;  %v16142_v53 = vrot.slane %v14651_v21, %v25947_v57  ;;  %v16150_v29 = vrot.slane %v14651_v21, %v26586_v26  ;;  %v16146_v45 = vrot.slane %v14651_v21, %v25950_v58 }
0x1b59   : > { %16330 = vmatpush1.bf16.msra.mxu0 %v23209_v33 }
0x1b5a   : > { %16331 = vmatprep.subr.bf16.mxu0 %v23217_v36  ;;  %v16154_v36 = vrot.slane %v14651_v21, %v26591_v39 }
0x1b5d   : > { %16332 = vmatpush1.bf16.msra.mxu0 %v23215_v51 }
0x1b5e   : > { %16333 = vmatprep.subr.bf16.mxu0 %v23223_v50 }
0x1b61   : > { %16334 = vmatpush1.bf16.msra.mxu0 %v23221_v41 }
0x1b62   : > { %21033 = vmatprep.subr.bf16.mxu0 %v23227_v44 }
0x1bd5   : > { %v16113_v56 = vpop.xlane.xlu0 %16112 }
0x1bd6   : > { %v16114_v24 = vmul.f32 0.0078125, %v16113_v56  ;;  %v23245_v56 = vld [vmem:[%s27979_s2 + $0x18] sm:$0xff]  }
0x1bd8   : > { %v16115_v52 = vsub.f32 %v27528_v6, %v16114_v24  ;;  %v23246_v24 = vld [vmem:[%s27979_s2 + $0x98] sm:$0xff]  }
0x1bda   : > { %v16116_v54 = vmul.f32 %v16115_v52, %v16115_v52 }
0x1bdc   : > { %16117 = vadd.xlane.f32.xlu1 %v16116_v54  ;;  %v23248_v54 = vld [vmem:[%s27979_s2 + $0xd0] sm:$0xff]  }
0x1c65   : > { %v16118_v28 = vpop.xlane.xlu1 %16117 }
0x1c66   : > { %v16119_v0 = vmul.f32 0.0078125, %v16118_v28 }
0x1c68   : > { %v16120_v31 = vadd.f32 1e-05, %v16119_v0 }
0x1c6a   : > { %23525 = vrsqrt.f32 %v16120_v31 }
0x1c77   : > { %v23526_v20 = vpop.eup %23525 }
0x1c78   : > { %v16122_v35 = vmul.f32 %v23526_v20, %v16115_v52  ;;  %v23247_v52 = vld [vmem:[%s27979_s2 + $0x50] sm:$0xff]  }
0x1c7a   : > { %v16129_v59 = vmul.f32 %v20668_v12, %v16122_v35 }
0x1c7c   : > { %v16136_v48 = vadd.f32 %v20669_v55, %v16129_v59 }
0x1c7e   : > { %v16137_v1 = vpack.c.bf16 %v16136_v48, %v16136_v48 }
0x1c80   : > { %16352 = vmatmul.mubr.bf16.vlgmr.msra.gmra.mxu0 %v16137_v1  ;;  %16393 = vmatmul.mubr.bf16.vlgmr.msra.gmra.mxu1 %v16137_v1 }
0x1c81   : > { %21034 = vmatpush3.bf16.msra.mxu0 %v23229_v4  ;;  %21056 = vmatpush3.bf16.msra.mxu1 %v23230_v3 }
0x1c82   : > { %21035 = vmatprep.subr.bf16.mxu0 %v23231_v42  ;;  %21057 = vmatprep.subr.bf16.mxu1 %v23232_v63 }
0x1c85   : > { %21036 = vmatpush3.bf16.msra.mxu0 %v23233_v32  ;;  %21058 = vmatpush3.bf16.msra.mxu1 %v23234_v37 }
0x1c86   : > { %21037 = vmatprep.subr.bf16.mxu0 %v23235_v22  ;;  %21059 = vmatprep.subr.bf16.mxu1 %v23236_v13 }
0x1c89   : > { %21038 = vmatpush3.bf16.msra.mxu0 %v23237_v62  ;;  %21060 = vmatpush3.bf16.msra.mxu1 %v23238_v16 }
0x1c8a   : > { %21039 = vmatprep.subr.bf16.mxu0 %v23239_v11  ;;  %21061 = vmatprep.subr.bf16.mxu1 %v23240_v46 }
0x1c8d   : > { %21040 = vmatpush3.bf16.msra.mxu0 %v23241_v40  ;;  %21062 = vmatpush3.bf16.msra.mxu1 %v23242_v49 }
0x1c8e   : > { %21041 = vmatprep.subr.bf16.mxu0 %v23243_v34  ;;  %21063 = vmatprep.subr.bf16.mxu1 %v23244_v43 }
0x1c91   : > { %21042 = vmatpush3.bf16.msra.mxu0 %v23245_v56  ;;  %21064 = vmatpush3.bf16.msra.mxu1 %v23246_v24 }
0x1c92   : > { %21043 = vmatprep.subr.bf16.mxu0 %v23247_v52  ;;  %21065 = vmatprep.subr.bf16.mxu1 %v23248_v54 }
0x1c95   : > { %21044 = vmatpush3.bf16.msra.mxu0 %v23249_v60  ;;  %21066 = vmatpush3.bf16.msra.mxu1 %v23250_v17 }
0x1c96   : > { %21045 = vmatprep.subr.bf16.mxu0 %v23251_v30  ;;  %21067 = vmatprep.subr.bf16.mxu1 %v23252_v15 }
0x1c99   : > { %21046 = vmatpush3.bf16.msra.mxu0 %v23253_v25  ;;  %21068 = vmatpush3.bf16.msra.mxu1 %v23254_v27 }
0x1c9a   : > { %21047 = vmatprep.subr.bf16.mxu0 %v23255_v19  ;;  %21069 = vmatprep.subr.bf16.mxu1 %v23256_v23 }
0x1c9d   : > { %21048 = vmatpush3.bf16.msra.mxu0 %v23257_v61  ;;  %21070 = vmatpush3.bf16.msra.mxu1 %v23258_v9 }
0x1c9e   : > { %21658 = vmatprep.subr.bf16.mxu0 %v25056_v7  ;;  %21666 = vmatprep.subr.bf16.mxu1 %v25056_v7 }
0x1d40   : > { %v16353_v2 = vpop.f32.mrf.mxu0  ;;  %v16394_v33 = vpop.f32.mrf.mxu1 }
0x1d41   : > { %v16354_v5 = vadd.f32 %v16353_v2, %v16142_v53  ;;  %v16395_v51 = vadd.f32 %v16394_v33, %v16150_v29 }
0x1d42   : > { %v16355_v38 = vpop.f32.mrf.mxu0  ;;  %v16396_v50 = vpop.f32.mrf.mxu1 }
0x1d43   : > { %v16405_v18 = vmul.f32 0.044715, %v16354_v5  ;;  %v16407_v41 = vmul.f32 0.044715, %v16395_v51  ;;  %v16356_v14 = vadd.f32 %v16355_v38, %v16146_v45  ;;  %v16397_v28 = vadd.f32 %v16396_v50, %v16154_v36 }
0x1d44   : > { %v16357_v0 = vpop.f32.mrf.mxu0  ;;  %v16398_v31 = vpop.f32.mrf.mxu1  ;;  %v16401_v56 = vmul.f32 0.5, %v16354_v5  ;;  %v16403_v52 = vmul.f32 0.5, %v16395_v51 }
0x1d45   : > { %v16409_v20 = vmul.f32 %v16405_v18, %v16354_v5  ;;  %v16411_v12 = vmul.f32 %v16407_v41, %v16395_v51  ;;  %v16406_v35 = vmul.f32 0.044715, %v16356_v14  ;;  %v16408_v55 = vmul.f32 0.044715, %v16397_v28  ;;  %v20734_v41 = vld [vmem:[#allocation63] ss:$0 sm:$0xff] }
0x1d46   : > { %v16358_v59 = vpop.f32.mrf.mxu0  ;;  %v16399_v48 = vpop.f32.mrf.mxu1  ;;  %v16402_v54 = vmul.f32 0.5, %v16356_v14  ;;  %v16404_v17 = vmul.f32 0.5, %v16397_v28 }
0x1d47   : > { %v16413_v1 = vmul.f32 %v16409_v20, %v16354_v5  ;;  %v16415_v44 = vmul.f32 %v16411_v12, %v16395_v51  ;;  %v16410_v10 = vmul.f32 %v16406_v35, %v16356_v14  ;;  %v16412_v4 = vmul.f32 %v16408_v55, %v16397_v28  ;;  %v23259_v35 = vld [vmem:[#allocation67 + $0x8] sm:$0xff]   ;;  %v23260_v55 = vld [vmem:[#allocation67 + $0x18] sm:$0xff]   ;;  %v23261_v59 = vld [vmem:[#allocation67] sm:$0xff]  }
0x1d49   : > { %v16417_v3 = vadd.f32 %v16413_v1, %v16354_v5  ;;  %v16419_v42 = vadd.f32 %v16415_v44, %v16395_v51  ;;  %v16414_v63 = vmul.f32 %v16410_v10, %v16356_v14  ;;  %v16416_v32 = vmul.f32 %v16412_v4, %v16397_v28  ;;  %v20735_v4 = vld [vmem:[#allocation64] ss:$0 sm:$0xff] }
0x1d4b   : > { %v16421_v37 = vmul.f32 0.7978846, %v16417_v3  ;;  %v16423_v22 = vmul.f32 0.7978846, %v16419_v42  ;;  %v16418_v13 = vadd.f32 %v16414_v63, %v16356_v14  ;;  %v16420_v62 = vadd.f32 %v16416_v32, %v16397_v28  ;;  %v20736_v42 = vld [vmem:[#allocation66] ss:$0 sm:$0xff] }
0x1d4d   : > { %23527 = vtanh.f32 %v16421_v37  ;;  %v16422_v16 = vmul.f32 0.7978846, %v16418_v13  ;;  %v16424_v11 = vmul.f32 0.7978846, %v16420_v62  ;;  %v23263_v37 = vld [vmem:[#allocation67 + $0x28] sm:$0xff]   ;;  %v23265_v62 = vld [vmem:[#allocation67 + $0x20] sm:$0xff]  }
0x1d4e   : > { %23529 = vtanh.f32 %v16423_v22  ;;  %v23264_v22 = vld [vmem:[#allocation67 + $0x38] sm:$0xff]  }
0x1d4f   : > { %23531 = vtanh.f32 %v16422_v16  ;;  %v23266_v16 = vld [vmem:[#allocation67 + $0x30] sm:$0xff]  }
0x1d50   : > { %23533 = vtanh.f32 %v16424_v11  ;;  %v23267_v11 = vld [vmem:[#allocation69 + $0x8] sm:$0xff]  }
0x1d5a   : > { %v23528_v46 = vpop.eup %23527 }
0x1d5b   : > { %v23530_v40 = vpop.eup %23529  ;;  %v16429_v49 = vadd.f32 1.0, %v23528_v46  ;;  %v23268_v46 = vld [vmem:[#allocation69 + $0x18] sm:$0xff]  }
0x1d5c   : > { %v16431_v34 = vadd.f32 1.0, %v23530_v40  ;;  %v23532_v43 = vpop.eup %23531  ;;  %v23269_v40 = vld [vmem:[#allocation69] sm:$0xff]  }
0x1d5d   : > { %v23534_v24 = vpop.eup %23533  ;;  %v16430_v60 = vadd.f32 1.0, %v23532_v43  ;;  %v16433_v15 = vmul.f32 %v16429_v49, %v16401_v56  ;;  %v23270_v49 = vld [vmem:[#allocation69 + $0x10] sm:$0xff]   ;;  %v23272_v43 = vld [vmem:[#allocation69 + $0x38] sm:$0xff]   ;;  %v23273_v56 = vld [vmem:[#allocation69 + $0x20] sm:$0xff]  }
0x1d5e   : > { %v16432_v30 = vadd.f32 1.0, %v23534_v24  ;;  %v16435_v27 = vmul.f32 %v16431_v34, %v16403_v52  ;;  %v23271_v34 = vld [vmem:[#allocation69 + $0x28] sm:$0xff]   ;;  %v23274_v24 = vld [vmem:[#allocation69 + $0x30] sm:$0xff]  }
0x1d5f   : > { %v16434_v25 = vmul.f32 %v16430_v60, %v16402_v54  ;;  %v16437_v9 = vpack.c.bf16 %v16433_v15, %v16433_v15  ;;  %v23275_v52 = vld [vmem:[#allocation70 + $0x8] sm:$0xff]   ;;  %v23276_v54 = vld [vmem:[#allocation70 + $0x18] sm:$0xff]   ;;  %v23277_v60 = vld [vmem:[#allocation70] sm:$0xff]  }
0x1d60   : > { %v16436_v19 = vmul.f32 %v16432_v30, %v16404_v17  ;;  %v16439_v21 = vpack.c.bf16 %v16435_v27, %v16435_v27  ;;  %v23278_v17 = vld [vmem:[#allocation70 + $0x10] sm:$0xff]   ;;  %v23279_v30 = vld [vmem:[#allocation70 + $0x28] sm:$0xff]   ;;  %v23280_v15 = vld [vmem:[#allocation70 + $0x38] sm:$0xff]  }
0x1d61   : > { %v16438_v23 = vpack.c.bf16 %v16434_v25, %v16434_v25  ;;  %v23281_v25 = vld [vmem:[#allocation70 + $0x20] sm:$0xff]   ;;  %v23282_v27 = vld [vmem:[#allocation70 + $0x30] sm:$0xff]  }
0x1d62   : > { %v16440_v61 = vpack.c.bf16 %v16436_v19, %v16436_v19 }
0x1d63   : > { %16665 = vmatprep.mubr.bf16.mxu0 %v16438_v23 }
0x1d64   : > { %16705 = vmatprep.mubr.bf16.mxu1 %v16440_v61  ;;  %16666 = vmatmul.mubr.bf16.vlgmr.msra.gmra.mxu0 %v16437_v9 }
0x1d65   : > { %16706 = vmatmul.mubr.bf16.vlgmr.msra.gmra.mxu1 %v16439_v21  ;;  %21662 = vmatprep.mubr.msk.bf16.mxu0 %vm25057_vm1, %v25056_v7 }
0x1d66   : > { %21670 = vmatprep.mubr.msk.bf16.mxu1 %vm25057_vm1, %v25056_v7  ;;  %21659 = vmatpush3.bf16.xpose.msra.mxu0 %v23259_v35 }
0x1d67   : > { %21667 = vmatpush3.bf16.xpose.msra.mxu1 %v23260_v55  ;;  %21660 = vmatprep.subr.bf16.mxu0 %v25056_v7 }
0x1d68   : > { %21668 = vmatprep.subr.bf16.mxu1 %v25056_v7 }
0x1d6e   : > { %21661 = vmatpush3.bf16.xpose.msra.mxu0 %v23261_v59 }
0x1d6f   : > { %21674 = vmatprep.subr.bf16.mxu0 %v25056_v7 }
0x1e24   : > { %v21049_v53 = vpop.f32.mrf.mxu0 }
0x1e25   : > { %v21071_v29 = vpop.f32.mrf.mxu1 }
0x1e26   : > { %v21050_v2 = vpop.f32.mrf.mxu0 }
0x1e27   : > { %v21051_v33 = vadd.f32 %v21050_v2, %v21049_v53  ;;  %v21072_v45 = vpop.f32.mrf.mxu1 }
0x1e28   : > { %v21073_v36 = vadd.f32 %v21072_v45, %v21071_v29  ;;  %v21052_v5 = vpop.f32.mrf.mxu0 }
0x1e29   : > { %v21074_v51 = vpop.f32.mrf.mxu1 }
0x1e2a   : > { %v16708_v38 = vadd.f32 %v21073_v36, %v21051_v33  ;;  %v21053_v50 = vpop.f32.mrf.mxu0 }
0x1e2b   : > { %v21075_v18 = vpop.f32.mrf.mxu1 }
0x1e2c   : > { %v16713_v14 = vadd.f32 %v16708_v38, %v27528_v6  ;;  %v23262_v6 = vld [vmem:[#allocation67 + $0x10] sm:$0xff]  }
0x1e2d   : > { %21669 = vmatpush3.bf16.xpose.msra.mxu1 %v23262_v6 }
0x1e2e   : > { %v27607_v28 = vadd.f32 %v20734_v41, %v16713_v14  ;;  %21682 = vmatprep.subr.bf16.mxu1 %v25056_v7  ;;  %v20749_v41 = vld [vmem:[#allocation73] ss:$0 sm:$0xff]  ;;  %v20750_v14 = vld [vmem:[#allocation73 + $0x1] ss:$0 sm:$0xff] }
0x1e30   : > { %16900 = vadd.xlane.f32.xlu0 %v27607_v28 }
0x1eb9   : > { %v16901_v0 = vpop.xlane.xlu0 %16900 }
0x1eba   : > { %v16902_v31 = vmul.f32 0.0078125, %v16901_v0 }
0x1ebc   : > { %v16903_v20 = vsub.f32 %v27607_v28, %v16902_v31 }
0x1ebe   : > { %v16904_v12 = vmul.f32 %v16903_v20, %v16903_v20 }
0x1ec0   : > { %16905 = vadd.xlane.f32.xlu1 %v16904_v12 }
0x1f49   : > { %v16906_v48 = vpop.xlane.xlu1 %16905 }
0x1f4a   : > { %v16907_v1 = vmul.f32 0.0078125, %v16906_v48  ;;  %v20737_v48 = vld [vmem:[#allocation72] ss:$0 sm:$0xff] }
0x1f4c   : > { %v16908_v44 = vadd.f32 1e-05, %v16907_v1  ;;  %v20738_v1 = vld [vmem:[#allocation72 + $0x1] ss:$0 sm:$0xff] }
0x1f4e   : > { %23535 = vrsqrt.f32 %v16908_v44 }
0x1f5b   : > { %v23536_v10 = vpop.eup %23535 }
0x1f5c   : > { %v16910_v3 = vmul.f32 %v23536_v10, %v16903_v20 }
0x1f5e   : > { %v16917_v63 = vmul.f32 %v20735_v4, %v16910_v3 }
0x1f60   : > { %v16924_v32 = vadd.f32 %v20736_v42, %v16917_v63 }
0x1f62   : > { %v27615_v13 = vpack.c.bf16 %v16924_v32, %v16924_v32 }
0x1f64   : > { %21663 = vmatmul.mubr.bf16.vlgmr.msra.gmra.mxu0 %v27615_v13  ;;  %21671 = vmatmul.mubr.bf16.vlgmr.msra.gmra.mxu1 %v27615_v13 }
0x1f65   : > { %21675 = vmatpush3.bf16.xpose.msra.mxu0 %v23263_v37  ;;  %21683 = vmatpush3.bf16.xpose.msra.mxu1 %v23264_v22 }
0x1f66   : > { %21676 = vmatprep.subr.bf16.mxu0 %v25056_v7  ;;  %21684 = vmatprep.subr.bf16.mxu1 %v25056_v7 }
0x1f67   : > { %21678 = vmatprep.mubr.msk.bf16.mxu0 %vm25057_vm1, %v25056_v7  ;;  %21686 = vmatprep.mubr.msk.bf16.mxu1 %vm25057_vm1, %v25056_v7 }
0x1f6d   : > { %21677 = vmatpush3.bf16.xpose.msra.mxu0 %v23265_v62  ;;  %21685 = vmatpush3.bf16.xpose.msra.mxu1 %v23266_v16  ;;  %v20751_v62 = vld [vmem:[#allocation73 + $0x2] ss:$0 sm:$0xff]  ;;  %v20752_v16 = vld [vmem:[#allocation73 + $0x3] ss:$0 sm:$0xff] }
0x1f6e   : > { %21690 = vmatprep.subr.bf16.mxu0 %v25056_v7  ;;  %21698 = vmatprep.subr.bf16.mxu1 %v25056_v7 }
0x1f74   : > { %21679 = vmatmul.mubr.bf16.vlgmr.msra.gmra.mxu0 %v27615_v13  ;;  %21687 = vmatmul.mubr.bf16.vlgmr.msra.gmra.mxu1 %v27615_v13 }
0x1f75   : > { %21691 = vmatpush3.bf16.xpose.msra.mxu0 %v23267_v11  ;;  %21699 = vmatpush3.bf16.xpose.msra.mxu1 %v23268_v46 }
0x1f76   : > { %21692 = vmatprep.subr.bf16.mxu0 %v25056_v7  ;;  %21700 = vmatprep.subr.bf16.mxu1 %v25056_v7 }
0x1f77   : > { %21694 = vmatprep.mubr.msk.bf16.mxu0 %vm25057_vm1, %v25056_v7  ;;  %21702 = vmatprep.mubr.msk.bf16.mxu1 %vm25057_vm1, %v25056_v7 }
0x1f7d   : > { %21693 = vmatpush3.bf16.xpose.msra.mxu0 %v23269_v40  ;;  %21701 = vmatpush3.bf16.xpose.msra.mxu1 %v23270_v49 }
0x1f7e   : > { %21706 = vmatprep.subr.bf16.mxu0 %v25056_v7  ;;  %21714 = vmatprep.subr.bf16.mxu1 %v25056_v7 }
0x1f84   : > { %21695 = vmatmul.mubr.bf16.vlgmr.msra.gmra.mxu0 %v27615_v13  ;;  %21703 = vmatmul.mubr.bf16.vlgmr.msra.gmra.mxu1 %v27615_v13 }
0x1f85   : > { %21707 = vmatpush3.bf16.xpose.msra.mxu0 %v23271_v34  ;;  %21715 = vmatpush3.bf16.xpose.msra.mxu1 %v23272_v43 }
0x1f86   : > { %21708 = vmatprep.subr.bf16.mxu0 %v25056_v7  ;;  %21716 = vmatprep.subr.bf16.mxu1 %v25056_v7 }
0x1f87   : > { %21710 = vmatprep.mubr.msk.bf16.mxu0 %vm25057_vm1, %v25056_v7  ;;  %21718 = vmatprep.mubr.msk.bf16.mxu1 %vm25057_vm1, %v25056_v7 }
0x1f8d   : > { %21709 = vmatpush3.bf16.xpose.msra.mxu0 %v23273_v56  ;;  %21717 = vmatpush3.bf16.xpose.msra.mxu1 %v23274_v24 }
0x1f8e   : > { %21722 = vmatprep.subr.bf16.mxu0 %v25056_v7  ;;  %21730 = vmatprep.subr.bf16.mxu1 %v25056_v7 }
0x1f94   : > { %21711 = vmatmul.mubr.bf16.vlgmr.msra.gmra.mxu0 %v27615_v13  ;;  %21719 = vmatmul.mubr.bf16.vlgmr.msra.gmra.mxu1 %v27615_v13 }
0x1f95   : > { %21723 = vmatpush3.bf16.xpose.msra.mxu0 %v23275_v52  ;;  %21731 = vmatpush3.bf16.xpose.msra.mxu1 %v23276_v54  ;;  %v20739_v52 = vld [vmem:[#allocation72 + $0x2] ss:$0 sm:$0xff]  ;;  %v20740_v54 = vld [vmem:[#allocation72 + $0x3] ss:$0 sm:$0xff] }
0x1f96   : > { %21724 = vmatprep.subr.bf16.mxu0 %v25056_v7  ;;  %21732 = vmatprep.subr.bf16.mxu1 %v25056_v7 }
0x1f97   : > { %21726 = vmatprep.mubr.msk.bf16.mxu0 %vm25057_vm1, %v25056_v7  ;;  %21734 = vmatprep.mubr.msk.bf16.mxu1 %vm25057_vm1, %v25056_v7 }
0x1f9d   : > { %21725 = vmatpush3.bf16.xpose.msra.mxu0 %v23277_v60  ;;  %21733 = vmatpush3.bf16.xpose.msra.mxu1 %v23278_v17 }
0x1f9e   : > { %21738 = vmatprep.subr.bf16.mxu0 %v25056_v7  ;;  %21746 = vmatprep.subr.bf16.mxu1 %v25056_v7 }
0x1fa4   : > { %21727 = vmatmul.mubr.bf16.vlgmr.msra.gmra.mxu0 %v27615_v13  ;;  %21735 = vmatmul.mubr.bf16.vlgmr.msra.gmra.mxu1 %v27615_v13 }
0x1fa5   : > { %21739 = vmatpush3.bf16.xpose.msra.mxu0 %v23279_v30  ;;  %21747 = vmatpush3.bf16.xpose.msra.mxu1 %v23280_v15 }
0x1fa6   : > { %21740 = vmatprep.subr.bf16.mxu0 %v25056_v7  ;;  %21748 = vmatprep.subr.bf16.mxu1 %v25056_v7 }
0x1fa7   : > { %21742 = vmatprep.mubr.msk.bf16.mxu0 %vm25057_vm1, %v25056_v7  ;;  %21750 = vmatprep.mubr.msk.bf16.mxu1 %vm25057_vm1, %v25056_v7 }
0x1fad   : > { %21741 = vmatpush3.bf16.xpose.msra.mxu0 %v23281_v25  ;;  %21749 = vmatpush3.bf16.xpose.msra.mxu1 %v23282_v27 }
0x1fae   : > { %21754 = vmatprep.subr.bf16.mxu0 %v25056_v7  ;;  %21760 = vmatprep.subr.bf16.mxu1 %v25056_v7 }
0x1fb4   : > { %21743 = vmatmul.mubr.bf16.vlgmr.msra.gmra.mxu0 %v27615_v13  ;;  %21751 = vmatmul.mubr.bf16.vlgmr.msra.gmra.mxu1 %v27615_v13 }
0x1fb5   : > { %21756 = vmatprep.mubr.msk.bf16.mxu0 %vm25057_vm1, %v25056_v7  ;;  %21762 = vmatprep.mubr.msk.bf16.mxu1 %vm25057_vm1, %v25056_v7 }
0x2024   : > { %v16996_v19 = vpop.f32.mrf.mxu0  ;;  %v17048_v23 = vpop.f32.mrf.mxu1 }
0x2025   : > { %v16997_v32 = vadd.f32 %v20737_v48, %v16996_v19  ;;  %v17049_v37 = vadd.f32 %v20738_v1, %v17048_v23 }
0x2026   : > { %v21664_v61 = vpop.f32.mrf.mxu0  ;;  %v21672_v9 = vpop.f32.mrf.mxu1 }
0x2027   : > { %v17622_v22 = vpack.c.bf16 %v16997_v32, %v16997_v32  ;;  %v17623_v13 = vpack.c.bf16 %v17049_v37, %v17049_v37 }
0x2028   : > { %v16999_v21 = vpop.f32.mrf.mxu0  ;;  %v17051_v53 = vpop.f32.mrf.mxu1 }
0x2029   : > { %v20761_v21 = vld [vmem:[#allocation75] ss:$0 sm:$0xff]  ;;  %v20762_v53 = vld [vmem:[#allocation75 + $0x1] ss:$0 sm:$0xff] }
0x202a   : > { %v21665_v29 = vpop.f32.mrf.mxu0  ;;  %v21673_v2 = vpop.f32.mrf.mxu1 }
0x2034   : > { %v17100_v33 = vpop.f32.mrf.mxu0  ;;  %v17152_v45 = vpop.f32.mrf.mxu1 }
0x2035   : > { %v17101_v19 = vadd.f32 %v20739_v52, %v17100_v33  ;;  %v17153_v23 = vadd.f32 %v20740_v54, %v17152_v45 }
0x2036   : > { %v21680_v36 = vpop.f32.mrf.mxu0  ;;  %v21688_v5 = vpop.f32.mrf.mxu1 }
0x2037   : > { %v17624_v61 = vpack.c.bf16 %v17101_v19, %v17101_v19  ;;  %v17625_v9 = vpack.c.bf16 %v17153_v23, %v17153_v23 }
0x2038   : > { %v17103_v51 = vpop.f32.mrf.mxu0  ;;  %v17155_v38 = vpop.f32.mrf.mxu1 }
0x203a   : > { %v21681_v50 = vpop.f32.mrf.mxu0  ;;  %v21689_v18 = vpop.f32.mrf.mxu1 }
0x2044   : > { %v17228_v0 = vpop.f32.mrf.mxu0  ;;  %v17280_v31 = vpop.f32.mrf.mxu1 }
0x2045   : > { %v17229_v20 = vadd.f32 %v20749_v41, %v17228_v0  ;;  %v17281_v12 = vadd.f32 %v20750_v14, %v17280_v31 }
0x2046   : > { %v21696_v35 = vpop.f32.mrf.mxu0  ;;  %v21704_v55 = vpop.f32.mrf.mxu1 }
0x2047   : > { %v17626_v59 = vpack.c.bf16 %v17229_v20, %v17229_v20  ;;  %v17627_v6 = vpack.c.bf16 %v17281_v12, %v17281_v12 }
0x2048   : > { %v17231_v44 = vpop.f32.mrf.mxu0  ;;  %v17283_v10 = vpop.f32.mrf.mxu1 }
0x2049   : > { %v17634_v4 = vsel %vm15448_vm6, %v17626_v59, 0  ;;  %v17680_v3 = vsel %vm15448_vm6, %v17627_v6, 0 }
0x204a   : > { %v21697_v42 = vpop.f32.mrf.mxu0  ;;  %v21705_v63 = vpop.f32.mrf.mxu1  ;;  %21755 = vmatpush3.bf16.xpose.msra.mxu0 %v17634_v4  ;;  %21761 = vmatpush3.bf16.xpose.msra.mxu1 %v17680_v3 }
0x204b   : > { %21766 = vmatprep.subr.bf16.mxu0 %v25056_v7  ;;  %21772 = vmatprep.subr.bf16.mxu1 %v25056_v7 }
0x2051   : > { %21757 = vmatmul.mubr.msk.bf16.vlgmr.msra.gmra.mxu0 %vm15448_vm6, %v17622_v22  ;;  %21763 = vmatmul.mubr.msk.bf16.vlgmr.msra.gmra.mxu1 %vm15448_vm6, %v17623_v13 }
0x2052   : > { %21768 = vmatprep.mubr.msk.bf16.mxu0 %vm25057_vm1, %v25056_v7  ;;  %21774 = vmatprep.mubr.msk.bf16.mxu1 %vm25057_vm1, %v25056_v7 }
0x2054   : > { %v17332_v11 = vpop.f32.mrf.mxu0  ;;  %v17384_v46 = vpop.f32.mrf.mxu1 }
0x2055   : > { %v17333_v40 = vadd.f32 %v20751_v62, %v17332_v11  ;;  %v17385_v49 = vadd.f32 %v20752_v16, %v17384_v46 }
0x2056   : > { %v21712_v34 = vpop.f32.mrf.mxu0  ;;  %v21720_v43 = vpop.f32.mrf.mxu1 }
0x2057   : > { %v17628_v56 = vpack.c.bf16 %v17333_v40, %v17333_v40  ;;  %v17629_v24 = vpack.c.bf16 %v17385_v49, %v17385_v49 }
0x2058   : > { %v17335_v60 = vpop.f32.mrf.mxu0  ;;  %v17387_v17 = vpop.f32.mrf.mxu1 }
0x2059   : > { %v17726_v30 = vsel %vm15448_vm6, %v17628_v56, 0  ;;  %v17772_v15 = vsel %vm15448_vm6, %v17629_v24, 0 }
0x205a   : > { %v21713_v25 = vpop.f32.mrf.mxu0  ;;  %v21721_v27 = vpop.f32.mrf.mxu1  ;;  %21767 = vmatpush3.bf16.xpose.msra.mxu0 %v17726_v30  ;;  %21773 = vmatpush3.bf16.xpose.msra.mxu1 %v17772_v15 }
0x205b   : > { %21778 = vmatprep.subr.bf16.mxu0 %v25056_v7  ;;  %21784 = vmatprep.subr.bf16.mxu1 %v25056_v7 }
0x2061   : > { %21769 = vmatmul.mubr.msk.bf16.vlgmr.msra.gmra.mxu0 %vm15448_vm6, %v17624_v61  ;;  %21775 = vmatmul.mubr.msk.bf16.vlgmr.msra.gmra.mxu1 %vm15448_vm6, %v17625_v9 }
0x2062   : > { %21786 = vmatprep.mubr.msk.bf16.mxu1 %vm25057_vm1, %v25056_v7  ;;  %21780 = vmatprep.mubr.msk.bf16.mxu0 %vm25057_vm1, %v25056_v7 }
0x2064   : > { %v17460_v29 = vpop.f32.mrf.mxu0  ;;  %v17512_v2 = vpop.f32.mrf.mxu1 }
0x2065   : > { %v17461_v33 = vadd.f32 %v20761_v21, %v17460_v29  ;;  %v17513_v45 = vadd.f32 %v20762_v53, %v17512_v2  ;;  %v20764_v29 = vld [vmem:[#allocation75 + $0x3] ss:$0 sm:$0xff] }
0x2066   : > { %v21728_v36 = vpop.f32.mrf.mxu0  ;;  %v21736_v5 = vpop.f32.mrf.mxu1 }
0x2067   : > { %v17866_v51 = vpack.c.bf16 %v17461_v33, %v17461_v33  ;;  %v17867_v38 = vpack.c.bf16 %v17513_v45, %v17513_v45 }
0x2068   : > { %v17463_v50 = vpop.f32.mrf.mxu0  ;;  %v17515_v18 = vpop.f32.mrf.mxu1 }
0x2069   : > { %v17874_v41 = vsel %vm6176_vm3, %v17866_v51, 0  ;;  %v17920_v14 = vsel %vm6176_vm3, %v17867_v38, 0 }
0x206a   : > { %v21729_v0 = vpop.f32.mrf.mxu0  ;;  %v21737_v31 = vpop.f32.mrf.mxu1  ;;  %21779 = vmatpush3.bf16.msra.mxu0 %v17874_v41  ;;  %21785 = vmatpush3.bf16.msra.mxu1 %v17920_v14 }
0x206b   : > { %21796 = vmatprep.subr.bf16.mxu1 %v25056_v7  ;;  %21790 = vmatprep.subr.bf16.mxu0 %v25056_v7 }
0x2074   : > { %v17564_v20 = vpop.f32.mrf.mxu0  ;;  %v17616_v12 = vpop.f32.mrf.mxu1 }
0x2075   : > { %v17617_v2 = vadd.f32 %v20764_v29, %v17616_v12 }
0x2076   : > { %v21744_v35 = vpop.f32.mrf.mxu0  ;;  %v21752_v55 = vpop.f32.mrf.mxu1 }
0x2077   : > { %v17869_v5 = vpack.c.bf16 %v17617_v2, %v17617_v2 }
0x2078   : > { %v17567_v59 = vpop.f32.mrf.mxu0  ;;  %v17619_v6 = vpop.f32.mrf.mxu1 }
0x2079   : > { %v18012_v12 = vsel %vm6176_vm3, %v17869_v5, 0 }
0x207a   : > { %v21745_v48 = vpop.f32.mrf.mxu0  ;;  %v21753_v1 = vpop.f32.mrf.mxu1 }
0x2111   : > { %v17670_v44 = vpop.f32.mrf.mxu0  ;;  %v17716_v10 = vpop.f32.mrf.mxu1 }
0x2112   : > { %v17814_v4 = vmul.f32 0.125, %v17670_v44  ;;  %v17815_v3 = vmul.f32 0.125, %v17716_v10 }
0x2113   : > { %v21758_v42 = vpop.f32.mrf.mxu0  ;;  %v21764_v63 = vpop.f32.mrf.mxu1 }
0x2114   : > { %v17819_v32 = vadd.f32 %v17815_v3, %v26230_v47  ;;  %v17818_v37 = vadd.f32 %v17814_v4, %v26230_v47  ;;  %v23283_v3 = vld [vmem:[#allocation76 + $0x8] sm:$0xff]   ;;  %v23284_v42 = vld [vmem:[#allocation76 + $0x18] sm:$0xff]   ;;  %v23285_v63 = vld [vmem:[#allocation76] sm:$0xff]  }
0x2115   : > { %v17673_v22 = vpop.f32.mrf.mxu0  ;;  %v17719_v13 = vpop.f32.mrf.mxu1 }
0x2116   : > { %v17825_v62 = vsel %vm6028_vm5, %v17819_v32, -inf  ;;  %v17822_v16 = vsel %vm6028_vm5, %v17818_v37, -inf }
0x2117   : > { %17826 = vmax.xlane.f32.xlu1 %v17825_v62  ;;  %v21765_v11 = vpop.f32.mrf.mxu1  ;;  %17823 = vmax.xlane.f32.xlu0 %v17822_v16  ;;  %v21759_v46 = vpop.f32.mrf.mxu0 }
0x2121   : > { %v17762_v40 = vpop.f32.mrf.mxu0  ;;  %v17808_v49 = vpop.f32.mrf.mxu1 }
0x2122   : > { %v17816_v34 = vmul.f32 0.125, %v17762_v40  ;;  %v17817_v43 = vmul.f32 0.125, %v17808_v49 }
0x2123   : > { %v21770_v56 = vpop.f32.mrf.mxu0  ;;  %v21776_v24 = vpop.f32.mrf.mxu1 }
0x2124   : > { %v17821_v52 = vadd.f32 %v17817_v43, %v26230_v47  ;;  %v17820_v54 = vadd.f32 %v17816_v34, %v26230_v47  ;;  %v20763_v47 = vld [vmem:[#allocation75 + $0x2] ss:$0 sm:$0xff] }
0x2125   : > { %v17765_v60 = vpop.f32.mrf.mxu0  ;;  %v17811_v17 = vpop.f32.mrf.mxu1  ;;  %v17565_v33 = vadd.f32 %v20763_v47, %v17564_v20  ;;  %v23288_v56 = vld [vmem:[#allocation76 + $0x38] sm:$0xff]  }
0x2126   : > { %v17831_v30 = vsel %vm6028_vm5, %v17821_v52, -inf  ;;  %v17828_v15 = vsel %vm6028_vm5, %v17820_v54, -inf }
0x2127   : > { %17832 = vmax.xlane.f32.xlu1 %v17831_v30  ;;  %v21777_v25 = vpop.f32.mrf.mxu1  ;;  %17829 = vmax.xlane.f32.xlu0 %v17828_v15  ;;  %v21771_v27 = vpop.f32.mrf.mxu0  ;;  %v17868_v18 = vpack.c.bf16 %v17565_v33, %v17565_v33 }
0x2128   : > { %v23290_v25 = vld [vmem:[#allocation76 + $0x30] sm:$0xff]  }
0x2129   : > { %v17966_v20 = vsel %vm6176_vm3, %v17868_v18, 0 }
0x21a0   : > { %v17827_v19 = vpop.xlane.xlu1 %17826  ;;  %v17824_v23 = vpop.xlane.xlu0 %17823 }
0x21a1   : > { %v17835_v61 = vsub.f32 %v17819_v32, %v17827_v19  ;;  %v17834_v9 = vsub.f32 %v17818_v37, %v17824_v23  ;;  %v23286_v32 = vld [vmem:[#allocation76 + $0x10] sm:$0xff]   ;;  %v23289_v19 = vld [vmem:[#allocation76 + $0x20] sm:$0xff]  }
0x21a3   : > { %v17840_v21 = vmul.f32 1.442695, %v17835_v61  ;;  %v17838_v53 = vmul.f32 1.442695, %v17834_v9 }
0x21a5   : > { %23537 = vpow2.f32 %v17840_v21 }
0x21a6   : > { %23539 = vpow2.f32 %v17838_v53 }
0x21b0   : > { %v17833_v45 = vpop.xlane.xlu1 %17832  ;;  %v17830_v36 = vpop.xlane.xlu0 %17829 }
0x21b1   : > { %v17837_v51 = vsub.f32 %v17821_v52, %v17833_v45  ;;  %v17836_v38 = vsub.f32 %v17820_v54, %v17830_v36  ;;  %v23287_v54 = vld [vmem:[#allocation76 + $0x28] sm:$0xff]  }
0x21b2   : > { %v23538_v50 = vpop.eup %23537 }
0x21b3   : > { %v23540_v41 = vpop.eup %23539  ;;  %v17863_v14 = vpack.c.bf16 %v23538_v50, %v23538_v50  ;;  %v17844_v0 = vmul.f32 1.442695, %v17837_v51  ;;  %v17842_v31 = vmul.f32 1.442695, %v17836_v38  ;;  %v17849_v35 = vsel %vm6028_vm5, %v23538_v50, 0.0 }
0x21b4   : > { %v17862_v55 = vpack.c.bf16 %v23540_v41, %v23540_v41  ;;  %17850 = vadd.xlane.f32.xlu1 %v17849_v35  ;;  %v17846_v59 = vsel %vm6028_vm5, %v23540_v41, 0.0 }
0x21b5   : > { %23541 = vpow2.f32 %v17844_v0  ;;  %17847 = vadd.xlane.f32.xlu0 %v17846_v59  ;;  %21787 = vmatmul.mubr.msk.bf16.vlgmr.msra.gmra.mxu1 %vm6028_vm5, %v17863_v14 }
0x21b6   : > { %23543 = vpow2.f32 %v17842_v31  ;;  %21781 = vmatmul.mubr.msk.bf16.vlgmr.msra.gmra.mxu0 %vm6028_vm5, %v17862_v55  ;;  %21797 = vmatpush3.bf16.msra.mxu1 %v18012_v12 }
0x21b7   : > { %21791 = vmatpush3.bf16.msra.mxu0 %v17966_v20  ;;  %21798 = vmatprep.mubr.msk.bf16.mxu1 %vm25057_vm1, %v25056_v7 }
0x21b8   : > { %21792 = vmatprep.mubr.msk.bf16.mxu0 %vm25057_vm1, %v25056_v7  ;;  %21802 = vmatprep.subr.bf16.mxu0 %v25056_v7 }
0x21b9   : > { %21810 = vmatprep.subr.bf16.mxu1 %v25056_v7 }
0x21c2   : > { %v23542_v6 = vpop.eup %23541 }
0x21c3   : > { %v23544_v48 = vpop.eup %23543  ;;  %v17865_v1 = vpack.c.bf16 %v23542_v6, %v23542_v6  ;;  %v17855_v44 = vsel %vm6028_vm5, %v23542_v6, 0.0 }
0x21c4   : > { %v17864_v10 = vpack.c.bf16 %v23544_v48, %v23544_v48  ;;  %17856 = vadd.xlane.f32.xlu1 %v17855_v44  ;;  %v17852_v4 = vsel %vm6028_vm5, %v23544_v48, 0.0 }
0x21c5   : > { %17853 = vadd.xlane.f32.xlu0 %v17852_v4  ;;  %21799 = vmatmul.mubr.msk.bf16.vlgmr.msra.gmra.mxu1 %vm6028_vm5, %v17865_v1  ;;  %v20793_v4 = vld [vmem:[#allocation78] ss:$0 sm:$0xff] }
0x21c6   : > { %21793 = vmatmul.mubr.msk.bf16.vlgmr.msra.gmra.mxu0 %vm6028_vm5, %v17864_v10  ;;  %21814 = vmatprep.mubr.msk.bf16.mxu1 %vm25057_vm1, %v25056_v7 }
0x21c7   : > { %21806 = vmatprep.mubr.msk.bf16.mxu0 %vm25057_vm1, %v25056_v7  ;;  %21803 = vmatpush3.bf16.msra.mxu0 %v23283_v3 }
0x21c8   : > { %21811 = vmatpush3.bf16.msra.mxu1 %v23284_v42  ;;  %21804 = vmatprep.subr.bf16.mxu0 %v25056_v7 }
0x21c9   : > { %21812 = vmatprep.subr.bf16.mxu1 %v25056_v7 }
0x21cb   : > { %21805 = vmatpush3.bf16.msra.mxu0 %v23285_v63 }
0x21cc   : > { %21813 = vmatpush3.bf16.msra.mxu1 %v23286_v32  ;;  %21818 = vmatprep.subr.bf16.mxu0 %v25056_v7 }
0x21cd   : > { %21826 = vmatprep.subr.bf16.mxu1 %v25056_v7 }
0x223d   : > { %v17851_v37 = vpop.xlane.xlu1 %17850 }
0x223e   : > { %v17848_v22 = vpop.xlane.xlu0 %17847  ;;  %23545 = vrcp.f32 %v17851_v37  ;;  %v23291_v37 = vld [vmem:[%s27980_s1 + $0xe0] ss:$16 sps:$4 sm:$0xff]  }
0x223f   : > { %23547 = vrcp.f32 %v17848_v22  ;;  %v23293_v22 = vld [vmem:[%s27980_s1 + $0xe4] ss:$16 sps:$4 sm:$0xff]  }
0x224b   : > { %v23546_v13 = vpop.eup %23545 }
0x224c   : > { %v23548_v11 = vpop.eup %23547 }
0x224d   : > { %v17857_v62 = vpop.xlane.xlu1 %17856 }
0x224e   : > { %v17854_v46 = vpop.xlane.xlu0 %17853  ;;  %23549 = vrcp.f32 %v17857_v62  ;;  %v23296_v62 = vld [vmem:[%s27980_s1 + $0xec] ss:$16 sps:$4 sm:$0xff]  }
0x224f   : > { %23551 = vrcp.f32 %v17854_v46  ;;  %v23300_v46 = vld [vmem:[%s27980_s1 + $0xc8] ss:$16 sps:$4 sm:$0xff]  }
0x225b   : > { %v23550_v23 = vpop.eup %23549 }
0x225c   : > { %v23552_v9 = vpop.eup %23551 }
0x2275   : > { %v17956_v16 = vpop.f32.mrf.mxu1 }
0x2276   : > { %v17910_v40 = vpop.f32.mrf.mxu0  ;;  %v18055_v49 = vmul.f32 %v23546_v13, %v17956_v16  ;;  %v23294_v13 = vld [vmem:[%s27980_s1 + $0xe8] ss:$16 sps:$4 sm:$0xff]   ;;  %v23299_v16 = vld [vmem:[%s27980_s1 + $0xc4] ss:$16 sps:$4 sm:$0xff]  }
0x2277   : > { %v18054_v34 = vmul.f32 %v23548_v11, %v17910_v40  ;;  %v21788_v43 = vpop.f32.mrf.mxu1  ;;  %v23302_v11 = vld [vmem:[%s27980_s1 + $0xcc] ss:$16 sps:$4 sm:$0xff]  }
0x2278   : > { %v18059_v24 = vpack.c.bf16 %v18055_v49, %v18055_v49  ;;  %v21782_v52 = vpop.f32.mrf.mxu0 }
0x2279   : > { %v18058_v60 = vpack.c.bf16 %v18054_v34, %v18054_v34  ;;  %v17959_v17 = vpop.f32.mrf.mxu1  ;;  %v23303_v52 = vld [vmem:[%s27980_s1 + $0xa0] ss:$16 sps:$4 sm:$0xff]  }
0x227a   : > { %v17913_v30 = vpop.f32.mrf.mxu0  ;;  %21815 = vmatmul.mubr.msk.bf16.vlgmr.msra.gmra.mxu1 %vm15448_vm6, %v18059_v24  ;;  %v23308_v24 = vld [vmem:[%s27980_s1 + $0xac] ss:$16 sps:$4 sm:$0xff]  }
0x227b   : > { %21807 = vmatmul.mubr.msk.bf16.vlgmr.msra.gmra.mxu0 %vm15448_vm6, %v18058_v60  ;;  %v21789_v15 = vpop.f32.mrf.mxu1  ;;  %21827 = vmatpush3.bf16.msra.mxu1 %v23288_v56  ;;  %v23305_v56 = vld [vmem:[%s27980_s1 + $0xa4] ss:$16 sps:$4 sm:$0xff]   ;;  %v23314_v17 = vld [vmem:[%s27980_s1 + $0x8c] ss:$16 sps:$4 sm:$0xff]   ;;  %v23309_v30 = vld [vmem:[%s27980_s1 + $0x80] ss:$16 sps:$4 sm:$0xff]  }
0x227c   : > { %v21783_v27 = vpop.f32.mrf.mxu0  ;;  %21819 = vmatpush3.bf16.msra.mxu0 %v23287_v54  ;;  %21828 = vmatprep.subr.bf16.mxu1 %v25056_v7  ;;  %v23306_v54 = vld [vmem:[%s27980_s1 + $0xa8] ss:$16 sps:$4 sm:$0xff]   ;;  %v23311_v60 = vld [vmem:[%s27980_s1 + $0x84] ss:$16 sps:$4 sm:$0xff]  }
0x227d   : > { %21820 = vmatprep.subr.bf16.mxu0 %v25056_v7  ;;  %21822 = vmatprep.mubr.msk.bf16.mxu0 %vm25057_vm1, %v25056_v7  ;;  %v23312_v15 = vld [vmem:[%s27980_s1 + $0x88] ss:$16 sps:$4 sm:$0xff]   ;;  %v23320_v27 = vld [vmem:[%s27980_s1 + $0x6c] ss:$16 sps:$4 sm:$0xff]  }
0x227e   : > { %21830 = vmatprep.mubr.msk.bf16.mxu1 %vm25057_vm1, %v25056_v7 }
0x227f   : > { %21829 = vmatpush3.bf16.msra.mxu1 %v23290_v25  ;;  %v23317_v25 = vld [vmem:[%s27980_s1 + $0x64] ss:$16 sps:$4 sm:$0xff]  }
0x2280   : > { %21821 = vmatpush3.bf16.msra.mxu0 %v23289_v19  ;;  %18541 = vmatprep.subr.bf16.mxu1 %v23296_v62  ;;  %v23315_v19 = vld [vmem:[%s27980_s1 + $0x60] ss:$16 sps:$4 sm:$0xff]  }
0x2281   : > { %18500 = vmatprep.subr.bf16.mxu0 %v23293_v22  ;;  %v23352_v22 = vld [vmem:[%s27983_s26 + $0xe0] sm:$0xff]  }
0x2282   : > { %v23354_v62 = vld [vmem:[%s27983_s26 + $0xa0] sm:$0xff]  }
0x2285   : > { %v18048_v61 = vpop.f32.mrf.mxu1 }
0x2286   : > { %v18002_v21 = vpop.f32.mrf.mxu0  ;;  %v18057_v53 = vmul.f32 %v23550_v23, %v18048_v61  ;;  %v23318_v23 = vld [vmem:[%s27980_s1 + $0x68] ss:$16 sps:$4 sm:$0xff]   ;;  %v23323_v61 = vld [vmem:[%s27980_s1 + $0x44] ss:$16 sps:$4 sm:$0xff]  }
0x2287   : > { %v18056_v29 = vmul.f32 %v23552_v9, %v18002_v21  ;;  %v21800_v47 = vpop.f32.mrf.mxu1  ;;  %v23326_v9 = vld [vmem:[%s27980_s1 + $0x4c] ss:$16 sps:$4 sm:$0xff]   ;;  %v23321_v21 = vld [vmem:[%s27980_s1 + $0x40] ss:$16 sps:$4 sm:$0xff]  }
0x2288   : > { %v18061_v2 = vpack.c.bf16 %v18057_v53, %v18057_v53  ;;  %v21794_v33 = vpop.f32.mrf.mxu0  ;;  %v23324_v53 = vld [vmem:[%s27980_s1 + $0x48] ss:$16 sps:$4 sm:$0xff]   ;;  %v23332_v47 = vld [vmem:[%s27980_s1 + $0x2c] ss:$16 sps:$4 sm:$0xff]  }
0x2289   : > { %v18060_v45 = vpack.c.bf16 %v18056_v29, %v18056_v29  ;;  %v18051_v36 = vpop.f32.mrf.mxu1  ;;  %v23329_v29 = vld [vmem:[%s27980_s1 + $0x24] ss:$16 sps:$4 sm:$0xff]   ;;  %v23330_v33 = vld [vmem:[%s27980_s1 + $0x28] ss:$16 sps:$4 sm:$0xff]  }
0x228a   : > { %v18005_v5 = vpop.f32.mrf.mxu0  ;;  %21831 = vmatmul.mubr.msk.bf16.vlgmr.msra.gmra.mxu1 %vm15448_vm6, %v18061_v2  ;;  %v23327_v2 = vld [vmem:[%s27980_s1 + $0x20] ss:$16 sps:$4 sm:$0xff]   ;;  %v23338_v36 = vld [vmem:[%s27980_s1 + $0xc] ss:$16 sps:$4 sm:$0xff]  }
0x228b   : > { %21823 = vmatmul.mubr.msk.bf16.vlgmr.msra.gmra.mxu0 %vm15448_vm6, %v18060_v45  ;;  %v21801_v51 = vpop.f32.mrf.mxu1  ;;  %18573 = vmatprep.mubr.bf16.mxu1 %v25059_v8  ;;  %v23335_v45 = vld [vmem:[%s27980_s1 + $0x4] ss:$16 sps:$4 sm:$0xff]   ;;  %v23333_v5 = vld [vmem:[%s27980_s1] ss:$16 sps:$4 sm:$0xff]  }
0x228c   : > { %v21795_v38 = vpop.f32.mrf.mxu0  ;;  %18532 = vmatprep.mubr.bf16.mxu0 %v25059_v8  ;;  %18501 = vmatpush1.bf16.msra.mxu0 %v23291_v37  ;;  %v23336_v51 = vld [vmem:[%s27980_s1 + $0x8] ss:$16 sps:$4 sm:$0xff]   ;;  %v23351_v37 = vld [vmem:[%s27983_s26 + $0x60] sm:$0xff]  }
0x228d   : > { %18542 = vmatpush1.bf16.msra.mxu1 %v23294_v13  ;;  %18502 = vmatprep.subr.bf16.mxu0 %v23299_v16  ;;  %v23353_v13 = vld [vmem:[%s27983_s26 + $0x20] sm:$0xff]   ;;  %v23355_v16 = vld [vmem:[%s27983_s26 + $0x58] sm:$0xff]  }
0x228e   : > { %18543 = vmatprep.subr.bf16.mxu1 %v23302_v11  ;;  %v23356_v11 = vld [vmem:[%s27983_s26 + $0xd8] sm:$0xff]  }
0x2291   : > { %18544 = vmatpush1.bf16.msra.mxu1 %v23300_v46  ;;  %v23358_v46 = vld [vmem:[%s27983_s26 + $0x98] sm:$0xff]  }
0x2292   : > { %18545 = vmatprep.subr.bf16.mxu1 %v23308_v24  ;;  %v23364_v24 = vld [vmem:[%s27983_s26 + $0xc8] sm:$0xff]  }
0x2295   : > { %18546 = vmatpush1.bf16.msra.mxu1 %v23306_v54  ;;  %v23366_v54 = vld [vmem:[%s27983_s26 + $0x88] sm:$0xff]  }
0x2296   : > { %18547 = vmatprep.subr.bf16.mxu1 %v23314_v17  ;;  %v23368_v17 = vld [vmem:[%s27983_s26 + $0xc0] sm:$0xff]  }
0x2299   : > { %18548 = vmatpush1.bf16.msra.mxu1 %v23312_v15  ;;  %v23370_v15 = vld [vmem:[%s27983_s26 + $0x80] sm:$0xff]  }
0x229a   : > { %18549 = vmatprep.subr.bf16.mxu1 %v23320_v27 }
0x229d   : > { %18550 = vmatpush1.bf16.msra.mxu1 %v23318_v23 }
0x229e   : > { %18551 = vmatprep.subr.bf16.mxu1 %v23326_v9 }
0x22a1   : > { %18552 = vmatpush1.bf16.msra.mxu1 %v23324_v53 }
0x22a2   : > { %18553 = vmatprep.subr.bf16.mxu1 %v23332_v47 }
0x22a5   : > { %18554 = vmatpush1.bf16.msra.mxu1 %v23330_v33 }
0x22a6   : > { %18555 = vmatprep.subr.bf16.mxu1 %v23338_v36 }
0x22a9   : > { %18556 = vmatpush1.bf16.msra.mxu1 %v23336_v51 }
0x233a   : > { %v18166_v50 = vpop.f32.mrf.mxu1 }
0x233b   : > { %v18111_v18 = vpop.f32.mrf.mxu0 }
0x233c   : > { %v21816_v41 = vpop.f32.mrf.mxu1  ;;  %v18282_v59 = vadd.f32 %v18166_v50, %v18111_v18 }
0x233d   : > { %v21808_v14 = vpop.f32.mrf.mxu0 }
0x233e   : > { %v18169_v0 = vpop.f32.mrf.mxu1  ;;  %v20794_v14 = vld [vmem:[%s27981_s3] ss:$0 sm:$0xff]  ;;  %s19747_s3 = sshll.u32 %s27986_s22, 3 }
0x233f   : > { %v18114_v31 = vpop.f32.mrf.mxu0 }
0x2340   : > { %v21817_v35 = vpop.f32.mrf.mxu1  ;;  %v20795_v31 = vld [vmem:[%s27982_s10] ss:$0 sm:$0xff]  ;;  %s2781_s10 = scalar_lea.vmem %s25423_s20, %s19747_s3 }
0x2341   : > { %v21809_v55 = vpop.f32.mrf.mxu0 }
0x234a   : > { %v18276_v12 = vpop.f32.mrf.mxu1 }
0x234b   : > { %v18221_v20 = vpop.f32.mrf.mxu0 }
0x234c   : > { %v18283_v6 = vadd.f32 %v18282_v59, %v18221_v20  ;;  %v21832_v48 = vpop.f32.mrf.mxu1  ;;  %v23340_v20 = vld [vmem:[%s27983_s26 + $0xf8] sm:$0xff]  }
0x234d   : > { %v21824_v1 = vpop.f32.mrf.mxu0  ;;  %v23342_v48 = vld [vmem:[%s27983_s26 + $0xb8] sm:$0xff]   ;;  %21163 = vmatprep.subr.bf16.mxu1 %v23340_v20 }
0x234e   : > { %v18284_v8 = vadd.f32 %v18283_v6, %v18276_v12  ;;  %v18279_v44 = vpop.f32.mrf.mxu1  ;;  %v23339_v12 = vld [vmem:[%s27983_s26 + $0x78] sm:$0xff]   ;;  %v23343_v1 = vld [vmem:[%s27983_s26 + $0x70] sm:$0xff]  }
0x234f   : > { %v18224_v10 = vpop.f32.mrf.mxu0  ;;  %v23341_v6 = vld [vmem:[%s27983_s26 + $0x38] sm:$0xff]   ;;  %v23345_v44 = vld [vmem:[%s27983_s26 + $0x30] sm:$0xff]  }
0x2350   : > { %v18285_v3 = vadd.f32 %v18284_v8, %v27607_v28  ;;  %v21833_v42 = vpop.f32.mrf.mxu1  ;;  %v23297_v28 = vld [vmem:[%s27980_s1 + $0xc0] ss:$16 sps:$4 sm:$0xff]  }
0x2351   : > { %v21825_v63 = vpop.f32.mrf.mxu0  ;;  %18503 = vmatpush1.bf16.msra.mxu0 %v23297_v28  ;;  %v23344_v8 = vld [vmem:[%s27983_s26 + $0xf0] sm:$0xff]   ;;  %v23349_v42 = vld [vmem:[%s27983_s26 + $0x28] sm:$0xff]   ;;  %v23357_v28 = vld [vmem:[%s27983_s26 + $0x18] sm:$0xff]  }
0x2352   : > { %v27742_v32 = vadd.f32 %v20793_v4, %v18285_v3  ;;  %18504 = vmatprep.subr.bf16.mxu0 %v23305_v56  ;;  %v23346_v10 = vld [vmem:[%s27983_s26 + $0xb0] sm:$0xff]   ;;  %v23347_v4 = vld [vmem:[%s27983_s26 + $0x68] sm:$0xff]  }
0x2353   : > { %v23348_v3 = vld [vmem:[%s27983_s26 + $0xe8] sm:$0xff]  }
0x2354   : > { %18293 = vadd.xlane.f32.xlu0 %v27742_v32  ;;  %v23350_v63 = vld [vmem:[%s27983_s26 + $0xa8] sm:$0xff]  }
0x2355   : > { %18505 = vmatpush1.bf16.msra.mxu0 %v23303_v52  ;;  %v23363_v56 = vld [vmem:[%s27983_s26 + $0x48] sm:$0xff]  }
0x2356   : > { %18506 = vmatprep.subr.bf16.mxu0 %v23311_v60  ;;  %v23365_v52 = vld [vmem:[%s27983_s26 + $0x8] sm:$0xff]   ;;  %v23367_v60 = vld [vmem:[%s27983_s26 + $0x40] sm:$0xff]  }
0x2359   : > { %18507 = vmatpush1.bf16.msra.mxu0 %v23309_v30  ;;  %v23369_v30 = vld [vmem:[%s27983_s26] sm:$0xff]  }
0x235a   : > { %18508 = vmatprep.subr.bf16.mxu0 %v23317_v25  ;;  %v16834_v25 = vld [vmem:[%s27984_s8] sm:$0xf] }
0x235b   : > { %v18323_v27 = vrot.slane %v16834_v25, %v25947_v57  ;;  %v18327_v9 = vrot.slane %v16834_v25, %v25950_v58 }
0x235d   : > { %18509 = vmatpush1.bf16.msra.mxu0 %v23315_v19  ;;  %v18331_v19 = vrot.slane %v16834_v25, %v26586_v26 }
0x235e   : > { %18510 = vmatprep.subr.bf16.mxu0 %v23323_v61 }
0x2361   : > { %18511 = vmatpush1.bf16.msra.mxu0 %v23321_v21  ;;  %v18335_v21 = vrot.slane %v16834_v25, %v26591_v39  ;;  %v23376_v25 = vld [vmem:[#allocation79 + $0x10] sm:$0xff]  }
0x2362   : > { %18512 = vmatprep.subr.bf16.mxu0 %v23329_v29 }
0x2365   : > { %18513 = vmatpush1.bf16.msra.mxu0 %v23327_v2 }
0x2366   : > { %18514 = vmatprep.subr.bf16.mxu0 %v23335_v45 }
0x2369   : > { %18515 = vmatpush1.bf16.msra.mxu0 %v23333_v5 }
0x236a   : > { %21141 = vmatprep.subr.bf16.mxu0 %v23339_v12 }
0x23dd   : > { %v18294_v40 = vpop.xlane.xlu0 %18293 }
0x23de   : > { %v18295_v49 = vmul.f32 0.0078125, %v18294_v40  ;;  %v23359_v40 = vld [vmem:[%s27983_s26 + $0x50] sm:$0xff]  }
0x23e0   : > { %v18296_v34 = vsub.f32 %v27742_v32, %v18295_v49  ;;  %v23360_v49 = vld [vmem:[%s27983_s26 + $0xd0] sm:$0xff]  }
0x23e2   : > { %v18297_v43 = vmul.f32 %v18296_v34, %v18296_v34 }
0x23e4   : > { %18298 = vadd.xlane.f32.xlu1 %v18297_v43  ;;  %v23362_v43 = vld [vmem:[%s27983_s26 + $0x90] sm:$0xff]  }
0x246d   : > { %v18299_v38 = vpop.xlane.xlu1 %18298 }
0x246e   : > { %v18300_v50 = vmul.f32 0.0078125, %v18299_v38 }
0x2470   : > { %v18301_v18 = vadd.f32 1e-05, %v18300_v50 }
0x2472   : > { %23553 = vrsqrt.f32 %v18301_v18 }
0x247f   : > { %v23554_v41 = vpop.eup %23553 }
0x2480   : > { %v18303_v0 = vmul.f32 %v23554_v41, %v18296_v34  ;;  %v23361_v34 = vld [vmem:[%s27983_s26 + $0x10] sm:$0xff]  }
0x2482   : > { %v18310_v35 = vmul.f32 %v20794_v14, %v18303_v0 }
0x2484   : > { %v18317_v55 = vadd.f32 %v20795_v31, %v18310_v35 }
0x2486   : > { %v18318_v59 = vpack.c.bf16 %v18317_v55, %v18317_v55 }
0x2488   : > { %18533 = vmatmul.mubr.bf16.vlgmr.msra.gmra.mxu0 %v18318_v59  ;;  %18574 = vmatmul.mubr.bf16.vlgmr.msra.gmra.mxu1 %v18318_v59 }
0x2489   : > { %21142 = vmatpush3.bf16.msra.mxu0 %v23341_v6  ;;  %21164 = vmatpush3.bf16.msra.mxu1 %v23342_v48 }
0x248a   : > { %21143 = vmatprep.subr.bf16.mxu0 %v23343_v1  ;;  %21165 = vmatprep.subr.bf16.mxu1 %v23344_v8 }
0x248d   : > { %21144 = vmatpush3.bf16.msra.mxu0 %v23345_v44  ;;  %21166 = vmatpush3.bf16.msra.mxu1 %v23346_v10 }
0x248e   : > { %21145 = vmatprep.subr.bf16.mxu0 %v23347_v4  ;;  %21167 = vmatprep.subr.bf16.mxu1 %v23348_v3 }
0x2491   : > { %21146 = vmatpush3.bf16.msra.mxu0 %v23349_v42  ;;  %21168 = vmatpush3.bf16.msra.mxu1 %v23350_v63 }
0x2492   : > { %21147 = vmatprep.subr.bf16.mxu0 %v23351_v37  ;;  %21169 = vmatprep.subr.bf16.mxu1 %v23352_v22 }
0x2495   : > { %21148 = vmatpush3.bf16.msra.mxu0 %v23353_v13  ;;  %21170 = vmatpush3.bf16.msra.mxu1 %v23354_v62 }
0x2496   : > { %21149 = vmatprep.subr.bf16.mxu0 %v23355_v16  ;;  %21171 = vmatprep.subr.bf16.mxu1 %v23356_v11 }
0x2499   : > { %21150 = vmatpush3.bf16.msra.mxu0 %v23357_v28  ;;  %21172 = vmatpush3.bf16.msra.mxu1 %v23358_v46 }
0x249a   : > { %21151 = vmatprep.subr.bf16.mxu0 %v23359_v40  ;;  %21173 = vmatprep.subr.bf16.mxu1 %v23360_v49 }
0x249d   : > { %21152 = vmatpush3.bf16.msra.mxu0 %v23361_v34  ;;  %21174 = vmatpush3.bf16.msra.mxu1 %v23362_v43 }
0x249e   : > { %21153 = vmatprep.subr.bf16.mxu0 %v23363_v56  ;;  %21175 = vmatprep.subr.bf16.mxu1 %v23364_v24  ;;  %v23371_v56 = vld [vmem:[#allocation79 + $0x38] sm:$0xff]  }
0x24a1   : > { %21154 = vmatpush3.bf16.msra.mxu0 %v23365_v52  ;;  %21176 = vmatpush3.bf16.msra.mxu1 %v23366_v54 }
0x24a2   : > { %21155 = vmatprep.subr.bf16.mxu0 %v23367_v60  ;;  %21177 = vmatprep.subr.bf16.mxu1 %v23368_v17  ;;  %v23372_v60 = vld [vmem:[#allocation79 + $0x30] sm:$0xff]   ;;  %v23373_v17 = vld [vmem:[#allocation79 + $0x28] sm:$0xff]  }
0x24a5   : > { %21156 = vmatpush3.bf16.msra.mxu0 %v23369_v30  ;;  %21178 = vmatpush3.bf16.msra.mxu1 %v23370_v15  ;;  %v23374_v30 = vld [vmem:[#allocation79 + $0x20] sm:$0xff]   ;;  %v23375_v15 = vld [vmem:[#allocation79 + $0x18] sm:$0xff]  }
0x24a6   : > { %21834 = vmatprep.subr.bf16.mxu0 %v25056_v7 }
0x2548   : > { %v18534_v23 = vpop.f32.mrf.mxu0  ;;  %v18575_v61 = vpop.f32.mrf.mxu1 }
0x2549   : > { %v18535_v53 = vadd.f32 %v18534_v23, %v18323_v27  ;;  %v18576_v29 = vadd.f32 %v18575_v61, %v18331_v19  ;;  %v23377_v27 = vld [vmem:[#allocation79 + $0x8] sm:$0xff]   ;;  %v23378_v19 = vld [vmem:[#allocation79] sm:$0xff]  }
0x254a   : > { %v18536_v47 = vpop.f32.mrf.mxu0  ;;  %v18577_v2 = vpop.f32.mrf.mxu1 }
0x254b   : > { %v18586_v33 = vmul.f32 0.044715, %v18535_v53  ;;  %v18588_v45 = vmul.f32 0.044715, %v18576_v29  ;;  %v18537_v36 = vadd.f32 %v18536_v47, %v18327_v9  ;;  %v18578_v5 = vadd.f32 %v18577_v2, %v18335_v21 }
0x254c   : > { %v18538_v51 = vpop.f32.mrf.mxu0  ;;  %v18579_v38 = vpop.f32.mrf.mxu1  ;;  %v18582_v37 = vmul.f32 0.5, %v18535_v53  ;;  %v18584_v13 = vmul.f32 0.5, %v18576_v29 }
0x254d   : > { %v18590_v50 = vmul.f32 %v18586_v33, %v18535_v53  ;;  %v18592_v57 = vmul.f32 %v18588_v45, %v18576_v29  ;;  %v18587_v18 = vmul.f32 0.044715, %v18537_v36  ;;  %v18589_v26 = vmul.f32 0.044715, %v18578_v5 }
0x254e   : > { %v18539_v41 = vpop.f32.mrf.mxu0  ;;  %v18580_v14 = vpop.f32.mrf.mxu1  ;;  %v18583_v62 = vmul.f32 0.5, %v18537_v36  ;;  %v18585_v11 = vmul.f32 0.5, %v18578_v5 }
0x254f   : > { %v18594_v0 = vmul.f32 %v18590_v50, %v18535_v53  ;;  %v18596_v58 = vmul.f32 %v18592_v57, %v18576_v29  ;;  %v18591_v31 = vmul.f32 %v18587_v18, %v18537_v36  ;;  %v18593_v39 = vmul.f32 %v18589_v26, %v18578_v5  ;;  %v20861_v50 = vld [vmem:[%s25418_s13] ss:$0 sm:$0xff] }
0x2551   : > { %v18598_v35 = vadd.f32 %v18594_v0, %v18535_v53  ;;  %v18600_v55 = vadd.f32 %v18596_v58, %v18576_v29  ;;  %v18595_v59 = vmul.f32 %v18591_v31, %v18537_v36  ;;  %v18597_v12 = vmul.f32 %v18593_v39, %v18578_v5 }
0x2553   : > { %v18602_v20 = vmul.f32 0.7978846, %v18598_v35  ;;  %v18604_v6 = vmul.f32 0.7978846, %v18600_v55  ;;  %v18599_v48 = vadd.f32 %v18595_v59, %v18537_v36  ;;  %v18601_v1 = vadd.f32 %v18597_v12, %v18578_v5  ;;  %v20860_v36 = vld [vmem:[%s25408_s29] ss:$0 sm:$0xff] }
0x2555   : > { %23555 = vtanh.f32 %v18602_v20  ;;  %v18603_v8 = vmul.f32 0.7978846, %v18599_v48  ;;  %v18605_v44 = vmul.f32 0.7978846, %v18601_v1 }
0x2556   : > { %23557 = vtanh.f32 %v18604_v6 }
0x2557   : > { %23559 = vtanh.f32 %v18603_v8 }
0x2558   : > { %23561 = vtanh.f32 %v18605_v44 }
0x2562   : > { %v23556_v10 = vpop.eup %23555 }
0x2563   : > { %v23558_v4 = vpop.eup %23557  ;;  %v18610_v3 = vadd.f32 1.0, %v23556_v10 }
0x2564   : > { %v18612_v42 = vadd.f32 1.0, %v23558_v4  ;;  %v23560_v63 = vpop.eup %23559 }
0x2565   : > { %v23562_v22 = vpop.eup %23561  ;;  %v18611_v16 = vadd.f32 1.0, %v23560_v63  ;;  %v18614_v46 = vmul.f32 %v18610_v3, %v18582_v37 }
0x2566   : > { %v18613_v28 = vadd.f32 1.0, %v23562_v22  ;;  %v18616_v49 = vmul.f32 %v18612_v42, %v18584_v13 }
0x2567   : > { %v18615_v40 = vmul.f32 %v18611_v16, %v18583_v62  ;;  %v18618_v52 = vpack.c.bf16 %v18614_v46, %v18614_v46 }
0x2568   : > { %v18617_v34 = vmul.f32 %v18613_v28, %v18585_v11  ;;  %v18620_v54 = vpack.c.bf16 %v18616_v49, %v18616_v49 }
0x2569   : > { %v18619_v43 = vpack.c.bf16 %v18615_v40, %v18615_v40 }
0x256a   : > { %v18621_v24 = vpack.c.bf16 %v18617_v34, %v18617_v34 }
0x256b   : > { %18846 = vmatprep.mubr.bf16.mxu0 %v18619_v43 }
0x256c   : > { %18886 = vmatprep.mubr.bf16.mxu1 %v18621_v24  ;;  %18847 = vmatmul.mubr.bf16.vlgmr.msra.gmra.mxu0 %v18618_v52 }
0x256d   : > { %18887 = vmatmul.mubr.bf16.vlgmr.msra.gmra.mxu1 %v18620_v54  ;;  %21835 = vmatpush3.bf16.msra.mxu0 %v23371_v56 }
0x256e   : > { %21836 = vmatprep.subr.bf16.mxu0 %v25056_v7  ;;  %21850 = vmatprep.mubr.msk.bf16.mxu0 %vm25057_vm1, %v25056_v7 }
0x2571   : > { %21837 = vmatpush3.bf16.msra.mxu0 %v23372_v60 }
0x2572   : > { %21838 = vmatprep.subr.bf16.mxu0 %v25056_v7 }
0x2575   : > { %21839 = vmatpush3.bf16.msra.mxu0 %v23373_v17 }
0x2576   : > { %21840 = vmatprep.subr.bf16.mxu0 %v25056_v7 }
0x2579   : > { %21841 = vmatpush3.bf16.msra.mxu0 %v23374_v30 }
0x257a   : > { %21842 = vmatprep.subr.bf16.mxu0 %v25056_v7 }
0x257d   : > { %21843 = vmatpush3.bf16.msra.mxu0 %v23375_v15 }
0x257e   : > { %21844 = vmatprep.subr.bf16.mxu0 %v25056_v7 }
0x2581   : > { %21845 = vmatpush3.bf16.msra.mxu0 %v23376_v25 }
0x2582   : > { %21846 = vmatprep.subr.bf16.mxu0 %v25056_v7 }
0x2585   : > { %21847 = vmatpush3.bf16.msra.mxu0 %v23377_v27 }
0x2586   : > { %21848 = vmatprep.subr.bf16.mxu0 %v25056_v7 }
0x2589   : > { %21849 = vmatpush3.bf16.msra.mxu0 %v23378_v19 }
0x262c   : > { %v21157_v23 = vpop.f32.mrf.mxu0 }
0x262d   : > { %v21179_v61 = vpop.f32.mrf.mxu1 }
0x262e   : > { %v21158_v9 = vpop.f32.mrf.mxu0 }
0x262f   : > { %v21159_v21 = vadd.f32 %v21158_v9, %v21157_v23  ;;  %v21180_v53 = vpop.f32.mrf.mxu1 }
0x2630   : > { %v21181_v29 = vadd.f32 %v21180_v53, %v21179_v61  ;;  %v21160_v47 = vpop.f32.mrf.mxu0 }
0x2631   : > { %v21182_v2 = vpop.f32.mrf.mxu1 }
0x2632   : > { %v18889_v33 = vadd.f32 %v21181_v29, %v21159_v21  ;;  %v21161_v45 = vpop.f32.mrf.mxu0 }
0x2633   : > { %v21183_v5 = vpop.f32.mrf.mxu1 }
0x2634   : > { %v18894_v51 = vadd.f32 %v18889_v33, %v27742_v32 }
0x2636   : > { %v18901_v7 = vadd.f32 %v20860_v36, %v18894_v51 }
0x2638   : > { %v18919_v38 = vpack.c.bf16 %v18901_v7, %v18901_v7 }
0x263a   : > { %21851 = vmatmul.mubr.bf16.vlgmr.msra.gmra.mxu0 %v18919_v38 }
0x26fa   : > { %v19008_v57 = vpop.f32.mrf.mxu0 }
0x26fb   : > { %v19009_v18 = vadd.f32 %v20861_v50, %v19008_v57 }
0x26fc   : > { %v21852_v26 = vpop.f32.mrf.mxu0 }
0x26fd   : > { %19014 = vst [vmem:[%s2781_s10] sm:$0xff] %v19009_v18 }
0x26fe   : > { %v19011_v41 = vpop.f32.mrf.mxu0 }
0x2700   : > { %v21853_v14 = vpop.f32.mrf.mxu0 }
0x2701 PF: > { %s180_s0 = sadd.s32 1, %s24925_s0  }
0x2702   : > { %p177_p2 = scmp.ge.s32.totalorder %s180_s0, 4  }
0x2704   :  { %179 = sbr.rel (!%p177_p2) target bundleno = 158 (0x9e), region = 614 }
0x2709   :  { %19034 = vsyncpa [#allocation3], 1 }
0x270a   :  { %19036 = vsyncpa [#allocation3 + $0x1], 1 }
0x270b   :  { %19037 = vsyncpa [#allocation5], 1 }
0x270c   :  { %19038 = vsyncpa [#allocation8], 1 }
0x270d   :  { %19039 = vsyncpa [#allocation11], 1 }
0x270e   :  { %19040 = vsyncpa [#allocation14], 1 }
0x270f   :  { %19041 = vsyncpa [#allocation17], 1 }
0x2710   :  { %19042 = vsyncpa [#allocation20], 1 }
0x2711   :  { %19043 = vsyncpa [#allocation23], 1 }
0x2712   :  { %19044 = vsyncpa [#allocation26], 1 }
0x2713   :  { %19045 = vsyncpa [#allocation29], 1 }
0x2714   :  { %19046 = vsyncpa [#allocation32], 1 }
0x2715   :  { %19047 = vsyncpa [#allocation35], 1 }
0x2716   :  { %19048 = vsyncpa [#allocation38], 1 }
0x2717   :  { %19049 = vsyncpa [#allocation41], 1 }
0x2718   :  { %19050 = vsyncpa [#allocation44], 1 }
0x2719   :  { %19051 = vsyncpa [#allocation47], 1 }
0x271a   :  { %19052 = vsyncpa [#allocation50], 1 }
0x271b   :  { %19053 = vsyncpa [#allocation53], 1 }
0x271c   :  { %19054 = vsyncpa [#allocation56], 1 }
0x271d   :  { %19055 = vsyncpa [#allocation59], 1 }
0x271e   :  { %19056 = vsyncpa [#allocation62], 1 }
0x271f   :  { %19057 = vsyncpa [#allocation65], 1 }
0x2720   :  { %19058 = vsyncpa [#allocation68], 1 }
0x2721   :  { %19059 = vsyncpa [#allocation71], 1 }
0x2722   :  { %19060 = vsyncpa [#allocation74], 1 }
0x2723   :  { %19061 = vsyncpa [#allocation77], 1 }
0x2724   :  { %19062 = vsyncpa [#allocation80], 1 }

</bundles_post_ra>
